<compile_context>
chip_gen: v7x
topology: tpu7x:2x2x1
jax: 0.10.0
libtpu: 0.0.40
codegen_flags: <defaults>
</compile_context>

<pallas_src>
import functools

import jax
import jax.numpy as jnp
from jax.experimental import pallas as pl
from jax.experimental.pallas import tpu as pltpu

HIDDEN = 88           # LSTM hidden size (bidirectional -> 176 features)
HIDDEN_PAD = 128      # lane-padded hidden size used inside the kernels
CONV_CH = 48          # conv channel count


def _round_up(x, m):
    return ((x + m - 1) // m) * m


def _vmem_limit_bytes():
    # ~85% of physical VMEM: ~109 MiB on v5e/v6e (128 MiB), ~54 MiB on v7x (64 MiB).
    try:
        cap = pltpu.get_tpu_info().vmem_capacity_bytes
    except Exception:
        cap = 64 * 1024 * 1024
    return int(cap * 0.85)


_VMEM_LIMIT = _vmem_limit_bytes()


# --------------------------------------------------------------------------------------
# Fused matmul * scale + bias (+ReLU): M- and K-tiled, bf16 MXU operands, f32 accumulator
# --------------------------------------------------------------------------------------

def _mm_scale_bias_kernel(a_ref, w_ref, s_ref, b_ref, o_ref, acc_ref, *, relu):
    k = pl.program_id(1)

    @pl.when(k == 0)
    def _init():
        acc_ref[...] = jnp.zeros_like(acc_ref)

    acc_ref[...] += jnp.dot(a_ref[...], w_ref[...], preferred_element_type=jnp.float32)

    @pl.when(k == pl.num_programs(1) - 1)
    def _store():
        y = acc_ref[...] * s_ref[...] + b_ref[...]
        if relu:
            y = jnp.maximum(y, 0.0)
        o_ref[...] = y.astype(o_ref.dtype)


def mm_scale_bias(a, w, scale, bias, relu=False, out_dtype=jnp.float32,
                  block_m=512, block_k=1024):
    """o = relu?( (a @ w) * scale + bias ), tiled over M and K (auto double-buffered)."""
    M, K = a.shape
    N = w.shape[1]
    a = a.astype(jnp.bfloat16)
    w = w.astype(jnp.bfloat16)
    tm = min(block_m, _round_up(M, 16))
    if K <= block_k:
        tk = K
    else:
        tk = block_k
        Kp = _round_up(K, tk)
        if Kp != K:                                       # zero-pad K: exact result
            a = jnp.pad(a, ((0, 0), (0, Kp - K)))
            w = jnp.pad(w, ((0, Kp - K), (0, 0)))
            K = Kp
    grid = (pl.cdiv(M, tm), K // tk)
    return pl.pallas_call(
        functools.partial(_mm_scale_bias_kernel, relu=relu),
        out_shape=jax.ShapeDtypeStruct((M, N), out_dtype),
        grid_spec=pltpu.PrefetchScalarGridSpec(
            num_scalar_prefetch=0,
            grid=grid,
            in_specs=[pl.BlockSpec((tm, tk), lambda i, k: (i, k)),
                      pl.BlockSpec((tk, N), lambda i, k: (k, 0)),
                      pl.BlockSpec((1, N), lambda i, k: (0, 0)),
                      pl.BlockSpec((1, N), lambda i, k: (0, 0))],
            out_specs=pl.BlockSpec((tm, N), lambda i, k: (i, 0)),
            scratch_shapes=[pltpu.VMEM((tm, N), jnp.float32)],
        ),
        compiler_params=pltpu.CompilerParams(
            dimension_semantics=("parallel", "arbitrary"),
            vmem_limit_bytes=_VMEM_LIMIT),
    )(a, w, scale.reshape(1, N).astype(jnp.float32), bias.reshape(1, N).astype(jnp.float32))


# --------------------------------------------------------------------------------------
# Fused 3x3 conv + BN(eval) + ReLU + MaxPool((1,3)) — multi-row blocks, single K=432 dot
# --------------------------------------------------------------------------------------

def _conv3x3_pool_kernel(x_ref, w_ref, s_ref, b_ref, o_ref, *, th, w_used, cin):
    cout = o_ref.shape[-1]
    wp = w_used // 3
    x = x_ref[0]                                           # (th+2, W+2, Cin) bf16
    # In-register im2col: one lane concat of the 9 (kh, kw) shifts -> single K=9*Cin dot.
    patches = jnp.concatenate(
        [x[i:i + th, j:j + w_used, :] for i in range(3) for j in range(3)], axis=-1)
    y = jnp.dot(patches.reshape(th * w_used, 9 * cin), w_ref[...],
                preferred_element_type=jnp.float32)        # (th*W, Cout) f32
    y = jnp.maximum(y * s_ref[...] + b_ref[...], 0.0)      # folded BN + ReLU
    # Fused MaxPool2d((1, 3)) epilogue (floor mode): group 3 consecutive W positions.
    yr = y.reshape(th * wp, 3, cout)
    pooled = jnp.maximum(jnp.maximum(yr[:, 0, :], yr[:, 1, :]), yr[:, 2, :])
    o_ref[0] = pooled.reshape(th, wp, cout).astype(o_ref.dtype)


def conv3x3_bn_relu_pool(x, w, b, gamma, beta, mean, var):
    """3x3 stride-1 pad-1 Conv2d (NHWC) + BatchNorm(eval) + ReLU + MaxPool((1,3)), fused."""
    B, H, W, Cin = x.shape
    Cout = w.shape[0]
    Wp = W // 3
    w_used = Wp * 3
    th = 1                                                 # H-row tile (must divide H)
    for cand in (8, 4, 2):
        if H % cand == 0:
            th = cand
            break
    n_h = H // th

    xb = x.astype(jnp.bfloat16)
    xp = jnp.pad(xb, ((0, 0), (1, 1), (1, 1), (0, 0)))     # (B, H+2, W+2, Cin)
    # Overlapping H windows (1-row halo each side) materialised once (~(th+2)/th copy)
    # so every grid step reads one rectangular block — no per-row 3x re-fetch.
    xpw = jnp.stack([xp[:, i * th:i * th + th + 2] for i in range(n_h)],
                    axis=1).reshape(B * n_h, th + 2, W + 2, Cin)

    wk = jnp.transpose(w, (2, 3, 1, 0)).reshape(9 * Cin, Cout).astype(jnp.bfloat16)
    inv = gamma * jax.lax.rsqrt(var + 1e-5)
    scale = inv.reshape(1, Cout).astype(jnp.float32)
    bias = (beta + (b - mean) * inv).reshape(1, Cout).astype(jnp.float32)

    out = pl.pallas_call(
        functools.partial(_conv3x3_pool_kernel, th=th, w_used=w_used, cin=Cin),
        out_shape=jax.ShapeDtypeStruct((B * n_h, th, Wp, Cout), jnp.bfloat16),
        grid_spec=pltpu.PrefetchScalarGridSpec(
            num_scalar_prefetch=0,
            grid=(B * n_h,),
            in_specs=[pl.BlockSpec((1, th + 2, W + 2, Cin), lambda i: (i, 0, 0, 0)),
                      pl.BlockSpec((9 * Cin, Cout), lambda i: (0, 0)),
                      pl.BlockSpec((1, Cout), lambda i: (0, 0)),
                      pl.BlockSpec((1, Cout), lambda i: (0, 0))],
            out_specs=pl.BlockSpec((1, th, Wp, Cout), lambda i: (i, 0, 0, 0)),
        ),
        compiler_params=pltpu.CompilerParams(
            dimension_semantics=("parallel",),
            vmem_limit_bytes=_VMEM_LIMIT),
    )(xpw, wk, scale, bias)
    return out.reshape(B, H, Wp, Cout)


# --------------------------------------------------------------------------------------
# 4-direction LSTM: grid = (2 direction groups [parallel], T/U time blocks [arbitrary])
# --------------------------------------------------------------------------------------

def _sigmoid(x):
    # Exact reciprocal (review: approx reciprocal can drift through the recurrence).
    return 1.0 / (1.0 + jnp.exp(-x))


def _bilstm_kernel(x_ref, w_ref, o_ref, h_scr, c_scr, *, hp, u):
    g = pl.program_id(0)                       # 0: forward group, 1: reverse group
    tb = pl.program_id(1)

    @pl.when(tb == 0)
    def _init():
        h_scr[...] = jnp.zeros_like(h_scr)
        c_scr[...] = jnp.zeros_like(c_scr)

    w = w_ref[0]                               # (2Hp, 8Hp) bf16 block-diag, gate-major
    for s in range(u):                         # unrolled: U timesteps per grid step
        row = s + g * (u - 1 - 2 * s)          # forward group: s ; reverse group: u-1-s
        # One fused (B, 2Hp) @ (2Hp, 8Hp) recurrent matmul covering both directions.
        z = x_ref[row] + jnp.dot(h_scr[...].astype(jnp.bfloat16), w,
                                 preferred_element_type=jnp.float32)   # (B, 8Hp)
        gi = _sigmoid(z[:, 0 * hp:2 * hp])
        gf = _sigmoid(z[:, 2 * hp:4 * hp])
        gg = jnp.tanh(z[:, 4 * hp:6 * hp])
        go = _sigmoid(z[:, 6 * hp:8 * hp])
        c_new = gf * c_scr[...] + gi * gg
        h_new = go * jnp.tanh(c_new)
        c_scr[...] = c_new
        h_scr[...] = h_new
        o_ref[row] = h_new


def bilstm(xproj, w_groups, u):
    """xproj: (T, B, 16*Hp) f32, gate-major per group [onset_f,frame_f | onset_r,frame_r];
    w_groups: (2, 2*Hp, 8*Hp) bf16 block-diagonal recurrent weights.
    Returns (T, B, 4*Hp) f32 with lanes [onset_fwd | frame_fwd | onset_rev | frame_rev],
    indexed by ORIGINAL time (reverse group scattered back via the output index_map)."""
    T, B, _ = xproj.shape
    Hp = HIDDEN_PAD
    nb = T // u

    x_spec = pl.BlockSpec((u, B, 8 * Hp),
                          lambda g, tb: ((1 - g) * tb + g * (nb - 1 - tb), 0, g))
    w_spec = pl.BlockSpec((1, 2 * Hp, 8 * Hp), lambda g, tb: (g, 0, 0))
    o_spec = pl.BlockSpec((u, B, 2 * Hp),
                          lambda g, tb: ((1 - g) * tb + g * (nb - 1 - tb), 0, g))

    return pl.pallas_call(
        functools.partial(_bilstm_kernel, hp=Hp, u=u),
        out_shape=jax.ShapeDtypeStruct((T, B, 4 * Hp), jnp.float32),
        grid_spec=pltpu.PrefetchScalarGridSpec(
            num_scalar_prefetch=0,
            grid=(2, nb),
            in_specs=[x_spec, w_spec],
            out_specs=o_spec,
            scratch_shapes=[pltpu.VMEM((B, 2 * Hp), jnp.float32),
                            pltpu.VMEM((B, 2 * Hp), jnp.float32)],
        ),
        compiler_params=pltpu.CompilerParams(
            dimension_semantics=("parallel", "arbitrary"),   # group axis -> 2 TCs on v7x
            vmem_limit_bytes=_VMEM_LIMIT),
    )(xproj, w_groups)


# --------------------------------------------------------------------------------------
# Parameter plumbing (PyTorch layouts -> packed / lane-padded kernel layouts)
# --------------------------------------------------------------------------------------

def _pack_lstm_group(dir_a, dir_b, H, Hp):
    """Pack two LSTM directions into a gate-major, lane-padded group layout.
    Returns (proj cols (F, 8Hp), bias (8Hp,), block-diag recurrent W (2Hp, 8Hp))."""
    cols, bias = [], []
    w_rec = jnp.zeros((2 * Hp, 8 * Hp), jnp.float32)
    for k in range(4):                                     # PyTorch gate order i, f, g, o
        for di, (w_ih, w_hh, b_ih, b_hh) in enumerate((dir_a, dir_b)):
            cols.append(jnp.pad(w_ih[k * H:(k + 1) * H, :].T, ((0, 0), (0, Hp - H))))
            bias.append(jnp.pad((b_ih + b_hh)[k * H:(k + 1) * H], (0, Hp - H)))
            blk = jnp.pad(w_hh[k * H:(k + 1) * H, :].T, ((0, Hp - H), (0, Hp - H)))
            w_rec = w_rec.at[di * Hp:(di + 1) * Hp,
                             (2 * k + di) * Hp:(2 * k + di + 1) * Hp].set(blk)
    return jnp.concatenate(cols, axis=1), jnp.concatenate(bias), w_rec


def _pack_heads(onset_fc_w, onset_fc_b, frame_fc_w, frame_fc_b, H, Hp):
    """Both FC heads fused into one matmul over the packed LSTM output lanes
    [onset_fwd | frame_fwd | onset_rev | frame_rev].  Returns (w (4Hp, 2Hp), b (2Hp,))."""
    w = jnp.zeros((4 * Hp, 2 * Hp), jnp.float32)
    w = w.at[0:H, 0:H].set(onset_fc_w[:, :H].T)                     # onset <- onset_fwd
    w = w.at[2 * Hp:2 * Hp + H, 0:H].set(onset_fc_w[:, H:].T)       # onset <- onset_rev
    w = w.at[Hp:Hp + H, Hp:Hp + H].set(frame_fc_w[:, :H].T)         # frame <- frame_fwd
    w = w.at[3 * Hp:3 * Hp + H, Hp:Hp + H].set(frame_fc_w[:, H:].T) # frame <- frame_rev
    b = jnp.concatenate([jnp.pad(onset_fc_b, (0, Hp - H)),
                         jnp.pad(frame_fc_b, (0, Hp - H))])
    return w, b


def _im2col(x, kh, kw, ph, pw):
    """x: (B,H,W,C) -> (B,H,W, C*kh*kw) with feature order (c, kh, kw) (PyTorch order)."""
    B, H, W, C = x.shape
    xp = jnp.pad(x, ((0, 0), (ph, ph), (pw, pw), (0, 0)))
    patches = jnp.stack([xp[:, i:i + H, j:j + W, :]
                         for i in range(kh) for j in range(kw)], axis=-1)   # (B,H,W,C,kh*kw)
    return patches.reshape(B, H, W, C * kh * kw)


def conv1_bn_relu(x, params):
    """First conv (Cin=1, 3x7) via im2col + tiled matmul (1-channel im2col is only 21
    scalars/pixel, smaller than the 48-channel output it produces), bf16 output."""
    B, H, W, _ = x.shape
    w, b = params["conv1_w"], params["conv1_b"]
    gamma, beta = params["bn1_g"], params["bn1_b"]
    mean, var = params["bn1_m"], params["bn1_v"]
    Cout = w.shape[0]
    kh, kw, ph, pw = 3, 7, 1, 3
    cols = _im2col(x, kh, kw, ph, pw).reshape(B * H * W, -1)
    wmat = w.reshape(Cout, -1).T
    inv = gamma * jax.lax.rsqrt(var + 1e-5)
    y = mm_scale_bias(cols, wmat, inv, beta + (b - mean) * inv, relu=True,
                      out_dtype=jnp.bfloat16)
    return y.reshape(B, H, W, Cout)


# --------------------------------------------------------------------------------------
# Forward pass
# --------------------------------------------------------------------------------------

def onsets_and_frames_forward(x, params):
    """x: (B, freq_bins, time) float32 — mirrors PyTorch forward (x.unsqueeze(1) -> NCHW)."""
    B, Hf, W = x.shape
    H, Hp = HIDDEN, HIDDEN_PAD

    # ---- conv stack (Dropout(0.1) is identity in eval mode) ----
    h1 = conv1_bn_relu(x[..., None], params)                          # (B, Hf, W, 48) bf16
    h3 = conv3x3_bn_relu_pool(h1, params["conv2_w"], params["conv2_b"],
                              params["bn2_g"], params["bn2_b"],
                              params["bn2_m"], params["bn2_v"])       # (B, Hf, W//3, 48)
    T = h3.shape[2]

    # PyTorch: permute(0,3,1,2).reshape(B, T, 48*Hf) -> feature order (c, h).
    # Time-major flattening here so the fused x-projection output is already (T, B, 16*Hp)
    # (no second big XLA transpose after the projection).
    seq = h3.transpose(2, 0, 3, 1).reshape(T * B, CONV_CH * Hf)

    # ---- one fused input projection for all 4 LSTM directions (lane-dense N = 16*Hp) ----
    onset, frame = params["onset_rnn"], params["frame_rnn"]
    wpf, bpf, wrf = _pack_lstm_group(onset["fwd"], frame["fwd"], H, Hp)
    wpr, bpr, wrr = _pack_lstm_group(onset["rev"], frame["rev"], H, Hp)
    w_proj = jnp.concatenate([wpf, wpr], axis=1)                      # (F, 16*Hp)
    b_proj = jnp.concatenate([bpf, bpr])                              # (16*Hp,)
    xproj = mm_scale_bias(seq, w_proj, jnp.ones((16 * Hp,), jnp.float32), b_proj)
    xproj = xproj.reshape(T, B, 16 * Hp)

    w_groups = jnp.stack([wrf, wrr]).astype(jnp.bfloat16)             # (2, 2Hp, 8Hp)

    u = 1                                                             # timesteps / grid step
    for cand in (8, 4, 2):
        if T % cand == 0:
            u = cand
            break
    hseq = bilstm(xproj, w_groups, u)                                 # (T, B, 4*Hp) f32

    # ---- both output projections fused in one matmul (valid 88 lanes sliced back) ----
    w_fc, b_fc = _pack_heads(params["onset_fc_w"], params["onset_fc_b"],
                             params["frame_fc_w"], params["frame_fc_b"], H, Hp)
    p = mm_scale_bias(hseq.reshape(T * B, 4 * Hp), w_fc,
                      jnp.ones((2 * Hp,), jnp.float32), b_fc)         # (T*B, 2*Hp)
    p = p.reshape(T, B, 2 * Hp)
    onset_pred = p[:, :, :H].transpose(1, 0, 2)                       # (B, T, 88)
    frame_pred = p[:, :, Hp:Hp + H].transpose(1, 0, 2)
    return onset_pred, frame_pred


# --------------------------------------------------------------------------------------
# Synthetic parameters (PyTorch layouts / shapes from the reference module)
# --------------------------------------------------------------------------------------

def init_params(key, in_h):
    keys = iter(jax.random.split(key, 64))

    def nrm(shape, s=0.05):
        return jax.random.normal(next(keys), shape, jnp.float32) * s

    H = HIDDEN
    F = CONV_CH * in_h   # LSTM input size (lazily inferred in the PyTorch forward)

    def lstm_dir():
        return (nrm((4 * H, F)), nrm((4 * H, H)), nrm((4 * H,)), nrm((4 * H,)))

    return {
        "conv1_w": nrm((CONV_CH, 1, 3, 7)), "conv1_b": nrm((CONV_CH,)),
        "bn1_g": 1.0 + nrm((CONV_CH,)), "bn1_b": nrm((CONV_CH,)),
        "bn1_m": jnp.zeros((CONV_CH,), jnp.float32), "bn1_v": jnp.ones((CONV_CH,), jnp.float32),
        "conv2_w": nrm((CONV_CH, CONV_CH, 3, 3)), "conv2_b": nrm((CONV_CH,)),
        "bn2_g": 1.0 + nrm((CONV_CH,)), "bn2_b": nrm((CONV_CH,)),
        "bn2_m": jnp.zeros((CONV_CH,), jnp.float32), "bn2_v": jnp.ones((CONV_CH,), jnp.float32),
        "onset_rnn": {"fwd": lstm_dir(), "rev": lstm_dir()},
        "frame_rnn": {"fwd": lstm_dir(), "rev": lstm_dir()},
        "onset_fc_w": nrm((H, 2 * H)), "onset_fc_b": nrm((H,)),
        "frame_fc_w": nrm((H, 2 * H)), "frame_fc_b": nrm((H,)),
    }


if __name__ == "__main__":
    key = jax.random.PRNGKey(0)
    kx, kp = jax.random.split(key)

    B, FREQ, TIME = 2, 4, 48            # x: (batch, freq-bins, time) -> seq len 16, feat 192
    x = jax.random.normal(kx, (B, FREQ, TIME), jnp.float32)
    params = init_params(kp, FREQ)

    fwd = jax.jit(onsets_and_frames_forward)
    onset_pred, frame_pred = fwd(x, params)
    jax.block_until_ready((onset_pred, frame_pred))

    assert onset_pred.shape == (B, TIME // 3, HIDDEN), onset_pred.shape
    assert frame_pred.shape == (B, TIME // 3, HIDDEN), frame_pred.shape
    assert bool(jnp.all(jnp.isfinite(onset_pred))) and bool(jnp.all(jnp.isfinite(frame_pred)))
    print("KERNEL_OK")
</pallas_src>

<mosaic_0001>
module attributes {stable_mosaic.version = 11 : i64} {
  func.func @_conv3x3_pool_kernel(%arg0: i32, %arg1: memref<1x6x50x48xbf16, #tpu.memory_space<vmem>>, %arg2: memref<432x48xbf16, #tpu.memory_space<vmem>>, %arg3: memref<1x48xf32, #tpu.memory_space<vmem>>, %arg4: memref<1x48xf32, #tpu.memory_space<vmem>>, %arg5: memref<1x4x16x48xbf16, #tpu.memory_space<vmem>>) attributes {dimension_semantics = [#tpu.dimension_semantics<parallel>], iteration_bounds = array<i64: 2>, scalar_prefetch = 0 : i64, scratch_operands = 0 : i64, tpu.core_type = #tpu.core_type<tc>, window_params = [{transform_indices = @transform_0, window_bounds = array<i64: 1, 6, 50, 48>}, {pipeline_mode = #tpu.pipeline_mode<synchronous>, transform_indices = @transform_1, window_bounds = array<i64: 432, 48>}, {pipeline_mode = #tpu.pipeline_mode<synchronous>, transform_indices = @transform_2, window_bounds = array<i64: 1, 48>}, {pipeline_mode = #tpu.pipeline_mode<synchronous>, transform_indices = @transform_3, window_bounds = array<i64: 1, 48>}, {transform_indices = @transform_4, window_bounds = array<i64: 1, 4, 16, 48>}]} {
    %c0 = arith.constant 0 : index
    %c0_0 = arith.constant 0 : index
    %c0_1 = arith.constant 0 : index
    %c0_2 = arith.constant 0 : index
    %0 = vector.load %arg1[%c0, %c0_0, %c0_1, %c0_2] : memref<1x6x50x48xbf16, #tpu.memory_space<vmem>>, vector<1x6x50x48xbf16>
    %1 = vector.shape_cast %0 : vector<1x6x50x48xbf16> to vector<6x50x48xbf16>
    %2 = vector.extract_strided_slice %1 {offsets = [0, 0, 0], sizes = [4, 48, 48], strides = [1, 1, 1]} : vector<6x50x48xbf16> to vector<4x48x48xbf16>
    %3 = vector.extract_strided_slice %1 {offsets = [0, 1, 0], sizes = [4, 48, 48], strides = [1, 1, 1]} : vector<6x50x48xbf16> to vector<4x48x48xbf16>
    %4 = vector.extract_strided_slice %1 {offsets = [0, 2, 0], sizes = [4, 48, 48], strides = [1, 1, 1]} : vector<6x50x48xbf16> to vector<4x48x48xbf16>
    %5 = vector.extract_strided_slice %1 {offsets = [1, 0, 0], sizes = [4, 48, 48], strides = [1, 1, 1]} : vector<6x50x48xbf16> to vector<4x48x48xbf16>
    %6 = vector.extract_strided_slice %1 {offsets = [1, 1, 0], sizes = [4, 48, 48], strides = [1, 1, 1]} : vector<6x50x48xbf16> to vector<4x48x48xbf16>
    %7 = vector.extract_strided_slice %1 {offsets = [1, 2, 0], sizes = [4, 48, 48], strides = [1, 1, 1]} : vector<6x50x48xbf16> to vector<4x48x48xbf16>
    %8 = vector.extract_strided_slice %1 {offsets = [2, 0, 0], sizes = [4, 48, 48], strides = [1, 1, 1]} : vector<6x50x48xbf16> to vector<4x48x48xbf16>
    %9 = vector.extract_strided_slice %1 {offsets = [2, 1, 0], sizes = [4, 48, 48], strides = [1, 1, 1]} : vector<6x50x48xbf16> to vector<4x48x48xbf16>
    %10 = vector.extract_strided_slice %1 {offsets = [2, 2, 0], sizes = [4, 48, 48], strides = [1, 1, 1]} : vector<6x50x48xbf16> to vector<4x48x48xbf16>
    %11 = tpu.concatenate %2, %3, %4, %5, %6, %7, %8, %9, %10 in 2 : vector<4x48x48xbf16>, vector<4x48x48xbf16>, vector<4x48x48xbf16>, vector<4x48x48xbf16>, vector<4x48x48xbf16>, vector<4x48x48xbf16>, vector<4x48x48xbf16>, vector<4x48x48xbf16>, vector<4x48x48xbf16> -> vector<4x48x432xbf16>
    %12 = vector.shape_cast %11 : vector<4x48x432xbf16> to vector<192x432xbf16>
    %c0_3 = arith.constant 0 : index
    %c0_4 = arith.constant 0 : index
    %13 = vector.load %arg2[%c0_3, %c0_4] : memref<432x48xbf16, #tpu.memory_space<vmem>>, vector<432x48xbf16>
    %cst = arith.constant dense<0.000000e+00> : vector<192x48xf32>
    %14 = tpu.matmul %12, %13, %cst {dimension_numbers = #tpu.dot_dimension_numbers<[1], [0], [0], [1], [0, 0, 1, 1], [], []>} : vector<192x432xbf16>, vector<432x48xbf16>, vector<192x48xf32> -> vector<192x48xf32>
    %c0_5 = arith.constant 0 : index
    %c0_6 = arith.constant 0 : index
    %15 = vector.load %arg3[%c0_5, %c0_6] : memref<1x48xf32, #tpu.memory_space<vmem>>, vector<1x48xf32>
    %16 = vector.broadcast %15 : vector<1x48xf32> to vector<192x48xf32>
    %17 = arith.mulf %14, %16 : vector<192x48xf32>
    %c0_7 = arith.constant 0 : index
    %c0_8 = arith.constant 0 : index
    %18 = vector.load %arg4[%c0_7, %c0_8] : memref<1x48xf32, #tpu.memory_space<vmem>>, vector<1x48xf32>
    %19 = vector.broadcast %18 : vector<1x48xf32> to vector<192x48xf32>
    %20 = arith.addf %17, %19 : vector<192x48xf32>
    %cst_9 = arith.constant 0.000000e+00 : f32
    %21 = vector.broadcast %cst_9 : f32 to vector<192x48xf32>
    %22 = arith.maximumf %20, %21 : vector<192x48xf32>
    %23 = vector.shape_cast %22 : vector<192x48xf32> to vector<64x3x48xf32>
    %24 = vector.extract_strided_slice %23 {offsets = [0, 0, 0], sizes = [64, 1, 48], strides = [1, 1, 1]} : vector<64x3x48xf32> to vector<64x1x48xf32>
    %25 = vector.shape_cast %24 : vector<64x1x48xf32> to vector<64x48xf32>
    %26 = vector.extract_strided_slice %23 {offsets = [0, 1, 0], sizes = [64, 1, 48], strides = [1, 1, 1]} : vector<64x3x48xf32> to vector<64x1x48xf32>
    %27 = vector.shape_cast %26 : vector<64x1x48xf32> to vector<64x48xf32>
    %28 = arith.maximumf %25, %27 : vector<64x48xf32>
    %29 = vector.extract_strided_slice %23 {offsets = [0, 2, 0], sizes = [64, 1, 48], strides = [1, 1, 1]} : vector<64x3x48xf32> to vector<64x1x48xf32>
    %30 = vector.shape_cast %29 : vector<64x1x48xf32> to vector<64x48xf32>
    %31 = arith.maximumf %28, %30 : vector<64x48xf32>
    %32 = vector.shape_cast %31 : vector<64x48xf32> to vector<4x16x48xf32>
    %33 = arith.truncf %32 : vector<4x16x48xf32> to vector<4x16x48xbf16>
    %c0_10 = arith.constant 0 : index
    %c0_11 = arith.constant 0 : index
    %c0_12 = arith.constant 0 : index
    %c0_13 = arith.constant 0 : index
    %34 = vector.load %arg5[%c0_10, %c0_11, %c0_12, %c0_13] : memref<1x4x16x48xbf16, #tpu.memory_space<vmem>>, vector<1x4x16x48xbf16>
    %35 = vector.shape_cast %34 : vector<1x4x16x48xbf16> to vector<4x16x48xbf16>
    %36 = vector.shape_cast %33 : vector<4x16x48xbf16> to vector<1x4x16x48xbf16>
    tpu.vector_store %arg5[%c0_10, %c0_11, %c0_12, %c0_13], %36 {strides = array<i32>} : memref<1x4x16x48xbf16, #tpu.memory_space<vmem>>, vector<1x4x16x48xbf16>,
    return
  }
  func.func @transform_0(%arg0: i32) -> (i32, i32, i32, i32) {
    %c0_i32 = arith.constant 0 : i32
    %c0_i32_0 = arith.constant 0 : i32
    %c0_i32_1 = arith.constant 0 : i32
    %c0_i32_2 = arith.constant 0 : i32
    return %arg0, %c0_i32, %c0_i32_0, %c0_i32_1 : i32, i32, i32, i32
  }
  func.func @transform_1(%arg0: i32) -> (i32, i32) {
    %c0_i32 = arith.constant 0 : i32
    %c0_i32_0 = arith.constant 0 : i32
    %c0_i32_1 = arith.constant 0 : i32
    return %c0_i32, %c0_i32_0 : i32, i32
  }
  func.func @transform_2(%arg0: i32) -> (i32, i32) {
    %c0_i32 = arith.constant 0 : i32
    %c0_i32_0 = arith.constant 0 : i32
    %c0_i32_1 = arith.constant 0 : i32
    return %c0_i32, %c0_i32_0 : i32, i32
  }
  func.func @transform_3(%arg0: i32) -> (i32, i32) {
    %c0_i32 = arith.constant 0 : i32
    %c0_i32_0 = arith.constant 0 : i32
    %c0_i32_1 = arith.constant 0 : i32
    return %c0_i32, %c0_i32_0 : i32, i32
  }
  func.func @transform_4(%arg0: i32) -> (i32, i32, i32, i32) {
    %c0_i32 = arith.constant 0 : i32
    %c0_i32_0 = arith.constant 0 : i32
    %c0_i32_1 = arith.constant 0 : i32
    %c0_i32_2 = arith.constant 0 : i32
    return %arg0, %c0_i32, %c0_i32_0, %c0_i32_1 : i32, i32, i32, i32
  }
}

module attributes {stable_mosaic.version = 11 : i64} {
  func.func @_mm_scale_bias_kernel(%arg0: i32, %arg1: i32, %arg2: memref<384x21xbf16, #tpu.memory_space<vmem>>, %arg3: memref<21x48xbf16, #tpu.memory_space<vmem>>, %arg4: memref<1x48xf32, #tpu.memory_space<vmem>>, %arg5: memref<1x48xf32, #tpu.memory_space<vmem>>, %arg6: memref<384x48xbf16, #tpu.memory_space<vmem>>, %arg7: memref<384x48xf32, #tpu.memory_space<vmem>>) attributes {dimension_semantics = [#tpu.dimension_semantics<parallel>, #tpu.dimension_semantics<arbitrary>], iteration_bounds = array<i64: 1, 1>, scalar_prefetch = 0 : i64, scratch_operands = 1 : i64, tpu.core_type = #tpu.core_type<tc>, window_params = [{transform_indices = @transform_0, window_bounds = array<i64: 384, 21>}, {transform_indices = @transform_1, window_bounds = array<i64: 21, 48>}, {pipeline_mode = #tpu.pipeline_mode<synchronous>, transform_indices = @transform_2, window_bounds = array<i64: 1, 48>}, {pipeline_mode = #tpu.pipeline_mode<synchronous>, transform_indices = @transform_3, window_bounds = array<i64: 1, 48>}, {transform_indices = @transform_4, window_bounds = array<i64: 384, 48>}]} {
    %c0_i32 = arith.constant 0 : i32
    %0 = arith.cmpi eq, %arg1, %c0_i32 : i32
    %1 = arith.extui %0 : i1 to i32
    %c0_i32_0 = arith.constant 0 : i32
    %2 = arith.cmpi ne, %1, %c0_i32_0 : i32
    scf.if %2 {
      %cst_10 = arith.constant 0.000000e+00 : f32
      %12 = vector.broadcast %cst_10 : f32 to vector<384x48xf32>
      %c0_11 = arith.constant 0 : index
      %c0_12 = arith.constant 0 : index
      %13 = vector.load %arg7[%c0_11, %c0_12] : memref<384x48xf32, #tpu.memory_space<vmem>>, vector<384x48xf32>
      tpu.vector_store %arg7[%c0_11, %c0_12], %12 {strides = array<i32>} : memref<384x48xf32, #tpu.memory_space<vmem>>, vector<384x48xf32>,
    } else {
    }
    %c0 = arith.constant 0 : index
    %c0_1 = arith.constant 0 : index
    %3 = vector.load %arg7[%c0, %c0_1] : memref<384x48xf32, #tpu.memory_space<vmem>>, vector<384x48xf32>
    %c0_2 = arith.constant 0 : index
    %c0_3 = arith.constant 0 : index
    %4 = vector.load %arg2[%c0_2, %c0_3] : memref<384x21xbf16, #tpu.memory_space<vmem>>, vector<384x21xbf16>
    %c0_4 = arith.constant 0 : index
    %c0_5 = arith.constant 0 : index
    %5 = vector.load %arg3[%c0_4, %c0_5] : memref<21x48xbf16, #tpu.memory_space<vmem>>, vector<21x48xbf16>
    %cst = arith.constant dense<0.000000e+00> : vector<384x48xf32>
    %6 = tpu.matmul %4, %5, %cst {dimension_numbers = #tpu.dot_dimension_numbers<[1], [0], [0], [1], [0, 0, 1, 1], [], []>} : vector<384x21xbf16>, vector<21x48xbf16>, vector<384x48xf32> -> vector<384x48xf32>
    %7 = arith.addf %3, %6 : vector<384x48xf32>
    %c0_6 = arith.constant 0 : index
    %c0_7 = arith.constant 0 : index
    %8 = vector.load %arg7[%c0_6, %c0_7] : memref<384x48xf32, #tpu.memory_space<vmem>>, vector<384x48xf32>
    tpu.vector_store %arg7[%c0_6, %c0_7], %7 {strides = array<i32>} : memref<384x48xf32, #tpu.memory_space<vmem>>, vector<384x48xf32>,
    %c0_i32_8 = arith.constant 0 : i32
    %9 = arith.cmpi eq, %arg1, %c0_i32_8 : i32
    %10 = arith.extui %9 : i1 to i32
    %c0_i32_9 = arith.constant 0 : i32
    %11 = arith.cmpi ne, %10, %c0_i32_9 : i32
    scf.if %11 {
      %c0_10 = arith.constant 0 : index
      %c0_11 = arith.constant 0 : index
      %12 = vector.load %arg7[%c0_10, %c0_11] : memref<384x48xf32, #tpu.memory_space<vmem>>, vector<384x48xf32>
      %c0_12 = arith.constant 0 : index
      %c0_13 = arith.constant 0 : index
      %13 = vector.load %arg4[%c0_12, %c0_13] : memref<1x48xf32, #tpu.memory_space<vmem>>, vector<1x48xf32>
      %14 = vector.broadcast %13 : vector<1x48xf32> to vector<384x48xf32>
      %15 = arith.mulf %12, %14 : vector<384x48xf32>
      %c0_14 = arith.constant 0 : index
      %c0_15 = arith.constant 0 : index
      %16 = vector.load %arg5[%c0_14, %c0_15] : memref<1x48xf32, #tpu.memory_space<vmem>>, vector<1x48xf32>
      %17 = vector.broadcast %16 : vector<1x48xf32> to vector<384x48xf32>
      %18 = arith.addf %15, %17 : vector<384x48xf32>
      %cst_16 = arith.constant 0.000000e+00 : f32
      %19 = vector.broadcast %cst_16 : f32 to vector<384x48xf32>
      %20 = arith.maximumf %18, %19 : vector<384x48xf32>
      %21 = arith.truncf %20 : vector<384x48xf32> to vector<384x48xbf16>
      %c0_17 = arith.constant 0 : index
      %c0_18 = arith.constant 0 : index
      %22 = vector.load %arg6[%c0_17, %c0_18] : memref<384x48xbf16, #tpu.memory_space<vmem>>, vector<384x48xbf16>
      tpu.vector_store %arg6[%c0_17, %c0_18], %21 {strides = array<i32>} : memref<384x48xbf16, #tpu.memory_space<vmem>>, vector<384x48xbf16>,
    } else {
    }
    return
  }
  func.func @transform_0(%arg0: i32, %arg1: i32) -> (i32, i32) {
    %c0_i32 = arith.constant 0 : i32
    return %arg0, %arg1 : i32, i32
  }
  func.func @transform_1(%arg0: i32, %arg1: i32) -> (i32, i32) {
    %c0_i32 = arith.constant 0 : i32
    %c0_i32_0 = arith.constant 0 : i32
    return %arg1, %c0_i32 : i32, i32
  }
  func.func @transform_2(%arg0: i32, %arg1: i32) -> (i32, i32) {
    %c0_i32 = arith.constant 0 : i32
    %c0_i32_0 = arith.constant 0 : i32
    %c0_i32_1 = arith.constant 0 : i32
    return %c0_i32, %c0_i32_0 : i32, i32
  }
  func.func @transform_3(%arg0: i32, %arg1: i32) -> (i32, i32) {
    %c0_i32 = arith.constant 0 : i32
    %c0_i32_0 = arith.constant 0 : i32
    %c0_i32_1 = arith.constant 0 : i32
    return %c0_i32, %c0_i32_0 : i32, i32
  }
  func.func @transform_4(%arg0: i32, %arg1: i32) -> (i32, i32) {
    %c0_i32 = arith.constant 0 : i32
    %c0_i32_0 = arith.constant 0 : i32
    return %arg0, %c0_i32 : i32, i32
  }
}

module attributes {stable_mosaic.version = 11 : i64} {
  func.func @_mm_scale_bias_kernel(%arg0: i32, %arg1: i32, %arg2: memref<32x192xbf16, #tpu.memory_space<vmem>>, %arg3: memref<192x2048xbf16, #tpu.memory_space<vmem>>, %arg4: memref<1x2048xf32, #tpu.memory_space<vmem>>, %arg5: memref<1x2048xf32, #tpu.memory_space<vmem>>, %arg6: memref<32x2048xf32, #tpu.memory_space<vmem>>, %arg7: memref<32x2048xf32, #tpu.memory_space<vmem>>) attributes {dimension_semantics = [#tpu.dimension_semantics<parallel>, #tpu.dimension_semantics<arbitrary>], iteration_bounds = array<i64: 1, 1>, scalar_prefetch = 0 : i64, scratch_operands = 1 : i64, tpu.core_type = #tpu.core_type<tc>, window_params = [{transform_indices = @transform_0, window_bounds = array<i64: 32, 192>}, {transform_indices = @transform_1, window_bounds = array<i64: 192, 2048>}, {pipeline_mode = #tpu.pipeline_mode<synchronous>, transform_indices = @transform_2, window_bounds = array<i64: 1, 2048>}, {pipeline_mode = #tpu.pipeline_mode<synchronous>, transform_indices = @transform_3, window_bounds = array<i64: 1, 2048>}, {transform_indices = @transform_4, window_bounds = array<i64: 32, 2048>}]} {
    %c0_i32 = arith.constant 0 : i32
    %0 = arith.cmpi eq, %arg1, %c0_i32 : i32
    %1 = arith.extui %0 : i1 to i32
    %c0_i32_0 = arith.constant 0 : i32
    %2 = arith.cmpi ne, %1, %c0_i32_0 : i32
    scf.if %2 {
      %cst_10 = arith.constant 0.000000e+00 : f32
      %12 = vector.broadcast %cst_10 : f32 to vector<32x2048xf32>
      %c0_11 = arith.constant 0 : index
      %c0_12 = arith.constant 0 : index
      %13 = vector.load %arg7[%c0_11, %c0_12] : memref<32x2048xf32, #tpu.memory_space<vmem>>, vector<32x2048xf32>
      tpu.vector_store %arg7[%c0_11, %c0_12], %12 {strides = array<i32>} : memref<32x2048xf32, #tpu.memory_space<vmem>>, vector<32x2048xf32>,
    } else {
    }
    %c0 = arith.constant 0 : index
    %c0_1 = arith.constant 0 : index
    %3 = vector.load %arg7[%c0, %c0_1] : memref<32x2048xf32, #tpu.memory_space<vmem>>, vector<32x2048xf32>
    %c0_2 = arith.constant 0 : index
    %c0_3 = arith.constant 0 : index
    %4 = vector.load %arg2[%c0_2, %c0_3] : memref<32x192xbf16, #tpu.memory_space<vmem>>, vector<32x192xbf16>
    %c0_4 = arith.constant 0 : index
    %c0_5 = arith.constant 0 : index
    %5 = vector.load %arg3[%c0_4, %c0_5] : memref<192x2048xbf16, #tpu.memory_space<vmem>>, vector<192x2048xbf16>
    %cst = arith.constant dense<0.000000e+00> : vector<32x2048xf32>
    %6 = tpu.matmul %4, %5, %cst {dimension_numbers = #tpu.dot_dimension_numbers<[1], [0], [0], [1], [0, 0, 1, 1], [], []>} : vector<32x192xbf16>, vector<192x2048xbf16>, vector<32x2048xf32> -> vector<32x2048xf32>
    %7 = arith.addf %3, %6 : vector<32x2048xf32>
    %c0_6 = arith.constant 0 : index
    %c0_7 = arith.constant 0 : index
    %8 = vector.load %arg7[%c0_6, %c0_7] : memref<32x2048xf32, #tpu.memory_space<vmem>>, vector<32x2048xf32>
    tpu.vector_store %arg7[%c0_6, %c0_7], %7 {strides = array<i32>} : memref<32x2048xf32, #tpu.memory_space<vmem>>, vector<32x2048xf32>,
    %c0_i32_8 = arith.constant 0 : i32
    %9 = arith.cmpi eq, %arg1, %c0_i32_8 : i32
    %10 = arith.extui %9 : i1 to i32
    %c0_i32_9 = arith.constant 0 : i32
    %11 = arith.cmpi ne, %10, %c0_i32_9 : i32
    scf.if %11 {
      %c0_10 = arith.constant 0 : index
      %c0_11 = arith.constant 0 : index
      %12 = vector.load %arg7[%c0_10, %c0_11] : memref<32x2048xf32, #tpu.memory_space<vmem>>, vector<32x2048xf32>
      %c0_12 = arith.constant 0 : index
      %c0_13 = arith.constant 0 : index
      %13 = vector.load %arg4[%c0_12, %c0_13] : memref<1x2048xf32, #tpu.memory_space<vmem>>, vector<1x2048xf32>
      %14 = vector.broadcast %13 : vector<1x2048xf32> to vector<32x2048xf32>
      %15 = arith.mulf %12, %14 : vector<32x2048xf32>
      %c0_14 = arith.constant 0 : index
      %c0_15 = arith.constant 0 : index
      %16 = vector.load %arg5[%c0_14, %c0_15] : memref<1x2048xf32, #tpu.memory_space<vmem>>, vector<1x2048xf32>
      %17 = vector.broadcast %16 : vector<1x2048xf32> to vector<32x2048xf32>
      %18 = arith.addf %15, %17 : vector<32x2048xf32>
      %c0_16 = arith.constant 0 : index
      %c0_17 = arith.constant 0 : index
      %19 = vector.load %arg6[%c0_16, %c0_17] : memref<32x2048xf32, #tpu.memory_space<vmem>>, vector<32x2048xf32>
      tpu.vector_store %arg6[%c0_16, %c0_17], %18 {strides = array<i32>} : memref<32x2048xf32, #tpu.memory_space<vmem>>, vector<32x2048xf32>,
    } else {
    }
    return
  }
  func.func @transform_0(%arg0: i32, %arg1: i32) -> (i32, i32) {
    %c0_i32 = arith.constant 0 : i32
    return %arg0, %arg1 : i32, i32
  }
  func.func @transform_1(%arg0: i32, %arg1: i32) -> (i32, i32) {
    %c0_i32 = arith.constant 0 : i32
    %c0_i32_0 = arith.constant 0 : i32
    return %arg1, %c0_i32 : i32, i32
  }
  func.func @transform_2(%arg0: i32, %arg1: i32) -> (i32, i32) {
    %c0_i32 = arith.constant 0 : i32
    %c0_i32_0 = arith.constant 0 : i32
    %c0_i32_1 = arith.constant 0 : i32
    return %c0_i32, %c0_i32_0 : i32, i32
  }
  func.func @transform_3(%arg0: i32, %arg1: i32) -> (i32, i32) {
    %c0_i32 = arith.constant 0 : i32
    %c0_i32_0 = arith.constant 0 : i32
    %c0_i32_1 = arith.constant 0 : i32
    return %c0_i32, %c0_i32_0 : i32, i32
  }
  func.func @transform_4(%arg0: i32, %arg1: i32) -> (i32, i32) {
    %c0_i32 = arith.constant 0 : i32
    %c0_i32_0 = arith.constant 0 : i32
    return %arg0, %c0_i32 : i32, i32
  }
}

module attributes {stable_mosaic.version = 11 : i64} {
  func.func @_bilstm_kernel(%arg0: i32, %arg1: i32, %arg2: memref<8x2x1024xf32, #tpu.memory_space<vmem>>, %arg3: memref<1x256x1024xbf16, #tpu.memory_space<vmem>>, %arg4: memref<8x2x256xf32, #tpu.memory_space<vmem>>, %arg5: memref<2x256xf32, #tpu.memory_space<vmem>>, %arg6: memref<2x256xf32, #tpu.memory_space<vmem>>) attributes {dimension_semantics = [#tpu.dimension_semantics<parallel>, #tpu.dimension_semantics<arbitrary>], iteration_bounds = array<i64: 2, 2>, scalar_prefetch = 0 : i64, scratch_operands = 2 : i64, tpu.core_type = #tpu.core_type<tc>, window_params = [{transform_indices = @transform_0, window_bounds = array<i64: 8, 2, 1024>}, {transform_indices = @transform_1, window_bounds = array<i64: 1, 256, 1024>}, {transform_indices = @transform_2, window_bounds = array<i64: 8, 2, 256>}]} {
    %c0_i32 = arith.constant 0 : i32
    %0 = arith.cmpi eq, %arg1, %c0_i32 : i32
    %1 = arith.extui %0 : i1 to i32
    %c0_i32_0 = arith.constant 0 : i32
    %2 = arith.cmpi ne, %1, %c0_i32_0 : i32
    scf.if %2 {
      %cst_183 = arith.constant 0.000000e+00 : f32
      %381 = vector.broadcast %cst_183 : f32 to vector<2x256xf32>
      %c0_184 = arith.constant 0 : index
      %c0_185 = arith.constant 0 : index
      %382 = vector.load %arg5[%c0_184, %c0_185] : memref<2x256xf32, #tpu.memory_space<vmem>>, vector<2x256xf32>
      tpu.vector_store %arg5[%c0_184, %c0_185], %381 {strides = array<i32>} : memref<2x256xf32, #tpu.memory_space<vmem>>, vector<2x256xf32>,
      %cst_186 = arith.constant 0.000000e+00 : f32
      %383 = vector.broadcast %cst_186 : f32 to vector<2x256xf32>
      %c0_187 = arith.constant 0 : index
      %c0_188 = arith.constant 0 : index
      %384 = vector.load %arg6[%c0_187, %c0_188] : memref<2x256xf32, #tpu.memory_space<vmem>>, vector<2x256xf32>
      tpu.vector_store %arg6[%c0_187, %c0_188], %383 {strides = array<i32>} : memref<2x256xf32, #tpu.memory_space<vmem>>, vector<2x256xf32>,
    } else {
    }
    %c0 = arith.constant 0 : index
    %c0_1 = arith.constant 0 : index
    %c0_2 = arith.constant 0 : index
    %3 = vector.load %arg3[%c0, %c0_1, %c0_2] : memref<1x256x1024xbf16, #tpu.memory_space<vmem>>, vector<1x256x1024xbf16>
    %4 = vector.shape_cast %3 : vector<1x256x1024xbf16> to vector<256x1024xbf16>
    %c7_i32 = arith.constant 7 : i32
    %5 = arith.muli %arg0, %c7_i32 : i32
    %c0_i32_3 = arith.constant 0 : i32
    %6 = arith.addi %c0_i32_3, %5 : i32
    %7 = arith.index_cast %6 : i32 to index
    %c0_4 = arith.constant 0 : index
    %c0_5 = arith.constant 0 : index
    %8 = vector.load %arg2[%7, %c0_4, %c0_5] : memref<8x2x1024xf32, #tpu.memory_space<vmem>>, vector<1x2x1024xf32>
    %9 = vector.shape_cast %8 : vector<1x2x1024xf32> to vector<2x1024xf32>
    %c0_6 = arith.constant 0 : index
    %c0_7 = arith.constant 0 : index
    %10 = vector.load %arg5[%c0_6, %c0_7] : memref<2x256xf32, #tpu.memory_space<vmem>>, vector<2x256xf32>
    %11 = arith.truncf %10 : vector<2x256xf32> to vector<2x256xbf16>
    %cst = arith.constant dense<0.000000e+00> : vector<2x1024xf32>
    %12 = tpu.matmul %11, %4, %cst {dimension_numbers = #tpu.dot_dimension_numbers<[1], [0], [0], [1], [0, 0, 1, 1], [], []>} : vector<2x256xbf16>, vector<256x1024xbf16>, vector<2x1024xf32> -> vector<2x1024xf32>
    %13 = arith.addf %9, %12 : vector<2x1024xf32>
    %14 = vector.extract_strided_slice %13 {offsets = [0, 0], sizes = [2, 256], strides = [1, 1]} : vector<2x1024xf32> to vector<2x256xf32>
    %cst_8 = arith.constant 0.000000e+00 : f32
    %15 = vector.broadcast %cst_8 : f32 to vector<2x256xf32>
    %16 = arith.subf %15, %14 : vector<2x256xf32>
    %17 = math.exp %16 : vector<2x256xf32>
    %cst_9 = arith.constant 1.000000e+00 : f32
    %18 = vector.broadcast %cst_9 : f32 to vector<2x256xf32>
    %19 = arith.addf %18, %17 : vector<2x256xf32>
    %cst_10 = arith.constant 1.000000e+00 : f32
    %20 = vector.broadcast %cst_10 : f32 to vector<2x256xf32>
    %21 = arith.divf %20, %19 : vector<2x256xf32>
    %22 = vector.extract_strided_slice %13 {offsets = [0, 256], sizes = [2, 256], strides = [1, 1]} : vector<2x1024xf32> to vector<2x256xf32>
    %cst_11 = arith.constant 0.000000e+00 : f32
    %23 = vector.broadcast %cst_11 : f32 to vector<2x256xf32>
    %24 = arith.subf %23, %22 : vector<2x256xf32>
    %25 = math.exp %24 : vector<2x256xf32>
    %cst_12 = arith.constant 1.000000e+00 : f32
    %26 = vector.broadcast %cst_12 : f32 to vector<2x256xf32>
    %27 = arith.addf %26, %25 : vector<2x256xf32>
    %cst_13 = arith.constant 1.000000e+00 : f32
    %28 = vector.broadcast %cst_13 : f32 to vector<2x256xf32>
    %29 = arith.divf %28, %27 : vector<2x256xf32>
    %30 = vector.extract_strided_slice %13 {offsets = [0, 512], sizes = [2, 256], strides = [1, 1]} : vector<2x1024xf32> to vector<2x256xf32>
    %31 = math.tanh %30 : vector<2x256xf32>
    %32 = vector.extract_strided_slice %13 {offsets = [0, 768], sizes = [2, 256], strides = [1, 1]} : vector<2x1024xf32> to vector<2x256xf32>
    %cst_14 = arith.constant 0.000000e+00 : f32
    %33 = vector.broadcast %cst_14 : f32 to vector<2x256xf32>
    %34 = arith.subf %33, %32 : vector<2x256xf32>
    %35 = math.exp %34 : vector<2x256xf32>
    %cst_15 = arith.constant 1.000000e+00 : f32
    %36 = vector.broadcast %cst_15 : f32 to vector<2x256xf32>
    %37 = arith.addf %36, %35 : vector<2x256xf32>
    %cst_16 = arith.constant 1.000000e+00 : f32
    %38 = vector.broadcast %cst_16 : f32 to vector<2x256xf32>
    %39 = arith.divf %38, %37 : vector<2x256xf32>
    %c0_17 = arith.constant 0 : index
    %c0_18 = arith.constant 0 : index
    %40 = vector.load %arg6[%c0_17, %c0_18] : memref<2x256xf32, #tpu.memory_space<vmem>>, vector<2x256xf32>
    %41 = arith.mulf %29, %40 : vector<2x256xf32>
    %42 = arith.mulf %21, %31 : vector<2x256xf32>
    %43 = arith.addf %41, %42 : vector<2x256xf32>
    %44 = math.tanh %43 : vector<2x256xf32>
    %45 = arith.mulf %39, %44 : vector<2x256xf32>
    %c0_19 = arith.constant 0 : index
    %c0_20 = arith.constant 0 : index
    %46 = vector.load %arg6[%c0_19, %c0_20] : memref<2x256xf32, #tpu.memory_space<vmem>>, vector<2x256xf32>
    tpu.vector_store %arg6[%c0_19, %c0_20], %43 {strides = array<i32>} : memref<2x256xf32, #tpu.memory_space<vmem>>, vector<2x256xf32>,
    %c0_21 = arith.constant 0 : index
    %c0_22 = arith.constant 0 : index
    %47 = vector.load %arg5[%c0_21, %c0_22] : memref<2x256xf32, #tpu.memory_space<vmem>>, vector<2x256xf32>
    tpu.vector_store %arg5[%c0_21, %c0_22], %45 {strides = array<i32>} : memref<2x256xf32, #tpu.memory_space<vmem>>, vector<2x256xf32>,
    %48 = arith.index_cast %6 : i32 to index
    %c0_23 = arith.constant 0 : index
    %c0_24 = arith.constant 0 : index
    %49 = vector.load %arg4[%48, %c0_23, %c0_24] : memref<8x2x256xf32, #tpu.memory_space<vmem>>, vector<1x2x256xf32>
    %50 = vector.shape_cast %49 : vector<1x2x256xf32> to vector<2x256xf32>
    %51 = vector.shape_cast %45 : vector<2x256xf32> to vector<1x2x256xf32>
    tpu.vector_store %arg4[%48, %c0_23, %c0_24], %51 {strides = array<i32>} : memref<8x2x256xf32, #tpu.memory_space<vmem>>, vector<1x2x256xf32>,
    %c5_i32 = arith.constant 5 : i32
    %52 = arith.muli %arg0, %c5_i32 : i32
    %c1_i32 = arith.constant 1 : i32
    %53 = arith.addi %c1_i32, %52 : i32
    %54 = arith.index_cast %53 : i32 to index
    %c0_25 = arith.constant 0 : index
    %c0_26 = arith.constant 0 : index
    %55 = vector.load %arg2[%54, %c0_25, %c0_26] : memref<8x2x1024xf32, #tpu.memory_space<vmem>>, vector<1x2x1024xf32>
    %56 = vector.shape_cast %55 : vector<1x2x1024xf32> to vector<2x1024xf32>
    %c0_27 = arith.constant 0 : index
    %c0_28 = arith.constant 0 : index
    %57 = vector.load %arg5[%c0_27, %c0_28] : memref<2x256xf32, #tpu.memory_space<vmem>>, vector<2x256xf32>
    %58 = arith.truncf %57 : vector<2x256xf32> to vector<2x256xbf16>
    %cst_29 = arith.constant dense<0.000000e+00> : vector<2x1024xf32>
    %59 = tpu.matmul %58, %4, %cst_29 {dimension_numbers = #tpu.dot_dimension_numbers<[1], [0], [0], [1], [0, 0, 1, 1], [], []>} : vector<2x256xbf16>, vector<256x1024xbf16>, vector<2x1024xf32> -> vector<2x1024xf32>
    %60 = arith.addf %56, %59 : vector<2x1024xf32>
    %61 = vector.extract_strided_slice %60 {offsets = [0, 0], sizes = [2, 256], strides = [1, 1]} : vector<2x1024xf32> to vector<2x256xf32>
    %cst_30 = arith.constant 0.000000e+00 : f32
    %62 = vector.broadcast %cst_30 : f32 to vector<2x256xf32>
    %63 = arith.subf %62, %61 : vector<2x256xf32>
    %64 = math.exp %63 : vector<2x256xf32>
    %cst_31 = arith.constant 1.000000e+00 : f32
    %65 = vector.broadcast %cst_31 : f32 to vector<2x256xf32>
    %66 = arith.addf %65, %64 : vector<2x256xf32>
    %cst_32 = arith.constant 1.000000e+00 : f32
    %67 = vector.broadcast %cst_32 : f32 to vector<2x256xf32>
    %68 = arith.divf %67, %66 : vector<2x256xf32>
    %69 = vector.extract_strided_slice %60 {offsets = [0, 256], sizes = [2, 256], strides = [1, 1]} : vector<2x1024xf32> to vector<2x256xf32>
    %cst_33 = arith.constant 0.000000e+00 : f32
    %70 = vector.broadcast %cst_33 : f32 to vector<2x256xf32>
    %71 = arith.subf %70, %69 : vector<2x256xf32>
    %72 = math.exp %71 : vector<2x256xf32>
    %cst_34 = arith.constant 1.000000e+00 : f32
    %73 = vector.broadcast %cst_34 : f32 to vector<2x256xf32>
    %74 = arith.addf %73, %72 : vector<2x256xf32>
    %cst_35 = arith.constant 1.000000e+00 : f32
    %75 = vector.broadcast %cst_35 : f32 to vector<2x256xf32>
    %76 = arith.divf %75, %74 : vector<2x256xf32>
    %77 = vector.extract_strided_slice %60 {offsets = [0, 512], sizes = [2, 256], strides = [1, 1]} : vector<2x1024xf32> to vector<2x256xf32>
    %78 = math.tanh %77 : vector<2x256xf32>
    %79 = vector.extract_strided_slice %60 {offsets = [0, 768], sizes = [2, 256], strides = [1, 1]} : vector<2x1024xf32> to vector<2x256xf32>
    %cst_36 = arith.constant 0.000000e+00 : f32
    %80 = vector.broadcast %cst_36 : f32 to vector<2x256xf32>
    %81 = arith.subf %80, %79 : vector<2x256xf32>
    %82 = math.exp %81 : vector<2x256xf32>
    %cst_37 = arith.constant 1.000000e+00 : f32
    %83 = vector.broadcast %cst_37 : f32 to vector<2x256xf32>
    %84 = arith.addf %83, %82 : vector<2x256xf32>
    %cst_38 = arith.constant 1.000000e+00 : f32
    %85 = vector.broadcast %cst_38 : f32 to vector<2x256xf32>
    %86 = arith.divf %85, %84 : vector<2x256xf32>
    %c0_39 = arith.constant 0 : index
    %c0_40 = arith.constant 0 : index
    %87 = vector.load %arg6[%c0_39, %c0_40] : memref<2x256xf32, #tpu.memory_space<vmem>>, vector<2x256xf32>
    %88 = arith.mulf %76, %87 : vector<2x256xf32>
    %89 = arith.mulf %68, %78 : vector<2x256xf32>
    %90 = arith.addf %88, %89 : vector<2x256xf32>
    %91 = math.tanh %90 : vector<2x256xf32>
    %92 = arith.mulf %86, %91 : vector<2x256xf32>
    %c0_41 = arith.constant 0 : index
    %c0_42 = arith.constant 0 : index
    %93 = vector.load %arg6[%c0_41, %c0_42] : memref<2x256xf32, #tpu.memory_space<vmem>>, vector<2x256xf32>
    tpu.vector_store %arg6[%c0_41, %c0_42], %90 {strides = array<i32>} : memref<2x256xf32, #tpu.memory_space<vmem>>, vector<2x256xf32>,
    %c0_43 = arith.constant 0 : index
    %c0_44 = arith.constant 0 : index
    %94 = vector.load %arg5[%c0_43, %c0_44] : memref<2x256xf32, #tpu.memory_space<vmem>>, vector<2x256xf32>
    tpu.vector_store %arg5[%c0_43, %c0_44], %92 {strides = array<i32>} : memref<2x256xf32, #tpu.memory_space<vmem>>, vector<2x256xf32>,
    %95 = arith.index_cast %53 : i32 to index
    %c0_45 = arith.constant 0 : index
    %c0_46 = arith.constant 0 : index
    %96 = vector.load %arg4[%95, %c0_45, %c0_46] : memref<8x2x256xf32, #tpu.memory_space<vmem>>, vector<1x2x256xf32>
    %97 = vector.shape_cast %96 : vector<1x2x256xf32> to vector<2x256xf32>
    %98 = vector.shape_cast %92 : vector<2x256xf32> to vector<1x2x256xf32>
    tpu.vector_store %arg4[%95, %c0_45, %c0_46], %98 {strides = array<i32>} : memref<8x2x256xf32, #tpu.memory_space<vmem>>, vector<1x2x256xf32>,
    %c3_i32 = arith.constant 3 : i32
    %99 = arith.muli %arg0, %c3_i32 : i32
    %c2_i32 = arith.constant 2 : i32
    %100 = arith.addi %c2_i32, %99 : i32
    %101 = arith.index_cast %100 : i32 to index
    %c0_47 = arith.constant 0 : index
    %c0_48 = arith.constant 0 : index
    %102 = vector.load %arg2[%101, %c0_47, %c0_48] : memref<8x2x1024xf32, #tpu.memory_space<vmem>>, vector<1x2x1024xf32>
    %103 = vector.shape_cast %102 : vector<1x2x1024xf32> to vector<2x1024xf32>
    %c0_49 = arith.constant 0 : index
    %c0_50 = arith.constant 0 : index
    %104 = vector.load %arg5[%c0_49, %c0_50] : memref<2x256xf32, #tpu.memory_space<vmem>>, vector<2x256xf32>
    %105 = arith.truncf %104 : vector<2x256xf32> to vector<2x256xbf16>
    %cst_51 = arith.constant dense<0.000000e+00> : vector<2x1024xf32>
    %106 = tpu.matmul %105, %4, %cst_51 {dimension_numbers = #tpu.dot_dimension_numbers<[1], [0], [0], [1], [0, 0, 1, 1], [], []>} : vector<2x256xbf16>, vector<256x1024xbf16>, vector<2x1024xf32> -> vector<2x1024xf32>
    %107 = arith.addf %103, %106 : vector<2x1024xf32>
    %108 = vector.extract_strided_slice %107 {offsets = [0, 0], sizes = [2, 256], strides = [1, 1]} : vector<2x1024xf32> to vector<2x256xf32>
    %cst_52 = arith.constant 0.000000e+00 : f32
    %109 = vector.broadcast %cst_52 : f32 to vector<2x256xf32>
    %110 = arith.subf %109, %108 : vector<2x256xf32>
    %111 = math.exp %110 : vector<2x256xf32>
    %cst_53 = arith.constant 1.000000e+00 : f32
    %112 = vector.broadcast %cst_53 : f32 to vector<2x256xf32>
    %113 = arith.addf %112, %111 : vector<2x256xf32>
    %cst_54 = arith.constant 1.000000e+00 : f32
    %114 = vector.broadcast %cst_54 : f32 to vector<2x256xf32>
    %115 = arith.divf %114, %113 : vector<2x256xf32>
    %116 = vector.extract_strided_slice %107 {offsets = [0, 256], sizes = [2, 256], strides = [1, 1]} : vector<2x1024xf32> to vector<2x256xf32>
    %cst_55 = arith.constant 0.000000e+00 : f32
    %117 = vector.broadcast %cst_55 : f32 to vector<2x256xf32>
    %118 = arith.subf %117, %116 : vector<2x256xf32>
    %119 = math.exp %118 : vector<2x256xf32>
    %cst_56 = arith.constant 1.000000e+00 : f32
    %120 = vector.broadcast %cst_56 : f32 to vector<2x256xf32>
    %121 = arith.addf %120, %119 : vector<2x256xf32>
    %cst_57 = arith.constant 1.000000e+00 : f32
    %122 = vector.broadcast %cst_57 : f32 to vector<2x256xf32>
    %123 = arith.divf %122, %121 : vector<2x256xf32>
    %124 = vector.extract_strided_slice %107 {offsets = [0, 512], sizes = [2, 256], strides = [1, 1]} : vector<2x1024xf32> to vector<2x256xf32>
    %125 = math.tanh %124 : vector<2x256xf32>
    %126 = vector.extract_strided_slice %107 {offsets = [0, 768], sizes = [2, 256], strides = [1, 1]} : vector<2x1024xf32> to vector<2x256xf32>
    %cst_58 = arith.constant 0.000000e+00 : f32
    %127 = vector.broadcast %cst_58 : f32 to vector<2x256xf32>
    %128 = arith.subf %127, %126 : vector<2x256xf32>
    %129 = math.exp %128 : vector<2x256xf32>
    %cst_59 = arith.constant 1.000000e+00 : f32
    %130 = vector.broadcast %cst_59 : f32 to vector<2x256xf32>
    %131 = arith.addf %130, %129 : vector<2x256xf32>
    %cst_60 = arith.constant 1.000000e+00 : f32
    %132 = vector.broadcast %cst_60 : f32 to vector<2x256xf32>
    %133 = arith.divf %132, %131 : vector<2x256xf32>
    %c0_61 = arith.constant 0 : index
    %c0_62 = arith.constant 0 : index
    %134 = vector.load %arg6[%c0_61, %c0_62] : memref<2x256xf32, #tpu.memory_space<vmem>>, vector<2x256xf32>
    %135 = arith.mulf %123, %134 : vector<2x256xf32>
    %136 = arith.mulf %115, %125 : vector<2x256xf32>
    %137 = arith.addf %135, %136 : vector<2x256xf32>
    %138 = math.tanh %137 : vector<2x256xf32>
    %139 = arith.mulf %133, %138 : vector<2x256xf32>
    %c0_63 = arith.constant 0 : index
    %c0_64 = arith.constant 0 : index
    %140 = vector.load %arg6[%c0_63, %c0_64] : memref<2x256xf32, #tpu.memory_space<vmem>>, vector<2x256xf32>
    tpu.vector_store %arg6[%c0_63, %c0_64], %137 {strides = array<i32>} : memref<2x256xf32, #tpu.memory_space<vmem>>, vector<2x256xf32>,
    %c0_65 = arith.constant 0 : index
    %c0_66 = arith.constant 0 : index
    %141 = vector.load %arg5[%c0_65, %c0_66] : memref<2x256xf32, #tpu.memory_space<vmem>>, vector<2x256xf32>
    tpu.vector_store %arg5[%c0_65, %c0_66], %139 {strides = array<i32>} : memref<2x256xf32, #tpu.memory_space<vmem>>, vector<2x256xf32>,
    %142 = arith.index_cast %100 : i32 to index
    %c0_67 = arith.constant 0 : index
    %c0_68 = arith.constant 0 : index
    %143 = vector.load %arg4[%142, %c0_67, %c0_68] : memref<8x2x256xf32, #tpu.memory_space<vmem>>, vector<1x2x256xf32>
    %144 = vector.shape_cast %143 : vector<1x2x256xf32> to vector<2x256xf32>
    %145 = vector.shape_cast %139 : vector<2x256xf32> to vector<1x2x256xf32>
    tpu.vector_store %arg4[%142, %c0_67, %c0_68], %145 {strides = array<i32>} : memref<8x2x256xf32, #tpu.memory_space<vmem>>, vector<1x2x256xf32>,
    %c1_i32_69 = arith.constant 1 : i32
    %146 = arith.muli %arg0, %c1_i32_69 : i32
    %c3_i32_70 = arith.constant 3 : i32
    %147 = arith.addi %c3_i32_70, %146 : i32
    %148 = arith.index_cast %147 : i32 to index
    %c0_71 = arith.constant 0 : index
    %c0_72 = arith.constant 0 : index
    %149 = vector.load %arg2[%148, %c0_71, %c0_72] : memref<8x2x1024xf32, #tpu.memory_space<vmem>>, vector<1x2x1024xf32>
    %150 = vector.shape_cast %149 : vector<1x2x1024xf32> to vector<2x1024xf32>
    %c0_73 = arith.constant 0 : index
    %c0_74 = arith.constant 0 : index
    %151 = vector.load %arg5[%c0_73, %c0_74] : memref<2x256xf32, #tpu.memory_space<vmem>>, vector<2x256xf32>
    %152 = arith.truncf %151 : vector<2x256xf32> to vector<2x256xbf16>
    %cst_75 = arith.constant dense<0.000000e+00> : vector<2x1024xf32>
    %153 = tpu.matmul %152, %4, %cst_75 {dimension_numbers = #tpu.dot_dimension_numbers<[1], [0], [0], [1], [0, 0, 1, 1], [], []>} : vector<2x256xbf16>, vector<256x1024xbf16>, vector<2x1024xf32> -> vector<2x1024xf32>
    %154 = arith.addf %150, %153 : vector<2x1024xf32>
    %155 = vector.extract_strided_slice %154 {offsets = [0, 0], sizes = [2, 256], strides = [1, 1]} : vector<2x1024xf32> to vector<2x256xf32>
    %cst_76 = arith.constant 0.000000e+00 : f32
    %156 = vector.broadcast %cst_76 : f32 to vector<2x256xf32>
    %157 = arith.subf %156, %155 : vector<2x256xf32>
    %158 = math.exp %157 : vector<2x256xf32>
    %cst_77 = arith.constant 1.000000e+00 : f32
    %159 = vector.broadcast %cst_77 : f32 to vector<2x256xf32>
    %160 = arith.addf %159, %158 : vector<2x256xf32>
    %cst_78 = arith.constant 1.000000e+00 : f32
    %161 = vector.broadcast %cst_78 : f32 to vector<2x256xf32>
    %162 = arith.divf %161, %160 : vector<2x256xf32>
    %163 = vector.extract_strided_slice %154 {offsets = [0, 256], sizes = [2, 256], strides = [1, 1]} : vector<2x1024xf32> to vector<2x256xf32>
    %cst_79 = arith.constant 0.000000e+00 : f32
    %164 = vector.broadcast %cst_79 : f32 to vector<2x256xf32>
    %165 = arith.subf %164, %163 : vector<2x256xf32>
    %166 = math.exp %165 : vector<2x256xf32>
    %cst_80 = arith.constant 1.000000e+00 : f32
    %167 = vector.broadcast %cst_80 : f32 to vector<2x256xf32>
    %168 = arith.addf %167, %166 : vector<2x256xf32>
    %cst_81 = arith.constant 1.000000e+00 : f32
    %169 = vector.broadcast %cst_81 : f32 to vector<2x256xf32>
    %170 = arith.divf %169, %168 : vector<2x256xf32>
    %171 = vector.extract_strided_slice %154 {offsets = [0, 512], sizes = [2, 256], strides = [1, 1]} : vector<2x1024xf32> to vector<2x256xf32>
    %172 = math.tanh %171 : vector<2x256xf32>
    %173 = vector.extract_strided_slice %154 {offsets = [0, 768], sizes = [2, 256], strides = [1, 1]} : vector<2x1024xf32> to vector<2x256xf32>
    %cst_82 = arith.constant 0.000000e+00 : f32
    %174 = vector.broadcast %cst_82 : f32 to vector<2x256xf32>
    %175 = arith.subf %174, %173 : vector<2x256xf32>
    %176 = math.exp %175 : vector<2x256xf32>
    %cst_83 = arith.constant 1.000000e+00 : f32
    %177 = vector.broadcast %cst_83 : f32 to vector<2x256xf32>
    %178 = arith.addf %177, %176 : vector<2x256xf32>
    %cst_84 = arith.constant 1.000000e+00 : f32
    %179 = vector.broadcast %cst_84 : f32 to vector<2x256xf32>
    %180 = arith.divf %179, %178 : vector<2x256xf32>
    %c0_85 = arith.constant 0 : index
    %c0_86 = arith.constant 0 : index
    %181 = vector.load %arg6[%c0_85, %c0_86] : memref<2x256xf32, #tpu.memory_space<vmem>>, vector<2x256xf32>
    %182 = arith.mulf %170, %181 : vector<2x256xf32>
    %183 = arith.mulf %162, %172 : vector<2x256xf32>
    %184 = arith.addf %182, %183 : vector<2x256xf32>
    %185 = math.tanh %184 : vector<2x256xf32>
    %186 = arith.mulf %180, %185 : vector<2x256xf32>
    %c0_87 = arith.constant 0 : index
    %c0_88 = arith.constant 0 : index
    %187 = vector.load %arg6[%c0_87, %c0_88] : memref<2x256xf32, #tpu.memory_space<vmem>>, vector<2x256xf32>
    tpu.vector_store %arg6[%c0_87, %c0_88], %184 {strides = array<i32>} : memref<2x256xf32, #tpu.memory_space<vmem>>, vector<2x256xf32>,
    %c0_89 = arith.constant 0 : index
    %c0_90 = arith.constant 0 : index
    %188 = vector.load %arg5[%c0_89, %c0_90] : memref<2x256xf32, #tpu.memory_space<vmem>>, vector<2x256xf32>
    tpu.vector_store %arg5[%c0_89, %c0_90], %186 {strides = array<i32>} : memref<2x256xf32, #tpu.memory_space<vmem>>, vector<2x256xf32>,
    %189 = arith.index_cast %147 : i32 to index
    %c0_91 = arith.constant 0 : index
    %c0_92 = arith.constant 0 : index
    %190 = vector.load %arg4[%189, %c0_91, %c0_92] : memref<8x2x256xf32, #tpu.memory_space<vmem>>, vector<1x2x256xf32>
    %191 = vector.shape_cast %190 : vector<1x2x256xf32> to vector<2x256xf32>
    %192 = vector.shape_cast %186 : vector<2x256xf32> to vector<1x2x256xf32>
    tpu.vector_store %arg4[%189, %c0_91, %c0_92], %192 {strides = array<i32>} : memref<8x2x256xf32, #tpu.memory_space<vmem>>, vector<1x2x256xf32>,
    %c-1_i32 = arith.constant -1 : i32
    %193 = arith.muli %arg0, %c-1_i32 : i32
    %c4_i32 = arith.constant 4 : i32
    %194 = arith.addi %c4_i32, %193 : i32
    %195 = arith.index_cast %194 : i32 to index
    %c0_93 = arith.constant 0 : index
    %c0_94 = arith.constant 0 : index
    %196 = vector.load %arg2[%195, %c0_93, %c0_94] : memref<8x2x1024xf32, #tpu.memory_space<vmem>>, vector<1x2x1024xf32>
    %197 = vector.shape_cast %196 : vector<1x2x1024xf32> to vector<2x1024xf32>
    %c0_95 = arith.constant 0 : index
    %c0_96 = arith.constant 0 : index
    %198 = vector.load %arg5[%c0_95, %c0_96] : memref<2x256xf32, #tpu.memory_space<vmem>>, vector<2x256xf32>
    %199 = arith.truncf %198 : vector<2x256xf32> to vector<2x256xbf16>
    %cst_97 = arith.constant dense<0.000000e+00> : vector<2x1024xf32>
    %200 = tpu.matmul %199, %4, %cst_97 {dimension_numbers = #tpu.dot_dimension_numbers<[1], [0], [0], [1], [0, 0, 1, 1], [], []>} : vector<2x256xbf16>, vector<256x1024xbf16>, vector<2x1024xf32> -> vector<2x1024xf32>
    %201 = arith.addf %197, %200 : vector<2x1024xf32>
    %202 = vector.extract_strided_slice %201 {offsets = [0, 0], sizes = [2, 256], strides = [1, 1]} : vector<2x1024xf32> to vector<2x256xf32>
    %cst_98 = arith.constant 0.000000e+00 : f32
    %203 = vector.broadcast %cst_98 : f32 to vector<2x256xf32>
    %204 = arith.subf %203, %202 : vector<2x256xf32>
    %205 = math.exp %204 : vector<2x256xf32>
    %cst_99 = arith.constant 1.000000e+00 : f32
    %206 = vector.broadcast %cst_99 : f32 to vector<2x256xf32>
    %207 = arith.addf %206, %205 : vector<2x256xf32>
    %cst_100 = arith.constant 1.000000e+00 : f32
    %208 = vector.broadcast %cst_100 : f32 to vector<2x256xf32>
    %209 = arith.divf %208, %207 : vector<2x256xf32>
    %210 = vector.extract_strided_slice %201 {offsets = [0, 256], sizes = [2, 256], strides = [1, 1]} : vector<2x1024xf32> to vector<2x256xf32>
    %cst_101 = arith.constant 0.000000e+00 : f32
    %211 = vector.broadcast %cst_101 : f32 to vector<2x256xf32>
    %212 = arith.subf %211, %210 : vector<2x256xf32>
    %213 = math.exp %212 : vector<2x256xf32>
    %cst_102 = arith.constant 1.000000e+00 : f32
    %214 = vector.broadcast %cst_102 : f32 to vector<2x256xf32>
    %215 = arith.addf %214, %213 : vector<2x256xf32>
    %cst_103 = arith.constant 1.000000e+00 : f32
    %216 = vector.broadcast %cst_103 : f32 to vector<2x256xf32>
    %217 = arith.divf %216, %215 : vector<2x256xf32>
    %218 = vector.extract_strided_slice %201 {offsets = [0, 512], sizes = [2, 256], strides = [1, 1]} : vector<2x1024xf32> to vector<2x256xf32>
    %219 = math.tanh %218 : vector<2x256xf32>
    %220 = vector.extract_strided_slice %201 {offsets = [0, 768], sizes = [2, 256], strides = [1, 1]} : vector<2x1024xf32> to vector<2x256xf32>
    %cst_104 = arith.constant 0.000000e+00 : f32
    %221 = vector.broadcast %cst_104 : f32 to vector<2x256xf32>
    %222 = arith.subf %221, %220 : vector<2x256xf32>
    %223 = math.exp %222 : vector<2x256xf32>
    %cst_105 = arith.constant 1.000000e+00 : f32
    %224 = vector.broadcast %cst_105 : f32 to vector<2x256xf32>
    %225 = arith.addf %224, %223 : vector<2x256xf32>
    %cst_106 = arith.constant 1.000000e+00 : f32
    %226 = vector.broadcast %cst_106 : f32 to vector<2x256xf32>
    %227 = arith.divf %226, %225 : vector<2x256xf32>
    %c0_107 = arith.constant 0 : index
    %c0_108 = arith.constant 0 : index
    %228 = vector.load %arg6[%c0_107, %c0_108] : memref<2x256xf32, #tpu.memory_space<vmem>>, vector<2x256xf32>
    %229 = arith.mulf %217, %228 : vector<2x256xf32>
    %230 = arith.mulf %209, %219 : vector<2x256xf32>
    %231 = arith.addf %229, %230 : vector<2x256xf32>
    %232 = math.tanh %231 : vector<2x256xf32>
    %233 = arith.mulf %227, %232 : vector<2x256xf32>
    %c0_109 = arith.constant 0 : index
    %c0_110 = arith.constant 0 : index
    %234 = vector.load %arg6[%c0_109, %c0_110] : memref<2x256xf32, #tpu.memory_space<vmem>>, vector<2x256xf32>
    tpu.vector_store %arg6[%c0_109, %c0_110], %231 {strides = array<i32>} : memref<2x256xf32, #tpu.memory_space<vmem>>, vector<2x256xf32>,
    %c0_111 = arith.constant 0 : index
    %c0_112 = arith.constant 0 : index
    %235 = vector.load %arg5[%c0_111, %c0_112] : memref<2x256xf32, #tpu.memory_space<vmem>>, vector<2x256xf32>
    tpu.vector_store %arg5[%c0_111, %c0_112], %233 {strides = array<i32>} : memref<2x256xf32, #tpu.memory_space<vmem>>, vector<2x256xf32>,
    %236 = arith.index_cast %194 : i32 to index
    %c0_113 = arith.constant 0 : index
    %c0_114 = arith.constant 0 : index
    %237 = vector.load %arg4[%236, %c0_113, %c0_114] : memref<8x2x256xf32, #tpu.memory_space<vmem>>, vector<1x2x256xf32>
    %238 = vector.shape_cast %237 : vector<1x2x256xf32> to vector<2x256xf32>
    %239 = vector.shape_cast %233 : vector<2x256xf32> to vector<1x2x256xf32>
    tpu.vector_store %arg4[%236, %c0_113, %c0_114], %239 {strides = array<i32>} : memref<8x2x256xf32, #tpu.memory_space<vmem>>, vector<1x2x256xf32>,
    %c-3_i32 = arith.constant -3 : i32
    %240 = arith.muli %arg0, %c-3_i32 : i32
    %c5_i32_115 = arith.constant 5 : i32
    %241 = arith.addi %c5_i32_115, %240 : i32
    %242 = arith.index_cast %241 : i32 to index
    %c0_116 = arith.constant 0 : index
    %c0_117 = arith.constant 0 : index
    %243 = vector.load %arg2[%242, %c0_116, %c0_117] : memref<8x2x1024xf32, #tpu.memory_space<vmem>>, vector<1x2x1024xf32>
    %244 = vector.shape_cast %243 : vector<1x2x1024xf32> to vector<2x1024xf32>
    %c0_118 = arith.constant 0 : index
    %c0_119 = arith.constant 0 : index
    %245 = vector.load %arg5[%c0_118, %c0_119] : memref<2x256xf32, #tpu.memory_space<vmem>>, vector<2x256xf32>
    %246 = arith.truncf %245 : vector<2x256xf32> to vector<2x256xbf16>
    %cst_120 = arith.constant dense<0.000000e+00> : vector<2x1024xf32>
    %247 = tpu.matmul %246, %4, %cst_120 {dimension_numbers = #tpu.dot_dimension_numbers<[1], [0], [0], [1], [0, 0, 1, 1], [], []>} : vector<2x256xbf16>, vector<256x1024xbf16>, vector<2x1024xf32> -> vector<2x1024xf32>
    %248 = arith.addf %244, %247 : vector<2x1024xf32>
    %249 = vector.extract_strided_slice %248 {offsets = [0, 0], sizes = [2, 256], strides = [1, 1]} : vector<2x1024xf32> to vector<2x256xf32>
    %cst_121 = arith.constant 0.000000e+00 : f32
    %250 = vector.broadcast %cst_121 : f32 to vector<2x256xf32>
    %251 = arith.subf %250, %249 : vector<2x256xf32>
    %252 = math.exp %251 : vector<2x256xf32>
    %cst_122 = arith.constant 1.000000e+00 : f32
    %253 = vector.broadcast %cst_122 : f32 to vector<2x256xf32>
    %254 = arith.addf %253, %252 : vector<2x256xf32>
    %cst_123 = arith.constant 1.000000e+00 : f32
    %255 = vector.broadcast %cst_123 : f32 to vector<2x256xf32>
    %256 = arith.divf %255, %254 : vector<2x256xf32>
    %257 = vector.extract_strided_slice %248 {offsets = [0, 256], sizes = [2, 256], strides = [1, 1]} : vector<2x1024xf32> to vector<2x256xf32>
    %cst_124 = arith.constant 0.000000e+00 : f32
    %258 = vector.broadcast %cst_124 : f32 to vector<2x256xf32>
    %259 = arith.subf %258, %257 : vector<2x256xf32>
    %260 = math.exp %259 : vector<2x256xf32>
    %cst_125 = arith.constant 1.000000e+00 : f32
    %261 = vector.broadcast %cst_125 : f32 to vector<2x256xf32>
    %262 = arith.addf %261, %260 : vector<2x256xf32>
    %cst_126 = arith.constant 1.000000e+00 : f32
    %263 = vector.broadcast %cst_126 : f32 to vector<2x256xf32>
    %264 = arith.divf %263, %262 : vector<2x256xf32>
    %265 = vector.extract_strided_slice %248 {offsets = [0, 512], sizes = [2, 256], strides = [1, 1]} : vector<2x1024xf32> to vector<2x256xf32>
    %266 = math.tanh %265 : vector<2x256xf32>
    %267 = vector.extract_strided_slice %248 {offsets = [0, 768], sizes = [2, 256], strides = [1, 1]} : vector<2x1024xf32> to vector<2x256xf32>
    %cst_127 = arith.constant 0.000000e+00 : f32
    %268 = vector.broadcast %cst_127 : f32 to vector<2x256xf32>
    %269 = arith.subf %268, %267 : vector<2x256xf32>
    %270 = math.exp %269 : vector<2x256xf32>
    %cst_128 = arith.constant 1.000000e+00 : f32
    %271 = vector.broadcast %cst_128 : f32 to vector<2x256xf32>
    %272 = arith.addf %271, %270 : vector<2x256xf32>
    %cst_129 = arith.constant 1.000000e+00 : f32
    %273 = vector.broadcast %cst_129 : f32 to vector<2x256xf32>
    %274 = arith.divf %273, %272 : vector<2x256xf32>
    %c0_130 = arith.constant 0 : index
    %c0_131 = arith.constant 0 : index
    %275 = vector.load %arg6[%c0_130, %c0_131] : memref<2x256xf32, #tpu.memory_space<vmem>>, vector<2x256xf32>
    %276 = arith.mulf %264, %275 : vector<2x256xf32>
    %277 = arith.mulf %256, %266 : vector<2x256xf32>
    %278 = arith.addf %276, %277 : vector<2x256xf32>
    %279 = math.tanh %278 : vector<2x256xf32>
    %280 = arith.mulf %274, %279 : vector<2x256xf32>
    %c0_132 = arith.constant 0 : index
    %c0_133 = arith.constant 0 : index
    %281 = vector.load %arg6[%c0_132, %c0_133] : memref<2x256xf32, #tpu.memory_space<vmem>>, vector<2x256xf32>
    tpu.vector_store %arg6[%c0_132, %c0_133], %278 {strides = array<i32>} : memref<2x256xf32, #tpu.memory_space<vmem>>, vector<2x256xf32>,
    %c0_134 = arith.constant 0 : index
    %c0_135 = arith.constant 0 : index
    %282 = vector.load %arg5[%c0_134, %c0_135] : memref<2x256xf32, #tpu.memory_space<vmem>>, vector<2x256xf32>
    tpu.vector_store %arg5[%c0_134, %c0_135], %280 {strides = array<i32>} : memref<2x256xf32, #tpu.memory_space<vmem>>, vector<2x256xf32>,
    %283 = arith.index_cast %241 : i32 to index
    %c0_136 = arith.constant 0 : index
    %c0_137 = arith.constant 0 : index
    %284 = vector.load %arg4[%283, %c0_136, %c0_137] : memref<8x2x256xf32, #tpu.memory_space<vmem>>, vector<1x2x256xf32>
    %285 = vector.shape_cast %284 : vector<1x2x256xf32> to vector<2x256xf32>
    %286 = vector.shape_cast %280 : vector<2x256xf32> to vector<1x2x256xf32>
    tpu.vector_store %arg4[%283, %c0_136, %c0_137], %286 {strides = array<i32>} : memref<8x2x256xf32, #tpu.memory_space<vmem>>, vector<1x2x256xf32>,
    %c-5_i32 = arith.constant -5 : i32
    %287 = arith.muli %arg0, %c-5_i32 : i32
    %c6_i32 = arith.constant 6 : i32
    %288 = arith.addi %c6_i32, %287 : i32
    %289 = arith.index_cast %288 : i32 to index
    %c0_138 = arith.constant 0 : index
    %c0_139 = arith.constant 0 : index
    %290 = vector.load %arg2[%289, %c0_138, %c0_139] : memref<8x2x1024xf32, #tpu.memory_space<vmem>>, vector<1x2x1024xf32>
    %291 = vector.shape_cast %290 : vector<1x2x1024xf32> to vector<2x1024xf32>
    %c0_140 = arith.constant 0 : index
    %c0_141 = arith.constant 0 : index
    %292 = vector.load %arg5[%c0_140, %c0_141] : memref<2x256xf32, #tpu.memory_space<vmem>>, vector<2x256xf32>
    %293 = arith.truncf %292 : vector<2x256xf32> to vector<2x256xbf16>
    %cst_142 = arith.constant dense<0.000000e+00> : vector<2x1024xf32>
    %294 = tpu.matmul %293, %4, %cst_142 {dimension_numbers = #tpu.dot_dimension_numbers<[1], [0], [0], [1], [0, 0, 1, 1], [], []>} : vector<2x256xbf16>, vector<256x1024xbf16>, vector<2x1024xf32> -> vector<2x1024xf32>
    %295 = arith.addf %291, %294 : vector<2x1024xf32>
    %296 = vector.extract_strided_slice %295 {offsets = [0, 0], sizes = [2, 256], strides = [1, 1]} : vector<2x1024xf32> to vector<2x256xf32>
    %cst_143 = arith.constant 0.000000e+00 : f32
    %297 = vector.broadcast %cst_143 : f32 to vector<2x256xf32>
    %298 = arith.subf %297, %296 : vector<2x256xf32>
    %299 = math.exp %298 : vector<2x256xf32>
    %cst_144 = arith.constant 1.000000e+00 : f32
    %300 = vector.broadcast %cst_144 : f32 to vector<2x256xf32>
    %301 = arith.addf %300, %299 : vector<2x256xf32>
    %cst_145 = arith.constant 1.000000e+00 : f32
    %302 = vector.broadcast %cst_145 : f32 to vector<2x256xf32>
    %303 = arith.divf %302, %301 : vector<2x256xf32>
    %304 = vector.extract_strided_slice %295 {offsets = [0, 256], sizes = [2, 256], strides = [1, 1]} : vector<2x1024xf32> to vector<2x256xf32>
    %cst_146 = arith.constant 0.000000e+00 : f32
    %305 = vector.broadcast %cst_146 : f32 to vector<2x256xf32>
    %306 = arith.subf %305, %304 : vector<2x256xf32>
    %307 = math.exp %306 : vector<2x256xf32>
    %cst_147 = arith.constant 1.000000e+00 : f32
    %308 = vector.broadcast %cst_147 : f32 to vector<2x256xf32>
    %309 = arith.addf %308, %307 : vector<2x256xf32>
    %cst_148 = arith.constant 1.000000e+00 : f32
    %310 = vector.broadcast %cst_148 : f32 to vector<2x256xf32>
    %311 = arith.divf %310, %309 : vector<2x256xf32>
    %312 = vector.extract_strided_slice %295 {offsets = [0, 512], sizes = [2, 256], strides = [1, 1]} : vector<2x1024xf32> to vector<2x256xf32>
    %313 = math.tanh %312 : vector<2x256xf32>
    %314 = vector.extract_strided_slice %295 {offsets = [0, 768], sizes = [2, 256], strides = [1, 1]} : vector<2x1024xf32> to vector<2x256xf32>
    %cst_149 = arith.constant 0.000000e+00 : f32
    %315 = vector.broadcast %cst_149 : f32 to vector<2x256xf32>
    %316 = arith.subf %315, %314 : vector<2x256xf32>
    %317 = math.exp %316 : vector<2x256xf32>
    %cst_150 = arith.constant 1.000000e+00 : f32
    %318 = vector.broadcast %cst_150 : f32 to vector<2x256xf32>
    %319 = arith.addf %318, %317 : vector<2x256xf32>
    %cst_151 = arith.constant 1.000000e+00 : f32
    %320 = vector.broadcast %cst_151 : f32 to vector<2x256xf32>
    %321 = arith.divf %320, %319 : vector<2x256xf32>
    %c0_152 = arith.constant 0 : index
    %c0_153 = arith.constant 0 : index
    %322 = vector.load %arg6[%c0_152, %c0_153] : memref<2x256xf32, #tpu.memory_space<vmem>>, vector<2x256xf32>
    %323 = arith.mulf %311, %322 : vector<2x256xf32>
    %324 = arith.mulf %303, %313 : vector<2x256xf32>
    %325 = arith.addf %323, %324 : vector<2x256xf32>
    %326 = math.tanh %325 : vector<2x256xf32>
    %327 = arith.mulf %321, %326 : vector<2x256xf32>
    %c0_154 = arith.constant 0 : index
    %c0_155 = arith.constant 0 : index
    %328 = vector.load %arg6[%c0_154, %c0_155] : memref<2x256xf32, #tpu.memory_space<vmem>>, vector<2x256xf32>
    tpu.vector_store %arg6[%c0_154, %c0_155], %325 {strides = array<i32>} : memref<2x256xf32, #tpu.memory_space<vmem>>, vector<2x256xf32>,
    %c0_156 = arith.constant 0 : index
    %c0_157 = arith.constant 0 : index
    %329 = vector.load %arg5[%c0_156, %c0_157] : memref<2x256xf32, #tpu.memory_space<vmem>>, vector<2x256xf32>
    tpu.vector_store %arg5[%c0_156, %c0_157], %327 {strides = array<i32>} : memref<2x256xf32, #tpu.memory_space<vmem>>, vector<2x256xf32>,
    %330 = arith.index_cast %288 : i32 to index
    %c0_158 = arith.constant 0 : index
    %c0_159 = arith.constant 0 : index
    %331 = vector.load %arg4[%330, %c0_158, %c0_159] : memref<8x2x256xf32, #tpu.memory_space<vmem>>, vector<1x2x256xf32>
    %332 = vector.shape_cast %331 : vector<1x2x256xf32> to vector<2x256xf32>
    %333 = vector.shape_cast %327 : vector<2x256xf32> to vector<1x2x256xf32>
    tpu.vector_store %arg4[%330, %c0_158, %c0_159], %333 {strides = array<i32>} : memref<8x2x256xf32, #tpu.memory_space<vmem>>, vector<1x2x256xf32>,
    %c-7_i32 = arith.constant -7 : i32
    %334 = arith.muli %arg0, %c-7_i32 : i32
    %c7_i32_160 = arith.constant 7 : i32
    %335 = arith.addi %c7_i32_160, %334 : i32
    %336 = arith.index_cast %335 : i32 to index
    %c0_161 = arith.constant 0 : index
    %c0_162 = arith.constant 0 : index
    %337 = vector.load %arg2[%336, %c0_161, %c0_162] : memref<8x2x1024xf32, #tpu.memory_space<vmem>>, vector<1x2x1024xf32>
    %338 = vector.shape_cast %337 : vector<1x2x1024xf32> to vector<2x1024xf32>
    %c0_163 = arith.constant 0 : index
    %c0_164 = arith.constant 0 : index
    %339 = vector.load %arg5[%c0_163, %c0_164] : memref<2x256xf32, #tpu.memory_space<vmem>>, vector<2x256xf32>
    %340 = arith.truncf %339 : vector<2x256xf32> to vector<2x256xbf16>
    %cst_165 = arith.constant dense<0.000000e+00> : vector<2x1024xf32>
    %341 = tpu.matmul %340, %4, %cst_165 {dimension_numbers = #tpu.dot_dimension_numbers<[1], [0], [0], [1], [0, 0, 1, 1], [], []>} : vector<2x256xbf16>, vector<256x1024xbf16>, vector<2x1024xf32> -> vector<2x1024xf32>
    %342 = arith.addf %338, %341 : vector<2x1024xf32>
    %343 = vector.extract_strided_slice %342 {offsets = [0, 0], sizes = [2, 256], strides = [1, 1]} : vector<2x1024xf32> to vector<2x256xf32>
    %cst_166 = arith.constant 0.000000e+00 : f32
    %344 = vector.broadcast %cst_166 : f32 to vector<2x256xf32>
    %345 = arith.subf %344, %343 : vector<2x256xf32>
    %346 = math.exp %345 : vector<2x256xf32>
    %cst_167 = arith.constant 1.000000e+00 : f32
    %347 = vector.broadcast %cst_167 : f32 to vector<2x256xf32>
    %348 = arith.addf %347, %346 : vector<2x256xf32>
    %cst_168 = arith.constant 1.000000e+00 : f32
    %349 = vector.broadcast %cst_168 : f32 to vector<2x256xf32>
    %350 = arith.divf %349, %348 : vector<2x256xf32>
    %351 = vector.extract_strided_slice %342 {offsets = [0, 256], sizes = [2, 256], strides = [1, 1]} : vector<2x1024xf32> to vector<2x256xf32>
    %cst_169 = arith.constant 0.000000e+00 : f32
    %352 = vector.broadcast %cst_169 : f32 to vector<2x256xf32>
    %353 = arith.subf %352, %351 : vector<2x256xf32>
    %354 = math.exp %353 : vector<2x256xf32>
    %cst_170 = arith.constant 1.000000e+00 : f32
    %355 = vector.broadcast %cst_170 : f32 to vector<2x256xf32>
    %356 = arith.addf %355, %354 : vector<2x256xf32>
    %cst_171 = arith.constant 1.000000e+00 : f32
    %357 = vector.broadcast %cst_171 : f32 to vector<2x256xf32>
    %358 = arith.divf %357, %356 : vector<2x256xf32>
    %359 = vector.extract_strided_slice %342 {offsets = [0, 512], sizes = [2, 256], strides = [1, 1]} : vector<2x1024xf32> to vector<2x256xf32>
    %360 = math.tanh %359 : vector<2x256xf32>
    %361 = vector.extract_strided_slice %342 {offsets = [0, 768], sizes = [2, 256], strides = [1, 1]} : vector<2x1024xf32> to vector<2x256xf32>
    %cst_172 = arith.constant 0.000000e+00 : f32
    %362 = vector.broadcast %cst_172 : f32 to vector<2x256xf32>
    %363 = arith.subf %362, %361 : vector<2x256xf32>
    %364 = math.exp %363 : vector<2x256xf32>
    %cst_173 = arith.constant 1.000000e+00 : f32
    %365 = vector.broadcast %cst_173 : f32 to vector<2x256xf32>
    %366 = arith.addf %365, %364 : vector<2x256xf32>
    %cst_174 = arith.constant 1.000000e+00 : f32
    %367 = vector.broadcast %cst_174 : f32 to vector<2x256xf32>
    %368 = arith.divf %367, %366 : vector<2x256xf32>
    %c0_175 = arith.constant 0 : index
    %c0_176 = arith.constant 0 : index
    %369 = vector.load %arg6[%c0_175, %c0_176] : memref<2x256xf32, #tpu.memory_space<vmem>>, vector<2x256xf32>
    %370 = arith.mulf %358, %369 : vector<2x256xf32>
    %371 = arith.mulf %350, %360 : vector<2x256xf32>
    %372 = arith.addf %370, %371 : vector<2x256xf32>
    %373 = math.tanh %372 : vector<2x256xf32>
    %374 = arith.mulf %368, %373 : vector<2x256xf32>
    %c0_177 = arith.constant 0 : index
    %c0_178 = arith.constant 0 : index
    %375 = vector.load %arg6[%c0_177, %c0_178] : memref<2x256xf32, #tpu.memory_space<vmem>>, vector<2x256xf32>
    tpu.vector_store %arg6[%c0_177, %c0_178], %372 {strides = array<i32>} : memref<2x256xf32, #tpu.memory_space<vmem>>, vector<2x256xf32>,
    %c0_179 = arith.constant 0 : index
    %c0_180 = arith.constant 0 : index
    %376 = vector.load %arg5[%c0_179, %c0_180] : memref<2x256xf32, #tpu.memory_space<vmem>>, vector<2x256xf32>
    tpu.vector_store %arg5[%c0_179, %c0_180], %374 {strides = array<i32>} : memref<2x256xf32, #tpu.memory_space<vmem>>, vector<2x256xf32>,
    %377 = arith.index_cast %335 : i32 to index
    %c0_181 = arith.constant 0 : index
    %c0_182 = arith.constant 0 : index
    %378 = vector.load %arg4[%377, %c0_181, %c0_182] : memref<8x2x256xf32, #tpu.memory_space<vmem>>, vector<1x2x256xf32>
    %379 = vector.shape_cast %378 : vector<1x2x256xf32> to vector<2x256xf32>
    %380 = vector.shape_cast %374 : vector<2x256xf32> to vector<1x2x256xf32>
    tpu.vector_store %arg4[%377, %c0_181, %c0_182], %380 {strides = array<i32>} : memref<8x2x256xf32, #tpu.memory_space<vmem>>, vector<1x2x256xf32>,
    return
  }
  func.func @transform_0(%arg0: i32, %arg1: i32) -> (i32, i32, i32) {
    %c1_i32 = arith.constant 1 : i32
    %0 = arith.subi %c1_i32, %arg0 : i32
    %1 = arith.muli %0, %arg1 : i32
    %c1_i32_0 = arith.constant 1 : i32
    %2 = arith.subi %c1_i32_0, %arg1 : i32
    %3 = arith.muli %arg0, %2 : i32
    %4 = arith.addi %1, %3 : i32
    %c0_i32 = arith.constant 0 : i32
    %c0_i32_1 = arith.constant 0 : i32
    return %4, %c0_i32, %arg0 : i32, i32, i32
  }
  func.func @transform_1(%arg0: i32, %arg1: i32) -> (i32, i32, i32) {
    %c0_i32 = arith.constant 0 : i32
    %c0_i32_0 = arith.constant 0 : i32
    %c0_i32_1 = arith.constant 0 : i32
    return %arg0, %c0_i32, %c0_i32_0 : i32, i32, i32
  }
  func.func @transform_2(%arg0: i32, %arg1: i32) -> (i32, i32, i32) {
    %c1_i32 = arith.constant 1 : i32
    %0 = arith.subi %c1_i32, %arg0 : i32
    %1 = arith.muli %0, %arg1 : i32
    %c1_i32_0 = arith.constant 1 : i32
    %2 = arith.subi %c1_i32_0, %arg1 : i32
    %3 = arith.muli %arg0, %2 : i32
    %4 = arith.addi %1, %3 : i32
    %c0_i32 = arith.constant 0 : i32
    %c0_i32_1 = arith.constant 0 : i32
    return %4, %c0_i32, %arg0 : i32, i32, i32
  }
}

module attributes {stable_mosaic.version = 11 : i64} {
  func.func @_mm_scale_bias_kernel(%arg0: i32, %arg1: i32, %arg2: memref<32x512xbf16, #tpu.memory_space<vmem>>, %arg3: memref<512x256xbf16, #tpu.memory_space<vmem>>, %arg4: memref<1x256xf32, #tpu.memory_space<vmem>>, %arg5: memref<1x256xf32, #tpu.memory_space<vmem>>, %arg6: memref<32x256xf32, #tpu.memory_space<vmem>>, %arg7: memref<32x256xf32, #tpu.memory_space<vmem>>) attributes {dimension_semantics = [#tpu.dimension_semantics<parallel>, #tpu.dimension_semantics<arbitrary>], iteration_bounds = array<i64: 1, 1>, scalar_prefetch = 0 : i64, scratch_operands = 1 : i64, tpu.core_type = #tpu.core_type<tc>, window_params = [{transform_indices = @transform_0, window_bounds = array<i64: 32, 512>}, {transform_indices = @transform_1, window_bounds = array<i64: 512, 256>}, {pipeline_mode = #tpu.pipeline_mode<synchronous>, transform_indices = @transform_2, window_bounds = array<i64: 1, 256>}, {pipeline_mode = #tpu.pipeline_mode<synchronous>, transform_indices = @transform_3, window_bounds = array<i64: 1, 256>}, {transform_indices = @transform_4, window_bounds = array<i64: 32, 256>}]} {
    %c0_i32 = arith.constant 0 : i32
    %0 = arith.cmpi eq, %arg1, %c0_i32 : i32
    %1 = arith.extui %0 : i1 to i32
    %c0_i32_0 = arith.constant 0 : i32
    %2 = arith.cmpi ne, %1, %c0_i32_0 : i32
    scf.if %2 {
      %cst_10 = arith.constant 0.000000e+00 : f32
      %12 = vector.broadcast %cst_10 : f32 to vector<32x256xf32>
      %c0_11 = arith.constant 0 : index
      %c0_12 = arith.constant 0 : index
      %13 = vector.load %arg7[%c0_11, %c0_12] : memref<32x256xf32, #tpu.memory_space<vmem>>, vector<32x256xf32>
      tpu.vector_store %arg7[%c0_11, %c0_12], %12 {strides = array<i32>} : memref<32x256xf32, #tpu.memory_space<vmem>>, vector<32x256xf32>,
    } else {
    }
    %c0 = arith.constant 0 : index
    %c0_1 = arith.constant 0 : index
    %3 = vector.load %arg7[%c0, %c0_1] : memref<32x256xf32, #tpu.memory_space<vmem>>, vector<32x256xf32>
    %c0_2 = arith.constant 0 : index
    %c0_3 = arith.constant 0 : index
    %4 = vector.load %arg2[%c0_2, %c0_3] : memref<32x512xbf16, #tpu.memory_space<vmem>>, vector<32x512xbf16>
    %c0_4 = arith.constant 0 : index
    %c0_5 = arith.constant 0 : index
    %5 = vector.load %arg3[%c0_4, %c0_5] : memref<512x256xbf16, #tpu.memory_space<vmem>>, vector<512x256xbf16>
    %cst = arith.constant dense<0.000000e+00> : vector<32x256xf32>
    %6 = tpu.matmul %4, %5, %cst {dimension_numbers = #tpu.dot_dimension_numbers<[1], [0], [0], [1], [0, 0, 1, 1], [], []>} : vector<32x512xbf16>, vector<512x256xbf16>, vector<32x256xf32> -> vector<32x256xf32>
    %7 = arith.addf %3, %6 : vector<32x256xf32>
    %c0_6 = arith.constant 0 : index
    %c0_7 = arith.constant 0 : index
    %8 = vector.load %arg7[%c0_6, %c0_7] : memref<32x256xf32, #tpu.memory_space<vmem>>, vector<32x256xf32>
    tpu.vector_store %arg7[%c0_6, %c0_7], %7 {strides = array<i32>} : memref<32x256xf32, #tpu.memory_space<vmem>>, vector<32x256xf32>,
    %c0_i32_8 = arith.constant 0 : i32
    %9 = arith.cmpi eq, %arg1, %c0_i32_8 : i32
    %10 = arith.extui %9 : i1 to i32
    %c0_i32_9 = arith.constant 0 : i32
    %11 = arith.cmpi ne, %10, %c0_i32_9 : i32
    scf.if %11 {
      %c0_10 = arith.constant 0 : index
      %c0_11 = arith.constant 0 : index
      %12 = vector.load %arg7[%c0_10, %c0_11] : memref<32x256xf32, #tpu.memory_space<vmem>>, vector<32x256xf32>
      %c0_12 = arith.constant 0 : index
      %c0_13 = arith.constant 0 : index
      %13 = vector.load %arg4[%c0_12, %c0_13] : memref<1x256xf32, #tpu.memory_space<vmem>>, vector<1x256xf32>
      %14 = vector.broadcast %13 : vector<1x256xf32> to vector<32x256xf32>
      %15 = arith.mulf %12, %14 : vector<32x256xf32>
      %c0_14 = arith.constant 0 : index
      %c0_15 = arith.constant 0 : index
      %16 = vector.load %arg5[%c0_14, %c0_15] : memref<1x256xf32, #tpu.memory_space<vmem>>, vector<1x256xf32>
      %17 = vector.broadcast %16 : vector<1x256xf32> to vector<32x256xf32>
      %18 = arith.addf %15, %17 : vector<32x256xf32>
      %c0_16 = arith.constant 0 : index
      %c0_17 = arith.constant 0 : index
      %19 = vector.load %arg6[%c0_16, %c0_17] : memref<32x256xf32, #tpu.memory_space<vmem>>, vector<32x256xf32>
      tpu.vector_store %arg6[%c0_16, %c0_17], %18 {strides = array<i32>} : memref<32x256xf32, #tpu.memory_space<vmem>>, vector<32x256xf32>,
    } else {
    }
    return
  }
  func.func @transform_0(%arg0: i32, %arg1: i32) -> (i32, i32) {
    %c0_i32 = arith.constant 0 : i32
    return %arg0, %arg1 : i32, i32
  }
  func.func @transform_1(%arg0: i32, %arg1: i32) -> (i32, i32) {
    %c0_i32 = arith.constant 0 : i32
    %c0_i32_0 = arith.constant 0 : i32
    return %arg1, %c0_i32 : i32, i32
  }
  func.func @transform_2(%arg0: i32, %arg1: i32) -> (i32, i32) {
    %c0_i32 = arith.constant 0 : i32
    %c0_i32_0 = arith.constant 0 : i32
    %c0_i32_1 = arith.constant 0 : i32
    return %c0_i32, %c0_i32_0 : i32, i32
  }
  func.func @transform_3(%arg0: i32, %arg1: i32) -> (i32, i32) {
    %c0_i32 = arith.constant 0 : i32
    %c0_i32_0 = arith.constant 0 : i32
    %c0_i32_1 = arith.constant 0 : i32
    return %c0_i32, %c0_i32_0 : i32, i32
  }
  func.func @transform_4(%arg0: i32, %arg1: i32) -> (i32, i32) {
    %c0_i32 = arith.constant 0 : i32
    %c0_i32_0 = arith.constant 0 : i32
    return %arg0, %c0_i32 : i32, i32
  }
}

</mosaic_0001>

<bundles_post_ra>
// kernel: onsets_and_frames_forward.5
= control target key start
LH: loop header
LB: loop body
LE: loop exit
PB: predicated region body
PF: predicated region fallthrough
CT: control target
= control target key end

     0   :  { %vm372_vm0 = vcmask 1041408   ;;  %vm373_vm1 = vcmask 1042432   ;;  %vm299_vm2 = vcmask 171008   ;;  %v1413_v1 = vmov 65535   ;;  %s1984_s1 = inlined_call_operand.vmem [shape: bf16[21,48], index: 1, kind: input, shape index: {}]   ;;  %s1985_s0 = inlined_call_operand.vmem [shape: bf16[384,21], index: 0, kind: input, shape index: {}]   ;;  %s1986_s2 = inlined_call_operand.vmem [shape: f32[1,48], index: 2, kind: input, shape index: {}]   ;;  %s1987_s3 = inlined_call_operand.vmem [shape: f32[1,48], index: 3, kind: input, shape index: {}]   ;;  %s1988_s4 = inlined_call_operand.vmem [shape: bf16[384,48], index: 4, kind: output, shape index: {}]  }
   0x1   :  { %v1387_v0 = vld [vmem:[%s1984_s1] sm:$0xff]   ;;  %v374_v2 = vsel %vm372_vm0, 4294967295, %v1413_v1  ;;  %v1388_v3 = vld [vmem:[%s1984_s1 + $0x8] ss:$0 sps:$4 sm:$0x77]   ;;  %vm22_vm3 = vcmask 392192  }
   0x2   :  { %v375_v4 = vsel %vm373_vm1, %v374_v2, 0  ;;  %1329 = vmatprep.subr.bf16.mxu0 %v1387_v0  ;;  %1381 = vmatprep.subr.bf16.mxu1 %v1387_v0  ;;  %v1389_v5 = vld [vmem:[%s1985_s0] sm:$0xff]   ;;  %v1391_v8 = vld [vmem:[%s1985_s0 + $0x8] sm:$0xff]   ;;  %v1414_v9 = vmov 0.0   ;;  %v1393_v11 = vld [vmem:[%s1985_s0 + $0x10] sm:$0xff]   ;;  %vm1102_vm4 = vcmask 388096  }
   0x3   :  { %1330 = vmatpush3.bf16.msra.mxu0 %v1387_v0  ;;  %1383 = vmatpush3.bf16.msra.mxu1 %v1387_v0  ;;  %v377_v6 = vand.u32 %v1388_v3, %v375_v4  ;;  %v1390_v7 = vld [vmem:[%s1985_s0 + $0x60] sm:$0xff]   ;;  %25 = vst.msk [vmem:[#allocation2 + $0x10] sm:$0xff] %vm22_vm3, %v1414_v9  ;;  %23 = vst.msk [vmem:[#allocation2] sm:$0xff] %vm22_vm3, %v1414_v9  ;;  %v1392_v10 = vld [vmem:[%s1985_s0 + $0x68] sm:$0xff]  }
   0x4   :  { %1333 = vmatprep.mubr.msk.bf16.mxu0 %vm299_vm2, %v1389_v5  ;;  %24 = vst.msk [vmem:[#allocation2 + $0x8] sm:$0xff] %vm22_vm3, %v1414_v9  ;;  %26 = vst.msk [vmem:[#allocation2 + $0x18] sm:$0xff] %vm22_vm3, %v1414_v9  ;;  %1357 = vmatprep.mubr.msk.bf16.mxu1 %vm299_vm2, %v1390_v7  ;;  %v1394_v12 = vld [vmem:[%s1985_s0 + $0x70] sm:$0xff]   ;;  %v1395_v13 = vld [vmem:[%s1985_s0 + $0x18] sm:$0xff]  }
   0x5   :  { %27 = vst.msk [vmem:[#allocation2 + $0x20] sm:$0xff] %vm22_vm3, %v1414_v9  ;;  %28 = vst.msk [vmem:[#allocation2 + $0x28] sm:$0xff] %vm22_vm3, %v1414_v9  ;;  %1331 = vmatprep.subr.bf16.mxu0 %v377_v6  ;;  %1382 = vmatprep.subr.bf16.mxu1 %v377_v6  ;;  %v1396_v14 = vld [vmem:[%s1985_s0 + $0x78] sm:$0xff]   ;;  %v1397_v15 = vld [vmem:[%s1985_s0 + $0x20] sm:$0xff]  }
   0x6   :  { %29 = vst.msk [vmem:[#allocation2 + $0x30] sm:$0xff] %vm22_vm3, %v1414_v9  ;;  %30 = vst.msk [vmem:[#allocation2 + $0x38] sm:$0xff] %vm22_vm3, %v1414_v9  ;;  %v1398_v16 = vld [vmem:[%s1985_s0 + $0x80] sm:$0xff]   ;;  %v1399_v17 = vld [vmem:[%s1985_s0 + $0x28] sm:$0xff]  }
   0x7   :  { %31 = vst.msk [vmem:[#allocation2 + $0x40] sm:$0xff] %vm22_vm3, %v1414_v9  ;;  %32 = vst.msk [vmem:[#allocation2 + $0x48] sm:$0xff] %vm22_vm3, %v1414_v9  ;;  %1332 = vmatpush3.bf16.msra.mxu0 %v377_v6  ;;  %1384 = vmatpush3.bf16.msra.mxu1 %v377_v6  ;;  %v1400_v18 = vld [vmem:[%s1985_s0 + $0x88] sm:$0xff]   ;;  %v1401_v19 = vld [vmem:[%s1985_s0 + $0x30] sm:$0xff]  }
   0x8   :  { %33 = vst.msk [vmem:[#allocation2 + $0x50] sm:$0xff] %vm22_vm3, %v1414_v9  ;;  %34 = vst.msk [vmem:[#allocation2 + $0x58] sm:$0xff] %vm22_vm3, %v1414_v9  ;;  %v1402_v20 = vld [vmem:[%s1985_s0 + $0x90] sm:$0xff]   ;;  %v1403_v21 = vld [vmem:[%s1985_s0 + $0x38] sm:$0xff]  }
   0x9   :  { %35 = vst.msk [vmem:[#allocation2 + $0x60] sm:$0xff] %vm22_vm3, %v1414_v9  ;;  %36 = vst.msk [vmem:[#allocation2 + $0x68] sm:$0xff] %vm22_vm3, %v1414_v9  ;;  %v1404_v22 = vld [vmem:[%s1985_s0 + $0x98] sm:$0xff]   ;;  %v1405_v23 = vld [vmem:[%s1985_s0 + $0x40] sm:$0xff]  }
   0xa   :  { %37 = vst.msk [vmem:[#allocation2 + $0x70] sm:$0xff] %vm22_vm3, %v1414_v9  ;;  %38 = vst.msk [vmem:[#allocation2 + $0x78] sm:$0xff] %vm22_vm3, %v1414_v9  ;;  %1334 = vmatmul.mubr.msk.bf16.vlgmr.msra.gmra.mrb[0].mxu0 %vm299_vm2, %v1391_v8  ;;  %1358 = vmatmul.mubr.msk.bf16.vlgmr.msra.gmra.mrb[0].mxu1 %vm299_vm2, %v1392_v10  ;;  %v1406_v24 = vld [vmem:[%s1985_s0 + $0xa0] sm:$0xff]   ;;  %v1407_v25 = vld [vmem:[%s1985_s0 + $0x48] sm:$0xff]  }
   0xb   :  { %39 = vst.msk [vmem:[#allocation2 + $0x80] sm:$0xff] %vm22_vm3, %v1414_v9  ;;  %40 = vst.msk [vmem:[#allocation2 + $0x88] sm:$0xff] %vm22_vm3, %v1414_v9  ;;  %1337 = vmatprep.mubr.msk.bf16.mxu0 %vm299_vm2, %v1393_v11  ;;  %1361 = vmatprep.mubr.msk.bf16.mxu1 %vm299_vm2, %v1394_v12  ;;  %v1408_v26 = vld [vmem:[%s1985_s0 + $0xa8] sm:$0xff]   ;;  %v1409_v27 = vld [vmem:[%s1985_s0 + $0x50] sm:$0xff]  }
   0xc   :  { %41 = vst.msk [vmem:[#allocation2 + $0x90] sm:$0xff] %vm22_vm3, %v1414_v9  ;;  %42 = vst.msk [vmem:[#allocation2 + $0x98] sm:$0xff] %vm22_vm3, %v1414_v9  ;;  %v1410_v28 = vld [vmem:[%s1985_s0 + $0xb0] sm:$0xff]   ;;  %v1411_v29 = vld [vmem:[%s1985_s0 + $0x58] sm:$0xff]  }
   0xd   :  { %43 = vst.msk [vmem:[#allocation2 + $0xa0] sm:$0xff] %vm22_vm3, %v1414_v9  ;;  %44 = vst.msk [vmem:[#allocation2 + $0xa8] sm:$0xff] %vm22_vm3, %v1414_v9  ;;  %v1412_v30 = vld [vmem:[%s1985_s0 + $0xb8] sm:$0xff]   ;;  %v73_v31 = vld [vmem:[#allocation2 + $0x10] sm:$0xff] }
   0xe   :  { %45 = vst.msk [vmem:[#allocation2 + $0xb0] sm:$0xff] %vm22_vm3, %v1414_v9  ;;  %46 = vst.msk [vmem:[#allocation2 + $0xb8] sm:$0xff] %vm22_vm3, %v1414_v9  ;;  %v71_v33 = vld [vmem:[#allocation2] sm:$0xff]  ;;  %v74_v37 = vld [vmem:[#allocation2 + $0x18] sm:$0xff] }
   0xf   :  { %47 = vst.msk [vmem:[#allocation2 + $0xc0] sm:$0xff] %vm22_vm3, %v1414_v9  ;;  %48 = vst.msk [vmem:[#allocation2 + $0xc8] sm:$0xff] %vm22_vm3, %v1414_v9  ;;  %v72_v43 = vld [vmem:[#allocation2 + $0x8] sm:$0xff]  ;;  %v77_v55 = vld [vmem:[#allocation2 + $0x30] sm:$0xff] }
  0x10   :  { %49 = vst.msk [vmem:[#allocation2 + $0xd0] sm:$0xff] %vm22_vm3, %v1414_v9  ;;  %50 = vst.msk [vmem:[#allocation2 + $0xd8] sm:$0xff] %vm22_vm3, %v1414_v9  ;;  %v75_v57 = vld [vmem:[#allocation2 + $0x20] sm:$0xff]  ;;  %v78_v62 = vld [vmem:[#allocation2 + $0x38] sm:$0xff] }
  0x11   :  { %51 = vst.msk [vmem:[#allocation2 + $0xe0] sm:$0xff] %vm22_vm3, %v1414_v9  ;;  %52 = vst.msk [vmem:[#allocation2 + $0xe8] sm:$0xff] %vm22_vm3, %v1414_v9  ;;  %v1601_v59 = vld [vmem:[%s1986_s2] ss:$0 sm:$0xff]  ;;  %v76_v5 = vld [vmem:[#allocation2 + $0x28] sm:$0xff] }
  0x12   :  { %53 = vst.msk [vmem:[#allocation2 + $0xf0] sm:$0xff] %vm22_vm3, %v1414_v9  ;;  %54 = vst.msk [vmem:[#allocation2 + $0xf8] sm:$0xff] %vm22_vm3, %v1414_v9  ;;  %1338 = vmatmul.mubr.msk.bf16.gmra.mrb[4].mxu0 %vm299_vm2, %v1395_v13  ;;  %1362 = vmatmul.mubr.msk.bf16.gmra.mrb[4].mxu1 %vm299_vm2, %v1396_v14  ;;  %v1606_v0 = vld [vmem:[%s1987_s3] ss:$0 sm:$0xff] }
  0x13   :  { %55 = vst.msk [vmem:[#allocation2 + $0x100] sm:$0xff] %vm22_vm3, %v1414_v9  ;;  %56 = vst.msk [vmem:[#allocation2 + $0x108] sm:$0xff] %vm22_vm3, %v1414_v9  ;;  %1341 = vmatprep.mubr.msk.bf16.mxu0 %vm299_vm2, %v1397_v15  ;;  %1365 = vmatprep.mubr.msk.bf16.mxu1 %vm299_vm2, %v1398_v16 }
  0x14   :  { %57 = vst.msk [vmem:[#allocation2 + $0x110] sm:$0xff] %vm22_vm3, %v1414_v9  ;;  %58 = vst.msk [vmem:[#allocation2 + $0x118] sm:$0xff] %vm22_vm3, %v1414_v9 }
  0x15   :  { %59 = vst.msk [vmem:[#allocation2 + $0x120] sm:$0xff] %vm22_vm3, %v1414_v9  ;;  %60 = vst.msk [vmem:[#allocation2 + $0x128] sm:$0xff] %vm22_vm3, %v1414_v9 }
  0x16   :  { %61 = vst.msk [vmem:[#allocation2 + $0x130] sm:$0xff] %vm22_vm3, %v1414_v9  ;;  %62 = vst.msk [vmem:[#allocation2 + $0x138] sm:$0xff] %vm22_vm3, %v1414_v9  ;;  %v95_v34 = vld [vmem:[#allocation2 + $0xc0] sm:$0xff]  ;;  %v96_v44 = vld [vmem:[#allocation2 + $0xc8] sm:$0xff] }
  0x17   :  { %63 = vst.msk [vmem:[#allocation2 + $0x140] sm:$0xff] %vm22_vm3, %v1414_v9  ;;  %64 = vst.msk [vmem:[#allocation2 + $0x148] sm:$0xff] %vm22_vm3, %v1414_v9  ;;  %v97_v32 = vld [vmem:[#allocation2 + $0xd0] sm:$0xff]  ;;  %v98_v38 = vld [vmem:[#allocation2 + $0xd8] sm:$0xff] }
  0x18   :  { %65 = vst.msk [vmem:[#allocation2 + $0x150] sm:$0xff] %vm22_vm3, %v1414_v9  ;;  %66 = vst.msk [vmem:[#allocation2 + $0x158] sm:$0xff] %vm22_vm3, %v1414_v9  ;;  %v99_v58 = vld [vmem:[#allocation2 + $0xe0] sm:$0xff]  ;;  %v100_v6 = vld [vmem:[#allocation2 + $0xe8] sm:$0xff] }
  0x19   :  { %67 = vst.msk [vmem:[#allocation2 + $0x160] sm:$0xff] %vm22_vm3, %v1414_v9  ;;  %68 = vst.msk [vmem:[#allocation2 + $0x168] sm:$0xff] %vm22_vm3, %v1414_v9  ;;  %v101_v56 = vld [vmem:[#allocation2 + $0xf0] sm:$0xff]  ;;  %v102_v63 = vld [vmem:[#allocation2 + $0xf8] sm:$0xff] }
  0x1a   :  { %69 = vst.msk [vmem:[#allocation2 + $0x170] sm:$0xff] %vm22_vm3, %v1414_v9  ;;  %70 = vst.msk [vmem:[#allocation2 + $0x178] sm:$0xff] %vm22_vm3, %v1414_v9  ;;  %1342 = vmatmul.mubr.msk.bf16.gmra.mrb[8].mxu0 %vm299_vm2, %v1399_v17  ;;  %1366 = vmatmul.mubr.msk.bf16.gmra.mrb[8].mxu1 %vm299_vm2, %v1400_v18 }
  0x1b   :  { %1345 = vmatprep.mubr.msk.bf16.mxu0 %vm299_vm2, %v1401_v19  ;;  %1369 = vmatprep.mubr.msk.bf16.mxu1 %vm299_vm2, %v1402_v20 }
  0x22   :  { %1346 = vmatmul.mubr.msk.bf16.gmra.mrb[12].mxu0 %vm299_vm2, %v1403_v21  ;;  %1370 = vmatmul.mubr.msk.bf16.gmra.mrb[12].mxu1 %vm299_vm2, %v1404_v22 }
  0x23   :  { %1349 = vmatprep.mubr.msk.bf16.mxu0 %vm299_vm2, %v1405_v23  ;;  %1373 = vmatprep.mubr.msk.bf16.mxu1 %vm299_vm2, %v1406_v24 }
  0x2a   :  { %1350 = vmatmul.mubr.msk.bf16.gmra.mrb[16].mxu0 %vm299_vm2, %v1407_v25  ;;  %1374 = vmatmul.mubr.msk.bf16.gmra.mrb[16].mxu1 %vm299_vm2, %v1408_v26 }
  0x2b   :  { %1353 = vmatprep.mubr.msk.bf16.mxu0 %vm299_vm2, %v1409_v27  ;;  %1377 = vmatprep.mubr.msk.bf16.mxu1 %vm299_vm2, %v1410_v28 }
  0x32   :  { %1354 = vmatmul.mubr.msk.bf16.gmra.mrb[20].mxu0 %vm299_vm2, %v1411_v29  ;;  %1378 = vmatmul.mubr.msk.bf16.gmra.mrb[20].mxu1 %vm299_vm2, %v1412_v30 }
  0xdd   :  { %v1335_v35 = vpop.f32.mrb[0].mxu0  ;;  %v1359_v36 = vpop.f32.mrb[0].mxu1 }
  0xde   :  { %v606_v39 = vadd.f32 %v1335_v35, %v73_v31  ;;  %v630_v40 = vadd.f32 %v1359_v36, %v97_v32  ;;  %v413_v41 = vpop.f32.mrb[1].mxu0  ;;  %v509_v42 = vpop.f32.mrb[1].mxu1 }
  0xdf   :  { %v604_v45 = vadd.f32 %v413_v41, %v71_v33  ;;  %v628_v46 = vadd.f32 %v509_v42, %v95_v34  ;;  %v1336_v47 = vpop.f32.mrb[2].mxu0  ;;  %v1360_v48 = vpop.f32.mrb[2].mxu1 }
  0xe0   :  { %655 = vst.msk [vmem:[#allocation2 + $0x10] sm:$0xff] %vm22_vm3, %v606_v39  ;;  %679 = vst.msk [vmem:[#allocation2 + $0xd0] sm:$0xff] %vm22_vm3, %v630_v40  ;;  %v607_v49 = vadd.f32 %v1336_v47, %v74_v37  ;;  %v631_v50 = vadd.f32 %v1360_v48, %v98_v38  ;;  %v416_v51 = vpop.f32.mrb[3].mxu0  ;;  %v512_v52 = vpop.f32.mrb[3].mxu1 }
  0xe1   :  { %653 = vst.msk [vmem:[#allocation2] sm:$0xff] %vm22_vm3, %v604_v45  ;;  %677 = vst.msk [vmem:[#allocation2 + $0xc0] sm:$0xff] %vm22_vm3, %v628_v46  ;;  %v605_v53 = vadd.f32 %v416_v51, %v72_v43  ;;  %v629_v54 = vadd.f32 %v512_v52, %v96_v44 }
  0xe2   :  { %656 = vst.msk [vmem:[#allocation2 + $0x18] sm:$0xff] %vm22_vm3, %v607_v49  ;;  %680 = vst.msk [vmem:[#allocation2 + $0xd8] sm:$0xff] %vm22_vm3, %v631_v50 }
  0xe3   :  { %654 = vst.msk [vmem:[#allocation2 + $0x8] sm:$0xff] %vm22_vm3, %v605_v53  ;;  %678 = vst.msk [vmem:[#allocation2 + $0xc8] sm:$0xff] %vm22_vm3, %v629_v54 }
  0xe5   :  { %v1339_v60 = vpop.f32.mrb[4].mxu0  ;;  %v1363_v61 = vpop.f32.mrb[4].mxu1 }
  0xe6   :  { %v610_v1 = vadd.f32 %v1339_v60, %v77_v55  ;;  %v634_v2 = vadd.f32 %v1363_v61, %v101_v56  ;;  %v429_v3 = vpop.f32.mrb[5].mxu0  ;;  %v525_v4 = vpop.f32.mrb[5].mxu1 }
  0xe7   :  { %v706_v7 = vld [vmem:[#allocation2 + $0x10] sm:$0xff]  ;;  %v608_v9 = vadd.f32 %v429_v3, %v75_v57  ;;  %v632_v10 = vadd.f32 %v525_v4, %v99_v58  ;;  %v1340_v11 = vpop.f32.mrb[6].mxu0  ;;  %v1364_v12 = vpop.f32.mrb[6].mxu1 }
  0xe8   :  { %v730_v8 = vld [vmem:[#allocation2 + $0xd0] sm:$0xff]  ;;  %v761_v13 = vmul.f32 %v1601_v59, %v706_v7  ;;  %v704_v15 = vld [vmem:[#allocation2] sm:$0xff]  ;;  %659 = vst.msk [vmem:[#allocation2 + $0x30] sm:$0xff] %vm22_vm3, %v610_v1  ;;  %683 = vst.msk [vmem:[#allocation2 + $0xf0] sm:$0xff] %vm22_vm3, %v634_v2  ;;  %v611_v17 = vadd.f32 %v1340_v11, %v78_v62  ;;  %v635_v18 = vadd.f32 %v1364_v12, %v102_v63  ;;  %v432_v19 = vpop.f32.mrb[7].mxu0  ;;  %v528_v20 = vpop.f32.mrb[7].mxu1 }
  0xe9   :  { %v785_v14 = vmul.f32 %v1601_v59, %v730_v8  ;;  %v728_v16 = vld [vmem:[#allocation2 + $0xc0] sm:$0xff]  ;;  %v759_v21 = vmul.f32 %v1601_v59, %v704_v15  ;;  %v707_v23 = vld [vmem:[#allocation2 + $0x18] sm:$0xff]  ;;  %657 = vst.msk [vmem:[#allocation2 + $0x20] sm:$0xff] %vm22_vm3, %v608_v9  ;;  %681 = vst.msk [vmem:[#allocation2 + $0xe0] sm:$0xff] %vm22_vm3, %v632_v10  ;;  %v609_v25 = vadd.f32 %v432_v19, %v76_v5 }
  0xea   :  { %v783_v22 = vmul.f32 %v1601_v59, %v728_v16  ;;  %v731_v24 = vld [vmem:[#allocation2 + $0xd8] sm:$0xff]  ;;  %v633_v26 = vadd.f32 %v528_v20, %v100_v6  ;;  %v816_v27 = vadd.f32 %v1606_v0, %v761_v13  ;;  %v762_v29 = vmul.f32 %v1601_v59, %v707_v23  ;;  %v705_v31 = vld [vmem:[#allocation2 + $0x8] sm:$0xff]  ;;  %660 = vst.msk [vmem:[#allocation2 + $0x38] sm:$0xff] %vm22_vm3, %v611_v17  ;;  %v81_v23 = vld [vmem:[#allocation2 + $0x50] sm:$0xff] }
  0xeb   :  { %v840_v28 = vadd.f32 %v1606_v0, %v785_v14  ;;  %v786_v30 = vmul.f32 %v1601_v59, %v731_v24  ;;  %v729_v32 = vld [vmem:[#allocation2 + $0xc8] sm:$0xff]  ;;  %684 = vst.msk [vmem:[#allocation2 + $0xf8] sm:$0xff] %vm22_vm3, %v635_v18  ;;  %v814_v33 = vadd.f32 %v1606_v0, %v759_v21  ;;  %v760_v35 = vmul.f32 %v1601_v59, %v705_v31 }
  0xec   :  { %v838_v34 = vadd.f32 %v1606_v0, %v783_v22  ;;  %v784_v36 = vmul.f32 %v1601_v59, %v729_v32  ;;  %658 = vst.msk [vmem:[#allocation2 + $0x28] sm:$0xff] %vm22_vm3, %v609_v25  ;;  %682 = vst.msk [vmem:[#allocation2 + $0xe8] sm:$0xff] %vm22_vm3, %v633_v26  ;;  %v864_v37 = vmax.f32 %v816_v27, 0.0  ;;  %v817_v39 = vadd.f32 %v1606_v0, %v762_v29  ;;  %v79_v29 = vld [vmem:[#allocation2 + $0x40] sm:$0xff] }
  0xed   :  { %v888_v38 = vmax.f32 %v840_v28, 0.0  ;;  %v841_v40 = vadd.f32 %v1606_v0, %v786_v30  ;;  %v862_v41 = vmax.f32 %v814_v33, 0.0  ;;  %v815_v43 = vadd.f32 %v1606_v0, %v760_v35  ;;  %v1632_v45 = vpop.f32.mrb[8].mxu0  ;;  %v1634_v46 = vpop.f32.mrb[8].mxu1  ;;  %v105_v28 = vld [vmem:[#allocation2 + $0x110] sm:$0xff]  ;;  %v103_v30 = vld [vmem:[#allocation2 + $0x100] sm:$0xff] }
  0xee   :  { %v886_v42 = vmax.f32 %v838_v34, 0.0  ;;  %v839_v44 = vadd.f32 %v1606_v0, %v784_v36  ;;  %v1257_v47 = vpack.c.bf16 %v864_v37, %v864_v37  ;;  %v865_v49 = vmax.f32 %v817_v39, 0.0  ;;  %v1636_v51 = vpop.f32.mrb[9].mxu0  ;;  %v1638_v52 = vpop.f32.mrb[9].mxu1  ;;  %v82_v35 = vld [vmem:[#allocation2 + $0x58] sm:$0xff] }
  0xef   :  { %v1281_v48 = vpack.c.bf16 %v888_v38, %v888_v38  ;;  %v889_v50 = vmax.f32 %v841_v40, 0.0  ;;  %v1255_v53 = vpack.c.bf16 %v862_v41, %v862_v41  ;;  %v863_v55 = vmax.f32 %v815_v43, 0.0  ;;  %v710_v57 = vld [vmem:[#allocation2 + $0x30] sm:$0xff]  ;;  %v1640_v60 = vpop.f32.mrb[10].mxu0  ;;  %v1642_v61 = vpop.f32.mrb[10].mxu1  ;;  %v106_v36 = vld [vmem:[#allocation2 + $0x118] sm:$0xff] }
  0xf0   :  { %v1279_v54 = vpack.c.bf16 %v886_v42, %v886_v42  ;;  %v887_v56 = vmax.f32 %v839_v44, 0.0  ;;  %v734_v58 = vld [vmem:[#allocation2 + $0xf0] sm:$0xff]  ;;  %1105 = vst.msk [vmem:[%s1988_s4 + $0x8] sm:$0xf] %vm1102_vm4, %v1257_v47  ;;  %v1258_v62 = vpack.c.bf16 %v865_v49, %v865_v49  ;;  %v765_v1 = vmul.f32 %v1601_v59, %v710_v57  ;;  %v708_v3 = vld [vmem:[#allocation2 + $0x20] sm:$0xff]  ;;  %v1654_v5 = vpop.f32.mrb[11].mxu0 }
  0xf1   :  { %1129 = vst.msk [vmem:[%s1988_s4 + $0x68] sm:$0xf] %vm1102_vm4, %v1281_v48  ;;  %v1282_v63 = vpack.c.bf16 %v889_v50, %v889_v50  ;;  %v789_v2 = vmul.f32 %v1601_v59, %v734_v58  ;;  %v732_v4 = vld [vmem:[#allocation2 + $0xe0] sm:$0xff]  ;;  %v1656_v6 = vpop.f32.mrb[11].mxu1  ;;  %1103 = vst.msk [vmem:[%s1988_s4] sm:$0xf] %vm1102_vm4, %v1255_v53  ;;  %v1256_v7 = vpack.c.bf16 %v863_v55, %v863_v55 }
  0xf2   :  { %1127 = vst.msk [vmem:[%s1988_s4 + $0x60] sm:$0xf] %vm1102_vm4, %v1279_v54  ;;  %v1280_v8 = vpack.c.bf16 %v887_v56, %v887_v56  ;;  %v763_v9 = vmul.f32 %v1601_v59, %v708_v3  ;;  %v787_v10 = vmul.f32 %v1601_v59, %v732_v4  ;;  %v711_v11 = vld [vmem:[#allocation2 + $0x38] sm:$0xff]  ;;  %1106 = vst.msk [vmem:[%s1988_s4 + $0xc] sm:$0xf] %vm1102_vm4, %v1258_v62  ;;  %v80_v43 = vld [vmem:[#allocation2 + $0x48] sm:$0xff] }
  0xf3   :  { %v735_v12 = vld [vmem:[#allocation2 + $0xf8] sm:$0xff]  ;;  %1130 = vst.msk [vmem:[%s1988_s4 + $0x6c] sm:$0xf] %vm1102_vm4, %v1282_v63  ;;  %v820_v13 = vadd.f32 %v1606_v0, %v765_v1  ;;  %v844_v14 = vadd.f32 %v1606_v0, %v789_v2  ;;  %v766_v15 = vmul.f32 %v1601_v59, %v711_v11  ;;  %v709_v17 = vld [vmem:[#allocation2 + $0x28] sm:$0xff]  ;;  %1104 = vst.msk [vmem:[%s1988_s4 + $0x4] sm:$0xf] %vm1102_vm4, %v1256_v7 }
  0xf4   :  { %v790_v16 = vmul.f32 %v1601_v59, %v735_v12  ;;  %v733_v18 = vld [vmem:[#allocation2 + $0xe8] sm:$0xff]  ;;  %1128 = vst.msk [vmem:[%s1988_s4 + $0x64] sm:$0xf] %vm1102_vm4, %v1280_v8  ;;  %v818_v19 = vadd.f32 %v1606_v0, %v763_v9  ;;  %v842_v20 = vadd.f32 %v1606_v0, %v787_v10  ;;  %v764_v21 = vmul.f32 %v1601_v59, %v709_v17  ;;  %v85_v55 = vld [vmem:[#allocation2 + $0x70] sm:$0xff]  ;;  %v83_v3 = vld [vmem:[#allocation2 + $0x60] sm:$0xff] }
  0xf5   :  { %v788_v22 = vmul.f32 %v1601_v59, %v733_v18  ;;  %v868_v24 = vmax.f32 %v820_v13, 0.0  ;;  %v892_v25 = vmax.f32 %v844_v14, 0.0  ;;  %v821_v26 = vadd.f32 %v1606_v0, %v766_v15  ;;  %v1347_v37 = vpop.f32.mrb[12].mxu0  ;;  %v1371_v38 = vpop.f32.mrb[12].mxu1  ;;  %v104_v44 = vld [vmem:[#allocation2 + $0x108] sm:$0xff]  ;;  %v109_v56 = vld [vmem:[#allocation2 + $0x130] sm:$0xff] }
  0xf6   :  { %v845_v27 = vadd.f32 %v1606_v0, %v790_v16  ;;  %v866_v31 = vmax.f32 %v818_v19, 0.0  ;;  %v890_v32 = vmax.f32 %v842_v20, 0.0  ;;  %v819_v33 = vadd.f32 %v1606_v0, %v764_v21  ;;  %v461_v47 = vpop.f32.mrb[13].mxu0  ;;  %v557_v48 = vpop.f32.mrb[13].mxu1  ;;  %v107_v4 = vld [vmem:[#allocation2 + $0x120] sm:$0xff]  ;;  %v86_v7 = vld [vmem:[#allocation2 + $0x78] sm:$0xff] }
  0xf7   :  { %v843_v34 = vadd.f32 %v1606_v0, %v788_v22  ;;  %v1261_v39 = vpack.c.bf16 %v868_v24, %v868_v24  ;;  %v1285_v40 = vpack.c.bf16 %v892_v25, %v892_v25  ;;  %v869_v41 = vmax.f32 %v821_v26, 0.0  ;;  %v1348_v57 = vpop.f32.mrb[14].mxu0  ;;  %v1372_v58 = vpop.f32.mrb[14].mxu1  ;;  %v110_v12 = vld [vmem:[#allocation2 + $0x138] sm:$0xff]  ;;  %v84_v13 = vld [vmem:[#allocation2 + $0x68] sm:$0xff]  ;;  %v89_v18 = vld [vmem:[#allocation2 + $0x90] sm:$0xff] }
  0xf8   :  { %v893_v42 = vmax.f32 %v845_v27, 0.0  ;;  %v1259_v49 = vpack.c.bf16 %v866_v31, %v866_v31  ;;  %v1283_v50 = vpack.c.bf16 %v890_v32, %v890_v32  ;;  %v867_v53 = vmax.f32 %v819_v33, 0.0  ;;  %v464_v8 = vpop.f32.mrb[15].mxu0  ;;  %v560_v9 = vpop.f32.mrb[15].mxu1  ;;  %v108_v14 = vld [vmem:[#allocation2 + $0x128] sm:$0xff]  ;;  %v111_v24 = vld [vmem:[#allocation2 + $0x140] sm:$0xff] }
  0xf9   :  { %v891_v54 = vmax.f32 %v843_v34, 0.0  ;;  %1109 = vst.msk [vmem:[%s1988_s4 + $0x18] sm:$0xf] %vm1102_vm4, %v1261_v39  ;;  %1133 = vst.msk [vmem:[%s1988_s4 + $0x78] sm:$0xf] %vm1102_vm4, %v1285_v40  ;;  %v1262_v62 = vpack.c.bf16 %v869_v41, %v869_v41  ;;  %v614_v1 = vadd.f32 %v1632_v45, %v81_v23  ;;  %v638_v2 = vadd.f32 %v1634_v46, %v105_v28  ;;  %v87_v23 = vld [vmem:[#allocation2 + $0x80] sm:$0xff] }
  0xfa   :  { %v1286_v63 = vpack.c.bf16 %v893_v42, %v893_v42  ;;  %1107 = vst.msk [vmem:[%s1988_s4 + $0x10] sm:$0xf] %vm1102_vm4, %v1259_v49  ;;  %1131 = vst.msk [vmem:[%s1988_s4 + $0x70] sm:$0xf] %vm1102_vm4, %v1283_v50  ;;  %v1260_v10 = vpack.c.bf16 %v867_v53, %v867_v53  ;;  %v612_v45 = vadd.f32 %v1636_v51, %v79_v29  ;;  %v90_v27 = vld [vmem:[#allocation2 + $0x98] sm:$0xff]  ;;  %v88_v33 = vld [vmem:[#allocation2 + $0x88] sm:$0xff] }
  0xfb   :  { %v1284_v11 = vpack.c.bf16 %v891_v54, %v891_v54  ;;  %v636_v46 = vadd.f32 %v1638_v52, %v103_v30  ;;  %1110 = vst.msk [vmem:[%s1988_s4 + $0x1c] sm:$0xf] %vm1102_vm4, %v1262_v62  ;;  %v615_v51 = vadd.f32 %v1640_v60, %v82_v35  ;;  %v639_v52 = vadd.f32 %v1642_v61, %v106_v36  ;;  %v114_v28 = vld [vmem:[#allocation2 + $0x158] sm:$0xff]  ;;  %v112_v34 = vld [vmem:[#allocation2 + $0x148] sm:$0xff] }
  0xfc   :  { %1134 = vst.msk [vmem:[%s1988_s4 + $0x7c] sm:$0xf] %vm1102_vm4, %v1286_v63  ;;  %v613_v15 = vadd.f32 %v1654_v5, %v80_v43  ;;  %v637_v16 = vadd.f32 %v1656_v6, %v104_v44  ;;  %1108 = vst.msk [vmem:[%s1988_s4 + $0x14] sm:$0xf] %vm1102_vm4, %v1260_v10  ;;  %v618_v60 = vadd.f32 %v1347_v37, %v85_v55  ;;  %v113_v6 = vld [vmem:[#allocation2 + $0x150] sm:$0xff] }
  0xfd   :  { %663 = vst.msk [vmem:[#allocation2 + $0x50] sm:$0xff] %vm22_vm3, %v614_v1  ;;  %687 = vst.msk [vmem:[#allocation2 + $0x110] sm:$0xff] %vm22_vm3, %v638_v2  ;;  %v642_v61 = vadd.f32 %v1371_v38, %v109_v56  ;;  %v616_v17 = vadd.f32 %v461_v47, %v83_v3  ;;  %v640_v5 = vadd.f32 %v557_v48, %v107_v4  ;;  %v1351_v25 = vpop.f32.mrb[16].mxu0  ;;  %v1375_v26 = vpop.f32.mrb[16].mxu1 }
  0xfe   :  { %1132 = vst.msk [vmem:[%s1988_s4 + $0x74] sm:$0xf] %vm1102_vm4, %v1284_v11  ;;  %v619_v19 = vadd.f32 %v1348_v57, %v86_v7  ;;  %v643_v20 = vadd.f32 %v1372_v58, %v110_v12  ;;  %v617_v21 = vadd.f32 %v464_v8, %v84_v13  ;;  %v641_v22 = vadd.f32 %v560_v9, %v108_v14  ;;  %v477_v31 = vpop.f32.mrb[17].mxu0  ;;  %v573_v32 = vpop.f32.mrb[17].mxu1 }
  0xff   :  { %661 = vst.msk [vmem:[#allocation2 + $0x40] sm:$0xff] %vm22_vm3, %v612_v45  ;;  %685 = vst.msk [vmem:[#allocation2 + $0x100] sm:$0xff] %vm22_vm3, %v636_v46  ;;  %v622_v29 = vadd.f32 %v1351_v25, %v89_v18  ;;  %v646_v30 = vadd.f32 %v1375_v26, %v113_v6  ;;  %v620_v35 = vadd.f32 %v477_v31, %v87_v23  ;;  %v1352_v37 = vpop.f32.mrb[18].mxu0  ;;  %v1376_v38 = vpop.f32.mrb[18].mxu1 }
 0x100   :  { %664 = vst.msk [vmem:[#allocation2 + $0x58] sm:$0xff] %vm22_vm3, %v615_v51  ;;  %688 = vst.msk [vmem:[#allocation2 + $0x118] sm:$0xff] %vm22_vm3, %v639_v52  ;;  %v644_v36 = vadd.f32 %v573_v32, %v111_v24  ;;  %v623_v39 = vadd.f32 %v1352_v37, %v90_v27  ;;  %v647_v40 = vadd.f32 %v1376_v38, %v114_v28  ;;  %v480_v41 = vpop.f32.mrb[19].mxu0  ;;  %v576_v42 = vpop.f32.mrb[19].mxu1 }
 0x101   :  { %662 = vst.msk [vmem:[#allocation2 + $0x48] sm:$0xff] %vm22_vm3, %v613_v15  ;;  %686 = vst.msk [vmem:[#allocation2 + $0x108] sm:$0xff] %vm22_vm3, %v637_v16  ;;  %v621_v47 = vadd.f32 %v480_v41, %v88_v33  ;;  %v645_v48 = vadd.f32 %v576_v42, %v112_v34 }
 0x102   :  { %667 = vst.msk [vmem:[#allocation2 + $0x70] sm:$0xff] %vm22_vm3, %v618_v60  ;;  %691 = vst.msk [vmem:[#allocation2 + $0x130] sm:$0xff] %vm22_vm3, %v642_v61 }
 0x103   :  { %665 = vst.msk [vmem:[#allocation2 + $0x60] sm:$0xff] %vm22_vm3, %v616_v17  ;;  %689 = vst.msk [vmem:[#allocation2 + $0x120] sm:$0xff] %vm22_vm3, %v640_v5 }
 0x104   :  { %668 = vst.msk [vmem:[#allocation2 + $0x78] sm:$0xff] %vm22_vm3, %v619_v19  ;;  %692 = vst.msk [vmem:[#allocation2 + $0x138] sm:$0xff] %vm22_vm3, %v643_v20  ;;  %v714_v43 = vld [vmem:[#allocation2 + $0x50] sm:$0xff] }
 0x105   :  { %666 = vst.msk [vmem:[#allocation2 + $0x68] sm:$0xff] %vm22_vm3, %v617_v21  ;;  %690 = vst.msk [vmem:[#allocation2 + $0x128] sm:$0xff] %vm22_vm3, %v641_v22  ;;  %v738_v44 = vld [vmem:[#allocation2 + $0x110] sm:$0xff]  ;;  %v769_v49 = vmul.f32 %v1601_v59, %v714_v43  ;;  %v1772_v11 = vpop.f32.mrb[20].mxu0  ;;  %v1774_v45 = vpop.f32.mrb[20].mxu1 }
 0x106   :  { %671 = vst.msk [vmem:[#allocation2 + $0x90] sm:$0xff] %vm22_vm3, %v622_v29  ;;  %695 = vst.msk [vmem:[#allocation2 + $0x150] sm:$0xff] %vm22_vm3, %v646_v30  ;;  %v793_v50 = vmul.f32 %v1601_v59, %v738_v44  ;;  %v712_v53 = vld [vmem:[#allocation2 + $0x40] sm:$0xff]  ;;  %v1778_v51 = vpop.f32.mrb[21].mxu0  ;;  %v1782_v5 = vpop.f32.mrb[21].mxu1 }
 0x107   :  { %669 = vst.msk [vmem:[#allocation2 + $0x80] sm:$0xff] %vm22_vm3, %v620_v35  ;;  %693 = vst.msk [vmem:[#allocation2 + $0x140] sm:$0xff] %vm22_vm3, %v644_v36  ;;  %v736_v54 = vld [vmem:[#allocation2 + $0x100] sm:$0xff]  ;;  %v767_v55 = vmul.f32 %v1601_v59, %v712_v53  ;;  %v715_v57 = vld [vmem:[#allocation2 + $0x58] sm:$0xff]  ;;  %v824_v63 = vadd.f32 %v1606_v0, %v769_v49  ;;  %v1784_v18 = vpop.f32.mrb[22].mxu0  ;;  %v1786_v24 = vpop.f32.mrb[22].mxu1 }
 0x108   :  { %672 = vst.msk [vmem:[#allocation2 + $0x98] sm:$0xff] %vm22_vm3, %v623_v39  ;;  %696 = vst.msk [vmem:[#allocation2 + $0x158] sm:$0xff] %vm22_vm3, %v647_v40  ;;  %v791_v56 = vmul.f32 %v1601_v59, %v736_v54  ;;  %v739_v58 = vld [vmem:[#allocation2 + $0x118] sm:$0xff]  ;;  %v713_v62 = vld [vmem:[#allocation2 + $0x48] sm:$0xff]  ;;  %v848_v1 = vadd.f32 %v1606_v0, %v793_v50  ;;  %v770_v2 = vmul.f32 %v1601_v59, %v715_v57  ;;  %v1788_v25 = vpop.f32.mrb[23].mxu0  ;;  %v1790_v32 = vpop.f32.mrb[23].mxu1 }
 0x109   :  { %670 = vst.msk [vmem:[#allocation2 + $0x88] sm:$0xff] %vm22_vm3, %v621_v47  ;;  %694 = vst.msk [vmem:[#allocation2 + $0x148] sm:$0xff] %vm22_vm3, %v645_v48  ;;  %v794_v3 = vmul.f32 %v1601_v59, %v739_v58  ;;  %v737_v4 = vld [vmem:[#allocation2 + $0x108] sm:$0xff]  ;;  %v822_v7 = vadd.f32 %v1606_v0, %v767_v55  ;;  %v768_v9 = vmul.f32 %v1601_v59, %v713_v62  ;;  %v872_v46 = vmax.f32 %v824_v63, 0.0  ;;  %v718_v61 = vld [vmem:[#allocation2 + $0x70] sm:$0xff] }
 0x10a   :  { %v846_v8 = vadd.f32 %v1606_v0, %v791_v56  ;;  %v792_v10 = vmul.f32 %v1601_v59, %v737_v4  ;;  %v896_v12 = vmax.f32 %v848_v1, 0.0  ;;  %v825_v13 = vadd.f32 %v1606_v0, %v770_v2  ;;  %v742_v17 = vld [vmem:[#allocation2 + $0x130] sm:$0xff]  ;;  %v716_v22 = vld [vmem:[#allocation2 + $0x60] sm:$0xff] }
 0x10b   :  { %v849_v14 = vadd.f32 %v1606_v0, %v794_v3  ;;  %v870_v52 = vmax.f32 %v822_v7, 0.0  ;;  %v823_v16 = vadd.f32 %v1606_v0, %v768_v9  ;;  %v1265_v6 = vpack.c.bf16 %v872_v46, %v872_v46  ;;  %v740_v23 = vld [vmem:[#allocation2 + $0x120] sm:$0xff]  ;;  %v719_v30 = vld [vmem:[#allocation2 + $0x78] sm:$0xff] }
 0x10c   :  { %v894_v15 = vmax.f32 %v846_v8, 0.0  ;;  %v847_v60 = vadd.f32 %v1606_v0, %v792_v10  ;;  %v1289_v19 = vpack.c.bf16 %v896_v12, %v896_v12  ;;  %v873_v20 = vmax.f32 %v825_v13, 0.0  ;;  %v743_v31 = vld [vmem:[#allocation2 + $0x138] sm:$0xff]  ;;  %v717_v37 = vld [vmem:[#allocation2 + $0x68] sm:$0xff] }
 0x10d   :  { %v897_v21 = vmax.f32 %v849_v14, 0.0  ;;  %v1263_v26 = vpack.c.bf16 %v870_v52, %v870_v52  ;;  %v871_v28 = vmax.f32 %v823_v16, 0.0  ;;  %1113 = vst.msk [vmem:[%s1988_s4 + $0x28] sm:$0xf] %vm1102_vm4, %v1265_v6  ;;  %v773_v35 = vmul.f32 %v1601_v59, %v718_v61  ;;  %v741_v38 = vld [vmem:[#allocation2 + $0x128] sm:$0xff]  ;;  %v722_v3 = vld [vmem:[#allocation2 + $0x90] sm:$0xff] }
 0x10e   :  { %v1287_v27 = vpack.c.bf16 %v894_v15, %v894_v15  ;;  %v895_v29 = vmax.f32 %v847_v60, 0.0  ;;  %1137 = vst.msk [vmem:[%s1988_s4 + $0x88] sm:$0xf] %vm1102_vm4, %v1289_v19  ;;  %v1266_v33 = vpack.c.bf16 %v873_v20, %v873_v20  ;;  %v797_v36 = vmul.f32 %v1601_v59, %v742_v17  ;;  %v746_v4 = vld [vmem:[#allocation2 + $0x150] sm:$0xff]  ;;  %v720_v46 = vld [vmem:[#allocation2 + $0x80] sm:$0xff] }
 0x10f   :  { %v1290_v34 = vpack.c.bf16 %v897_v21, %v897_v21  ;;  %1111 = vst.msk [vmem:[%s1988_s4 + $0x20] sm:$0xf] %vm1102_vm4, %v1263_v26  ;;  %v1264_v39 = vpack.c.bf16 %v871_v28, %v871_v28  ;;  %v771_v41 = vmul.f32 %v1601_v59, %v716_v22  ;;  %v795_v42 = vmul.f32 %v1601_v59, %v740_v23  ;;  %v744_v12 = vld [vmem:[#allocation2 + $0x140] sm:$0xff]  ;;  %v723_v16 = vld [vmem:[#allocation2 + $0x98] sm:$0xff] }
 0x110   :  { %1135 = vst.msk [vmem:[%s1988_s4 + $0x80] sm:$0xf] %vm1102_vm4, %v1287_v27  ;;  %v1288_v40 = vpack.c.bf16 %v895_v29, %v895_v29  ;;  %1114 = vst.msk [vmem:[%s1988_s4 + $0x2c] sm:$0xf] %vm1102_vm4, %v1266_v33  ;;  %v828_v43 = vadd.f32 %v1606_v0, %v773_v35  ;;  %v852_v44 = vadd.f32 %v1606_v0, %v797_v36  ;;  %v747_v60 = vld [vmem:[#allocation2 + $0x158] sm:$0xff]  ;;  %v721_v20 = vld [vmem:[#allocation2 + $0x88] sm:$0xff] }
 0x111   :  { %1138 = vst.msk [vmem:[%s1988_s4 + $0x8c] sm:$0xf] %vm1102_vm4, %v1290_v34  ;;  %v774_v47 = vmul.f32 %v1601_v59, %v719_v30  ;;  %v798_v48 = vmul.f32 %v1601_v59, %v743_v31  ;;  %1112 = vst.msk [vmem:[%s1988_s4 + $0x24] sm:$0xf] %vm1102_vm4, %v1264_v39  ;;  %v826_v49 = vadd.f32 %v1606_v0, %v771_v41  ;;  %v745_v21 = vld [vmem:[#allocation2 + $0x148] sm:$0xff] }
 0x112   :  { %1136 = vst.msk [vmem:[%s1988_s4 + $0x84] sm:$0xf] %vm1102_vm4, %v1288_v40  ;;  %v850_v50 = vadd.f32 %v1606_v0, %v795_v42  ;;  %v772_v53 = vmul.f32 %v1601_v59, %v717_v37  ;;  %v796_v54 = vmul.f32 %v1601_v59, %v741_v38  ;;  %v876_v55 = vmax.f32 %v828_v43, 0.0 }
 0x113   :  { %v900_v56 = vmax.f32 %v852_v44, 0.0  ;;  %v829_v57 = vadd.f32 %v1606_v0, %v774_v47  ;;  %v853_v58 = vadd.f32 %v1606_v0, %v798_v48  ;;  %v874_v62 = vmax.f32 %v826_v49, 0.0  ;;  %v93_v47 = vld [vmem:[#allocation2 + $0xb0] sm:$0xff] }
 0x114   :  { %v898_v63 = vmax.f32 %v850_v50, 0.0  ;;  %v827_v1 = vadd.f32 %v1606_v0, %v772_v53  ;;  %v851_v2 = vadd.f32 %v1606_v0, %v796_v54  ;;  %v1269_v7 = vpack.c.bf16 %v876_v55, %v876_v55  ;;  %v117_v48 = vld [vmem:[#allocation2 + $0x170] sm:$0xff]  ;;  %v91_v55 = vld [vmem:[#allocation2 + $0xa0] sm:$0xff] }
 0x115   :  { %v1293_v8 = vpack.c.bf16 %v900_v56, %v900_v56  ;;  %v877_v9 = vmax.f32 %v829_v57, 0.0  ;;  %v901_v10 = vmax.f32 %v853_v58, 0.0  ;;  %v1267_v13 = vpack.c.bf16 %v874_v62, %v874_v62  ;;  %v115_v56 = vld [vmem:[#allocation2 + $0x160] sm:$0xff]  ;;  %v94_v57 = vld [vmem:[#allocation2 + $0xb8] sm:$0xff] }
 0x116   :  { %v1291_v14 = vpack.c.bf16 %v898_v63, %v898_v63  ;;  %v875_v52 = vmax.f32 %v827_v1, 0.0  ;;  %v899_v15 = vmax.f32 %v851_v2, 0.0  ;;  %1117 = vst.msk [vmem:[%s1988_s4 + $0x38] sm:$0xf] %vm1102_vm4, %v1269_v7  ;;  %v777_v6 = vmul.f32 %v1601_v59, %v722_v3  ;;  %v118_v2 = vld [vmem:[#allocation2 + $0x178] sm:$0xff]  ;;  %v92_v3 = vld [vmem:[#allocation2 + $0xa8] sm:$0xff] }
 0x117   :  { %1141 = vst.msk [vmem:[%s1988_s4 + $0x98] sm:$0xf] %vm1102_vm4, %v1293_v8  ;;  %v1270_v61 = vpack.c.bf16 %v877_v9, %v877_v9  ;;  %v1294_v17 = vpack.c.bf16 %v901_v10, %v901_v10  ;;  %v801_v19 = vmul.f32 %v1601_v59, %v746_v4  ;;  %1115 = vst.msk [vmem:[%s1988_s4 + $0x30] sm:$0xf] %vm1102_vm4, %v1267_v13  ;;  %v116_v4 = vld [vmem:[#allocation2 + $0x168] sm:$0xff] }
 0x118   :  { %1139 = vst.msk [vmem:[%s1988_s4 + $0x90] sm:$0xf] %vm1102_vm4, %v1291_v14  ;;  %v1268_v22 = vpack.c.bf16 %v875_v52, %v875_v52  ;;  %v1292_v23 = vpack.c.bf16 %v899_v15, %v899_v15  ;;  %v775_v26 = vmul.f32 %v1601_v59, %v720_v46  ;;  %v799_v27 = vmul.f32 %v1601_v59, %v744_v12 }
 0x119   :  { %1118 = vst.msk [vmem:[%s1988_s4 + $0x3c] sm:$0xf] %vm1102_vm4, %v1270_v61  ;;  %1142 = vst.msk [vmem:[%s1988_s4 + $0x9c] sm:$0xf] %vm1102_vm4, %v1294_v17  ;;  %v832_v28 = vadd.f32 %v1606_v0, %v777_v6  ;;  %v856_v29 = vadd.f32 %v1606_v0, %v801_v19  ;;  %v778_v30 = vmul.f32 %v1601_v59, %v723_v16 }
 0x11a   :  { %v802_v31 = vmul.f32 %v1601_v59, %v747_v60  ;;  %1116 = vst.msk [vmem:[%s1988_s4 + $0x34] sm:$0xf] %vm1102_vm4, %v1268_v22  ;;  %1140 = vst.msk [vmem:[%s1988_s4 + $0x94] sm:$0xf] %vm1102_vm4, %v1292_v23  ;;  %v830_v33 = vadd.f32 %v1606_v0, %v775_v26  ;;  %v854_v34 = vadd.f32 %v1606_v0, %v799_v27 }
 0x11b   :  { %v776_v35 = vmul.f32 %v1601_v59, %v721_v20  ;;  %v800_v36 = vmul.f32 %v1601_v59, %v745_v21  ;;  %v880_v37 = vmax.f32 %v832_v28, 0.0  ;;  %v904_v38 = vmax.f32 %v856_v29, 0.0 }
 0x11c   :  { %v833_v39 = vadd.f32 %v1606_v0, %v778_v30  ;;  %v857_v40 = vadd.f32 %v1606_v0, %v802_v31  ;;  %v878_v41 = vmax.f32 %v830_v33, 0.0  ;;  %v902_v42 = vmax.f32 %v854_v34, 0.0 }
 0x11d   :  { %v831_v43 = vadd.f32 %v1606_v0, %v776_v35  ;;  %v855_v44 = vadd.f32 %v1606_v0, %v800_v36  ;;  %v1273_v49 = vpack.c.bf16 %v880_v37, %v880_v37  ;;  %v1297_v50 = vpack.c.bf16 %v904_v38, %v904_v38 }
 0x11e   :  { %v881_v53 = vmax.f32 %v833_v39, 0.0  ;;  %v905_v54 = vmax.f32 %v857_v40, 0.0  ;;  %v1271_v58 = vpack.c.bf16 %v878_v41, %v878_v41  ;;  %v1295_v62 = vpack.c.bf16 %v902_v42, %v902_v42 }
 0x11f   :  { %v879_v63 = vmax.f32 %v831_v43, 0.0  ;;  %v903_v1 = vmax.f32 %v855_v44, 0.0  ;;  %1121 = vst.msk [vmem:[%s1988_s4 + $0x48] sm:$0xf] %vm1102_vm4, %v1273_v49  ;;  %1145 = vst.msk [vmem:[%s1988_s4 + $0xa8] sm:$0xf] %vm1102_vm4, %v1297_v50  ;;  %v626_v9 = vadd.f32 %v1772_v11, %v93_v47  ;;  %v650_v10 = vadd.f32 %v1774_v45, %v117_v48 }
 0x120   :  { %v1274_v7 = vpack.c.bf16 %v881_v53, %v881_v53  ;;  %v1298_v8 = vpack.c.bf16 %v905_v54, %v905_v54  ;;  %1119 = vst.msk [vmem:[%s1988_s4 + $0x40] sm:$0xf] %vm1102_vm4, %v1271_v58  ;;  %1143 = vst.msk [vmem:[%s1988_s4 + $0xa0] sm:$0xf] %vm1102_vm4, %v1295_v62  ;;  %v624_v13 = vadd.f32 %v1778_v51, %v91_v55 }
 0x121   :  { %v1272_v46 = vpack.c.bf16 %v879_v63, %v879_v63  ;;  %v1296_v12 = vpack.c.bf16 %v903_v1, %v903_v1  ;;  %v648_v14 = vadd.f32 %v1782_v5, %v115_v56  ;;  %675 = vst.msk [vmem:[#allocation2 + $0xb0] sm:$0xff] %vm22_vm3, %v626_v9  ;;  %699 = vst.msk [vmem:[#allocation2 + $0x170] sm:$0xff] %vm22_vm3, %v650_v10 }
 0x122   :  { %1122 = vst.msk [vmem:[%s1988_s4 + $0x4c] sm:$0xf] %vm1102_vm4, %v1274_v7  ;;  %1146 = vst.msk [vmem:[%s1988_s4 + $0xac] sm:$0xf] %vm1102_vm4, %v1298_v8  ;;  %v627_v11 = vadd.f32 %v1784_v18, %v94_v57  ;;  %v651_v45 = vadd.f32 %v1786_v24, %v118_v2  ;;  %v625_v51 = vadd.f32 %v1788_v25, %v92_v3 }
 0x123   :  { %v649_v5 = vadd.f32 %v1790_v32, %v116_v4  ;;  %1120 = vst.msk [vmem:[%s1988_s4 + $0x44] sm:$0xf] %vm1102_vm4, %v1272_v46  ;;  %1144 = vst.msk [vmem:[%s1988_s4 + $0xa4] sm:$0xf] %vm1102_vm4, %v1296_v12 }
 0x124   :  { %673 = vst.msk [vmem:[#allocation2 + $0xa0] sm:$0xff] %vm22_vm3, %v624_v13  ;;  %697 = vst.msk [vmem:[#allocation2 + $0x160] sm:$0xff] %vm22_vm3, %v648_v14 }
 0x125   :  { %676 = vst.msk [vmem:[#allocation2 + $0xb8] sm:$0xff] %vm22_vm3, %v627_v11  ;;  %700 = vst.msk [vmem:[#allocation2 + $0x178] sm:$0xff] %vm22_vm3, %v651_v45 }
 0x126   :  { %674 = vst.msk [vmem:[#allocation2 + $0xa8] sm:$0xff] %vm22_vm3, %v625_v51  ;;  %698 = vst.msk [vmem:[#allocation2 + $0x168] sm:$0xff] %vm22_vm3, %v649_v5 }
 0x128   :  { %v726_v18 = vld [vmem:[#allocation2 + $0xb0] sm:$0xff] }
 0x129   :  { %v750_v24 = vld [vmem:[#allocation2 + $0x170] sm:$0xff]  ;;  %v781_v25 = vmul.f32 %v1601_v59, %v726_v18 }
 0x12a   :  { %v805_v32 = vmul.f32 %v1601_v59, %v750_v24 }
 0x12b   :  { %v724_v52 = vld [vmem:[#allocation2 + $0xa0] sm:$0xff]  ;;  %v836_v19 = vadd.f32 %v1606_v0, %v781_v25 }
 0x12c   :  { %v748_v15 = vld [vmem:[#allocation2 + $0x160] sm:$0xff]  ;;  %v779_v16 = vmul.f32 %v1601_v59, %v724_v52  ;;  %v727_v61 = vld [vmem:[#allocation2 + $0xb8] sm:$0xff]  ;;  %v860_v20 = vadd.f32 %v1606_v0, %v805_v32 }
 0x12d   :  { %v803_v60 = vmul.f32 %v1601_v59, %v748_v15  ;;  %v751_v17 = vld [vmem:[#allocation2 + $0x178] sm:$0xff]  ;;  %v725_v6 = vld [vmem:[#allocation2 + $0xa8] sm:$0xff]  ;;  %v782_v21 = vmul.f32 %v1601_v59, %v727_v61  ;;  %v884_v30 = vmax.f32 %v836_v19, 0.0 }
 0x12e   :  { %v806_v22 = vmul.f32 %v1601_v59, %v751_v17  ;;  %v749_v23 = vld [vmem:[#allocation2 + $0x168] sm:$0xff]  ;;  %v834_v26 = vadd.f32 %v1606_v0, %v779_v16  ;;  %v780_v28 = vmul.f32 %v1601_v59, %v725_v6  ;;  %v908_v31 = vmax.f32 %v860_v20, 0.0 }
 0x12f   :  { %v858_v27 = vadd.f32 %v1606_v0, %v803_v60  ;;  %v804_v29 = vmul.f32 %v1601_v59, %v749_v23  ;;  %v837_v33 = vadd.f32 %v1606_v0, %v782_v21  ;;  %v1277_v39 = vpack.c.bf16 %v884_v30, %v884_v30 }
 0x130   :  { %v861_v34 = vadd.f32 %v1606_v0, %v806_v22  ;;  %v882_v35 = vmax.f32 %v834_v26, 0.0  ;;  %v835_v37 = vadd.f32 %v1606_v0, %v780_v28  ;;  %v1301_v40 = vpack.c.bf16 %v908_v31, %v908_v31 }
 0x131   :  { %v906_v36 = vmax.f32 %v858_v27, 0.0  ;;  %v859_v38 = vadd.f32 %v1606_v0, %v804_v29  ;;  %v885_v41 = vmax.f32 %v837_v33, 0.0  ;;  %1125 = vst.msk [vmem:[%s1988_s4 + $0x58] sm:$0xf] %vm1102_vm4, %v1277_v39 }
 0x132   :  { %v909_v42 = vmax.f32 %v861_v34, 0.0  ;;  %v1275_v43 = vpack.c.bf16 %v882_v35, %v882_v35  ;;  %v883_v47 = vmax.f32 %v835_v37, 0.0  ;;  %1149 = vst.msk [vmem:[%s1988_s4 + $0xb8] sm:$0xf] %vm1102_vm4, %v1301_v40 }
 0x133   :  { %v1299_v44 = vpack.c.bf16 %v906_v36, %v906_v36  ;;  %v907_v59 = vmax.f32 %v859_v38, 0.0  ;;  %v1278_v48 = vpack.c.bf16 %v885_v41, %v885_v41 }
 0x134   :  { %v1302_v0 = vpack.c.bf16 %v909_v42, %v909_v42  ;;  %1123 = vst.msk [vmem:[%s1988_s4 + $0x50] sm:$0xf] %vm1102_vm4, %v1275_v43  ;;  %v1276_v49 = vpack.c.bf16 %v883_v47, %v883_v47 }
 0x135   :  { %1147 = vst.msk [vmem:[%s1988_s4 + $0xb0] sm:$0xf] %vm1102_vm4, %v1299_v44  ;;  %v1300_v50 = vpack.c.bf16 %v907_v59, %v907_v59  ;;  %1126 = vst.msk [vmem:[%s1988_s4 + $0x5c] sm:$0xf] %vm1102_vm4, %v1278_v48 }
 0x136   :  { %1150 = vst.msk [vmem:[%s1988_s4 + $0xbc] sm:$0xf] %vm1102_vm4, %v1302_v0  ;;  %1124 = vst.msk [vmem:[%s1988_s4 + $0x54] sm:$0xf] %vm1102_vm4, %v1276_v49 }
 0x137   :  { %1148 = vst.msk [vmem:[%s1988_s4 + $0xb4] sm:$0xf] %vm1102_vm4, %v1300_v50 }

// kernel: onsets_and_frames_forward.6
= control target key start
LH: loop header
LB: loop body
LE: loop exit
PB: predicated region body
PF: predicated region fallthrough
CT: control target
= control target key end

     0   :  { %s3980_s15 = smov 0   ;;  %s5029_s0 = inlined_call_operand.vmem [shape: bf16[2,6,50,48], index: 0, kind: input, shape index: {}]   ;;  %s5030_s1 = inlined_call_operand.vmem [shape: bf16[432,48], index: 1, kind: input, shape index: {}]   ;;  %s5031_s2 = inlined_call_operand.vmem [shape: f32[1,48], index: 2, kind: input, shape index: {}]   ;;  %s5032_s3 = inlined_call_operand.vmem [shape: f32[1,48], index: 3, kind: input, shape index: {}]   ;;  %s5033_s4 = inlined_call_operand.vmem [shape: bf16[2,4,16,48], index: 4, kind: output, shape index: {}]  }
   0x1 LB: > { %s3575_s16 = sadd.s32 4294967295, %s3944_s15   ;;  %p3579_p0 = scmp.ge.s32.totalorder %s3944_s15, 1  ;;  %s3944_s15 = sphi %s3980_s15, %s14_s15  }
   0x2   : > { %p162_p1 = scmp.lt.s32.totalorder %s3944_s15, 3 }
   0x4   : > { %p163_p2 = pnand %p3579_p0, %p162_p1 }
   0x5   : > { %p188_p3 = scmp.lt.s32.totalorder (!%p163_p2), %s3575_s16, 1  ;;  %v3946_v0 = vmov (!%p163_p2), 0   ;;  %v3901_v1 = vld [vmem:[%s5030_s1 + $0x80] sm:$0xff] (!%p163_p2)   ;;  %v3903_v3 = vld [vmem:[%s5030_s1 + $0x88] sm:$0xff] (!%p163_p2)   ;;  %vm450_vm0 = vcmask (!%p163_p2), 1046528   ;;  %v3906_v4 = vld [vmem:[%s5030_s1 + $0x90] sm:$0xff] (!%p163_p2)  }
   0x6   : > { %166 = sbr.rel (%p163_p2) target bundleno = 587 (0x24b), region = 36  ;;  %1321 = vmatprep.subr.bf16.mxu1 (!%p163_p2), %v3946_v0  ;;  %v3905_v2 = vld [vmem:[%s5030_s1 + $0x40] sm:$0xff] (!%p163_p2)   ;;  %vm313_vm1 = vsmask.f32 (!%p163_p2), 7424  ;;  %s3947_s5 = smov (!%p163_p2), 32   ;;  %vm729_vm2 = vcmask (!%p163_p2), 392192  }
   0x7   : > { %1322 = vmatpush1.bf16.msra.mxu1 (!%p163_p2), %v3901_v1  ;;  %3779 = vmatprep.subr.bf16.mxu0 (!%p163_p2), %v3905_v2  ;;  %v3907_v5 = vld [vmem:[%s5030_s1] sm:$0xff] (!%p163_p2)   ;;  %s3948_s6 = smov (!%p163_p2), 16   ;;  %s3949_s7 = smov (!%p163_p2), 96   ;;  %vm791_vm3 = vcmask (!%p163_p2), 130048   ;;  %vm816_vm4 = vcmask (!%p163_p2), 523264   ;;  %vm841_vm5 = vcmask (!%p163_p2), 916480  }
   0x8   : > { %1323 = vmatprep.subr.bf16.mxu1 (!%p163_p2), %v3946_v0  ;;  %3780 = vmatpush3.bf16.msra.mxu0 (!%p163_p2), %v3907_v5  ;;  %s3950_s8 = smov (!%p163_p2), 64   ;;  %s3951_s9 = smov (!%p163_p2), 112   ;;  %vm878_vm6 = vcmask (!%p163_p2), 261120   ;;  %vm754_vm7 = vcmask (!%p163_p2), 785408   ;;  %vm903_vm8 = vcmask (!%p163_p2), 654336   ;;  %vm3377_vm9 = vcmask (!%p163_p2), 1041409  }
   0x9   : > { %s3952_s10 = smov (!%p163_p2), 48   ;;  %s3953_s11 = smov (!%p163_p2), 80   ;;  %vm3380_vm10 = vcmask (!%p163_p2), 1042434   ;;  %vm3383_vm11 = vcmask (!%p163_p2), 1043459   ;;  %vm3386_vm12 = vcmask (!%p163_p2), 1044484   ;;  %vm3389_vm13 = vcmask (!%p163_p2), 1045509  }
   0xa   : > { %vm3392_vm14 = vcmask (!%p163_p2), 1046534   ;;  %vm3395_vm15 = vcmask (!%p163_p2), 1047559  }
   0xb   : > { %1324 = vmatpush1.bf16.msra.mxu1 (!%p163_p2), %v3903_v3 }
   0xc   : > { %1325 = vmatprep.subr.bf16.mxu1 (!%p163_p2), %v3946_v0 }
   0xd   : > { %s5035_s16 = smov (!%p188_p3, %s3575_s16), 1 }
   0xe   : > { %s3867_s21 = smul.u32 168, %s5035_s16 }
   0xf   : > { %1326 = vmatpush1.bf16.msra.mxu1 %v3906_v4  ;;  %v3908_v4 = vld [vmem:[%s5030_s1 + $0x48] sm:$0xff]  }
  0x10   : > { %s4005_s26 = scalar_lea.vmem %s5029_s0, %s3867_s21  ;;  %1327 = vmatprep.subr.bf16.mxu1 %v3946_v0  ;;  %3781 = vmatprep.subr.bf16.mxu0 %v3908_v4 }
  0x11   : > { %v4014_v6 = vld [vmem:[%s4005_s26 + $0x38] sm:$0xff]   ;;  %v4022_v8 = vld [vmem:[%s4005_s26 + $0x24] sm:$0xff]   ;;  %v4032_v11 = vld [vmem:[%s4005_s26 + $0x10] sm:$0xff]  }
  0x12   : > { %v4017_v7 = vld [vmem:[%s4005_s26 + $0x1c] sm:$0xff]   ;;  %643 = vrot.lane.b32.xlu1 %v4014_v6, %s3947_s5  ;;  %v371_v9 = vshrl.u32 %v4014_v6, 16  ;;  %v4029_v10 = vld [vmem:[%s4005_s26 + $0x8] sm:$0xff]   ;;  %v350_v14 = vshll.u32 %v4022_v8, 16  ;;  %v454_v17 = vrot.slane %v4032_v11, 1  ;;  %v459_v22 = vrot.slane %v4022_v8, 1 }
  0x13   : > { %518 = vrot.lane.b32.xlu0 %v4017_v7, %s3948_s6  ;;  %v343_v12 = vshrl.u32 %v4017_v7, 16  ;;  %v345_v13 = vshll.u32 %v4017_v7, 16  ;;  %v4038_v15 = vld [vmem:[%s4005_s26] sm:$0xff]   ;;  %v452_v16 = vrot.slane %v4029_v10, 1  ;;  %v458_v19 = vrot.slane %v4017_v7, 1  ;;  %v4058_v29 = vld [vmem:[%s4005_s26 + $0x2c] sm:$0xff]  }
  0x14   : > { %v352_v20 = vrot.slane %v350_v14, 1  ;;  %v451_v21 = vrot.slane %v4038_v15, 1  ;;  %v315_v23 = vshrl.u32 %v4038_v15, 16  ;;  %v317_v26 = vshll.u32 %v4038_v15, 16  ;;  %v4055_v28 = vld [vmem:[%s4005_s26 + $0x40] sm:$0xff]   ;;  %v4078_v45 = vld [vmem:[%s4005_s26 + $0x48] sm:$0xff]  }
  0x15   : > { %v347_v18 = vrot.slane %v345_v13, 1  ;;  %v455_v24 = vsel %vm450_vm0, %v452_v16, %v454_v17  ;;  %v322_v27 = vshll.u32 %v4029_v10, 16  ;;  %v373_v31 = vshll.u32 %v4014_v6, 16  ;;  %v3894_v49 = vld [vmem:[%s4005_s26 + $0x18] ss:$0 sps:$4 sm:$0x11]  }
  0x16   : > { %481 = vrot.lane.b32.xlu1 %v455_v24, %s3949_s7  ;;  %v453_v30 = vsel %vm450_vm0, %v451_v21, %v452_v16  ;;  %v354_v32 = vshrl.u32 %v4022_v8, 16  ;;  %v319_v34 = vrot.slane %v317_v26, 1  ;;  %v378_v36 = vshll.u32 %v4055_v28, 16  ;;  %v4085_v50 = vld [vmem:[%s4005_s26 + $0x34] ss:$0 sps:$4 sm:$0x11]  }
  0x17   : > { %520 = vrot.lane.b32.xlu0 %v4022_v8, %s3948_s6  ;;  %v348_v25 = vor.u32 %v347_v18, %v343_v12  ;;  %v324_v35 = vrot.slane %v322_v27, 1  ;;  %v4070_v37 = vsel %vm450_vm0, %v458_v19, %v459_v22  ;;  %v375_v38 = vrot.slane %v373_v31, 1  ;;  %v4101_v60 = vld [vmem:[%s4005_s26 + $0x64] sm:$0xff]   ;;  %v4105_v62 = vld [vmem:[%s4005_s26 + $0x50] ss:$0 sps:$4 sm:$0x11]  }
  0x18   : > { %v358_v39 = vshll.u32 %v4058_v29, 16  ;;  %v320_v40 = vor.u32 %v319_v34, %v315_v23  ;;  %v380_v41 = vrot.slane %v378_v36, 1  ;;  %v326_v42 = vshrl.u32 %v4029_v10, 16  ;;  %v4108_v63 = vld [vmem:[%s4005_s26 + $0x6c] ss:$0 sps:$4 sm:$0x11]  }
  0x19   : > { %v4065_v33 = vsel %vm313_vm1, %v348_v25, %v352_v20  ;;  %v330_v43 = vshll.u32 %v4032_v11, 16  ;;  %v376_v44 = vor.u32 %v375_v38, %v371_v9  ;;  %v356_v47 = vor.u32 %v354_v32, %v352_v20  ;;  %v4126_v14 = vld [vmem:[%s4005_s26 + $0x70] sm:$0xff]   ;;  %v3909_v16 = vld [vmem:[%s5030_s1 + $0x98] sm:$0xff]   ;;  %v3910_v21 = vld [vmem:[%s5030_s1 + $0x8] sm:$0xff]  }
  0x1a   : > { %573 = vrot.lane.b32.xlu1 %v4065_v33, %s3950_s8  ;;  %v325_v46 = vsel %vm313_vm1, %v320_v40, %v324_v35  ;;  %v360_v48 = vrot.slane %v358_v39, 1  ;;  %v328_v52 = vor.u32 %v326_v42, %v324_v35  ;;  %v461_v54 = vrot.slane %v4058_v29, 1  ;;  %v4134_v20 = vld [vmem:[%s4005_s26 + $0x78] sm:$0xff]   ;;  %1328 = vmatpush1.bf16.msra.mxu1 %v3909_v16  ;;  %v3911_v25 = vld [vmem:[%s5030_s1 + $0x50] sm:$0xff]   ;;  %v3912_v35 = vld [vmem:[%s5030_s1 + $0xa0] sm:$0xff]  }
  0x1b   : > { %479 = vrot.lane.b32.xlu0 %v453_v30, %s3949_s7  ;;  %v4088_v51 = vsel %vm313_vm1, %v376_v44, %v380_v41  ;;  %v332_v53 = vrot.slane %v330_v43, 1  ;;  %v386_v55 = vshll.u32 %v4078_v45, 16  ;;  %v382_v57 = vshrl.u32 %v4055_v28, 16  ;;  %3782 = vmatpush3.bf16.msra.mxu0 %v3910_v21  ;;  %v3913_v43 = vld [vmem:[%s5030_s1 + $0x10] sm:$0xff]  }
  0x1c   : > { %v4094_v56 = vsel %vm313_vm1, %v356_v47, %v360_v48  ;;  %v456_v58 = vrot.slane %v3894_v49, 1  ;;  %v366_v59 = vshll.u32 %v4085_v50, 16  ;;  %v362_v2 = vshrl.u32 %v4058_v29, 16  ;;  %1329 = vmatprep.subr.bf16.mxu1 %v3946_v0  ;;  %3783 = vmatprep.subr.bf16.mxu0 %v3911_v25  ;;  %v4205_v4 = vld [vmem:[%s4005_s26 + $0x54] sm:$0xff]  }
  0x1d   : > { %v333_v61 = vsel %vm313_vm1, %v328_v52, %v332_v53  ;;  %v4112_v1 = vrot.slane %v386_v55, 1  ;;  %v338_v3 = vshll.u32 %v3894_v49, 16  ;;  %v4121_v5 = vsel %vm450_vm0, %v459_v22, %v461_v54  ;;  %v3919_v21 = vld [vmem:[%s5030_s1 + $0xb0] sm:$0xff]  }
  0x1e   : > { %426 = vrot.lane.b32.xlu1 %v325_v46, %s3952_s10  ;;  %v384_v9 = vor.u32 %v382_v57, %v380_v41  ;;  %v334_v12 = vshrl.u32 %v4032_v11, 16  ;;  %v463_v13 = vrot.slane %v4085_v50, 1  ;;  %v368_v18 = vrot.slane %v366_v59, 1  ;;  %1330 = vmatpush1.bf16.msra.mxu1 %v3912_v35  ;;  %v3915_v57 = vld [vmem:[%s5030_s1 + $0x58] sm:$0xff]   ;;  %v3925_v35 = vld [vmem:[%s5030_s1 + $0xc0] sm:$0xff]  }
  0x1f   : > { %604 = vrot.lane.b32.xlu0 %v4070_v37, %s3951_s9  ;;  %v414_v19 = vshll.u32 %v4101_v60, 16  ;;  %v390_v22 = vshrl.u32 %v4078_v45, 16  ;;  %v418_v23 = vshrl.u32 %v4101_v60, 16  ;;  %v422_v24 = vshll.u32 %v4108_v63, 16  ;;  %1331 = vmatprep.subr.bf16.mxu1 %v3946_v0 }
  0x20   : > { %v340_v26 = vrot.slane %v338_v3, 1  ;;  %v4151_v30 = vsel %vm313_vm1, %v384_v9, %v4112_v1  ;;  %v394_v31 = vshll.u32 %v4105_v62, 16  ;;  %v546_v34 = vshrl.u32 %v4126_v14, 16  ;;  %3784 = vmatpush3.bf16.msra.mxu0 %v3913_v43  ;;  %v3917_v3 = vld [vmem:[%s5030_s1 + $0x18] sm:$0xff]  }
  0x21   : > { %v4147_v27 = vrot.slane %v414_v19, 1  ;;  %v424_v32 = vrot.slane %v422_v24, 1  ;;  %v548_v38 = vshll.u32 %v4126_v14, 16  ;;  %v553_v39 = vshll.u32 %v4134_v20, 16  ;;  %3785 = vmatprep.subr.bf16.mxu0 %v3915_v57  ;;  %v4227_v24 = vld [vmem:[%s4005_s26 + $0x5c] sm:$0xff]  }
  0x22   : > { %575 = vrot.lane.b32.xlu1 %v4094_v56, %s3950_s8  ;;  %v457_v40 = vsel %vm450_vm0, %v454_v17, %v456_v58  ;;  %v364_v41 = vor.u32 %v362_v2, %v360_v48  ;;  %v465_v42 = vrot.slane %v4014_v6, 1  ;;  %v336_v49 = vor.u32 %v334_v12, %v332_v53  ;;  %v4179_v48 = vld [vmem:[%s4005_s26 + $0x80] sm:$0xff]  }
  0x23   : > { %698 = vrot.lane.b32.xlu0 %v4088_v51, %s3953_s11  ;;  %v420_v36 = vor.u32 %v418_v23, %v4147_v27  ;;  %v550_v46 = vrot.slane %v548_v38, 1  ;;  %v555_v47 = vrot.slane %v553_v39, 1  ;;  %v557_v50 = vshrl.u32 %v4134_v20, 16  ;;  %v3918_v12 = vld [vmem:[%s5030_s1 + $0x60] sm:$0xff]   ;;  %v3926_v39 = vld [vmem:[%s5030_s1 + $0x30] sm:$0xff]  }
  0x24   : > { %v4183_v52 = vsel %vm313_vm1, %v364_v41, %v368_v18  ;;  %v466_v55 = vrot.slane %v4055_v28, 1  ;;  %v561_v59 = vshll.u32 %v4179_v48, 16  ;;  %v341_v2 = vsel %vm313_vm1, %v336_v49, %v340_v26  ;;  %3786 = vmatpush3.bf16.msra.mxu0 %v3917_v3  ;;  %v3928_v41 = vld [vmem:[%s5030_s1 + $0x78] sm:$0xff]  }
  0x25   : > { %v4174_v44 = vsel %vm313_vm1, %v420_v36, %v424_v32  ;;  %v551_v17 = vor.u32 %v550_v46, %v546_v34  ;;  %v559_v58 = vor.u32 %v557_v50, %v555_v47  ;;  %v4213_v16 = vsel %vm450_vm0, %v461_v54, %v463_v13  ;;  %3787 = vmatprep.subr.bf16.mxu0 %v3918_v12  ;;  %v3921_v13 = vld [vmem:[%s5030_s1 + $0x68] sm:$0xff]   ;;  %v3924_v34 = vld [vmem:[%s5030_s1 + $0x70] sm:$0xff]  }
  0x26   : > { %606 = vrot.lane.b32.xlu1 %v4121_v5, %s3951_s9  ;;  %v563_v9 = vrot.slane %v561_v59, 1  ;;  %v392_v18 = vor.u32 %v390_v22, %v4112_v1  ;;  %v396_v19 = vrot.slane %v394_v31, 1  ;;  %v4224_v23 = vsel %vm450_vm0, %v465_v42, %v466_v55  ;;  %v3920_v1 = vld [vmem:[%s5030_s1 + $0x20] sm:$0xff]   ;;  %v3922_v22 = vld [vmem:[%s5030_s1 + $0xb8] sm:$0xff]   ;;  %v3923_v31 = vld [vmem:[%s5030_s1 + $0x28] sm:$0xff]  }
  0x27   : > { %428 = vrot.lane.b32.xlu0 %v333_v61, %s3952_s10  ;;  %v4192_v53 = vsel %vm313_vm1, %v551_v17, %v555_v47  ;;  %v3916_v61 = vld [vmem:[%s5030_s1 + $0xa8] sm:$0xff]   ;;  %3634 = vmatprep.mubr.msk.bf16.mxu1 %vm729_vm2, %v4224_v23  ;;  %v399_v26 = vshrl.u32 %v4205_v4, 16  ;;  %v401_v32 = vshll.u32 %v4205_v4, 16  ;;  %v565_v36 = vshrl.u32 %v4179_v48, 16 }
  0x28   : > { %1332 = vmatpush1.bf16.msra.mxu1 %v3916_v61  ;;  %v4230_v54 = vsel %vm313_vm1, %v559_v58, %v563_v9  ;;  %v4246_v25 = vsel %vm313_vm1, %v392_v18, %v396_v19  ;;  %3788 = vmatpush3.bf16.msra.mxu0 %v3920_v1  ;;  %v406_v38 = vshll.u32 %v4227_v24, 16  ;;  %v3929_v47 = vld [vmem:[%s5030_s1 + $0xc8] sm:$0xff]   ;;  %v3931_v58 = vld [vmem:[%s5030_s1 + $0xd0] sm:$0xff]   ;;  %v475_v3 = vrot.slane %v4101_v60, 1 }
  0x29   : > { %1333 = vmatprep.subr.bf16.mxu1 %v3946_v0  ;;  %3789 = vmatprep.subr.bf16.mxu0 %v3921_v13  ;;  %v403_v42 = vrot.slane %v401_v32, 1  ;;  %v567_v43 = vor.u32 %v565_v36, %v563_v9  ;;  %v477_v9 = vrot.slane %v4108_v63, 1  ;;  %v4401_v19 = vld [vmem:[%s4005_s26 + $0x8c] sm:$0xff]   ;;  %v4409_v1 = vld [vmem:[%s4005_s26 + $0x94] sm:$0xff]   ;;  %v598_v32 = vrot.slane %v4134_v20, 1 }
  0x2a   : > { %700 = vrot.lane.b32.xlu1 %v4151_v30, %s3953_s11  ;;  %v408_v50 = vrot.slane %v406_v38, 1  ;;  %v673_v13 = vshll.u32 %v4401_v19, 16  ;;  %v678_v38 = vshll.u32 %v4409_v1, 16 }
  0x2b   : > { %645 = vrot.lane.b32.xlu0 %v4055_v28, %s3947_s5  ;;  %v404_v17 = vor.u32 %v403_v42, %v399_v26 }
  0x2c   : > { %1334 = vmatpush1.bf16.msra.mxu1 %v3919_v21  ;;  %3790 = vmatpush3.bf16.msra.mxu0 %v3923_v31  ;;  %v597_v31 = vrot.slane %v4126_v14, 1  ;;  %v675_v36 = vrot.slane %v673_v13, 1 }
  0x2d   : > { %1335 = vmatprep.subr.bf16.mxu1 %v3946_v0  ;;  %3791 = vmatprep.subr.bf16.mxu0 %v3924_v34  ;;  %v4302_v59 = vsel %vm313_vm1, %v404_v17, %v408_v50 }
  0x2e   : > { %522 = vrot.lane.b32.xlu1 %v4058_v29, %s3948_s6 }
  0x2f   : > { %483 = vrot.lane.b32.xlu0 %v457_v40, %s3949_s7  ;;  %v4271_v40 = vld [vmem:[%s4005_s26 + $0x88] ss:$0 sps:$4 sm:$0x11]  }
  0x30   : > { %1336 = vmatpush1.bf16.msra.mxu1 %v3922_v22  ;;  %v569_v46 = vshll.u32 %v4271_v40, 16  ;;  %3792 = vmatpush3.bf16.msra.mxu0 %v3926_v39 }
  0x31   : > { %1337 = vmatprep.subr.bf16.mxu1 %v3946_v0  ;;  %3793 = vmatprep.subr.bf16.mxu0 %v3928_v41 }
  0x32   : > { %430 = vrot.lane.b32.xlu1 %v341_v2, %s3952_s10  ;;  %v571_v49 = vrot.slane %v569_v46, 1 }
  0x33   : > { %577 = vrot.lane.b32.xlu0 %v4183_v52, %s3950_s8 }
  0x34   : > { %1338 = vmatpush1.bf16.msra.mxu1 %v3925_v35  ;;  %v4291_v57 = vsel %vm313_vm1, %v567_v43, %v571_v49  ;;  %v671_v35 = vshrl.u32 %v4401_v19, 16  ;;  %v4432_v49 = vsel %vm450_vm0, %v597_v31, %v598_v32  ;;  %v4482_v31 = vld [vmem:[%s4005_s26 + $0xa4] ss:$0 sps:$4 sm:$0x11]  }
  0x35   : > { %1339 = vmatprep.subr.bf16.mxu1 %v3946_v0 }
  0x36   : > { %647 = vrot.lane.b32.xlu1 %v4078_v45, %s3947_s5 }
  0x37   : > { %608 = vrot.lane.b32.xlu0 %v4213_v16, %s3951_s9 }
  0x38   : > { %1340 = vmatpush1.bf16.msra.mxu1 %v3929_v47 }
  0x39   : > { %1341 = vmatprep.subr.bf16.mxu1 %v3946_v0  ;;  %v410_v0 = vshrl.u32 %v4227_v24, 16 }
  0x3a   : > { %485 = vrot.lane.b32.xlu1 %v4070_v37, %s3949_s7  ;;  %v3930_v37 = vld [vmem:[%s5030_s1 + $0x38] sm:$0xff]  }
  0x3b   : > { %702 = vrot.lane.b32.xlu0 %v4246_v25, %s3953_s11  ;;  %3794 = vmatpush3.bf16.msra.mxu0 %v3930_v37  ;;  %v412_v2 = vor.u32 %v410_v0, %v408_v50  ;;  %v680_v37 = vrot.slane %v678_v38, 1  ;;  %v602_v38 = vrot.slane %v4271_v40, 1 }
  0x3c   : > { %1342 = vmatpush1.bf16.msra.mxu1 %v3931_v58 }
  0x3e   : > { %579 = vrot.lane.b32.xlu1 %v4088_v51, %s3950_s8 }
  0x3f   : > { %524 = vrot.lane.b32.xlu0 %v4014_v6, %s3948_s6 }
  0x42   : > { %610 = vrot.lane.b32.xlu1 %v4224_v23, %s3951_s9 }
  0x43   : > { %432 = vrot.lane.b32.xlu0 %v4065_v33, %s3952_s10  ;;  %v468_v33 = vrot.slane %v4078_v45, 1 }
  0x45   : > { %v4319_v61 = vsel %vm450_vm0, %v466_v55, %v468_v33  ;;  %v470_v55 = vrot.slane %v4105_v62, 1  ;;  %v472_v62 = vrot.slane %v4205_v4, 1 }
  0x46   : > { %704 = vrot.lane.b32.xlu1 %v4302_v59, %s3953_s11 }
  0x47   : > { %649 = vrot.lane.b32.xlu0 %v4205_v4, %s3947_s5 }
  0x4a   : > { %526 = vrot.lane.b32.xlu1 %v4055_v28, %s3948_s6 }
  0x4b   : > { %487 = vrot.lane.b32.xlu0 %v4121_v5, %s3949_s7  ;;  %v4327_v5 = vsel %vm313_vm1, %v412_v2, %v4147_v27  ;;  %v473_v27 = vrot.slane %v4227_v24, 1  ;;  %v4450_v2 = vld [vmem:[%s4005_s26 + $0x9c] sm:$0xff]  }
  0x4e   : > { %434 = vrot.lane.b32.xlu1 %v4094_v56, %s3952_s10  ;;  %v4341_v56 = vsel %vm450_vm0, %v468_v33, %v470_v55 }
  0x4f   : > { %581 = vrot.lane.b32.xlu0 %v4151_v30, %s3950_s8 }
  0x52   : > { %651 = vrot.lane.b32.xlu1 %v4227_v24, %s3947_s5 }
  0x53   : > { %612 = vrot.lane.b32.xlu0 %v4319_v61, %s3951_s9 }
  0x56   : > { %489 = vrot.lane.b32.xlu1 %v4213_v16, %s3949_s7  ;;  %v4396_v16 = vsel %vm450_vm0, %v475_v3, %v477_v9  ;;  %v682_v9 = vshrl.u32 %v4409_v1, 16 }
  0x57   : > { %706 = vrot.lane.b32.xlu0 %v4327_v5, %s3953_s11 }
  0x5a   : > { %583 = vrot.lane.b32.xlu1 %v4246_v25, %s3950_s8 }
  0x5b   : > { %528 = vrot.lane.b32.xlu0 %v4078_v45, %s3948_s6 }
  0x5e   : > { %614 = vrot.lane.b32.xlu1 %v4341_v56, %s3951_s9 }
  0x5f   : > { %436 = vrot.lane.b32.xlu0 %v4183_v52, %s3952_s10  ;;  %v4360_v52 = vsel %vm450_vm0, %v472_v62, %v473_v27 }
  0x62   : > { %708 = vrot.lane.b32.xlu1 %v4174_v44, %s3953_s11 }
  0x63   : > { %653 = vrot.lane.b32.xlu0 %v4101_v60, %s3947_s5 }
  0x66   : > { %530 = vrot.lane.b32.xlu1 %v4205_v4, %s3948_s6 }
  0x67   : > { %491 = vrot.lane.b32.xlu0 %v4224_v23, %s3949_s7 }
  0x6a   : > { %438 = vrot.lane.b32.xlu1 %v4088_v51, %s3952_s10  ;;  %v4378_v51 = vsel %vm450_vm0, %v473_v27, %v475_v3  ;;  %v600_v3 = vrot.slane %v4179_v48, 1 }
  0x6b   : > { %585 = vrot.lane.b32.xlu0 %v4302_v59, %s3950_s8 }
  0x6e   : > { %655 = vrot.lane.b32.xlu1 %v4126_v14, %s3947_s5 }
  0x6f   : > { %616 = vrot.lane.b32.xlu0 %v4360_v52, %s3951_s9 }
  0x72   : > { %493 = vrot.lane.b32.xlu1 %v4319_v61, %s3949_s7 }
  0x73   : > { %710 = vrot.lane.b32.xlu0 %v4192_v53, %s3953_s11 }
  0x76   : > { %587 = vrot.lane.b32.xlu1 %v4327_v5, %s3950_s8 }
  0x77   : > { %532 = vrot.lane.b32.xlu0 %v4227_v24, %s3948_s6 }
  0x7a   : > { %618 = vrot.lane.b32.xlu1 %v4378_v51, %s3951_s9 }
  0x7b   : > { %440 = vrot.lane.b32.xlu0 %v4151_v30, %s3952_s10 }
  0x7e   : > { %712 = vrot.lane.b32.xlu1 %v4230_v54, %s3953_s11 }
  0x7f   : > { %657 = vrot.lane.b32.xlu0 %v4134_v20, %s3947_s5 }
  0x82   : > { %534 = vrot.lane.b32.xlu1 %v4101_v60, %s3948_s6 }
  0x83   : > { %495 = vrot.lane.b32.xlu0 %v4341_v56, %s3949_s7 }
  0x84   : > { %v644_v12 = vpop.permute.xlu1 %643 }
  0x85   : > { %v519_v30 = vpop.permute.xlu0 %518 }
  0x86   : > { %442 = vrot.lane.b32.xlu1 %v4246_v25, %s3952_s10 }
  0x87   : > { %589 = vrot.lane.b32.xlu0 %v4174_v44, %s3950_s8 }
  0x88   : > { %v482_v21 = vpop.permute.xlu1 %481 }
  0x89   : > { %v521_v18 = vpop.permute.xlu0 %520 }
  0x8a   : > { %659 = vrot.lane.b32.xlu1 %v4179_v48, %s3947_s5 }
  0x8b   : > { %620 = vrot.lane.b32.xlu0 %v4396_v16, %s3951_s9 }
  0x8c   : > { %v574_v22 = vpop.permute.xlu1 %573 }
  0x8d   : > { %v480_v63 = vpop.permute.xlu0 %479 }
  0x8e   : > { %v793_v23 = vsel %vm791_vm3, %v480_v63, %v519_v30  ;;  %497 = vrot.lane.b32.xlu1 %v4360_v52, %s3949_s7 }
  0x8f   : > { %714 = vrot.lane.b32.xlu0 %v4291_v57, %s3953_s11  ;;  %v818_v26 = vsel %vm816_vm4, %v793_v23, %v574_v22 }
  0x90   : > { %v427_v39 = vpop.permute.xlu1 %426 }
  0x91   : > { %v605_v25 = vpop.permute.xlu0 %604  ;;  %v731_v41 = vsel %vm729_vm2, %v4038_v15, %v427_v39  ;;  %v690_v39 = vshrl.u32 %v4450_v2, 16 }
  0x92   : > { %v843_v34 = vsel %vm841_vm5, %v818_v26, %v605_v25  ;;  %v880_v42 = vsel %vm878_vm6, %v605_v25, %v644_v12  ;;  %591 = vrot.lane.b32.xlu1 %v4192_v53, %s3950_s8  ;;  %v756_v43 = vsel %vm754_vm7, %v731_v41, %v480_v63  ;;  %v795_v53 = vsel %vm791_vm3, %v482_v21, %v521_v18 }
  0x93   : > { %536 = vrot.lane.b32.xlu0 %v4126_v14, %s3948_s6  ;;  %1224 = vmatprep.mubr.bf16.mxu0 %v843_v34  ;;  %v676_v14 = vor.u32 %v675_v36, %v671_v35  ;;  %v686_v12 = vshll.u32 %v4450_v2, 16  ;;  %v684_v63 = vor.u32 %v682_v9, %v680_v37  ;;  %v694_v41 = vshll.u32 %v4482_v31, 16 }
  0x94   : > { %1225 = vmatmul.mubr.bf16.vlgmr.msra.gmra.mrb[0].mxu0 %v756_v43  ;;  %v576_v17 = vpop.permute.xlu1 %575 }
  0x95   : > { %v699_v46 = vpop.permute.xlu0 %698  ;;  %v681_v58 = vsel %vm313_vm1, %v676_v14, %v680_v37  ;;  %v820_v33 = vsel %vm816_vm4, %v795_v53, %v576_v17  ;;  %v688_v23 = vrot.slane %v686_v12, 1 }
  0x96   : > { %v905_v47 = vsel %vm903_vm8, %v880_v42, %v699_v46  ;;  %622 = vrot.lane.b32.xlu1 %v4432_v49, %s3951_s9  ;;  %v4500_v46 = vsel %vm450_vm0, %v600_v3, %v602_v38 }
  0x97   : > { %444 = vrot.lane.b32.xlu0 %v4302_v59, %s3952_s10  ;;  %1354 = vmatmul.mubr.bf16.vlgmr.msra.gmra.mrb[0].mxu1 %v905_v47  ;;  %v692_v40 = vor.u32 %v690_v39, %v688_v23  ;;  %v696_v47 = vrot.slane %v694_v41, 1 }
  0x98   : > { %3635 = vmatprep.mubr.msk.bf16.mxu1 %vm729_vm2, %v4319_v61  ;;  %v607_v0 = vpop.permute.xlu1 %606 }
  0x99   : > { %v429_v15 = vpop.permute.xlu0 %428  ;;  %v846_v61 = vsel %vm841_vm5, %v820_v33, %v607_v0 }
  0x9a   : > { %v733_v50 = vsel %vm729_vm2, %v4029_v10, %v429_v15  ;;  %716 = vrot.lane.b32.xlu1 %v681_v58, %s3953_s11  ;;  %1232 = vmatprep.mubr.bf16.mxu0 %v846_v61 }
  0x9b   : > { %661 = vrot.lane.b32.xlu0 %v4401_v19, %s3947_s5  ;;  %v759_v59 = vsel %vm754_vm7, %v733_v50, %v482_v21  ;;  %v4467_v21 = vsel %vm450_vm0, %v598_v32, %v600_v3 }
  0x9c   : > { %1233 = vmatmul.mubr.bf16.gmra.mrb[4].mxu0 %v759_v59  ;;  %v701_v62 = vpop.permute.xlu1 %700 }
  0x9d   : > { %v646_v55 = vpop.permute.xlu0 %645 }
  0x9e   : > { %v882_v10 = vsel %vm878_vm6, %v607_v0, %v646_v55  ;;  %538 = vrot.lane.b32.xlu1 %v4134_v20, %s3948_s6 }
  0x9f   : > { %499 = vrot.lane.b32.xlu0 %v4378_v51, %s3949_s7  ;;  %v908_v27 = vsel %vm903_vm8, %v882_v10, %v701_v62 }
  0xa0   : > { %1362 = vmatmul.mubr.bf16.gmra.mrb[4].mxu1 %v908_v27  ;;  %v523_v18 = vpop.permute.xlu1 %522 }
  0xa1   : > { %v484_v30 = vpop.permute.xlu0 %483  ;;  %3636 = vmatprep.mubr.msk.bf16.mxu1 %vm729_vm2, %v4341_v56 }
  0xa2   : > { %446 = vrot.lane.b32.xlu1 %v4327_v5, %s3952_s10  ;;  %v797_v56 = vsel %vm791_vm3, %v484_v30, %v523_v18 }
  0xa3   : > { %593 = vrot.lane.b32.xlu0 %v4230_v54, %s3950_s8  ;;  %v689_v54 = vsel %vm313_vm1, %v684_v63, %v688_v23 }
  0xa4   : > { %v431_v20 = vpop.permute.xlu1 %430 }
  0xa5   : > { %v578_v13 = vpop.permute.xlu0 %577  ;;  %v735_v22 = vsel %vm729_vm2, %v4032_v11, %v431_v20 }
  0xa6   : > { %v822_v25 = vsel %vm816_vm4, %v797_v56, %v578_v13  ;;  %663 = vrot.lane.b32.xlu1 %v4409_v1, %s3947_s5  ;;  %v762_v34 = vsel %vm754_vm7, %v735_v22, %v484_v30 }
  0xa7   : > { %624 = vrot.lane.b32.xlu0 %v4467_v21, %s3951_s9 }
  0xa8   : > { %v648_v32 = vpop.permute.xlu1 %647 }
  0xa9   : > { %v609_v26 = vpop.permute.xlu0 %608 }
  0xaa   : > { %v849_v5 = vsel %vm841_vm5, %v822_v25, %v609_v26  ;;  %v884_v11 = vsel %vm878_vm6, %v609_v26, %v648_v32  ;;  %501 = vrot.lane.b32.xlu1 %v4396_v16, %s3949_s7 }
  0xab   : > { %718 = vrot.lane.b32.xlu0 %v689_v54, %s3953_s11  ;;  %1240 = vmatprep.mubr.bf16.mxu0 %v849_v5 }
  0xac   : > { %1241 = vmatmul.mubr.bf16.gmra.mrb[8].mxu0 %v762_v34  ;;  %v486_v42 = vpop.permute.xlu1 %485 }
  0xad   : > { %v703_v35 = vpop.permute.xlu0 %702 }
  0xae   : > { %v911_v36 = vsel %vm903_vm8, %v884_v11, %v703_v35  ;;  %595 = vrot.lane.b32.xlu1 %v4291_v57, %s3950_s8  ;;  %v697_v57 = vsel %vm313_vm1, %v692_v40, %v696_v47  ;;  %s3714_s8 = sshll.u32 %s5035_s16, 5 }
  0xaf   : > { %540 = vrot.lane.b32.xlu0 %v4179_v48, %s3948_s6  ;;  %1370 = vmatmul.mubr.bf16.gmra.mrb[8].mxu1 %v911_v36 }
  0xb0   : > { %3637 = vmatprep.mubr.msk.bf16.mxu1 %vm729_vm2, %v4360_v52  ;;  %v580_v14 = vpop.permute.xlu1 %579 }
  0xb1   : > { %v525_v43 = vpop.permute.xlu0 %524 }
  0xb2   : > { %v799_v37 = vsel %vm791_vm3, %v486_v42, %v525_v43  ;;  %626 = vrot.lane.b32.xlu1 %v4500_v46, %s3951_s9 }
  0xb3   : > { %448 = vrot.lane.b32.xlu0 %v4174_v44, %s3952_s10  ;;  %v824_v17 = vsel %vm816_vm4, %v799_v37, %v580_v14  ;;  %s4670_s10 = scalar_lea.vmem %s5033_s4, %s3714_s8 }
  0xb4   : > { %v611_v15 = vpop.permute.xlu1 %610 }
  0xb5   : > { %v433_v48 = vpop.permute.xlu0 %432  ;;  %v852_v44 = vsel %vm841_vm5, %v824_v17, %v611_v15 }
  0xb6   : > { %v737_v52 = vsel %vm729_vm2, %v4017_v7, %v433_v48  ;;  %1248 = vmatprep.mubr.bf16.mxu0 %v852_v44  ;;  %720 = vrot.lane.b32.xlu1 %v697_v57, %s3953_s11 }
  0xb7   : > { %665 = vrot.lane.b32.xlu0 %v4450_v2, %s3947_s5  ;;  %v765_v53 = vsel %vm754_vm7, %v737_v52, %v486_v42 }
  0xb8   : > { %1249 = vmatmul.mubr.bf16.gmra.mrb[12].mxu0 %v765_v53  ;;  %v705_v7 = vpop.permute.xlu1 %704 }
  0xb9   : > { %v650_v50 = vpop.permute.xlu0 %649 }
  0xba   : > { %v886_v58 = vsel %vm878_vm6, %v611_v15, %v650_v50 }
  0xbb   : > { %v914_v33 = vsel %vm903_vm8, %v886_v58, %v705_v7 }
  0xbc   : > { %1378 = vmatmul.mubr.bf16.gmra.mrb[12].mxu1 %v914_v33  ;;  %v527_v59 = vpop.permute.xlu1 %526 }
  0xbd   : > { %v488_v0 = vpop.permute.xlu0 %487  ;;  %3638 = vmatprep.mubr.msk.bf16.mxu1 %vm729_vm2, %v4378_v51 }
  0xbe   : > { %v801_v10 = vsel %vm791_vm3, %v488_v0, %v527_v59 }
  0xc0   : > { %v435_v55 = vpop.permute.xlu1 %434 }
  0xc1   : > { %v582_v61 = vpop.permute.xlu0 %581  ;;  %v739_v62 = vsel %vm729_vm2, %v4022_v8, %v435_v55 }
  0xc2   : > { %v826_v27 = vsel %vm816_vm4, %v801_v10, %v582_v61  ;;  %v768_v30 = vsel %vm754_vm7, %v739_v62, %v488_v0 }
  0xc4   : > { %v652_v12 = vpop.permute.xlu1 %651 }
  0xc5   : > { %v613_v3 = vpop.permute.xlu0 %612 }
  0xc6   : > { %v855_v9 = vsel %vm841_vm5, %v826_v27, %v613_v3  ;;  %v888_v51 = vsel %vm878_vm6, %v613_v3, %v652_v12  ;;  %v722_v12 = vrot.slane %v4401_v19, 1 }
  0xc7   : > { %1256 = vmatprep.mubr.bf16.mxu0 %v855_v9 }
  0xc8   : > { %1257 = vmatmul.mubr.bf16.gmra.mrb[16].mxu0 %v768_v30  ;;  %v490_v23 = vpop.permute.xlu1 %489  ;;  %v723_v30 = vrot.slane %v4409_v1, 1 }
  0xc9   : > { %v707_v18 = vpop.permute.xlu0 %706 }
  0xca   : > { %v917_v63 = vsel %vm903_vm8, %v888_v51, %v707_v18 }
  0xcb   : > { %1386 = vmatmul.mubr.bf16.gmra.mrb[16].mxu1 %v917_v63 }
  0xcc   : > { %3639 = vmatprep.mubr.msk.bf16.mxu1 %vm729_vm2, %v4396_v16  ;;  %v584_v13 = vpop.permute.xlu1 %583 }
  0xcd   : > { %v529_v8 = vpop.permute.xlu0 %528 }
  0xce   : > { %v803_v20 = vsel %vm791_vm3, %v490_v23, %v529_v8  ;;  %v724_v8 = vsel %vm450_vm0, %v722_v12, %v723_v30 }
  0xcf   : > { %v828_v54 = vsel %vm816_vm4, %v803_v20, %v584_v13 }
  0xd0   : > { %v615_v25 = vpop.permute.xlu1 %614 }
  0xd1   : > { %v437_v56 = vpop.permute.xlu0 %436  ;;  %v858_v5 = vsel %vm841_vm5, %v828_v54, %v615_v25 }
  0xd2   : > { %v741_v22 = vsel %vm729_vm2, %v4058_v29, %v437_v56  ;;  %1264 = vmatprep.mubr.bf16.mxu0 %v858_v5  ;;  %v725_v5 = vrot.slane %v4450_v2, 1 }
  0xd3   : > { %v771_v26 = vsel %vm754_vm7, %v741_v22, %v490_v23 }
  0xd4   : > { %1265 = vmatmul.mubr.bf16.gmra.mrb[20].mxu0 %v771_v26  ;;  %v709_v34 = vpop.permute.xlu1 %708 }
  0xd5   : > { %v654_v32 = vpop.permute.xlu0 %653 }
  0xd6   : > { %v890_v16 = vsel %vm878_vm6, %v615_v25, %v654_v32 }
  0xd7   : > { %v920_v11 = vsel %vm903_vm8, %v890_v16, %v709_v34 }
  0xd8   : > { %1394 = vmatmul.mubr.bf16.gmra.mrb[20].mxu1 %v920_v11  ;;  %v531_v29 = vpop.permute.xlu1 %530 }
  0xd9   : > { %v492_v35 = vpop.permute.xlu0 %491  ;;  %3640 = vmatprep.mubr.msk.bf16.mxu1 %vm729_vm2, %v4432_v49 }
  0xda   : > { %v805_v39 = vsel %vm791_vm3, %v492_v35, %v531_v29 }
  0xdc   : > { %v439_v38 = vpop.permute.xlu1 %438 }
  0xdd   : > { %v586_v36 = vpop.permute.xlu0 %585  ;;  %v743_v41 = vsel %vm729_vm2, %v4014_v6, %v439_v38 }
  0xde   : > { %v830_v42 = vsel %vm816_vm4, %v805_v39, %v586_v36  ;;  %v774_v14 = vsel %vm754_vm7, %v743_v41, %v492_v35  ;;  %v726_v35 = vsel %vm450_vm0, %v723_v30, %v725_v5  ;;  %v4605_v30 = vld [vmem:[%s5031_s2] ss:$0 sm:$0xff] }
  0xe0   : > { %v656_v47 = vpop.permute.xlu1 %655 }
  0xe1   : > { %v617_v43 = vpop.permute.xlu0 %616 }
  0xe2   : > { %v861_v40 = vsel %vm841_vm5, %v830_v42, %v617_v43  ;;  %v892_v49 = vsel %vm878_vm6, %v617_v43, %v656_v47 }
  0xe3   : > { %1272 = vmatprep.mubr.bf16.mxu0 %v861_v40  ;;  %v727_v40 = vrot.slane %v4482_v31, 1 }
  0xe4   : > { %1273 = vmatmul.mubr.bf16.gmra.mrb[24].mxu0 %v774_v14  ;;  %v494_v52 = vpop.permute.xlu1 %493 }
  0xe5   : > { %v711_v37 = vpop.permute.xlu0 %710 }
  0xe6   : > { %v923_v48 = vsel %vm903_vm8, %v892_v49, %v711_v37 }
  0xe7   : > { %1402 = vmatmul.mubr.bf16.gmra.mrb[24].mxu1 %v923_v48 }
  0xe8   : > { %3641 = vmatprep.mubr.msk.bf16.mxu1 %vm729_vm2, %v4467_v21  ;;  %v588_v57 = vpop.permute.xlu1 %587 }
  0xe9   : > { %v533_v6 = vpop.permute.xlu0 %532 }
  0xea   : > { %v807_v17 = vsel %vm791_vm3, %v494_v52, %v533_v6 }
  0xeb   : > { %v832_v44 = vsel %vm816_vm4, %v807_v17, %v588_v57 }
  0xec   : > { %v619_v50 = vpop.permute.xlu1 %618 }
  0xed   : > { %v441_v15 = vpop.permute.xlu0 %440  ;;  %v864_v7 = vsel %vm841_vm5, %v832_v44, %v619_v50 }
  0xee   : > { %v745_v53 = vsel %vm729_vm2, %v4055_v28, %v441_v15  ;;  %1280 = vmatprep.mubr.bf16.mxu0 %v864_v7 }
  0xef   : > { %v777_v58 = vsel %vm754_vm7, %v745_v53, %v494_v52  ;;  %v728_v52 = vsel %vm450_vm0, %v725_v5, %v727_v40  ;;  %vm3511_vm0 = vcmask 388096  }
  0xf0   : > { %1281 = vmatmul.mubr.bf16.gmra.mrb[28].mxu0 %v777_v58  ;;  %v713_v0 = vpop.permute.xlu1 %712 }
  0xf1   : > { %v658_v33 = vpop.permute.xlu0 %657 }
  0xf2   : > { %v894_v21 = vsel %vm878_vm6, %v619_v50, %v658_v33 }
  0xf3   : > { %v926_v59 = vsel %vm903_vm8, %v894_v21, %v713_v0 }
  0xf4   : > { %1410 = vmatmul.mubr.bf16.gmra.mrb[28].mxu1 %v926_v59  ;;  %v535_v28 = vpop.permute.xlu1 %534 }
  0xf5   : > { %v496_v61 = vpop.permute.xlu0 %495  ;;  %3642 = vmatprep.mubr.msk.bf16.mxu1 %vm729_vm2, %v4500_v46 }
  0xf6   : > { %v809_v62 = vsel %vm791_vm3, %v496_v61, %v535_v28  ;;  %v3954_v28 = vmov 1966171168  }
  0xf8   : > { %v443_v10 = vpop.permute.xlu1 %442 }
  0xf9   : > { %v590_v55 = vpop.permute.xlu0 %589  ;;  %v747_v27 = vsel %vm729_vm2, %v4078_v45, %v443_v10 }
  0xfa   : > { %v834_v3 = vsel %vm816_vm4, %v809_v62, %v590_v55  ;;  %v780_v46 = vsel %vm754_vm7, %v747_v27, %v496_v61  ;;  %v1562_v55 = vunpack.c.l.s4 %v3954_v28 }
  0xfc   : > { %v660_v18 = vpop.permute.xlu1 %659 }
  0xfd   : > { %v621_v9 = vpop.permute.xlu0 %620 }
  0xfe   : > { %v867_v51 = vsel %vm841_vm5, %v834_v3, %v621_v9  ;;  %v896_v63 = vsel %vm878_vm6, %v621_v9, %v660_v18 }
  0xff   : > { %1288 = vmatprep.mubr.bf16.mxu0 %v867_v51 }
 0x100   : > { %1289 = vmatmul.mubr.bf16.gmra.mrb[32].mxu0 %v780_v46  ;;  %v498_v13 = vpop.permute.xlu1 %497 }
 0x101   : > { %v715_v23 = vpop.permute.xlu0 %714 }
 0x102   : > { %v929_v45 = vsel %vm903_vm8, %v896_v63, %v715_v23  ;;  %v1563_v63 = vunpack.c.0.s8 %v1562_v55 }
 0x103   : > { %1418 = vmatmul.mubr.bf16.gmra.mrb[32].mxu1 %v929_v45  ;;  %v4610_v45 = vld [vmem:[%s5032_s3] ss:$0 sm:$0xff] }
 0x104   : > { %3643 = vmatprep.mubr.msk.bf16.mxu1 %vm729_vm2, %v724_v8  ;;  %v592_v1 = vpop.permute.xlu1 %591 }
 0x105   : > { %v537_v19 = vpop.permute.xlu0 %536 }
 0x106   : > { %v811_v20 = vsel %vm791_vm3, %v498_v13, %v537_v19 }
 0x107   : > { %v836_v54 = vsel %vm816_vm4, %v811_v20, %v592_v1 }
 0x108   : > { %v623_v25 = vpop.permute.xlu1 %622 }
 0x109   : > { %v445_v56 = vpop.permute.xlu0 %444  ;;  %v870_v32 = vsel %vm841_vm5, %v836_v54, %v623_v25 }
 0x10a   : > { %v749_v22 = vsel %vm729_vm2, %v4205_v4, %v445_v56  ;;  %1296 = vmatprep.mubr.bf16.mxu0 %v870_v32 }
 0x10b   : > { %v783_v26 = vsel %vm754_vm7, %v749_v22, %v498_v13 }
 0x10c   : > { %1297 = vmatmul.mubr.bf16.gmra.mrb[36].mxu0 %v783_v26  ;;  %v717_v11 = vpop.permute.xlu1 %716 }
 0x10d   : > { %v662_v16 = vpop.permute.xlu0 %661 }
 0x10e   : > { %v898_v34 = vsel %vm878_vm6, %v623_v25, %v662_v16 }
 0x10f   : > { %v932_v29 = vsel %vm903_vm8, %v898_v34, %v717_v11 }
 0x110   : > { %1426 = vmatmul.mubr.bf16.gmra.mrb[36].mxu1 %v932_v29  ;;  %v539_v36 = vpop.permute.xlu1 %538 }
 0x111   : > { %v500_v4 = vpop.permute.xlu0 %499  ;;  %3644 = vmatprep.mubr.msk.bf16.mxu1 %vm729_vm2, %v726_v35 }
 0x112   : > { %v813_v2 = vsel %vm791_vm3, %v500_v4, %v539_v36 }
 0x114   : > { %v447_v39 = vpop.permute.xlu1 %446 }
 0x115   : > { %v594_v38 = vpop.permute.xlu0 %593  ;;  %v751_v41 = vsel %vm729_vm2, %v4227_v24, %v447_v39 }
 0x116   : > { %v838_v42 = vsel %vm816_vm4, %v813_v2, %v594_v38  ;;  %v786_v49 = vsel %vm754_vm7, %v751_v41, %v500_v4 }
 0x118   : > { %v664_v14 = vpop.permute.xlu1 %663 }
 0x119   : > { %v625_v43 = vpop.permute.xlu0 %624 }
 0x11a   : > { %v873_v47 = vsel %vm841_vm5, %v838_v42, %v625_v43  ;;  %v900_v37 = vsel %vm878_vm6, %v625_v43, %v664_v14 }
 0x11b   : > { %1304 = vmatprep.mubr.bf16.mxu0 %v873_v47 }
 0x11c   : > { %1305 = vmatmul.mubr.bf16.gmra.mrb[40].mxu0 %v786_v49  ;;  %v502_v24 = vpop.permute.xlu1 %501 }
 0x11d   : > { %v719_v48 = vpop.permute.xlu0 %718 }
 0x11e   : > { %v935_v6 = vsel %vm903_vm8, %v900_v37, %v719_v48 }
 0x11f   : > { %1434 = vmatmul.mubr.bf16.gmra.mrb[40].mxu1 %v935_v6 }
 0x120   : > { %3645 = vmatprep.mubr.msk.bf16.mxu1 %vm729_vm2, %v728_v52  ;;  %v596_v31 = vpop.permute.xlu1 %595 }
 0x121   : > { %v541_v57 = vpop.permute.xlu0 %540 }
 0x122   : > { %v815_v17 = vsel %vm791_vm3, %v502_v24, %v541_v57 }
 0x123   : > { %v840_v44 = vsel %vm816_vm4, %v815_v17, %v596_v31 }
 0x124   : > { %v627_v50 = vpop.permute.xlu1 %626 }
 0x125   : > { %v449_v15 = vpop.permute.xlu0 %448  ;;  %v876_v7 = vsel %vm841_vm5, %v840_v44, %v627_v50 }
 0x126   : > { %v753_v53 = vsel %vm729_vm2, %v4101_v60, %v449_v15  ;;  %1312 = vmatprep.mubr.bf16.mxu0 %v876_v7  ;;  %v1564_v60 = vlaneseq }
 0x127   : > { %v789_v58 = vsel %vm754_vm7, %v753_v53, %v502_v24 }
 0x128   : > { %1313 = vmatmul.mubr.bf16.gmra.mrb[44].mxu0 %v789_v58  ;;  %v721_v0 = vpop.permute.xlu1 %720  ;;  %v1565_v23 = vshrl.u32 %v1564_v60, 7 }
 0x129   : > { %v666_v33 = vpop.permute.xlu0 %665 }
 0x12a   : > { %v902_v21 = vsel %vm878_vm6, %v627_v50, %v666_v33  ;;  %v4614_v20 = vsub.s32 %v1563_v63, %v1565_v23 }
 0x12b   : > { %v938_v59 = vsel %vm903_vm8, %v902_v21, %v721_v0 }
 0x12c   : > { %1442 = vmatmul.mubr.bf16.gmra.mrb[44].mxu1 %v938_v59 }
 0x167   : > { %v3795_v61 = vpop.f32.mrb[0].mxu0 }
 0x168   : > { %v3796_v10 = vpop.f32.mrb[1].mxu0 }
 0x169   : > { %v3797_v27 = vadd.f32 %v3796_v10, %v3795_v61  ;;  %v3798_v3 = vpop.f32.mrb[2].mxu0 }
 0x16a   : > { %v1355_v62 = vpop.f32.mrb[0].mxu1  ;;  %v3799_v12 = vpop.f32.mrb[3].mxu0 }
 0x16b   : > { %v1357_v9 = vpop.f32.mrb[1].mxu1  ;;  %v3800_v18 = vadd.f32 %v3799_v12, %v3798_v3  ;;  %v1356_v46 = vadd.f32 %v3797_v27, %v1355_v62 }
 0x16c   : > { %v1358_v51 = vpop.f32.mrb[2].mxu1 }
 0x16d   : > { %v1360_v8 = vpop.f32.mrb[3].mxu1  ;;  %v1457_v13 = vmul.f32 %v4605_v30, %v1356_v46  ;;  %v1359_v19 = vadd.f32 %v3800_v18, %v1358_v51 }
 0x16f   : > { %v1488_v1 = vadd.f32 %v4610_v45, %v1457_v13  ;;  %v1458_v56 = vmul.f32 %v4605_v30, %v1359_v19  ;;  %v3801_v22 = vpop.f32.mrb[4].mxu0 }
 0x170   : > { %v3802_v54 = vpop.f32.mrb[5].mxu0 }
 0x171   : > { %v1512_v25 = vmax.f32 %v1488_v1, 0.0  ;;  %v1489_v26 = vadd.f32 %v4610_v45, %v1458_v56  ;;  %v3803_v5 = vadd.f32 %v3802_v54, %v3801_v22  ;;  %v3804_v32 = vpop.f32.mrb[6].mxu0 }
 0x172   : > { %v3805_v16 = vpop.f32.mrb[7].mxu0 }
 0x173   : > { %v1363_v34 = vpop.f32.mrb[4].mxu1  ;;  %v1560_v11 = vcombine.high %v1512_v25, %v1512_v25  ;;  %v1567_v35 = vrot.slane %v1512_v25, %v4614_v20  ;;  %v1513_v29 = vmax.f32 %v1489_v26, 0.0  ;;  %v3806_v4 = vadd.f32 %v3805_v16, %v3804_v32 }
 0x174   : > { %v1365_v36 = vpop.f32.mrb[5].mxu1  ;;  %v1364_v38 = vadd.f32 %v3803_v5, %v1363_v34 }
 0x175   : > { %v1366_v39 = vpop.f32.mrb[6].mxu1  ;;  %v1574_v2 = vrot.slane %v1560_v11, %v4614_v20  ;;  %v1575_v41 = vcombine.high %v1567_v35, %v1567_v35  ;;  %v1583_v42 = vrot.slane %v1567_v35, %v4614_v20  ;;  %v1609_v43 = vcombine.high %v1513_v29, %v1513_v29 }
 0x176   : > { %v1368_v40 = vpop.f32.mrb[7].mxu1  ;;  %v1616_v47 = vrot.slane %v1513_v29, %v4614_v20  ;;  %v1459_v14 = vmul.f32 %v4605_v30, %v1364_v38  ;;  %v4623_v49 = vadd.f32 %v3806_v4, %v1366_v39 }
 0x177   : > { %v1576_v37 = vcombine.high %v1574_v2, %v1574_v2  ;;  %v1590_v48 = vrot.slane %v1574_v2, %v4614_v20  ;;  %v1597_v52 = vrot.slane %v1575_v41, %v4614_v20  ;;  %v1605_v6 = vcombine.high %v1583_v42, %v1583_v42 }
 0x178   : > { %v1623_v24 = vrot.slane %v1609_v43, %v4614_v20  ;;  %v1624_v57 = vcombine.high %v1616_v47, %v1616_v47  ;;  %v1632_v31 = vrot.slane %v1616_v47, %v4614_v20  ;;  %v1490_v17 = vadd.f32 %v4610_v45, %v1459_v14 }
 0x179   : > { %v1604_v15 = vrot.slane %v1576_v37, %v4614_v20  ;;  %v1606_v53 = vcombine.high %v1590_v48, %v1590_v48  ;;  %v1607_v44 = vcombine.high %v1597_v52, %v1597_v52  ;;  %v2928_v50 = vmax.f32 %v1583_v42, %v1597_v52 }
 0x17a   : > { %v1625_v58 = vcombine.high %v1623_v24, %v1623_v24  ;;  %v1639_v7 = vrot.slane %v1623_v24, %v4614_v20  ;;  %v1646_v33 = vrot.slane %v1624_v57, %v4614_v20  ;;  %v1654_v21 = vcombine.high %v1632_v31, %v1632_v31 }
 0x17b   : > { %v2929_v0 = vmax.f32 %v1607_v44, %v1590_v48  ;;  %v2992_v59 = vmax.f32 %v2928_v50, %v1605_v6  ;;  %v1608_v61 = vcombine.high %v1604_v15, %v1604_v15  ;;  %v1514_v28 = vmax.f32 %v1490_v17, 0.0 }
 0x17c   : > { %v1653_v55 = vrot.slane %v1625_v58, %v4614_v20  ;;  %v1655_v60 = vcombine.high %v1639_v7, %v1639_v7  ;;  %v1656_v10 = vcombine.high %v1646_v33, %v1646_v33  ;;  %v2931_v62 = vmax.f32 %v1646_v33, %v1654_v21 }
 0x17d   : > { %v2993_v27 = vmax.f32 %v2929_v0, %v1604_v15  ;;  %v3715_v3 = vpack.c.bf16 %v2992_v59, %v2992_v59  ;;  %v2930_v9 = vmax.f32 %v1606_v53, %v1608_v61  ;;  %v1658_v12 = vcombine.high %v1514_v28, %v1514_v28 }
 0x17e   : > { %v2932_v18 = vmax.f32 %v1639_v7, %v1653_v55  ;;  %v2995_v46 = vmax.f32 %v2931_v62, %v1656_v10  ;;  %v1657_v63 = vcombine.high %v1653_v55, %v1653_v55  ;;  %v1665_v23 = vrot.slane %v1514_v28, %v4614_v20 }
 0x17f   : > { %v3807_v51 = vpop.f32.mrb[8].mxu0  ;;  %v3716_v13 = vpack.c.bf16 %v2993_v27, %v2993_v27  ;;  %v3312_v19 = vunpack.c.l.b16 %v3715_v3  ;;  %v2994_v1 = vmax.f32 %v2930_v9, %v1632_v31  ;;  %v1672_v56 = vrot.slane %v1658_v12, %v4614_v20 }
 0x180   : > { %v3808_v8 = vpop.f32.mrb[9].mxu0  ;;  %v2996_v54 = vmax.f32 %v2932_v18, %v1655_v60  ;;  %v3718_v25 = vpack.c.bf16 %v2995_v46, %v2995_v46  ;;  %v1673_v26 = vcombine.high %v1665_v23, %v1665_v23  ;;  %v1681_v5 = vrot.slane %v1665_v23, %v4614_v20 }
 0x181   : > { %v3810_v22 = vpop.f32.mrb[10].mxu0  ;;  %v3313_v34 = vunpack.c.l.b16 %v3716_v13  ;;  %v3717_v11 = vpack.c.bf16 %v2994_v1, %v2994_v1  ;;  %v1674_v35 = vcombine.high %v1672_v56, %v1672_v56  ;;  %v1688_v29 = vrot.slane %v1672_v56, %v4614_v20 }
 0x182   : > { %v3811_v32 = vpop.f32.mrb[11].mxu0  ;;  %v1371_v16 = vpop.f32.mrb[8].mxu1  ;;  %v3719_v36 = vpack.c.bf16 %v2996_v54, %v2996_v54  ;;  %v3315_v38 = vunpack.c.l.b16 %v3718_v25  ;;  %v1695_v39 = vrot.slane %v1673_v26, %v4614_v20  ;;  %v1703_v2 = vcombine.high %v1681_v5, %v1681_v5 }
 0x183   : > { %v1373_v4 = vpop.f32.mrb[9].mxu1  ;;  %v3376_v42 = vrot.slane %v3313_v34, 7  ;;  %v3314_v43 = vunpack.c.l.b16 %v3717_v11  ;;  %v1702_v40 = vrot.slane %v1674_v35, %v4614_v20  ;;  %v1704_v47 = vcombine.high %v1688_v29, %v1688_v29 }
 0x184   : > { %v1374_v41 = vpop.f32.mrb[10].mxu1  ;;  %v3316_v37 = vunpack.c.l.b16 %v3719_v36  ;;  %v3382_v48 = vrot.slane %v3315_v38, 5  ;;  %v1705_v52 = vcombine.high %v1695_v39, %v1695_v39  ;;  %v2933_v6 = vmax.f32 %v1657_v63, %v1681_v5 }
 0x185   : > { %v1376_v14 = vpop.f32.mrb[11].mxu1  ;;  %v3378_v24 = vsel %vm3377_vm9, %v3376_v42, %v3312_v19  ;;  %v3379_v57 = vrot.slane %v3314_v43, 6  ;;  %v1706_v31 = vcombine.high %v1702_v40, %v1702_v40  ;;  %v2935_v17 = vmax.f32 %v1702_v40, %v1704_v47 }
 0x186   : > { %v3385_v15 = vrot.slane %v3316_v37, 4  ;;  %v2934_v53 = vmax.f32 %v1703_v2, %v1705_v52  ;;  %v2997_v44 = vmax.f32 %v2933_v6, %v1695_v39  ;;  %v1460_v50 = vmul.f32 %v4605_v30, %v4623_v49 }
 0x187   : > { %v3381_v58 = vsel %vm3380_vm10, %v3379_v57, %v3378_v24  ;;  %v2999_v7 = vmax.f32 %v2935_v17, %v1706_v31  ;;  %v3809_v33 = vadd.f32 %v3808_v8, %v3807_v51  ;;  %v3812_v21 = vadd.f32 %v3811_v32, %v3810_v22 }
 0x188   : > { %v3384_v0 = vsel %vm3383_vm11, %v3382_v48, %v3381_v58  ;;  %v2998_v59 = vmax.f32 %v2934_v53, %v1688_v29  ;;  %v3720_v61 = vpack.c.bf16 %v2997_v44, %v2997_v44  ;;  %v1491_v28 = vadd.f32 %v4610_v45, %v1460_v50 }
 0x189   : > { %v3387_v55 = vsel %vm3386_vm12, %v3385_v15, %v3384_v0  ;;  %v3722_v60 = vpack.c.bf16 %v2999_v7, %v2999_v7  ;;  %v1372_v10 = vadd.f32 %v3809_v33, %v1371_v16  ;;  %v1375_v62 = vadd.f32 %v3812_v21, %v1374_v41 }
 0x18a   : > { %v3721_v27 = vpack.c.bf16 %v2998_v59, %v2998_v59  ;;  %v3317_v3 = vunpack.c.l.b16 %v3720_v61  ;;  %v1515_v49 = vmax.f32 %v1491_v28, 0.0 }
 0x18b   : > { %v3319_v9 = vunpack.c.l.b16 %v3722_v60  ;;  %v1461_v12 = vmul.f32 %v4605_v30, %v1372_v10  ;;  %v1462_v51 = vmul.f32 %v4605_v30, %v1375_v62  ;;  %v3813_v18 = vpop.f32.mrb[12].mxu0 }
 0x18c   : > { %v3318_v46 = vunpack.c.l.b16 %v3721_v27  ;;  %v3388_v63 = vrot.slane %v3317_v3, 3  ;;  %v1707_v23 = vcombine.high %v1515_v49, %v1515_v49  ;;  %v1714_v8 = vrot.slane %v1515_v49, %v4614_v20  ;;  %v3814_v13 = vpop.f32.mrb[13].mxu0 }
 0x18d   : > { %v3394_v19 = vrot.slane %v3319_v9, 1  ;;  %v1492_v1 = vadd.f32 %v4610_v45, %v1461_v12  ;;  %v1493_v56 = vadd.f32 %v4610_v45, %v1462_v51  ;;  %v4652_v22 = vadd.f32 %v3814_v13, %v3813_v18  ;;  %v3816_v54 = vpop.f32.mrb[14].mxu0 }
 0x18e   : > { %v3390_v25 = vsel %vm3389_vm13, %v3388_v63, %v3387_v55  ;;  %v3391_v26 = vrot.slane %v3318_v46, 2  ;;  %v1721_v5 = vrot.slane %v1707_v23, %v4614_v20  ;;  %v1722_v32 = vcombine.high %v1714_v8, %v1714_v8  ;;  %v3817_v16 = vpop.f32.mrb[15].mxu0 }
 0x18f   : > { %v4657_v34 = vpop.f32.mrb[12].mxu1  ;;  %v1730_v11 = vrot.slane %v1714_v8, %v4614_v20  ;;  %v1516_v35 = vmax.f32 %v1492_v1, 0.0  ;;  %v1517_v29 = vmax.f32 %v1493_v56, 0.0  ;;  %v4660_v4 = vadd.f32 %v3817_v16, %v3816_v54 }
 0x190   : > { %v1381_v36 = vpop.f32.mrb[13].mxu1  ;;  %v3393_v38 = vsel %vm3392_vm14, %v3391_v26, %v3390_v25  ;;  %v1723_v39 = vcombine.high %v1721_v5, %v1721_v5  ;;  %v1737_v2 = vrot.slane %v1721_v5, %v4614_v20  ;;  %v1744_v41 = vrot.slane %v1722_v32, %v4614_v20 }
 0x191   : > { %v4665_v42 = vpop.f32.mrb[14].mxu1  ;;  %v3396_v43 = vsel %vm3395_vm15, %v3394_v19, %v3393_v38  ;;  %v1752_v40 = vcombine.high %v1730_v11, %v1730_v11  ;;  %v1756_v47 = vcombine.high %v1516_v35, %v1516_v35  ;;  %v1763_v14 = vrot.slane %v1516_v35, %v4614_v20 }
 0x192   : > { %v1384_v37 = vpop.f32.mrb[15].mxu1  ;;  %v3495_v48 = vpack.c.b16 %v3396_v43, %v3396_v43  ;;  %v1751_v52 = vrot.slane %v1723_v39, %v4614_v20  ;;  %v1753_v6 = vcombine.high %v1737_v2, %v1737_v2  ;;  %v1754_v24 = vcombine.high %v1744_v41, %v1744_v41 }
 0x193   : > { %v2936_v57 = vmax.f32 %v1730_v11, %v1744_v41  ;;  %v1770_v31 = vrot.slane %v1756_v47, %v4614_v20  ;;  %v1771_v17 = vcombine.high %v1763_v14, %v1763_v14  ;;  %v1779_v15 = vrot.slane %v1763_v14, %v4614_v20 }
 0x194   : > { %3512 = vst.msk [vmem:[%s4670_s10] sm:$0xf] %vm3511_vm0, %v3495_v48  ;;  %v2937_v53 = vmax.f32 %v1754_v24, %v1737_v2  ;;  %v1755_v44 = vcombine.high %v1751_v52, %v1751_v52  ;;  %v1805_v50 = vcombine.high %v1517_v29, %v1517_v29  ;;  %v1812_v58 = vrot.slane %v1517_v29, %v4614_v20 }
 0x195   : > { %v3000_v7 = vmax.f32 %v2936_v57, %v1752_v40  ;;  %v1772_v33 = vcombine.high %v1770_v31, %v1770_v31  ;;  %v1786_v21 = vrot.slane %v1770_v31, %v4614_v20  ;;  %v1793_v0 = vrot.slane %v1771_v17, %v4614_v20 }
 0x196   : > { %v3001_v59 = vmax.f32 %v2937_v53, %v1751_v52  ;;  %v1801_v61 = vcombine.high %v1779_v15, %v1779_v15  ;;  %v2938_v28 = vmax.f32 %v1753_v6, %v1755_v44  ;;  %v1819_v55 = vrot.slane %v1805_v50, %v4614_v20 }
 0x197   : > { %v3723_v60 = vpack.c.bf16 %v3000_v7, %v3000_v7  ;;  %v1800_v10 = vrot.slane %v1772_v33, %v4614_v20  ;;  %v1802_v62 = vcombine.high %v1786_v21, %v1786_v21  ;;  %v1803_v27 = vcombine.high %v1793_v0, %v1793_v0 }
 0x198   : > { %v3724_v3 = vpack.c.bf16 %v3001_v59, %v3001_v59  ;;  %v2939_v49 = vmax.f32 %v1793_v0, %v1801_v61  ;;  %v3002_v9 = vmax.f32 %v2938_v28, %v1779_v15  ;;  %v1820_v12 = vcombine.high %v1812_v58, %v1812_v58 }
 0x199   : > { %v3320_v51 = vunpack.c.l.b16 %v3723_v60  ;;  %v2940_v18 = vmax.f32 %v1786_v21, %v1800_v10  ;;  %v1804_v46 = vcombine.high %v1800_v10, %v1800_v10  ;;  %v1821_v63 = vcombine.high %v1819_v55, %v1819_v55 }
 0x19a   : > { %v3321_v8 = vunpack.c.l.b16 %v3724_v3  ;;  %v3003_v13 = vmax.f32 %v2939_v49, %v1803_v27  ;;  %v3725_v19 = vpack.c.bf16 %v3002_v9, %v3002_v9  ;;  %v1828_v1 = vrot.slane %v1812_v58, %v4614_v20 }
 0x19b   : > { %v3819_v23 = vpop.f32.mrb[16].mxu0  ;;  %v3004_v54 = vmax.f32 %v2940_v18, %v1802_v62  ;;  %v1835_v25 = vrot.slane %v1819_v55, %v4614_v20  ;;  %v1842_v26 = vrot.slane %v1820_v12, %v4614_v20  ;;  %v1849_v5 = vrot.slane %v1821_v63, %v4614_v20 }
 0x19c   : > { %v3820_v56 = vpop.f32.mrb[17].mxu0  ;;  %v3397_v16 = vrot.slane %v3321_v8, 7  ;;  %v3726_v11 = vpack.c.bf16 %v3003_v13, %v3003_v13  ;;  %v3322_v35 = vunpack.c.l.b16 %v3725_v19  ;;  %v1850_v29 = vcombine.high %v1828_v1, %v1828_v1 }
 0x19d   : > { %v3822_v32 = vpop.f32.mrb[18].mxu0  ;;  %v3727_v39 = vpack.c.bf16 %v3004_v54, %v3004_v54  ;;  %v1851_v2 = vcombine.high %v1835_v25, %v1835_v25  ;;  %v1852_v41 = vcombine.high %v1842_v26, %v1842_v26  ;;  %v1853_v43 = vcombine.high %v1849_v5, %v1849_v5 }
 0x19e   : > { %v3823_v36 = vpop.f32.mrb[19].mxu0  ;;  %v1387_v38 = vpop.f32.mrb[16].mxu1  ;;  %v3398_v47 = vsel %vm3377_vm9, %v3397_v16, %v3320_v51  ;;  %v3323_v14 = vunpack.c.l.b16 %v3726_v11  ;;  %v3399_v37 = vrot.slane %v3322_v35, 6  ;;  %v2941_v48 = vmax.f32 %v1804_v46, %v1828_v1 }
 0x19f   : > { %v1389_v40 = vpop.f32.mrb[17].mxu1  ;;  %v3324_v6 = vunpack.c.l.b16 %v3727_v39  ;;  %v2942_v24 = vmax.f32 %v1850_v29, %v1852_v41  ;;  %v2943_v57 = vmax.f32 %v1849_v5, %v1851_v2  ;;  %v1380_v31 = vadd.f32 %v4652_v22, %v4657_v34 }
 0x1a0   : > { %v1390_v52 = vpop.f32.mrb[18].mxu1  ;;  %v3400_v15 = vsel %vm3380_vm10, %v3399_v37, %v3398_v47  ;;  %v3401_v53 = vrot.slane %v3323_v14, 5  ;;  %v3005_v44 = vmax.f32 %v2941_v48, %v1842_v26  ;;  %v1383_v50 = vadd.f32 %v4660_v4, %v4665_v42 }
 0x1a1   : > { %v1392_v17 = vpop.f32.mrb[19].mxu1  ;;  %v3403_v58 = vrot.slane %v3324_v6, 4  ;;  %v3006_v7 = vmax.f32 %v2942_v24, %v1835_v25  ;;  %v3007_v33 = vmax.f32 %v2943_v57, %v1853_v43  ;;  %v1463_v21 = vmul.f32 %v4605_v30, %v1380_v31 }
 0x1a2   : > { %v3402_v0 = vsel %vm3383_vm11, %v3401_v53, %v3400_v15  ;;  %v3728_v59 = vpack.c.bf16 %v3005_v44, %v3005_v44  ;;  %v1464_v61 = vmul.f32 %v4605_v30, %v1383_v50  ;;  %v3821_v28 = vadd.f32 %v3820_v56, %v3819_v23 }
 0x1a3   : > { %v3404_v22 = vsel %vm3386_vm12, %v3403_v58, %v3402_v0  ;;  %v3729_v34 = vpack.c.bf16 %v3006_v7, %v3006_v7  ;;  %v3730_v55 = vpack.c.bf16 %v3007_v33, %v3007_v33  ;;  %v1494_v60 = vadd.f32 %v4610_v45, %v1463_v21 }
 0x1a4   : > { %v3325_v10 = vunpack.c.l.b16 %v3728_v59  ;;  %v1495_v4 = vadd.f32 %v4610_v45, %v1464_v61  ;;  %v3824_v42 = vadd.f32 %v3823_v36, %v3822_v32  ;;  %v1388_v62 = vadd.f32 %v3821_v28, %v1387_v38 }
 0x1a5   : > { %v3326_v27 = vunpack.c.l.b16 %v3729_v34  ;;  %v3327_v3 = vunpack.c.l.b16 %v3730_v55  ;;  %v1518_v49 = vmax.f32 %v1494_v60, 0.0 }
 0x1a6   : > { %v3405_v9 = vrot.slane %v3325_v10, 3  ;;  %v1519_v12 = vmax.f32 %v1495_v4, 0.0  ;;  %v1465_v51 = vmul.f32 %v4605_v30, %v1388_v62  ;;  %v1391_v18 = vadd.f32 %v3824_v42, %v1390_v52 }
 0x1a7   : > { %v3407_v46 = vrot.slane %v3326_v27, 2  ;;  %v3409_v63 = vrot.slane %v3327_v3, 1  ;;  %v1854_v23 = vcombine.high %v1518_v49, %v1518_v49  ;;  %v1861_v8 = vrot.slane %v1518_v49, %v4614_v20  ;;  %v4702_v13 = vpop.f32.mrb[20].mxu0 }
 0x1a8   : > { %v3406_v19 = vsel %vm3389_vm13, %v3405_v9, %v3404_v22  ;;  %v1903_v1 = vcombine.high %v1519_v12, %v1519_v12  ;;  %v1910_v56 = vrot.slane %v1519_v12, %v4614_v20  ;;  %v1496_v54 = vadd.f32 %v4610_v45, %v1465_v51  ;;  %v4707_v25 = vpop.f32.mrb[21].mxu0 }
 0x1a9   : > { %v3408_v26 = vsel %vm3392_vm14, %v3407_v46, %v3406_v19  ;;  %v1868_v5 = vrot.slane %v1854_v23, %v4614_v20  ;;  %v1869_v32 = vcombine.high %v1861_v8, %v1861_v8  ;;  %v1877_v16 = vrot.slane %v1861_v8, %v4614_v20  ;;  %v4712_v11 = vpop.f32.mrb[22].mxu0 }
 0x1aa   : > { %v3410_v35 = vsel %vm3395_vm15, %v3409_v63, %v3408_v26  ;;  %v1917_v29 = vrot.slane %v1903_v1, %v4614_v20  ;;  %v1918_v36 = vcombine.high %v1910_v56, %v1910_v56  ;;  %v1926_v38 = vrot.slane %v1910_v56, %v4614_v20  ;;  %v4717_v39 = vpop.f32.mrb[23].mxu0 }
 0x1ab   : > { %v4719_v2 = vpop.f32.mrb[20].mxu1  ;;  %v3496_v41 = vpack.c.b16 %v3410_v35, %v3410_v35  ;;  %v1870_v43 = vcombine.high %v1868_v5, %v1868_v5  ;;  %v1884_v40 = vrot.slane %v1868_v5, %v4614_v20  ;;  %v1891_v47 = vrot.slane %v1869_v32, %v4614_v20 }
 0x1ac   : > { %v1397_v14 = vpop.f32.mrb[21].mxu1  ;;  %v1899_v37 = vcombine.high %v1877_v16, %v1877_v16  ;;  %v1919_v48 = vcombine.high %v1917_v29, %v1917_v29  ;;  %v1933_v52 = vrot.slane %v1917_v29, %v4614_v20  ;;  %v1940_v6 = vrot.slane %v1918_v36, %v4614_v20 }
 0x1ad   : > { %v4725_v24 = vpop.f32.mrb[22].mxu1  ;;  %3513 = vst.msk [vmem:[%s4670_s10 + $0x4] sm:$0xf] %vm3511_vm0, %v3496_v41  ;;  %v1898_v57 = vrot.slane %v1870_v43, %v4614_v20  ;;  %v1900_v31 = vcombine.high %v1884_v40, %v1884_v40  ;;  %v1901_v17 = vcombine.high %v1891_v47, %v1891_v47  ;;  %v2944_v15 = vmax.f32 %v1877_v16, %v1891_v47 }
 0x1ae   : > { %v1400_v53 = vpop.f32.mrb[23].mxu1  ;;  %v1947_v44 = vrot.slane %v1919_v48, %v4614_v20  ;;  %v1948_v50 = vcombine.high %v1926_v38, %v1926_v38  ;;  %v1949_v58 = vcombine.high %v1933_v52, %v1933_v52  ;;  %v1950_v7 = vcombine.high %v1940_v6, %v1940_v6 }
 0x1af   : > { %v2945_v33 = vmax.f32 %v1901_v17, %v1884_v40  ;;  %v3008_v21 = vmax.f32 %v2944_v15, %v1899_v37  ;;  %v1902_v0 = vcombine.high %v1898_v57, %v1898_v57  ;;  %v1520_v59 = vmax.f32 %v1496_v54, 0.0 }
 0x1b0   : > { %v2947_v61 = vmax.f32 %v1940_v6, %v1948_v50  ;;  %v2948_v28 = vmax.f32 %v1933_v52, %v1947_v44  ;;  %v1951_v22 = vcombine.high %v1947_v44, %v1947_v44  ;;  %v1466_v34 = vmul.f32 %v4605_v30, %v1391_v18 }
 0x1b1   : > { %v3009_v55 = vmax.f32 %v2945_v33, %v1898_v57  ;;  %v3731_v60 = vpack.c.bf16 %v3008_v21, %v3008_v21  ;;  %v2946_v10 = vmax.f32 %v1900_v31, %v1902_v0  ;;  %v1952_v4 = vcombine.high %v1520_v59, %v1520_v59 }
 0x1b2   : > { %v3011_v42 = vmax.f32 %v2947_v61, %v1950_v7  ;;  %v3012_v62 = vmax.f32 %v2948_v28, %v1949_v58  ;;  %v1959_v27 = vrot.slane %v1520_v59, %v4614_v20  ;;  %v1497_v3 = vadd.f32 %v4610_v45, %v1466_v34 }
 0x1b3   : > { %v3732_v49 = vpack.c.bf16 %v3009_v55, %v3009_v55  ;;  %v3328_v9 = vunpack.c.l.b16 %v3731_v60  ;;  %v3010_v12 = vmax.f32 %v2946_v10, %v1926_v38  ;;  %v1966_v51 = vrot.slane %v1952_v4, %v4614_v20 }
 0x1b4   : > { %v3734_v46 = vpack.c.bf16 %v3011_v42, %v3011_v42  ;;  %v3735_v63 = vpack.c.bf16 %v3012_v62, %v3012_v62  ;;  %v1967_v23 = vcombine.high %v1959_v27, %v1959_v27  ;;  %v1975_v18 = vrot.slane %v1959_v27, %v4614_v20 }
 0x1b5   : > { %v3329_v8 = vunpack.c.l.b16 %v3732_v49  ;;  %v3733_v19 = vpack.c.bf16 %v3010_v12, %v3010_v12  ;;  %v1968_v1 = vcombine.high %v1966_v51, %v1966_v51  ;;  %v1982_v56 = vrot.slane %v1966_v51, %v4614_v20 }
 0x1b6   : > { %v3331_v26 = vunpack.c.l.b16 %v3734_v46  ;;  %v3332_v5 = vunpack.c.l.b16 %v3735_v63  ;;  %v1989_v32 = vrot.slane %v1967_v23, %v4614_v20  ;;  %v1997_v16 = vcombine.high %v1975_v18, %v1975_v18 }
 0x1b7   : > { %v3831_v54 = vpop.f32.mrb[24].mxu0  ;;  %v3411_v29 = vrot.slane %v3329_v8, 7  ;;  %v3330_v36 = vunpack.c.l.b16 %v3733_v19  ;;  %v1996_v38 = vrot.slane %v1968_v1, %v4614_v20  ;;  %v1998_v41 = vcombine.high %v1982_v56, %v1982_v56 }
 0x1b8   : > { %v3832_v35 = vpop.f32.mrb[25].mxu0  ;;  %v3415_v40 = vrot.slane %v3331_v26, 5  ;;  %v3417_v47 = vrot.slane %v3332_v5, 4  ;;  %v1999_v14 = vcombine.high %v1989_v32, %v1989_v32  ;;  %v2949_v37 = vmax.f32 %v1951_v22, %v1975_v18 }
 0x1b9   : > { %v3834_v43 = vpop.f32.mrb[26].mxu0  ;;  %v3412_v6 = vsel %vm3377_vm9, %v3411_v29, %v3328_v9  ;;  %v3413_v57 = vrot.slane %v3330_v36, 6  ;;  %v2000_v31 = vcombine.high %v1996_v38, %v1996_v38  ;;  %v2951_v17 = vmax.f32 %v1996_v38, %v1998_v41 }
 0x1ba   : > { %v3835_v48 = vpop.f32.mrb[27].mxu0  ;;  %v1403_v52 = vpop.f32.mrb[24].mxu1  ;;  %v2950_v53 = vmax.f32 %v1997_v16, %v1999_v14  ;;  %v3013_v44 = vmax.f32 %v2949_v37, %v1989_v32  ;;  %v1521_v50 = vmax.f32 %v1497_v3, 0.0  ;;  %v3827_v58 = vadd.f32 %v4707_v25, %v4702_v13 }
 0x1bb   : > { %v1405_v15 = vpop.f32.mrb[25].mxu1  ;;  %v3414_v33 = vsel %vm3380_vm10, %v3413_v57, %v3412_v6  ;;  %v3015_v21 = vmax.f32 %v2951_v17, %v2000_v31  ;;  %v3830_v0 = vadd.f32 %v4717_v39, %v4712_v11  ;;  %v3833_v59 = vadd.f32 %v3832_v35, %v3831_v54 }
 0x1bc   : > { %v4742_v7 = vpop.f32.mrb[26].mxu1  ;;  %v3416_v28 = vsel %vm3383_vm11, %v3415_v40, %v3414_v33  ;;  %v3014_v22 = vmax.f32 %v2950_v53, %v1982_v56  ;;  %v3736_v34 = vpack.c.bf16 %v3013_v44, %v3013_v44  ;;  %v2001_v55 = vcombine.high %v1521_v50, %v1521_v50 }
 0x1bd   : > { %v1408_v61 = vpop.f32.mrb[27].mxu1  ;;  %v3418_v60 = vsel %vm3386_vm12, %v3417_v47, %v3416_v28  ;;  %v3738_v10 = vpack.c.bf16 %v3015_v21, %v3015_v21  ;;  %v2008_v13 = vrot.slane %v1521_v50, %v4614_v20  ;;  %v1396_v25 = vadd.f32 %v3827_v58, %v4719_v2 }
 0x1be   : > { %v3737_v4 = vpack.c.bf16 %v3014_v22, %v3014_v22  ;;  %v3333_v42 = vunpack.c.l.b16 %v3736_v34  ;;  %v2015_v62 = vrot.slane %v2001_v55, %v4614_v20  ;;  %v1399_v11 = vadd.f32 %v3830_v0, %v4725_v24 }
 0x1bf   : > { %v3335_v39 = vunpack.c.l.b16 %v3738_v10  ;;  %v2016_v27 = vcombine.high %v2008_v13, %v2008_v13  ;;  %v2024_v3 = vrot.slane %v2008_v13, %v4614_v20  ;;  %v1467_v49 = vmul.f32 %v4605_v30, %v1396_v25 }
 0x1c0   : > { %v3334_v9 = vunpack.c.l.b16 %v3737_v4  ;;  %v3419_v12 = vrot.slane %v3333_v42, 3  ;;  %v2017_v51 = vcombine.high %v2015_v62, %v2015_v62  ;;  %v2031_v46 = vrot.slane %v2015_v62, %v4614_v20 }
 0x1c1   : > { %v3423_v63 = vrot.slane %v3335_v39, 1  ;;  %v2038_v2 = vrot.slane %v2016_v27, %v4614_v20  ;;  %v2046_v23 = vcombine.high %v2024_v3, %v2024_v3  ;;  %v1498_v18 = vadd.f32 %v4610_v45, %v1467_v49 }
 0x1c2   : > { %v3420_v8 = vsel %vm3389_vm13, %v3419_v12, %v3418_v60  ;;  %v3421_v24 = vrot.slane %v3334_v9, 2  ;;  %v2045_v19 = vrot.slane %v2017_v51, %v4614_v20  ;;  %v2047_v1 = vcombine.high %v2031_v46, %v2031_v46 }
 0x1c3   : > { %v2048_v56 = vcombine.high %v2038_v2, %v2038_v2  ;;  %v2952_v54 = vmax.f32 %v2024_v3, %v2038_v2  ;;  %v1522_v26 = vmax.f32 %v1498_v18, 0.0  ;;  %v1468_v5 = vmul.f32 %v4605_v30, %v1399_v11  ;;  %v4761_v32 = vpop.f32.mrb[28].mxu0 }
 0x1c4   : > { %v3422_v16 = vsel %vm3392_vm14, %v3421_v24, %v3420_v8  ;;  %v2049_v35 = vcombine.high %v2045_v19, %v2045_v19  ;;  %v3836_v29 = vadd.f32 %v3835_v48, %v3834_v43  ;;  %v1404_v36 = vadd.f32 %v3833_v59, %v1403_v52  ;;  %v4764_v38 = vpop.f32.mrb[29].mxu0 }
 0x1c5   : > { %v3424_v41 = vsel %vm3395_vm15, %v3423_v63, %v3422_v16  ;;  %v2953_v40 = vmax.f32 %v2048_v56, %v2031_v46  ;;  %v3016_v47 = vmax.f32 %v2952_v54, %v2046_v23  ;;  %v2050_v14 = vcombine.high %v1522_v26, %v1522_v26  ;;  %v4767_v37 = vpop.f32.mrb[30].mxu0 }
 0x1c6   : > { %v3497_v6 = vpack.c.b16 %v3424_v41, %v3424_v41  ;;  %v2057_v57 = vrot.slane %v1522_v26, %v4614_v20  ;;  %v2954_v31 = vmax.f32 %v2047_v1, %v2049_v35  ;;  %v1499_v17 = vadd.f32 %v4610_v45, %v1468_v5  ;;  %v4771_v15 = vpop.f32.mrb[31].mxu0 }
 0x1c7   : > { %v4773_v43 = vpop.f32.mrb[28].mxu1  ;;  %v3017_v48 = vmax.f32 %v2953_v40, %v2045_v19  ;;  %v3739_v52 = vpack.c.bf16 %v3016_v47, %v3016_v47  ;;  %v2064_v53 = vrot.slane %v2050_v14, %v4614_v20  ;;  %v1469_v44 = vmul.f32 %v4605_v30, %v1404_v36 }
 0x1c8   : > { %v1413_v50 = vpop.f32.mrb[29].mxu1  ;;  %3514 = vst.msk [vmem:[%s4670_s10 + $0x8] sm:$0xf] %vm3511_vm0, %v3497_v6  ;;  %v2065_v58 = vcombine.high %v2057_v57, %v2057_v57  ;;  %v2073_v33 = vrot.slane %v2057_v57, %v4614_v20  ;;  %v1523_v21 = vmax.f32 %v1499_v17, 0.0  ;;  %v1407_v0 = vadd.f32 %v3836_v29, %v4742_v7 }
 0x1c9   : > { %v4781_v59 = vpop.f32.mrb[30].mxu1  ;;  %v3740_v61 = vpack.c.bf16 %v3017_v48, %v3017_v48  ;;  %v3336_v28 = vunpack.c.l.b16 %v3739_v52  ;;  %v2066_v22 = vcombine.high %v2064_v53, %v2064_v53  ;;  %v2080_v34 = vrot.slane %v2064_v53, %v4614_v20 }
 0x1ca   : > { %v1416_v55 = vpop.f32.mrb[31].mxu1  ;;  %v2087_v60 = vrot.slane %v2065_v58, %v4614_v20  ;;  %v2095_v10 = vcombine.high %v2073_v33, %v2073_v33  ;;  %v3018_v13 = vmax.f32 %v2954_v31, %v2073_v33  ;;  %v2099_v25 = vcombine.high %v1523_v21, %v1523_v21 }
 0x1cb   : > { %v3337_v4 = vunpack.c.l.b16 %v3740_v61  ;;  %v2094_v42 = vrot.slane %v2066_v22, %v4614_v20  ;;  %v2096_v62 = vcombine.high %v2080_v34, %v2080_v34  ;;  %v2106_v11 = vrot.slane %v1523_v21, %v4614_v20 }
 0x1cc   : > { %v2097_v7 = vcombine.high %v2087_v60, %v2087_v60  ;;  %v2955_v39 = vmax.f32 %v2087_v60, %v2095_v10  ;;  %v3741_v27 = vpack.c.bf16 %v3018_v13, %v3018_v13  ;;  %v2113_v3 = vrot.slane %v2099_v25, %v4614_v20 }
 0x1cd   : > { %v3425_v49 = vrot.slane %v3337_v4, 7  ;;  %v2956_v9 = vmax.f32 %v2080_v34, %v2094_v42  ;;  %v2098_v12 = vcombine.high %v2094_v42, %v2094_v42  ;;  %v2114_v51 = vcombine.high %v2106_v11, %v2106_v11 }
 0x1ce   : > { %v3019_v46 = vmax.f32 %v2955_v39, %v2097_v7  ;;  %v3338_v63 = vunpack.c.l.b16 %v3741_v27  ;;  %v2115_v2 = vcombine.high %v2113_v3, %v2113_v3  ;;  %v2122_v23 = vrot.slane %v2106_v11, %v4614_v20 }
 0x1cf   : > { %v3426_v18 = vsel %vm3377_vm9, %v3425_v49, %v3336_v28  ;;  %v3020_v8 = vmax.f32 %v2956_v9, %v2096_v62  ;;  %v2129_v24 = vrot.slane %v2113_v3, %v4614_v20  ;;  %v2136_v19 = vrot.slane %v2114_v51, %v4614_v20 }
 0x1d0   : > { %v3742_v1 = vpack.c.bf16 %v3019_v46, %v3019_v46  ;;  %v3427_v56 = vrot.slane %v3338_v63, 6  ;;  %v2143_v54 = vrot.slane %v2115_v2, %v4614_v20  ;;  %v2144_v26 = vcombine.high %v2122_v23, %v2122_v23 }
 0x1d1   : > { %v3743_v5 = vpack.c.bf16 %v3020_v8, %v3020_v8  ;;  %v2145_v16 = vcombine.high %v2129_v24, %v2129_v24  ;;  %v2146_v35 = vcombine.high %v2136_v19, %v2136_v19  ;;  %v2957_v29 = vmax.f32 %v2098_v12, %v2122_v23 }
 0x1d2   : > { %v3339_v41 = vunpack.c.l.b16 %v3742_v1  ;;  %v3428_v40 = vsel %vm3380_vm10, %v3427_v56, %v3426_v18  ;;  %v2147_v47 = vcombine.high %v2143_v54, %v2143_v54  ;;  %v1500_v14 = vadd.f32 %v4610_v45, %v1469_v44 }
 0x1d3   : > { %v4793_v36 = vpop.f32.mrb[32].mxu0  ;;  %v3340_v57 = vunpack.c.l.b16 %v3743_v5  ;;  %v2958_v31 = vmax.f32 %v2144_v26, %v2146_v35  ;;  %v2959_v17 = vmax.f32 %v2143_v54, %v2145_v16  ;;  %v3021_v48 = vmax.f32 %v2957_v29, %v2136_v19 }
 0x1d4   : > { %v4797_v6 = vpop.f32.mrb[33].mxu0  ;;  %v3429_v53 = vrot.slane %v3339_v41, 5  ;;  %v1524_v50 = vmax.f32 %v1500_v14, 0.0  ;;  %v1470_v58 = vmul.f32 %v4605_v30, %v1407_v0  ;;  %v3839_v33 = vadd.f32 %v4764_v38, %v4761_v32 }
 0x1d5   : > { %v4799_v52 = vpop.f32.mrb[34].mxu0  ;;  %v3431_v44 = vrot.slane %v3340_v57, 4  ;;  %v3022_v28 = vmax.f32 %v2958_v31, %v2129_v24  ;;  %v3023_v22 = vmax.f32 %v2959_v17, %v2147_v47  ;;  %v3744_v34 = vpack.c.bf16 %v3021_v48, %v3021_v48 }
 0x1d6   : > { %v4804_v21 = vpop.f32.mrb[35].mxu0  ;;  %v4806_v61 = vpop.f32.mrb[32].mxu1  ;;  %v3430_v60 = vsel %vm3383_vm11, %v3429_v53, %v3428_v40  ;;  %v2148_v10 = vcombine.high %v1524_v50, %v1524_v50  ;;  %v2155_v13 = vrot.slane %v1524_v50, %v4614_v20  ;;  %v1501_v25 = vadd.f32 %v4610_v45, %v1470_v58 }
 0x1d7   : > { %v1421_v55 = vpop.f32.mrb[33].mxu1  ;;  %v3432_v32 = vsel %vm3386_vm12, %v3431_v44, %v3430_v60  ;;  %v3745_v38 = vpack.c.bf16 %v3022_v28, %v3022_v28  ;;  %v3746_v0 = vpack.c.bf16 %v3023_v22, %v3023_v22  ;;  %v3341_v4 = vunpack.c.l.b16 %v3744_v34 }
 0x1d8   : > { %v4811_v30 = vpop.f32.mrb[34].mxu1  ;;  %v2162_v62 = vrot.slane %v2148_v10, %v4614_v20  ;;  %v2163_v11 = vcombine.high %v2155_v13, %v2155_v13  ;;  %v2171_v7 = vrot.slane %v2155_v13, %v4614_v20  ;;  %v1525_v39 = vmax.f32 %v1501_v25, 0.0 }
 0x1d9   : > { %v1424_v42 = vpop.f32.mrb[35].mxu1  ;;  %v3342_v27 = vunpack.c.l.b16 %v3745_v38  ;;  %v3343_v3 = vunpack.c.l.b16 %v3746_v0  ;;  %v3433_v49 = vrot.slane %v3341_v4, 3  ;;  %v3842_v45 = vadd.f32 %v4771_v15, %v4767_v37  ;;  %v4852_v0 = vld [vmem:[%s5032_s3] ss:$0 sm:$0xff] }
 0x1da   : > { %v2164_v9 = vcombine.high %v2162_v62, %v2162_v62  ;;  %v2178_v12 = vrot.slane %v2162_v62, %v4614_v20  ;;  %v2185_v51 = vrot.slane %v2163_v11, %v4614_v20  ;;  %v2193_v46 = vcombine.high %v2171_v7, %v2171_v7 }
 0x1db   : > { %v3434_v63 = vsel %vm3389_vm13, %v3433_v49, %v3432_v32  ;;  %v3435_v2 = vrot.slane %v3342_v27, 2  ;;  %v3437_v23 = vrot.slane %v3343_v3, 1  ;;  %v2197_v18 = vcombine.high %v1525_v39, %v1525_v39 }
 0x1dc   : > { %v2192_v8 = vrot.slane %v2164_v9, %v4614_v20  ;;  %v2194_v24 = vcombine.high %v2178_v12, %v2178_v12  ;;  %v2195_v19 = vcombine.high %v2185_v51, %v2185_v51  ;;  %v2960_v1 = vmax.f32 %v2171_v7, %v2185_v51 }
 0x1dd   : > { %v3436_v56 = vsel %vm3392_vm14, %v3435_v2, %v3434_v63  ;;  %v2204_v37 = vrot.slane %v1525_v39, %v4614_v20  ;;  %v2211_v15 = vrot.slane %v2197_v18, %v4614_v20  ;;  %v1412_v54 = vadd.f32 %v3839_v33, %v4773_v43  ;;  %v4840_v33 = vld [vmem:[%s5031_s2] ss:$0 sm:$0xff] }
 0x1de   : > { %v3438_v26 = vsel %vm3395_vm15, %v3437_v23, %v3436_v56  ;;  %v2961_v5 = vmax.f32 %v2195_v19, %v2178_v12  ;;  %v3024_v16 = vmax.f32 %v2960_v1, %v2193_v46  ;;  %v2196_v35 = vcombine.high %v2192_v8, %v2192_v8 }
 0x1df   : > { %v3498_v29 = vpack.c.b16 %v3438_v26, %v3438_v26  ;;  %v2212_v41 = vcombine.high %v2204_v37, %v2204_v37  ;;  %v2213_v40 = vcombine.high %v2211_v15, %v2211_v15  ;;  %v2220_v47 = vrot.slane %v2204_v37, %v4614_v20  ;;  %v4828_v14 = vpop.f32.mrb[36].mxu0 }
 0x1e0   : > { %v3025_v57 = vmax.f32 %v2961_v5, %v2192_v8  ;;  %v3747_v31 = vpack.c.bf16 %v3024_v16, %v3024_v16  ;;  %v2227_v17 = vrot.slane %v2211_v15, %v4614_v20  ;;  %v2962_v48 = vmax.f32 %v2194_v24, %v2196_v35  ;;  %v4831_v53 = vpop.f32.mrb[37].mxu0 }
 0x1e1   : > { %3515 = vst.msk [vmem:[%s4670_s10 + $0xc] sm:$0xf] %vm3511_vm0, %v3498_v29  ;;  %v2234_v43 = vrot.slane %v2212_v41, %v4614_v20  ;;  %v2241_v50 = vrot.slane %v2213_v40, %v4614_v20  ;;  %v2242_v58 = vcombine.high %v2220_v47, %v2220_v47  ;;  %v1471_v44 = vmul.f32 %v4840_v33, %v1412_v54  ;;  %v4843_v28 = vpop.f32.mrb[38].mxu0 }
 0x1e2   : > { %v3748_v22 = vpack.c.bf16 %v3025_v57, %v3025_v57  ;;  %v3344_v34 = vunpack.c.l.b16 %v3747_v31  ;;  %v2243_v55 = vcombine.high %v2227_v17, %v2227_v17  ;;  %v3026_v60 = vmax.f32 %v2962_v48, %v2220_v47  ;;  %v4845_v10 = vpop.f32.mrb[39].mxu0 }
 0x1e3   : > { %v4847_v13 = vpop.f32.mrb[36].mxu1  ;;  %v2244_v25 = vcombine.high %v2234_v43, %v2234_v43  ;;  %v2963_v32 = vmax.f32 %v2234_v43, %v2242_v58  ;;  %v2964_v38 = vmax.f32 %v2227_v17, %v2241_v50  ;;  %v1502_v4 = vadd.f32 %v4852_v0, %v1471_v44 }
 0x1e4   : > { %v1429_v42 = vpop.f32.mrb[37].mxu1  ;;  %v3345_v62 = vunpack.c.l.b16 %v3748_v22  ;;  %v3749_v11 = vpack.c.bf16 %v3026_v60, %v3026_v60  ;;  %v2245_v7 = vcombine.high %v2241_v50, %v2241_v50  ;;  %v1415_v39 = vadd.f32 %v3842_v45, %v4781_v59 }
 0x1e5   : > { %v4856_v27 = vpop.f32.mrb[38].mxu1  ;;  %v3027_v3 = vmax.f32 %v2963_v32, %v2244_v25  ;;  %v3028_v49 = vmax.f32 %v2964_v38, %v2243_v55  ;;  %v1526_v9 = vmax.f32 %v1502_v4, 0.0  ;;  %v3845_v12 = vadd.f32 %v4797_v6, %v4793_v36 }
 0x1e6   : > { %v1432_v51 = vpop.f32.mrb[39].mxu1  ;;  %v3439_v46 = vrot.slane %v3345_v62, 7  ;;  %v3346_v63 = vunpack.c.l.b16 %v3749_v11  ;;  %v1472_v2 = vmul.f32 %v4840_v33, %v1415_v39  ;;  %v4863_v23 = vadd.f32 %v4804_v21, %v4799_v52 }
 0x1e7   : > { %v3750_v18 = vpack.c.bf16 %v3027_v3, %v3027_v3  ;;  %v3751_v8 = vpack.c.bf16 %v3028_v49, %v3028_v49  ;;  %v2246_v59 = vcombine.high %v1526_v9, %v1526_v9  ;;  %v2253_v45 = vrot.slane %v1526_v9, %v4614_v20 }
 0x1e8   : > { %v3440_v24 = vsel %vm3377_vm9, %v3439_v46, %v3344_v34  ;;  %v3441_v19 = vrot.slane %v3346_v63, 6  ;;  %v1503_v1 = vadd.f32 %v4852_v0, %v1472_v2  ;;  %v1420_v36 = vadd.f32 %v3845_v12, %v4806_v61 }
 0x1e9   : > { %v3347_v6 = vunpack.c.l.b16 %v3750_v18  ;;  %v3348_v56 = vunpack.c.l.b16 %v3751_v8  ;;  %v2260_v37 = vrot.slane %v2246_v59, %v4614_v20  ;;  %v2261_v15 = vcombine.high %v2253_v45, %v2253_v45 }
 0x1ea   : > { %v3442_v52 = vsel %vm3380_vm10, %v3441_v19, %v3440_v24  ;;  %v2269_v21 = vrot.slane %v2253_v45, %v4614_v20  ;;  %v1527_v54 = vmax.f32 %v1503_v1, 0.0  ;;  %v1473_v26 = vmul.f32 %v4840_v33, %v1420_v36 }
 0x1eb   : > { %v3443_v5 = vrot.slane %v3347_v6, 5  ;;  %v3445_v16 = vrot.slane %v3348_v56, 4  ;;  %v2262_v35 = vcombine.high %v2260_v37, %v2260_v37  ;;  %v2276_v29 = vrot.slane %v2260_v37, %v4614_v20 }
 0x1ec   : > { %v2283_v41 = vrot.slane %v2261_v15, %v4614_v20  ;;  %v2291_v61 = vcombine.high %v2269_v21, %v2269_v21  ;;  %v2965_v40 = vmax.f32 %v2245_v7, %v2269_v21  ;;  %v2295_v47 = vcombine.high %v1527_v54, %v1527_v54 }
 0x1ed   : > { %v3444_v57 = vsel %vm3383_vm11, %v3443_v5, %v3442_v52  ;;  %v2290_v31 = vrot.slane %v2262_v35, %v4614_v20  ;;  %v2292_v17 = vcombine.high %v2276_v29, %v2276_v29  ;;  %v2302_v48 = vrot.slane %v1527_v54, %v4614_v20 }
 0x1ee   : > { %v3446_v50 = vsel %vm3386_vm12, %v3445_v16, %v3444_v57  ;;  %v2293_v58 = vcombine.high %v2283_v41, %v2283_v41  ;;  %v3029_v44 = vmax.f32 %v2965_v40, %v2283_v41  ;;  %v2309_v22 = vrot.slane %v2295_v47, %v4614_v20 }
 0x1ef   : > { %v4878_v43 = vpop.f32.mrb[40].mxu0  ;;  %v2294_v55 = vcombine.high %v2290_v31, %v2290_v31  ;;  %v2967_v60 = vmax.f32 %v2290_v31, %v2292_v17  ;;  %v2310_v25 = vcombine.high %v2302_v48, %v2302_v48  ;;  %v2318_v32 = vrot.slane %v2302_v48, %v4614_v20 }
 0x1f0   : > { %v4882_v34 = vpop.f32.mrb[41].mxu0  ;;  %v2966_v4 = vmax.f32 %v2291_v61, %v2293_v58  ;;  %v3752_v42 = vpack.c.bf16 %v3029_v44, %v3029_v44  ;;  %v2311_v62 = vcombine.high %v2309_v22, %v2309_v22  ;;  %v2325_v11 = vrot.slane %v2309_v22, %v4614_v20 }
 0x1f1   : > { %v4885_v38 = vpop.f32.mrb[42].mxu0  ;;  %v3031_v3 = vmax.f32 %v2967_v60, %v2294_v55  ;;  %v2332_v49 = vrot.slane %v2310_v25, %v4614_v20  ;;  %v2340_v9 = vcombine.high %v2318_v32, %v2318_v32  ;;  %v1504_v12 = vadd.f32 %v4852_v0, %v1473_v26 }
 0x1f2   : > { %v4888_v7 = vpop.f32.mrb[43].mxu0  ;;  %v4890_v39 = vpop.f32.mrb[40].mxu1  ;;  %v3030_v46 = vmax.f32 %v2966_v4, %v2276_v29  ;;  %v3349_v63 = vunpack.c.l.b16 %v3752_v42  ;;  %v2339_v2 = vrot.slane %v2311_v62, %v4614_v20  ;;  %v2341_v18 = vcombine.high %v2325_v11, %v2325_v11 }
 0x1f3   : > { %v1437_v51 = vpop.f32.mrb[41].mxu1  ;;  %v3754_v59 = vpack.c.bf16 %v3031_v3, %v3031_v3  ;;  %v2342_v45 = vcombine.high %v2332_v49, %v2332_v49  ;;  %v2968_v24 = vmax.f32 %v2318_v32, %v2332_v49  ;;  %v1528_v19 = vmax.f32 %v1504_v12, 0.0 }
 0x1f4   : > { %v4895_v8 = vpop.f32.mrb[42].mxu1  ;;  %v3753_v36 = vpack.c.bf16 %v3030_v46, %v3030_v46  ;;  %v3447_v6 = vrot.slane %v3349_v63, 3  ;;  %v2343_v56 = vcombine.high %v2339_v2, %v2339_v2  ;;  %v1423_v37 = vadd.f32 %v4863_v23, %v4811_v30 }
 0x1f5   : > { %v1440_v1 = vpop.f32.mrb[43].mxu1  ;;  %v3351_v15 = vunpack.c.l.b16 %v3754_v59  ;;  %v2969_v52 = vmax.f32 %v2342_v45, %v2325_v11  ;;  %v3032_v21 = vmax.f32 %v2968_v24, %v2340_v9  ;;  %v2344_v54 = vcombine.high %v1528_v19, %v1528_v19 }
 0x1f6   : > { %v3350_v26 = vunpack.c.l.b16 %v3753_v36  ;;  %v3448_v5 = vsel %vm3389_vm13, %v3447_v6, %v3446_v50  ;;  %v2351_v16 = vrot.slane %v1528_v19, %v4614_v20  ;;  %v2970_v35 = vmax.f32 %v2341_v18, %v2343_v56 }
 0x1f7   : > { %v3451_v29 = vrot.slane %v3351_v15, 1  ;;  %v3033_v41 = vmax.f32 %v2969_v52, %v2339_v2  ;;  %v3755_v61 = vpack.c.bf16 %v3032_v21, %v3032_v21  ;;  %v2358_v40 = vrot.slane %v2344_v54, %v4614_v20 }
 0x1f8   : > { %v3449_v47 = vrot.slane %v3350_v26, 2  ;;  %v2359_v57 = vcombine.high %v2351_v16, %v2351_v16  ;;  %v2367_v31 = vrot.slane %v2351_v16, %v4614_v20  ;;  %v1474_v30 = vmul.f32 %v4840_v33, %v1423_v37 }
 0x1f9   : > { %v3756_v23 = vpack.c.bf16 %v3033_v41, %v3033_v41  ;;  %v3352_v17 = vunpack.c.l.b16 %v3755_v61  ;;  %v2360_v48 = vcombine.high %v2358_v40, %v2358_v40  ;;  %v2374_v58 = vrot.slane %v2358_v40, %v4614_v20 }
 0x1fa   : > { %v3450_v50 = vsel %vm3392_vm14, %v3449_v47, %v3448_v5  ;;  %v2381_v44 = vrot.slane %v2359_v57, %v4614_v20  ;;  %v2389_v22 = vcombine.high %v2367_v31, %v2367_v31  ;;  %v3034_v55 = vmax.f32 %v2970_v35, %v2367_v31 }
 0x1fb   : > { %v3452_v60 = vsel %vm3395_vm15, %v3451_v29, %v3450_v50  ;;  %v3353_v25 = vunpack.c.l.b16 %v3756_v23  ;;  %v2388_v32 = vrot.slane %v2360_v48, %v4614_v20  ;;  %v2390_v4 = vcombine.high %v2374_v58, %v2374_v58  ;;  %v4909_v42 = vpop.f32.mrb[44].mxu0 }
 0x1fc   : > { %v3499_v62 = vpack.c.b16 %v3452_v60, %v3452_v60  ;;  %v2391_v11 = vcombine.high %v2381_v44, %v2381_v44  ;;  %v2971_v3 = vmax.f32 %v2381_v44, %v2389_v22  ;;  %v3757_v49 = vpack.c.bf16 %v3034_v55, %v3034_v55  ;;  %v4911_v9 = vpop.f32.mrb[45].mxu0 }
 0x1fd   : > { %v3453_v12 = vrot.slane %v3353_v25, 7  ;;  %v2972_v51 = vmax.f32 %v2374_v58, %v2388_v32  ;;  %v1505_v46 = vadd.f32 %v4852_v0, %v1474_v30  ;;  %v2392_v63 = vcombine.high %v2388_v32, %v2388_v32  ;;  %v4914_v2 = vpop.f32.mrb[46].mxu0 }
 0x1fe   : > { %3516 = vst.msk [vmem:[%s4670_s10 + $0x10] sm:$0xf] %vm3511_vm0, %v3499_v62  ;;  %v3035_v18 = vmax.f32 %v2971_v3, %v2391_v11  ;;  %v3354_v59 = vunpack.c.l.b16 %v3757_v49  ;;  %v3851_v45 = vadd.f32 %v4831_v53, %v4828_v14  ;;  %v3854_v24 = vadd.f32 %v4845_v10, %v4843_v28  ;;  %v4922_v19 = vpop.f32.mrb[47].mxu0 }
 0x1ff   : > { %v4924_v1 = vpop.f32.mrb[44].mxu1  ;;  %v3454_v36 = vsel %vm3377_vm9, %v3453_v12, %v3352_v17  ;;  %v3036_v6 = vmax.f32 %v2972_v51, %v2390_v4  ;;  %v1529_v56 = vmax.f32 %v1505_v46, 0.0  ;;  %v3857_v37 = vadd.f32 %v4882_v34, %v4878_v43 }
 0x200   : > { %v1445_v15 = vpop.f32.mrb[45].mxu1  ;;  %v3758_v52 = vpack.c.bf16 %v3035_v18, %v3035_v18  ;;  %v3455_v21 = vrot.slane %v3354_v59, 6  ;;  %v1428_v54 = vadd.f32 %v3851_v45, %v4847_v13  ;;  %v1431_v14 = vadd.f32 %v3854_v24, %v4856_v27 }
 0x201   : > { %v4931_v53 = vpop.f32.mrb[46].mxu1  ;;  %v3759_v28 = vpack.c.bf16 %v3036_v6, %v3036_v6  ;;  %v2393_v10 = vcombine.high %v1529_v56, %v1529_v56  ;;  %v2400_v26 = vrot.slane %v1529_v56, %v4614_v20  ;;  %v4936_v5 = vadd.f32 %v4888_v7, %v4885_v38 }
 0x202   : > { %v1448_v16 = vpop.f32.mrb[47].mxu1  ;;  %v3355_v35 = vunpack.c.l.b16 %v3758_v52  ;;  %v3456_v43 = vsel %vm3380_vm10, %v3455_v21, %v3454_v36  ;;  %v1475_v34 = vmul.f32 %v4840_v33, %v1428_v54  ;;  %v1476_v13 = vmul.f32 %v4840_v33, %v1431_v14 }
 0x203   : > { %v3356_v29 = vunpack.c.l.b16 %v3759_v28  ;;  %v2407_v27 = vrot.slane %v2393_v10, %v4614_v20  ;;  %v2408_v41 = vcombine.high %v2400_v26, %v2400_v26  ;;  %v2416_v61 = vrot.slane %v2400_v26, %v4614_v20 }
 0x204   : > { %v3457_v40 = vrot.slane %v3355_v35, 5  ;;  %v1506_v47 = vadd.f32 %v4852_v0, %v1475_v34  ;;  %v1507_v38 = vadd.f32 %v4852_v0, %v1476_v13  ;;  %v1436_v7 = vadd.f32 %v3857_v37, %v4890_v39 }
 0x205   : > { %v3459_v57 = vrot.slane %v3356_v29, 4  ;;  %v2409_v31 = vcombine.high %v2407_v27, %v2407_v27  ;;  %v2423_v30 = vrot.slane %v2407_v27, %v4614_v20  ;;  %v2430_v23 = vrot.slane %v2408_v41, %v4614_v20 }
 0x206   : > { %v3458_v17 = vsel %vm3383_vm11, %v3457_v40, %v3456_v43  ;;  %v2438_v48 = vcombine.high %v2416_v61, %v2416_v61  ;;  %v2973_v58 = vmax.f32 %v2392_v63, %v2416_v61  ;;  %v1530_v50 = vmax.f32 %v1506_v47, 0.0 }
 0x207   : > { %v3460_v44 = vsel %vm3386_vm12, %v3459_v57, %v3458_v17  ;;  %v2437_v22 = vrot.slane %v2409_v31, %v4614_v20  ;;  %v2439_v55 = vcombine.high %v2423_v30, %v2423_v30  ;;  %v2440_v60 = vcombine.high %v2430_v23, %v2430_v23 }
 0x208   : > { %v3037_v25 = vmax.f32 %v2973_v58, %v2430_v23  ;;  %v2442_v32 = vcombine.high %v1530_v50, %v1530_v50  ;;  %v2449_v39 = vrot.slane %v1530_v50, %v4614_v20  ;;  %v1531_v4 = vmax.f32 %v1507_v38, 0.0 }
 0x209   : > { %v2441_v62 = vcombine.high %v2437_v22, %v2437_v22  ;;  %v2974_v11 = vmax.f32 %v2438_v48, %v2440_v60  ;;  %v2975_v3 = vmax.f32 %v2437_v22, %v2439_v55  ;;  %v1477_v49 = vmul.f32 %v4840_v33, %v1436_v7 }
 0x20a   : > { %v3760_v12 = vpack.c.bf16 %v3037_v25, %v3037_v25  ;;  %v2456_v51 = vrot.slane %v2442_v32, %v4614_v20  ;;  %v2457_v46 = vcombine.high %v2449_v39, %v2449_v39  ;;  %v2465_v63 = vrot.slane %v2449_v39, %v4614_v20 }
 0x20b   : > { %v3038_v18 = vmax.f32 %v2974_v11, %v2423_v30  ;;  %v3039_v59 = vmax.f32 %v2975_v3, %v2441_v62  ;;  %v2491_v45 = vcombine.high %v1531_v4, %v1531_v4  ;;  %v2498_v24 = vrot.slane %v1531_v4, %v4614_v20 }
 0x20c   : > { %v3357_v36 = vunpack.c.l.b16 %v3760_v12  ;;  %v2458_v6 = vcombine.high %v2456_v51, %v2456_v51  ;;  %v2472_v56 = vrot.slane %v2456_v51, %v4614_v20  ;;  %v2479_v37 = vrot.slane %v2457_v46, %v4614_v20 }
 0x20d   : > { %v3761_v15 = vpack.c.bf16 %v3038_v18, %v3038_v18  ;;  %v3762_v52 = vpack.c.bf16 %v3039_v59, %v3039_v59  ;;  %v2487_v21 = vcombine.high %v2465_v63, %v2465_v63  ;;  %v2505_v54 = vrot.slane %v2491_v45, %v4614_v20 }
 0x20e   : > { %v3461_v14 = vrot.slane %v3357_v36, 3  ;;  %v2486_v28 = vrot.slane %v2458_v6, %v4614_v20  ;;  %v2488_v10 = vcombine.high %v2472_v56, %v2472_v56  ;;  %v2489_v26 = vcombine.high %v2479_v37, %v2479_v37 }
 0x20f   : > { %v3358_v16 = vunpack.c.l.b16 %v3761_v15  ;;  %v3359_v35 = vunpack.c.l.b16 %v3762_v52  ;;  %v2976_v43 = vmax.f32 %v2465_v63, %v2479_v37  ;;  %v2506_v34 = vcombine.high %v2498_v24, %v2498_v24 }
 0x210   : > { %v3462_v13 = vsel %vm3389_vm13, %v3461_v14, %v3460_v44  ;;  %v2977_v29 = vmax.f32 %v2489_v26, %v2472_v56  ;;  %v2490_v27 = vcombine.high %v2486_v28, %v2486_v28  ;;  %v2507_v41 = vcombine.high %v2505_v54, %v2505_v54 }
 0x211   : > { %v3463_v61 = vrot.slane %v3358_v16, 2  ;;  %v3465_v40 = vrot.slane %v3359_v35, 1  ;;  %v3040_v47 = vmax.f32 %v2976_v43, %v2487_v21  ;;  %v2514_v38 = vrot.slane %v2498_v24, %v4614_v20 }
 0x212   : > { %v3041_v7 = vmax.f32 %v2977_v29, %v2486_v28  ;;  %v2521_v57 = vrot.slane %v2505_v54, %v4614_v20  ;;  %v2528_v31 = vrot.slane %v2506_v34, %v4614_v20  ;;  %v2535_v30 = vrot.slane %v2507_v41, %v4614_v20 }
 0x213   : > { %v3464_v23 = vsel %vm3392_vm14, %v3463_v61, %v3462_v13  ;;  %v3763_v17 = vpack.c.bf16 %v3040_v47, %v3040_v47  ;;  %v2536_v48 = vcombine.high %v2514_v38, %v2514_v38  ;;  %v2978_v58 = vmax.f32 %v2488_v10, %v2490_v27 }
 0x214   : > { %v3466_v50 = vsel %vm3395_vm15, %v3465_v40, %v3464_v23  ;;  %v3764_v44 = vpack.c.bf16 %v3041_v7, %v3041_v7  ;;  %v2537_v22 = vcombine.high %v2521_v57, %v2521_v57  ;;  %v2538_v55 = vcombine.high %v2528_v31, %v2528_v31 }
 0x215   : > { %v3500_v60 = vpack.c.b16 %v3466_v50, %v3466_v50  ;;  %v3360_v25 = vunpack.c.l.b16 %v3763_v17  ;;  %v2979_v32 = vmax.f32 %v2528_v31, %v2536_v48  ;;  %v2980_v39 = vmax.f32 %v2521_v57, %v2535_v30 }
 0x216   : > { %v3361_v4 = vunpack.c.l.b16 %v3764_v44  ;;  %v3042_v62 = vmax.f32 %v2978_v58, %v2514_v38  ;;  %v1508_v11 = vadd.f32 %v4852_v0, %v1477_v49  ;;  %v2539_v3 = vcombine.high %v2535_v30, %v2535_v30 }
 0x217   : > { %3517 = vst.msk [vmem:[%s4670_s10 + $0x14] sm:$0xf] %vm3511_vm0, %v3500_v60  ;;  %v3043_v12 = vmax.f32 %v2979_v32, %v2538_v55  ;;  %v3044_v51 = vmax.f32 %v2980_v39, %v2537_v22  ;;  %v1439_v46 = vadd.f32 %v4936_v5, %v4895_v8  ;;  %v3863_v63 = vadd.f32 %v4911_v9, %v4909_v42 }
 0x218   : > { %v3467_v18 = vrot.slane %v3361_v4, 7  ;;  %v3765_v59 = vpack.c.bf16 %v3042_v62, %v3042_v62  ;;  %v1532_v45 = vmax.f32 %v1508_v11, 0.0  ;;  %v3866_v24 = vadd.f32 %v4922_v19, %v4914_v2 }
 0x219   : > { %v3766_v36 = vpack.c.bf16 %v3043_v12, %v3043_v12  ;;  %v3767_v6 = vpack.c.bf16 %v3044_v51, %v3044_v51  ;;  %v1478_v49 = vmul.f32 %v4840_v33, %v1439_v46  ;;  %v1444_v56 = vadd.f32 %v3863_v63, %v4924_v1 }
 0x21a   : > { %v3468_v37 = vsel %vm3377_vm9, %v3467_v18, %v3360_v25  ;;  %v3362_v15 = vunpack.c.l.b16 %v3765_v59  ;;  %v2540_v52 = vcombine.high %v1532_v45, %v1532_v45  ;;  %v2547_v8 = vrot.slane %v1532_v45, %v4614_v20 }
 0x21b   : > { %v3363_v5 = vunpack.c.l.b16 %v3766_v36  ;;  %v3364_v42 = vunpack.c.l.b16 %v3767_v6  ;;  %v1509_v9 = vadd.f32 %v4852_v0, %v1478_v49  ;;  %v1479_v21 = vmul.f32 %v4840_v33, %v1444_v56 }
 0x21c   : > { %v3469_v54 = vrot.slane %v3362_v15, 6  ;;  %v2554_v2 = vrot.slane %v2540_v52, %v4614_v20  ;;  %v2555_v19 = vcombine.high %v2547_v8, %v2547_v8  ;;  %v2563_v14 = vrot.slane %v2547_v8, %v4614_v20 }
 0x21d   : > { %v3471_v28 = vrot.slane %v3363_v5, 5  ;;  %v3473_v1 = vrot.slane %v3364_v42, 4  ;;  %v1533_v10 = vmax.f32 %v1509_v9, 0.0  ;;  %v1510_v26 = vadd.f32 %v4852_v0, %v1479_v21 }
 0x21e   : > { %v3470_v16 = vsel %vm3380_vm10, %v3469_v54, %v3468_v37  ;;  %v2556_v35 = vcombine.high %v2554_v2, %v2554_v2  ;;  %v2570_v43 = vrot.slane %v2554_v2, %v4614_v20  ;;  %v2577_v34 = vrot.slane %v2555_v19, %v4614_v20 }
 0x21f   : > { %v3472_v13 = vsel %vm3383_vm11, %v3471_v28, %v3470_v16  ;;  %v2585_v29 = vcombine.high %v2563_v14, %v2563_v14  ;;  %v2981_v27 = vmax.f32 %v2539_v3, %v2563_v14  ;;  %v2589_v41 = vcombine.high %v1533_v10, %v1533_v10 }
 0x220   : > { %v3474_v61 = vsel %vm3386_vm12, %v3473_v1, %v3472_v13  ;;  %v2584_v40 = vrot.slane %v2556_v35, %v4614_v20  ;;  %v2586_v47 = vcombine.high %v2570_v43, %v2570_v43  ;;  %v2587_v38 = vcombine.high %v2577_v34, %v2577_v34 }
 0x221   : > { %v3045_v7 = vmax.f32 %v2981_v27, %v2577_v34  ;;  %v2596_v57 = vrot.slane %v1533_v10, %v4614_v20  ;;  %v2603_v31 = vrot.slane %v2589_v41, %v4614_v20  ;;  %v1534_v30 = vmax.f32 %v1510_v26, 0.0 }
 0x222   : > { %v2588_v23 = vcombine.high %v2584_v40, %v2584_v40  ;;  %v2982_v17 = vmax.f32 %v2585_v29, %v2587_v38  ;;  %v2983_v48 = vmax.f32 %v2584_v40, %v2586_v47  ;;  %v1447_v58 = vadd.f32 %v3866_v24, %v4931_v53 }
 0x223   : > { %v3768_v50 = vpack.c.bf16 %v3045_v7, %v3045_v7  ;;  %v2604_v44 = vcombine.high %v2596_v57, %v2596_v57  ;;  %v2605_v22 = vcombine.high %v2603_v31, %v2603_v31  ;;  %v2612_v55 = vrot.slane %v2596_v57, %v4614_v20 }
 0x224   : > { %v3046_v60 = vmax.f32 %v2982_v17, %v2570_v43  ;;  %v3047_v25 = vmax.f32 %v2983_v48, %v2588_v23  ;;  %v2638_v32 = vcombine.high %v1534_v30, %v1534_v30  ;;  %v2619_v4 = vrot.slane %v2603_v31, %v4614_v20 }
 0x225   : > { %v3365_v39 = vunpack.c.l.b16 %v3768_v50  ;;  %v2626_v62 = vrot.slane %v2604_v44, %v4614_v20  ;;  %v2633_v11 = vrot.slane %v2605_v22, %v4614_v20  ;;  %v2634_v51 = vcombine.high %v2612_v55, %v2612_v55 }
 0x226   : > { %v3769_v3 = vpack.c.bf16 %v3046_v60, %v3046_v60  ;;  %v3770_v12 = vpack.c.bf16 %v3047_v25, %v3047_v25  ;;  %v2645_v53 = vrot.slane %v1534_v30, %v4614_v20  ;;  %v2652_v36 = vrot.slane %v2638_v32, %v4614_v20 }
 0x227   : > { %v3475_v46 = vrot.slane %v3365_v39, 3  ;;  %v2636_v63 = vcombine.high %v2626_v62, %v2626_v62  ;;  %v2984_v18 = vmax.f32 %v2612_v55, %v2626_v62  ;;  %v2637_v59 = vcombine.high %v2633_v11, %v2633_v11 }
 0x228   : > { %v3366_v45 = vunpack.c.l.b16 %v3769_v3  ;;  %v3367_v24 = vunpack.c.l.b16 %v3770_v12  ;;  %v2653_v6 = vcombine.high %v2645_v53, %v2645_v53  ;;  %v2635_v56 = vcombine.high %v2619_v4, %v2619_v4 }
 0x229   : > { %v3476_v49 = vsel %vm3389_vm13, %v3475_v46, %v3474_v61  ;;  %v2985_v37 = vmax.f32 %v2636_v63, %v2619_v4  ;;  %v2661_v15 = vrot.slane %v2645_v53, %v4614_v20  ;;  %v2654_v5 = vcombine.high %v2652_v36, %v2652_v36 }
 0x22a   : > { %v3477_v52 = vrot.slane %v3366_v45, 2  ;;  %v3479_v8 = vrot.slane %v3367_v24, 1  ;;  %v2668_v42 = vrot.slane %v2652_v36, %v4614_v20  ;;  %v3048_v9 = vmax.f32 %v2984_v18, %v2634_v51 }
 0x22b   : > { %v3049_v21 = vmax.f32 %v2985_v37, %v2633_v11  ;;  %v2675_v54 = vrot.slane %v2653_v6, %v4614_v20  ;;  %v2683_v2 = vcombine.high %v2661_v15, %v2661_v15  ;;  %v2682_v14 = vrot.slane %v2654_v5, %v4614_v20 }
 0x22c   : > { %v3478_v19 = vsel %vm3392_vm14, %v3477_v52, %v3476_v49  ;;  %v2986_v28 = vmax.f32 %v2635_v56, %v2637_v59  ;;  %v2684_v26 = vcombine.high %v2668_v42, %v2668_v42  ;;  %v3771_v29 = vpack.c.bf16 %v3048_v9, %v3048_v9 }
 0x22d   : > { %v3480_v1 = vsel %vm3395_vm15, %v3479_v8, %v3478_v19  ;;  %v3772_v10 = vpack.c.bf16 %v3049_v21, %v3049_v21  ;;  %v2685_v16 = vcombine.high %v2675_v54, %v2675_v54  ;;  %v2987_v43 = vmax.f32 %v2675_v54, %v2683_v2 }
 0x22e   : > { %v3501_v35 = vpack.c.b16 %v3480_v1, %v3480_v1  ;;  %v2988_v34 = vmax.f32 %v2668_v42, %v2682_v14  ;;  %v3050_v13 = vmax.f32 %v2986_v28, %v2661_v15  ;;  %v1480_v41 = vmul.f32 %v4840_v33, %v1447_v58 }
 0x22f   : > { %v3369_v27 = vunpack.c.l.b16 %v3772_v10  ;;  %v3051_v61 = vmax.f32 %v2987_v43, %v2685_v16  ;;  %v3368_v23 = vunpack.c.l.b16 %v3771_v29  ;;  %v2686_v32 = vcombine.high %v2682_v14, %v2682_v14 }
 0x230   : > { %3518 = vst.msk [vmem:[%s4670_s10 + $0x18] sm:$0xf] %vm3511_vm0, %v3501_v35  ;;  %v3052_v40 = vmax.f32 %v2988_v34, %v2684_v26  ;;  %v3773_v47 = vpack.c.bf16 %v3050_v13, %v3050_v13  ;;  %v1511_v7 = vadd.f32 %v4852_v0, %v1480_v41 }
 0x231   : > { %v3481_v38 = vrot.slane %v3369_v27, 7  ;;  %v3774_v57 = vpack.c.bf16 %v3051_v61, %v3051_v61 }
 0x232   : > { %v3775_v31 = vpack.c.bf16 %v3052_v40, %v3052_v40  ;;  %v3370_v30 = vunpack.c.l.b16 %v3773_v47  ;;  %v1535_v17 = vmax.f32 %v1511_v7, 0.0 }
 0x233   : > { %v3371_v48 = vunpack.c.l.b16 %v3774_v57  ;;  %v3482_v22 = vsel %vm3377_vm9, %v3481_v38, %v3368_v23 }
 0x234   : > { %v3372_v50 = vunpack.c.l.b16 %v3775_v31  ;;  %v3483_v44 = vrot.slane %v3370_v30, 6  ;;  %v2687_v55 = vcombine.high %v1535_v17, %v1535_v17  ;;  %v2694_v33 = vrot.slane %v1535_v17, %v4614_v20 }
 0x235   : > { %v3485_v60 = vrot.slane %v3371_v48, 5 }
 0x236   : > { %v3484_v58 = vsel %vm3380_vm10, %v3483_v44, %v3482_v22  ;;  %v3487_v25 = vrot.slane %v3372_v50, 4  ;;  %v2701_v0 = vrot.slane %v2687_v55, %v4614_v20  ;;  %v2702_v39 = vcombine.high %v2694_v33, %v2694_v33 }
 0x237   : > { %v2710_v4 = vrot.slane %v2694_v33, %v4614_v20  ;;  %v3486_v62 = vsel %vm3383_vm11, %v3485_v60, %v3484_v58 }
 0x238   : > { %v3488_v11 = vsel %vm3386_vm12, %v3487_v25, %v3486_v62  ;;  %v2703_v3 = vcombine.high %v2701_v0, %v2701_v0  ;;  %v2717_v12 = vrot.slane %v2701_v0, %v4614_v20  ;;  %v2724_v51 = vrot.slane %v2702_v39, %v4614_v20 }
 0x239   : > { %v2989_v53 = vmax.f32 %v2686_v32, %v2710_v4  ;;  %v2732_v63 = vcombine.high %v2710_v4, %v2710_v4 }
 0x23a   : > { %v2731_v46 = vrot.slane %v2703_v3, %v4614_v20  ;;  %v2733_v18 = vcombine.high %v2717_v12, %v2717_v12  ;;  %v2734_v59 = vcombine.high %v2724_v51, %v2724_v51 }
 0x23b   : > { %v3053_v45 = vmax.f32 %v2989_v53, %v2724_v51 }
 0x23c   : > { %v2735_v24 = vcombine.high %v2731_v46, %v2731_v46  ;;  %v2990_v36 = vmax.f32 %v2732_v63, %v2734_v59  ;;  %v2991_v6 = vmax.f32 %v2731_v46, %v2733_v18 }
 0x23d   : > { %v3776_v49 = vpack.c.bf16 %v3053_v45, %v3053_v45 }
 0x23e   : > { %v3054_v56 = vmax.f32 %v2990_v36, %v2717_v12  ;;  %v3055_v37 = vmax.f32 %v2991_v6, %v2735_v24 }
 0x23f   : > { %v3373_v15 = vunpack.c.l.b16 %v3776_v49 }
 0x240   : > { %v3777_v52 = vpack.c.bf16 %v3054_v56, %v3054_v56  ;;  %v3778_v8 = vpack.c.bf16 %v3055_v37, %v3055_v37 }
 0x241   : > { %v3489_v5 = vrot.slane %v3373_v15, 3 }
 0x242   : > { %v3374_v42 = vunpack.c.l.b16 %v3777_v52  ;;  %v3375_v9 = vunpack.c.l.b16 %v3778_v8 }
 0x243   : > { %v3490_v21 = vsel %vm3389_vm13, %v3489_v5, %v3488_v11 }
 0x244   : > { %v3491_v20 = vrot.slane %v3374_v42, 2  ;;  %v3493_v54 = vrot.slane %v3375_v9, 1 }
 0x246   : > { %v3492_v2 = vsel %vm3392_vm14, %v3491_v20, %v3490_v21 }
 0x247   : > { %v3494_v19 = vsel %vm3395_vm15, %v3493_v54, %v3492_v2 }
 0x248   : > { %v3502_v14 = vpack.c.b16 %v3494_v19, %v3494_v19 }
 0x24a   : > { %3519 = vst.msk [vmem:[%s4670_s10 + $0x1c] sm:$0xf] %vm3511_vm0, %v3502_v14 }
 0x24b PF: > { %s14_s15 = sadd.s32 1, %s3944_s15  }
 0x24c   : > { %p11_p4 = scmp.ge.s32.totalorder %s14_s15, 4  }
 0x24e   :  { %13 = sbr.rel (!%p11_p4) target bundleno = 1 (0x1), region = 66 }

// kernel: custom-call
= control target key start
LH: loop header
LB: loop body
LE: loop exit
PB: predicated region body
PF: predicated region fallthrough
CT: control target
= control target key end

     0   :  { %s6_s0 = inlined_call_operand.vmem [shape: f32[2048], index: 0, kind: output, shape index: {}]  }

// kernel: onsets_and_frames_forward.7
= control target key start
LH: loop header
LB: loop body
LE: loop exit
PB: predicated region body
PF: predicated region fallthrough
CT: control target
= control target key end

     0   :  { %vm1324_vm0 = vcmask 523264   ;;  %s3503_s1 = inlined_call_operand.vmem [shape: bf16[192,2048], index: 1, kind: input, shape index: {}]   ;;  %s3504_s0 = inlined_call_operand.vmem [shape: bf16[32,192], index: 0, kind: input, shape index: {}]   ;;  %s3505_s2 = inlined_call_operand.vmem [shape: f32[1,2048], index: 2, kind: input, shape index: {}]   ;;  %s3506_s3 = inlined_call_operand.vmem [shape: f32[1,2048], index: 3, kind: input, shape index: {}]   ;;  %s3507_s4 = inlined_call_operand.vmem [shape: f32[32,2048], index: 4, kind: output, shape index: {}]  }
   0x1   :  { %v154_v0 = vld [vmem:[%s3503_s1] sm:$0xff]  ;;  %v155_v2 = vld [vmem:[%s3503_s1 + $0x8] sm:$0xff] }
   0x2   :  { %v162_v1 = vld [vmem:[%s3503_s1 + $0x40] sm:$0xff]  ;;  %v163_v4 = vld [vmem:[%s3503_s1 + $0x48] sm:$0xff] }
   0x3   :  { %v2319_v3 = vcombine.high %v154_v0, %v162_v1  ;;  %v2318_v5 = vcombine.low %v154_v0, %v162_v1  ;;  %v170_v6 = vld [vmem:[%s3503_s1 + $0x80] sm:$0xff]  ;;  %v2321_v8 = vcombine.high %v155_v2, %v163_v4  ;;  %v2320_v9 = vcombine.low %v155_v2, %v163_v4  ;;  %v171_v11 = vld [vmem:[%s3503_s1 + $0x88] sm:$0xff] }
   0x4   :  { %v178_v7 = vld [vmem:[%s3503_s1 + $0xc0] sm:$0xff]  ;;  %v179_v12 = vld [vmem:[%s3503_s1 + $0xc8] sm:$0xff] }
   0x5   :  { %v2335_v10 = vcombine.high %v170_v6, %v178_v7  ;;  %v186_v13 = vld [vmem:[%s3503_s1 + $0x100] sm:$0xff]  ;;  %1331 = vmatprep.subr.bf16.mxu0 %v2319_v3  ;;  %v2337_v14 = vcombine.high %v171_v11, %v179_v12  ;;  %v187_v16 = vld [vmem:[%s3503_s1 + $0x108] sm:$0xff]  ;;  %1384 = vmatprep.subr.bf16.mxu1 %v2321_v8  ;;  %v2334_v18 = vcombine.low %v170_v6, %v178_v7 }
   0x6   :  { %v194_v15 = vld [vmem:[%s3503_s1 + $0x140] sm:$0xff]  ;;  %v195_v17 = vld [vmem:[%s3503_s1 + $0x148] sm:$0xff]  ;;  %1332 = vmatpush1.bf16.msra.mxu0 %v2318_v5  ;;  %1385 = vmatpush1.bf16.msra.mxu1 %v2320_v9  ;;  %v2336_v19 = vcombine.low %v171_v11, %v179_v12 }
   0x7   :  { %1333 = vmatprep.subr.bf16.mxu0 %v2335_v10  ;;  %v2351_v20 = vcombine.high %v186_v13, %v194_v15  ;;  %1386 = vmatprep.subr.bf16.mxu1 %v2337_v14  ;;  %v2353_v21 = vcombine.high %v187_v16, %v195_v17  ;;  %v202_v22 = vld [vmem:[%s3503_s1 + $0x180] sm:$0xff]  ;;  %v203_v24 = vld [vmem:[%s3503_s1 + $0x188] sm:$0xff]  ;;  %v2350_v26 = vcombine.low %v186_v13, %v194_v15 }
   0x8   :  { %v210_v23 = vld [vmem:[%s3503_s1 + $0x1c0] sm:$0xff]  ;;  %v211_v25 = vld [vmem:[%s3503_s1 + $0x1c8] sm:$0xff]  ;;  %v2352_v27 = vcombine.low %v187_v16, %v195_v17 }
   0x9   :  { %v2367_v28 = vcombine.high %v202_v22, %v210_v23  ;;  %v2369_v29 = vcombine.high %v203_v24, %v211_v25  ;;  %v218_v30 = vld [vmem:[%s3503_s1 + $0x200] sm:$0xff]  ;;  %v219_v32 = vld [vmem:[%s3503_s1 + $0x208] sm:$0xff]  ;;  %v2366_v34 = vcombine.low %v202_v22, %v210_v23  ;;  %v2368_v35 = vcombine.low %v203_v24, %v211_v25 }
   0xa   :  { %1334 = vmatpush1.bf16.msra.mxu0 %v2334_v18  ;;  %1387 = vmatpush1.bf16.msra.mxu1 %v2336_v19  ;;  %v226_v31 = vld [vmem:[%s3503_s1 + $0x240] sm:$0xff]  ;;  %v227_v33 = vld [vmem:[%s3503_s1 + $0x248] sm:$0xff] }
   0xb   :  { %1335 = vmatprep.subr.bf16.mxu0 %v2351_v20  ;;  %1388 = vmatprep.subr.bf16.mxu1 %v2353_v21  ;;  %v2383_v36 = vcombine.high %v218_v30, %v226_v31  ;;  %v2385_v37 = vcombine.high %v219_v32, %v227_v33  ;;  %v234_v38 = vld [vmem:[%s3503_s1 + $0x280] sm:$0xff]  ;;  %v235_v40 = vld [vmem:[%s3503_s1 + $0x288] sm:$0xff]  ;;  %v2382_v42 = vcombine.low %v218_v30, %v226_v31  ;;  %v156_v31 = vld [vmem:[%s3503_s1 + $0x10] sm:$0xff] }
   0xc   :  { %v242_v39 = vld [vmem:[%s3503_s1 + $0x2c0] sm:$0xff]  ;;  %v243_v41 = vld [vmem:[%s3503_s1 + $0x2c8] sm:$0xff]  ;;  %v2384_v44 = vcombine.low %v219_v32, %v227_v33  ;;  %v164_v32 = vld [vmem:[%s3503_s1 + $0x50] sm:$0xff] }
   0xd   :  { %v2632_v43 = vld [vmem:[%s3504_s0 + $0x4] ss:$8 sps:$4 sm:$0xff]   ;;  %v2399_v45 = vcombine.high %v234_v38, %v242_v39  ;;  %v2401_v46 = vcombine.high %v235_v40, %v243_v41  ;;  %v2398_v51 = vcombine.low %v234_v38, %v242_v39  ;;  %v2400_v52 = vcombine.low %v235_v40, %v243_v41  ;;  %v157_v33 = vld [vmem:[%s3503_s1 + $0x18] sm:$0xff]  ;;  %v172_v39 = vld [vmem:[%s3503_s1 + $0x90] sm:$0xff] }
   0xe   :  { %1336 = vmatpush1.bf16.msra.mxu0 %v2350_v26  ;;  %1389 = vmatpush1.bf16.msra.mxu1 %v2352_v27  ;;  %v250_v47 = vld [vmem:[%s3503_s1 + $0x300] sm:$0xff]  ;;  %v251_v49 = vld [vmem:[%s3503_s1 + $0x308] sm:$0xff]  ;;  %v180_v40 = vld [vmem:[%s3503_s1 + $0xd0] sm:$0xff] }
   0xf   :  { %1337 = vmatprep.subr.bf16.mxu0 %v2367_v28  ;;  %1390 = vmatprep.subr.bf16.mxu1 %v2369_v29  ;;  %v258_v48 = vld [vmem:[%s3503_s1 + $0x340] sm:$0xff]  ;;  %v259_v50 = vld [vmem:[%s3503_s1 + $0x348] sm:$0xff] }
  0x10   :  { %2510 = vmatprep.mubr.msk.bf16.mxu0 %vm1324_vm0, %v2632_v43  ;;  %2512 = vmatprep.mubr.msk.bf16.mxu1 %vm1324_vm0, %v2632_v43  ;;  %v2415_v53 = vcombine.high %v250_v47, %v258_v48  ;;  %v2417_v54 = vcombine.high %v251_v49, %v259_v50  ;;  %v266_v55 = vld [vmem:[%s3503_s1 + $0x380] sm:$0xff]  ;;  %v267_v57 = vld [vmem:[%s3503_s1 + $0x388] sm:$0xff]  ;;  %v2414_v59 = vcombine.low %v250_v47, %v258_v48 }
  0x11   :  { %v274_v56 = vld [vmem:[%s3503_s1 + $0x3c0] sm:$0xff]  ;;  %v275_v58 = vld [vmem:[%s3503_s1 + $0x3c8] sm:$0xff]  ;;  %v2416_v60 = vcombine.low %v251_v49, %v259_v50  ;;  %v2339_v47 = vcombine.high %v172_v39, %v180_v40  ;;  %v188_v49 = vld [vmem:[%s3503_s1 + $0x110] sm:$0xff] }
  0x12   :  { %1338 = vmatpush1.bf16.msra.mxu0 %v2366_v34  ;;  %1391 = vmatpush1.bf16.msra.mxu1 %v2368_v35  ;;  %v2431_v61 = vcombine.high %v266_v55, %v274_v56  ;;  %v2433_v62 = vcombine.high %v267_v57, %v275_v58  ;;  %v282_v63 = vld [vmem:[%s3503_s1 + $0x400] sm:$0xff]  ;;  %v283_v1 = vld [vmem:[%s3503_s1 + $0x408] sm:$0xff]  ;;  %v2430_v3 = vcombine.low %v266_v55, %v274_v56  ;;  %v165_v34 = vld [vmem:[%s3503_s1 + $0x58] sm:$0xff] }
  0x13   :  { %1339 = vmatprep.subr.bf16.mxu0 %v2383_v36  ;;  %1392 = vmatprep.subr.bf16.mxu1 %v2385_v37  ;;  %v290_v0 = vld [vmem:[%s3503_s1 + $0x440] sm:$0xff]  ;;  %v291_v2 = vld [vmem:[%s3503_s1 + $0x448] sm:$0xff]  ;;  %v2432_v4 = vcombine.low %v267_v57, %v275_v58  ;;  %v2323_v37 = vcombine.high %v156_v31, %v164_v32  ;;  %v2325_v38 = vcombine.high %v157_v33, %v165_v34  ;;  %v196_v50 = vld [vmem:[%s3503_s1 + $0x150] sm:$0xff] }
  0x14   :  { %v2447_v5 = vcombine.high %v282_v63, %v290_v0  ;;  %v2449_v6 = vcombine.high %v283_v1, %v291_v2  ;;  %v298_v7 = vld [vmem:[%s3503_s1 + $0x480] sm:$0xff]  ;;  %v299_v9 = vld [vmem:[%s3503_s1 + $0x488] sm:$0xff]  ;;  %v2446_v11 = vcombine.low %v282_v63, %v290_v0  ;;  %v2448_v12 = vcombine.low %v283_v1, %v291_v2  ;;  %v204_v58 = vld [vmem:[%s3503_s1 + $0x190] sm:$0xff] }
  0x15   :  { %v306_v8 = vld [vmem:[%s3503_s1 + $0x4c0] sm:$0xff]  ;;  %v307_v10 = vld [vmem:[%s3503_s1 + $0x4c8] sm:$0xff]  ;;  %v2355_v56 = vcombine.high %v188_v49, %v196_v50  ;;  %v2354_v63 = vcombine.low %v188_v49, %v196_v50 }
  0x16   :  { %1340 = vmatpush1.bf16.msra.mxu0 %v2382_v42  ;;  %1393 = vmatpush1.bf16.msra.mxu1 %v2384_v44  ;;  %v2463_v13 = vcombine.high %v298_v7, %v306_v8  ;;  %v2465_v14 = vcombine.high %v299_v9, %v307_v10  ;;  %v314_v15 = vld [vmem:[%s3503_s1 + $0x500] sm:$0xff]  ;;  %v315_v17 = vld [vmem:[%s3503_s1 + $0x508] sm:$0xff]  ;;  %v2462_v19 = vcombine.low %v298_v7, %v306_v8  ;;  %v173_v42 = vld [vmem:[%s3503_s1 + $0x98] sm:$0xff] }
  0x17   :  { %1341 = vmatprep.subr.bf16.mxu0 %v2399_v45  ;;  %1394 = vmatprep.subr.bf16.mxu1 %v2401_v46  ;;  %v322_v16 = vld [vmem:[%s3503_s1 + $0x540] sm:$0xff]  ;;  %v323_v18 = vld [vmem:[%s3503_s1 + $0x548] sm:$0xff]  ;;  %v2464_v20 = vcombine.low %v299_v9, %v307_v10  ;;  %v181_v44 = vld [vmem:[%s3503_s1 + $0xd8] sm:$0xff]  ;;  %v2322_v45 = vcombine.low %v156_v31, %v164_v32  ;;  %v2324_v46 = vcombine.low %v157_v33, %v165_v34 }
  0x18   :  { %v2479_v21 = vcombine.high %v314_v15, %v322_v16  ;;  %v2481_v22 = vcombine.high %v315_v17, %v323_v18  ;;  %v330_v23 = vld [vmem:[%s3503_s1 + $0x580] sm:$0xff]  ;;  %v331_v25 = vld [vmem:[%s3503_s1 + $0x588] sm:$0xff]  ;;  %v2478_v27 = vcombine.low %v314_v15, %v322_v16  ;;  %v2480_v28 = vcombine.low %v315_v17, %v323_v18 }
  0x19   :  { %v338_v24 = vld [vmem:[%s3503_s1 + $0x5c0] sm:$0xff]  ;;  %v339_v26 = vld [vmem:[%s3503_s1 + $0x5c8] sm:$0xff]  ;;  %v2341_v48 = vcombine.high %v173_v42, %v181_v44  ;;  %v2340_v55 = vcombine.low %v173_v42, %v181_v44 }
  0x1a   :  { %1342 = vmatpush1.bf16.msra.mxu0 %v2398_v51  ;;  %1395 = vmatpush1.bf16.msra.mxu1 %v2400_v52  ;;  %v2495_v29 = vcombine.high %v330_v23, %v338_v24  ;;  %v2497_v30 = vcombine.high %v331_v25, %v339_v26  ;;  %v2494_v35 = vcombine.low %v330_v23, %v338_v24  ;;  %v2731_v41 = vld [vmem:[%s3504_s0] ss:$8 sps:$4 sm:$0xff]   ;;  %v2748_v51 = vld [vmem:[%s3504_s0 + $0x14] ss:$8 sps:$4 sm:$0xff]  }
  0x1b   :  { %1343 = vmatprep.subr.bf16.mxu0 %v2415_v53  ;;  %1396 = vmatprep.subr.bf16.mxu1 %v2417_v54  ;;  %v2496_v36 = vcombine.low %v331_v25, %v339_v26  ;;  %v189_v52 = vld [vmem:[%s3503_s1 + $0x118] sm:$0xff]  ;;  %v2338_v54 = vcombine.low %v172_v39, %v180_v40 }
  0x1c   :  { %v197_v53 = vld [vmem:[%s3503_s1 + $0x158] sm:$0xff] }
  0x1d   :  { %v2357_v57 = vcombine.high %v189_v52, %v197_v53  ;;  %v2356_v0 = vcombine.low %v189_v52, %v197_v53 }
  0x1e   :  { %1344 = vmatpush1.bf16.msra.mxu0 %v2414_v59  ;;  %1397 = vmatpush1.bf16.msra.mxu1 %v2416_v60  ;;  %v212_v59 = vld [vmem:[%s3503_s1 + $0x1d0] sm:$0xff]  ;;  %v205_v60 = vld [vmem:[%s3503_s1 + $0x198] sm:$0xff] }
  0x1f   :  { %1345 = vmatprep.subr.bf16.mxu0 %v2431_v61  ;;  %1398 = vmatprep.subr.bf16.mxu1 %v2433_v62  ;;  %v213_v61 = vld [vmem:[%s3503_s1 + $0x1d8] sm:$0xff]  ;;  %v2371_v1 = vcombine.high %v204_v58, %v212_v59  ;;  %v2370_v7 = vcombine.low %v204_v58, %v212_v59 }
  0x20   :  { %v2777_v62 = vld [vmem:[%s3504_s0 + $0x10] ss:$8 sps:$4 sm:$0xff]   ;;  %v2373_v2 = vcombine.high %v205_v60, %v213_v61  ;;  %v2372_v8 = vcombine.low %v205_v60, %v213_v61 }
  0x22   :  { %1346 = vmatpush1.bf16.msra.mxu0 %v2430_v3  ;;  %1399 = vmatpush1.bf16.msra.mxu1 %v2432_v4  ;;  %v220_v3 = vld [vmem:[%s3503_s1 + $0x210] sm:$0xff] }
  0x23   :  { %1347 = vmatprep.subr.bf16.mxu0 %v2447_v5  ;;  %1400 = vmatprep.subr.bf16.mxu1 %v2449_v6  ;;  %v228_v4 = vld [vmem:[%s3503_s1 + $0x250] sm:$0xff]  ;;  %v221_v5 = vld [vmem:[%s3503_s1 + $0x218] sm:$0xff] }
  0x24   :  { %v229_v6 = vld [vmem:[%s3503_s1 + $0x258] sm:$0xff]  ;;  %v2387_v9 = vcombine.high %v220_v3, %v228_v4  ;;  %v2386_v15 = vcombine.low %v220_v3, %v228_v4 }
  0x25   :  { %v2389_v10 = vcombine.high %v221_v5, %v229_v6  ;;  %v2388_v16 = vcombine.low %v221_v5, %v229_v6 }
  0x26   :  { %1348 = vmatpush1.bf16.msra.mxu0 %v2446_v11  ;;  %1401 = vmatpush1.bf16.msra.mxu1 %v2448_v12  ;;  %v236_v11 = vld [vmem:[%s3503_s1 + $0x290] sm:$0xff] }
  0x27   :  { %1349 = vmatprep.subr.bf16.mxu0 %v2463_v13  ;;  %1402 = vmatprep.subr.bf16.mxu1 %v2465_v14  ;;  %v244_v12 = vld [vmem:[%s3503_s1 + $0x2d0] sm:$0xff]  ;;  %v237_v13 = vld [vmem:[%s3503_s1 + $0x298] sm:$0xff] }
  0x28   :  { %v245_v14 = vld [vmem:[%s3503_s1 + $0x2d8] sm:$0xff]  ;;  %v2403_v17 = vcombine.high %v236_v11, %v244_v12  ;;  %v2402_v23 = vcombine.low %v236_v11, %v244_v12 }
  0x29   :  { %v2405_v18 = vcombine.high %v237_v13, %v245_v14  ;;  %v2404_v24 = vcombine.low %v237_v13, %v245_v14 }
  0x2a   :  { %1350 = vmatpush1.bf16.msra.mxu0 %v2462_v19  ;;  %1403 = vmatpush1.bf16.msra.mxu1 %v2464_v20  ;;  %v252_v19 = vld [vmem:[%s3503_s1 + $0x310] sm:$0xff] }
  0x2b   :  { %1351 = vmatprep.subr.bf16.mxu0 %v2479_v21  ;;  %1404 = vmatprep.subr.bf16.mxu1 %v2481_v22  ;;  %v260_v20 = vld [vmem:[%s3503_s1 + $0x350] sm:$0xff]  ;;  %v253_v21 = vld [vmem:[%s3503_s1 + $0x318] sm:$0xff] }
  0x2c   :  { %v261_v22 = vld [vmem:[%s3503_s1 + $0x358] sm:$0xff]  ;;  %v2419_v25 = vcombine.high %v252_v19, %v260_v20  ;;  %v2418_v31 = vcombine.low %v252_v19, %v260_v20 }
  0x2d   :  { %v2421_v26 = vcombine.high %v253_v21, %v261_v22  ;;  %v2420_v32 = vcombine.low %v253_v21, %v261_v22 }
  0x2e   :  { %1352 = vmatpush1.bf16.msra.mxu0 %v2478_v27  ;;  %1405 = vmatpush1.bf16.msra.mxu1 %v2480_v28  ;;  %v268_v27 = vld [vmem:[%s3503_s1 + $0x390] sm:$0xff] }
  0x2f   :  { %1353 = vmatprep.subr.bf16.mxu0 %v2495_v29  ;;  %1406 = vmatprep.subr.bf16.mxu1 %v2497_v30  ;;  %v276_v28 = vld [vmem:[%s3503_s1 + $0x3d0] sm:$0xff]  ;;  %v269_v29 = vld [vmem:[%s3503_s1 + $0x398] sm:$0xff] }
  0x30   :  { %v277_v30 = vld [vmem:[%s3503_s1 + $0x3d8] sm:$0xff]  ;;  %v2435_v33 = vcombine.high %v268_v27, %v276_v28  ;;  %v2434_v39 = vcombine.low %v268_v27, %v276_v28 }
  0x31   :  { %v2437_v34 = vcombine.high %v269_v29, %v277_v30  ;;  %v2436_v40 = vcombine.low %v269_v29, %v277_v30 }
  0x32   :  { %1354 = vmatpush1.bf16.msra.mxu0 %v2494_v35  ;;  %1407 = vmatpush1.bf16.msra.mxu1 %v2496_v36  ;;  %v284_v35 = vld [vmem:[%s3503_s1 + $0x410] sm:$0xff] }
  0x33   :  { %1437 = vmatprep.subr.bf16.mxu0 %v2323_v37  ;;  %1490 = vmatprep.subr.bf16.mxu1 %v2325_v38  ;;  %v292_v36 = vld [vmem:[%s3503_s1 + $0x450] sm:$0xff]  ;;  %v285_v37 = vld [vmem:[%s3503_s1 + $0x418] sm:$0xff] }
  0x34   :  { %v293_v38 = vld [vmem:[%s3503_s1 + $0x458] sm:$0xff]  ;;  %v2451_v42 = vcombine.high %v284_v35, %v292_v36  ;;  %v2450_v49 = vcombine.low %v284_v35, %v292_v36 }
  0x35   :  { %1364 = vmatmul.mubr.bf16.vlgmr.msra.gmra.mrb[0].mxu0 %v2731_v41  ;;  %1417 = vmatmul.mubr.bf16.vlgmr.msra.gmra.mrb[0].mxu1 %v2731_v41  ;;  %v2453_v44 = vcombine.high %v285_v37, %v293_v38  ;;  %v2452_v50 = vcombine.low %v285_v37, %v293_v38 }
  0x36   :  { %1438 = vmatpush1.bf16.msra.mxu0 %v2322_v45  ;;  %1491 = vmatpush1.bf16.msra.mxu1 %v2324_v46  ;;  %v300_v45 = vld [vmem:[%s3503_s1 + $0x490] sm:$0xff] }
  0x37   :  { %1439 = vmatprep.subr.bf16.mxu0 %v2339_v47  ;;  %1492 = vmatprep.subr.bf16.mxu1 %v2341_v48  ;;  %v308_v46 = vld [vmem:[%s3503_s1 + $0x4d0] sm:$0xff]  ;;  %v301_v47 = vld [vmem:[%s3503_s1 + $0x498] sm:$0xff] }
  0x38   :  { %2511 = vmatprep.mubr.msk.bf16.mxu0 %vm1324_vm0, %v2748_v51  ;;  %2513 = vmatprep.mubr.msk.bf16.mxu1 %vm1324_vm0, %v2748_v51  ;;  %v309_v48 = vld [vmem:[%s3503_s1 + $0x4d8] sm:$0xff]  ;;  %v2467_v52 = vcombine.high %v300_v45, %v308_v46  ;;  %v2466_v58 = vcombine.low %v300_v45, %v308_v46 }
  0x39   :  { %v2469_v53 = vcombine.high %v301_v47, %v309_v48  ;;  %v2468_v59 = vcombine.low %v301_v47, %v309_v48 }
  0x3a   :  { %1440 = vmatpush1.bf16.msra.mxu0 %v2338_v54  ;;  %1493 = vmatpush1.bf16.msra.mxu1 %v2340_v55  ;;  %v316_v54 = vld [vmem:[%s3503_s1 + $0x510] sm:$0xff] }
  0x3b   :  { %1441 = vmatprep.subr.bf16.mxu0 %v2355_v56  ;;  %1494 = vmatprep.subr.bf16.mxu1 %v2357_v57  ;;  %v324_v55 = vld [vmem:[%s3503_s1 + $0x550] sm:$0xff]  ;;  %v317_v56 = vld [vmem:[%s3503_s1 + $0x518] sm:$0xff] }
  0x3c   :  { %v325_v57 = vld [vmem:[%s3503_s1 + $0x558] sm:$0xff]  ;;  %v2483_v60 = vcombine.high %v316_v54, %v324_v55  ;;  %v2482_v3 = vcombine.low %v316_v54, %v324_v55 }
  0x3d   :  { %1374 = vmatmul.mubr.bf16.gmra.mrb[4].mxu0 %v2777_v62  ;;  %1427 = vmatmul.mubr.bf16.gmra.mrb[4].mxu1 %v2777_v62  ;;  %v2485_v61 = vcombine.high %v317_v56, %v325_v57  ;;  %v2484_v4 = vcombine.low %v317_v56, %v325_v57 }
  0x3e   :  { %1442 = vmatpush1.bf16.msra.mxu0 %v2354_v63  ;;  %1495 = vmatpush1.bf16.msra.mxu1 %v2356_v0  ;;  %v332_v63 = vld [vmem:[%s3503_s1 + $0x590] sm:$0xff] }
  0x3f   :  { %1443 = vmatprep.subr.bf16.mxu0 %v2371_v1  ;;  %1496 = vmatprep.subr.bf16.mxu1 %v2373_v2  ;;  %v340_v0 = vld [vmem:[%s3503_s1 + $0x5d0] sm:$0xff]  ;;  %v333_v1 = vld [vmem:[%s3503_s1 + $0x598] sm:$0xff] }
  0x40   :  { %2514 = vmatprep.mubr.msk.bf16.mxu0 %vm1324_vm0, %v2632_v43  ;;  %2516 = vmatprep.mubr.msk.bf16.mxu1 %vm1324_vm0, %v2632_v43  ;;  %v341_v2 = vld [vmem:[%s3503_s1 + $0x5d8] sm:$0xff]  ;;  %v2499_v5 = vcombine.high %v332_v63, %v340_v0  ;;  %v2498_v11 = vcombine.low %v332_v63, %v340_v0 }
  0x41   :  { %v2501_v6 = vcombine.high %v333_v1, %v341_v2  ;;  %v2500_v12 = vcombine.low %v333_v1, %v341_v2 }
  0x42   :  { %1444 = vmatpush1.bf16.msra.mxu0 %v2370_v7  ;;  %1497 = vmatpush1.bf16.msra.mxu1 %v2372_v8  ;;  %v158_v7 = vld [vmem:[%s3503_s1 + $0x20] sm:$0xff] }
  0x43   :  { %1445 = vmatprep.subr.bf16.mxu0 %v2387_v9  ;;  %1498 = vmatprep.subr.bf16.mxu1 %v2389_v10  ;;  %v166_v8 = vld [vmem:[%s3503_s1 + $0x60] sm:$0xff]  ;;  %v159_v9 = vld [vmem:[%s3503_s1 + $0x28] sm:$0xff] }
  0x44   :  { %v167_v10 = vld [vmem:[%s3503_s1 + $0x68] sm:$0xff]  ;;  %v2327_v13 = vcombine.high %v158_v7, %v166_v8  ;;  %v2326_v19 = vcombine.low %v158_v7, %v166_v8 }
  0x45   :  { %v2329_v14 = vcombine.high %v159_v9, %v167_v10  ;;  %v2328_v20 = vcombine.low %v159_v9, %v167_v10 }
  0x46   :  { %1446 = vmatpush1.bf16.msra.mxu0 %v2386_v15  ;;  %1499 = vmatpush1.bf16.msra.mxu1 %v2388_v16  ;;  %v174_v15 = vld [vmem:[%s3503_s1 + $0xa0] sm:$0xff] }
  0x47   :  { %1447 = vmatprep.subr.bf16.mxu0 %v2403_v17  ;;  %1500 = vmatprep.subr.bf16.mxu1 %v2405_v18  ;;  %v182_v16 = vld [vmem:[%s3503_s1 + $0xe0] sm:$0xff]  ;;  %v175_v17 = vld [vmem:[%s3503_s1 + $0xa8] sm:$0xff] }
  0x48   :  { %v183_v18 = vld [vmem:[%s3503_s1 + $0xe8] sm:$0xff]  ;;  %v2343_v21 = vcombine.high %v174_v15, %v182_v16  ;;  %v2342_v27 = vcombine.low %v174_v15, %v182_v16 }
  0x49   :  { %v2345_v22 = vcombine.high %v175_v17, %v183_v18  ;;  %v2344_v28 = vcombine.low %v175_v17, %v183_v18 }
  0x4a   :  { %1448 = vmatpush1.bf16.msra.mxu0 %v2402_v23  ;;  %1501 = vmatpush1.bf16.msra.mxu1 %v2404_v24  ;;  %v190_v23 = vld [vmem:[%s3503_s1 + $0x120] sm:$0xff] }
  0x4b   :  { %1449 = vmatprep.subr.bf16.mxu0 %v2419_v25  ;;  %1502 = vmatprep.subr.bf16.mxu1 %v2421_v26  ;;  %v198_v24 = vld [vmem:[%s3503_s1 + $0x160] sm:$0xff]  ;;  %v191_v25 = vld [vmem:[%s3503_s1 + $0x128] sm:$0xff] }
  0x4c   :  { %v199_v26 = vld [vmem:[%s3503_s1 + $0x168] sm:$0xff]  ;;  %v2359_v29 = vcombine.high %v190_v23, %v198_v24  ;;  %v2358_v35 = vcombine.low %v190_v23, %v198_v24 }
  0x4d   :  { %v2361_v30 = vcombine.high %v191_v25, %v199_v26  ;;  %v2360_v36 = vcombine.low %v191_v25, %v199_v26 }
  0x4e   :  { %1450 = vmatpush1.bf16.msra.mxu0 %v2418_v31  ;;  %1503 = vmatpush1.bf16.msra.mxu1 %v2420_v32  ;;  %v206_v31 = vld [vmem:[%s3503_s1 + $0x1a0] sm:$0xff] }
  0x4f   :  { %1451 = vmatprep.subr.bf16.mxu0 %v2435_v33  ;;  %1504 = vmatprep.subr.bf16.mxu1 %v2437_v34  ;;  %v214_v32 = vld [vmem:[%s3503_s1 + $0x1e0] sm:$0xff]  ;;  %v207_v33 = vld [vmem:[%s3503_s1 + $0x1a8] sm:$0xff] }
  0x50   :  { %v215_v34 = vld [vmem:[%s3503_s1 + $0x1e8] sm:$0xff]  ;;  %v2375_v37 = vcombine.high %v206_v31, %v214_v32  ;;  %v2374_v45 = vcombine.low %v206_v31, %v214_v32 }
  0x51   :  { %v2377_v38 = vcombine.high %v207_v33, %v215_v34  ;;  %v2376_v46 = vcombine.low %v207_v33, %v215_v34 }
  0x52   :  { %1452 = vmatpush1.bf16.msra.mxu0 %v2434_v39  ;;  %1505 = vmatpush1.bf16.msra.mxu1 %v2436_v40  ;;  %v222_v39 = vld [vmem:[%s3503_s1 + $0x220] sm:$0xff] }
  0x53   :  { %1453 = vmatprep.subr.bf16.mxu0 %v2451_v42  ;;  %1506 = vmatprep.subr.bf16.mxu1 %v2453_v44  ;;  %v230_v40 = vld [vmem:[%s3503_s1 + $0x260] sm:$0xff]  ;;  %v223_v42 = vld [vmem:[%s3503_s1 + $0x228] sm:$0xff] }
  0x54   :  { %v231_v44 = vld [vmem:[%s3503_s1 + $0x268] sm:$0xff]  ;;  %v2391_v47 = vcombine.high %v222_v39, %v230_v40  ;;  %v2390_v54 = vcombine.low %v222_v39, %v230_v40 }
  0x55   :  { %v2393_v48 = vcombine.high %v223_v42, %v231_v44  ;;  %v2392_v55 = vcombine.low %v223_v42, %v231_v44 }
  0x56   :  { %1454 = vmatpush1.bf16.msra.mxu0 %v2450_v49  ;;  %1507 = vmatpush1.bf16.msra.mxu1 %v2452_v50  ;;  %v238_v49 = vld [vmem:[%s3503_s1 + $0x2a0] sm:$0xff] }
  0x57   :  { %1455 = vmatprep.subr.bf16.mxu0 %v2467_v52  ;;  %1508 = vmatprep.subr.bf16.mxu1 %v2469_v53  ;;  %v246_v50 = vld [vmem:[%s3503_s1 + $0x2e0] sm:$0xff]  ;;  %v239_v52 = vld [vmem:[%s3503_s1 + $0x2a8] sm:$0xff] }
  0x58   :  { %v247_v53 = vld [vmem:[%s3503_s1 + $0x2e8] sm:$0xff]  ;;  %v2407_v56 = vcombine.high %v238_v49, %v246_v50  ;;  %v2406_v63 = vcombine.low %v238_v49, %v246_v50 }
  0x59   :  { %v2409_v57 = vcombine.high %v239_v52, %v247_v53  ;;  %v2408_v0 = vcombine.low %v239_v52, %v247_v53 }
  0x5a   :  { %1456 = vmatpush1.bf16.msra.mxu0 %v2466_v58  ;;  %1509 = vmatpush1.bf16.msra.mxu1 %v2468_v59  ;;  %v254_v58 = vld [vmem:[%s3503_s1 + $0x320] sm:$0xff] }
  0x5b   :  { %1457 = vmatprep.subr.bf16.mxu0 %v2483_v60  ;;  %1510 = vmatprep.subr.bf16.mxu1 %v2485_v61  ;;  %v262_v59 = vld [vmem:[%s3503_s1 + $0x360] sm:$0xff]  ;;  %v255_v60 = vld [vmem:[%s3503_s1 + $0x328] sm:$0xff] }
  0x5c   :  { %v263_v61 = vld [vmem:[%s3503_s1 + $0x368] sm:$0xff]  ;;  %v2423_v1 = vcombine.high %v254_v58, %v262_v59  ;;  %v2422_v7 = vcombine.low %v254_v58, %v262_v59 }
  0x5d   :  { %v2425_v2 = vcombine.high %v255_v60, %v263_v61  ;;  %v2424_v8 = vcombine.low %v255_v60, %v263_v61 }
  0x5e   :  { %1458 = vmatpush1.bf16.msra.mxu0 %v2482_v3  ;;  %1511 = vmatpush1.bf16.msra.mxu1 %v2484_v4  ;;  %v270_v3 = vld [vmem:[%s3503_s1 + $0x3a0] sm:$0xff] }
  0x5f   :  { %1459 = vmatprep.subr.bf16.mxu0 %v2499_v5  ;;  %1512 = vmatprep.subr.bf16.mxu1 %v2501_v6  ;;  %v278_v4 = vld [vmem:[%s3503_s1 + $0x3e0] sm:$0xff]  ;;  %v271_v5 = vld [vmem:[%s3503_s1 + $0x3a8] sm:$0xff] }
  0x60   :  { %v279_v6 = vld [vmem:[%s3503_s1 + $0x3e8] sm:$0xff]  ;;  %v2439_v9 = vcombine.high %v270_v3, %v278_v4  ;;  %v2438_v15 = vcombine.low %v270_v3, %v278_v4 }
  0x61   :  { %v2441_v10 = vcombine.high %v271_v5, %v279_v6  ;;  %v2440_v16 = vcombine.low %v271_v5, %v279_v6 }
  0x62   :  { %1460 = vmatpush1.bf16.msra.mxu0 %v2498_v11  ;;  %1513 = vmatpush1.bf16.msra.mxu1 %v2500_v12  ;;  %v286_v11 = vld [vmem:[%s3503_s1 + $0x420] sm:$0xff] }
  0x63   :  { %1543 = vmatprep.subr.bf16.mxu0 %v2327_v13  ;;  %1596 = vmatprep.subr.bf16.mxu1 %v2329_v14  ;;  %v294_v12 = vld [vmem:[%s3503_s1 + $0x460] sm:$0xff]  ;;  %v287_v13 = vld [vmem:[%s3503_s1 + $0x428] sm:$0xff] }
  0x64   :  { %v295_v14 = vld [vmem:[%s3503_s1 + $0x468] sm:$0xff]  ;;  %v2455_v17 = vcombine.high %v286_v11, %v294_v12  ;;  %v2454_v23 = vcombine.low %v286_v11, %v294_v12 }
  0x65   :  { %1470 = vmatmul.mubr.bf16.vlgmr.msra.gmra.mrb[8].mxu0 %v2731_v41  ;;  %1523 = vmatmul.mubr.bf16.vlgmr.msra.gmra.mrb[8].mxu1 %v2731_v41  ;;  %v2457_v18 = vcombine.high %v287_v13, %v295_v14  ;;  %v2456_v24 = vcombine.low %v287_v13, %v295_v14 }
  0x66   :  { %1544 = vmatpush1.bf16.msra.mxu0 %v2326_v19  ;;  %1597 = vmatpush1.bf16.msra.mxu1 %v2328_v20  ;;  %v302_v19 = vld [vmem:[%s3503_s1 + $0x4a0] sm:$0xff] }
  0x67   :  { %1545 = vmatprep.subr.bf16.mxu0 %v2343_v21  ;;  %1598 = vmatprep.subr.bf16.mxu1 %v2345_v22  ;;  %v310_v20 = vld [vmem:[%s3503_s1 + $0x4e0] sm:$0xff]  ;;  %v303_v21 = vld [vmem:[%s3503_s1 + $0x4a8] sm:$0xff] }
  0x68   :  { %2515 = vmatprep.mubr.msk.bf16.mxu0 %vm1324_vm0, %v2748_v51  ;;  %2517 = vmatprep.mubr.msk.bf16.mxu1 %vm1324_vm0, %v2748_v51  ;;  %v311_v22 = vld [vmem:[%s3503_s1 + $0x4e8] sm:$0xff]  ;;  %v2471_v25 = vcombine.high %v302_v19, %v310_v20  ;;  %v2470_v31 = vcombine.low %v302_v19, %v310_v20 }
  0x69   :  { %v2473_v26 = vcombine.high %v303_v21, %v311_v22  ;;  %v2472_v32 = vcombine.low %v303_v21, %v311_v22 }
  0x6a   :  { %1546 = vmatpush1.bf16.msra.mxu0 %v2342_v27  ;;  %1599 = vmatpush1.bf16.msra.mxu1 %v2344_v28  ;;  %v318_v27 = vld [vmem:[%s3503_s1 + $0x520] sm:$0xff] }
  0x6b   :  { %1547 = vmatprep.subr.bf16.mxu0 %v2359_v29  ;;  %1600 = vmatprep.subr.bf16.mxu1 %v2361_v30  ;;  %v326_v28 = vld [vmem:[%s3503_s1 + $0x560] sm:$0xff]  ;;  %v319_v29 = vld [vmem:[%s3503_s1 + $0x528] sm:$0xff] }
  0x6c   :  { %v327_v30 = vld [vmem:[%s3503_s1 + $0x568] sm:$0xff]  ;;  %v2487_v33 = vcombine.high %v318_v27, %v326_v28  ;;  %v2486_v39 = vcombine.low %v318_v27, %v326_v28 }
  0x6d   :  { %1480 = vmatmul.mubr.bf16.gmra.mrb[12].mxu0 %v2777_v62  ;;  %1533 = vmatmul.mubr.bf16.gmra.mrb[12].mxu1 %v2777_v62  ;;  %v2489_v34 = vcombine.high %v319_v29, %v327_v30  ;;  %v2488_v40 = vcombine.low %v319_v29, %v327_v30 }
  0x6e   :  { %1548 = vmatpush1.bf16.msra.mxu0 %v2358_v35  ;;  %1601 = vmatpush1.bf16.msra.mxu1 %v2360_v36  ;;  %v334_v35 = vld [vmem:[%s3503_s1 + $0x5a0] sm:$0xff] }
  0x6f   :  { %1549 = vmatprep.subr.bf16.mxu0 %v2375_v37  ;;  %1602 = vmatprep.subr.bf16.mxu1 %v2377_v38  ;;  %v342_v36 = vld [vmem:[%s3503_s1 + $0x5e0] sm:$0xff]  ;;  %v335_v37 = vld [vmem:[%s3503_s1 + $0x5a8] sm:$0xff] }
  0x70   :  { %2518 = vmatprep.mubr.msk.bf16.mxu0 %vm1324_vm0, %v2632_v43  ;;  %2520 = vmatprep.mubr.msk.bf16.mxu1 %vm1324_vm0, %v2632_v43  ;;  %v343_v38 = vld [vmem:[%s3503_s1 + $0x5e8] sm:$0xff]  ;;  %v2503_v42 = vcombine.high %v334_v35, %v342_v36  ;;  %v2502_v49 = vcombine.low %v334_v35, %v342_v36 }
  0x71   :  { %v2505_v44 = vcombine.high %v335_v37, %v343_v38  ;;  %v2504_v50 = vcombine.low %v335_v37, %v343_v38  ;;  %v272_v38 = vld [vmem:[%s3503_s1 + $0x3b0] sm:$0xff] }
  0x72   :  { %1550 = vmatpush1.bf16.msra.mxu0 %v2374_v45  ;;  %1603 = vmatpush1.bf16.msra.mxu1 %v2376_v46  ;;  %v160_v45 = vld [vmem:[%s3503_s1 + $0x30] sm:$0xff] }
  0x73   :  { %1551 = vmatprep.subr.bf16.mxu0 %v2391_v47  ;;  %1604 = vmatprep.subr.bf16.mxu1 %v2393_v48  ;;  %v168_v46 = vld [vmem:[%s3503_s1 + $0x70] sm:$0xff]  ;;  %v161_v47 = vld [vmem:[%s3503_s1 + $0x38] sm:$0xff] }
  0x74   :  { %v169_v48 = vld [vmem:[%s3503_s1 + $0x78] sm:$0xff]  ;;  %v2331_v52 = vcombine.high %v160_v45, %v168_v46  ;;  %v2330_v58 = vcombine.low %v160_v45, %v168_v46 }
  0x75   :  { %v2333_v53 = vcombine.high %v161_v47, %v169_v48  ;;  %v2332_v59 = vcombine.low %v161_v47, %v169_v48  ;;  %v288_v48 = vld [vmem:[%s3503_s1 + $0x430] sm:$0xff] }
  0x76   :  { %1552 = vmatpush1.bf16.msra.mxu0 %v2390_v54  ;;  %1605 = vmatpush1.bf16.msra.mxu1 %v2392_v55  ;;  %v176_v54 = vld [vmem:[%s3503_s1 + $0xb0] sm:$0xff] }
  0x77   :  { %1553 = vmatprep.subr.bf16.mxu0 %v2407_v56  ;;  %1606 = vmatprep.subr.bf16.mxu1 %v2409_v57  ;;  %v184_v55 = vld [vmem:[%s3503_s1 + $0xf0] sm:$0xff]  ;;  %v177_v56 = vld [vmem:[%s3503_s1 + $0xb8] sm:$0xff] }
  0x78   :  { %v185_v57 = vld [vmem:[%s3503_s1 + $0xf8] sm:$0xff]  ;;  %v2347_v60 = vcombine.high %v176_v54, %v184_v55  ;;  %v2346_v3 = vcombine.low %v176_v54, %v184_v55 }
  0x79   :  { %v2349_v61 = vcombine.high %v177_v56, %v185_v57  ;;  %v2348_v4 = vcombine.low %v177_v56, %v185_v57  ;;  %v304_v57 = vld [vmem:[%s3503_s1 + $0x4b0] sm:$0xff] }
  0x7a   :  { %1554 = vmatpush1.bf16.msra.mxu0 %v2406_v63  ;;  %1607 = vmatpush1.bf16.msra.mxu1 %v2408_v0  ;;  %v192_v63 = vld [vmem:[%s3503_s1 + $0x130] sm:$0xff] }
  0x7b   :  { %1555 = vmatprep.subr.bf16.mxu0 %v2423_v1  ;;  %1608 = vmatprep.subr.bf16.mxu1 %v2425_v2  ;;  %v200_v0 = vld [vmem:[%s3503_s1 + $0x170] sm:$0xff]  ;;  %v193_v1 = vld [vmem:[%s3503_s1 + $0x138] sm:$0xff] }
  0x7c   :  { %v201_v2 = vld [vmem:[%s3503_s1 + $0x178] sm:$0xff]  ;;  %v2363_v5 = vcombine.high %v192_v63, %v200_v0  ;;  %v2362_v11 = vcombine.low %v192_v63, %v200_v0 }
  0x7d   :  { %v2365_v6 = vcombine.high %v193_v1, %v201_v2  ;;  %v2364_v12 = vcombine.low %v193_v1, %v201_v2  ;;  %v320_v2 = vld [vmem:[%s3503_s1 + $0x530] sm:$0xff] }
  0x7e   :  { %1556 = vmatpush1.bf16.msra.mxu0 %v2422_v7  ;;  %1609 = vmatpush1.bf16.msra.mxu1 %v2424_v8  ;;  %v208_v7 = vld [vmem:[%s3503_s1 + $0x1b0] sm:$0xff] }
  0x7f   :  { %1557 = vmatprep.subr.bf16.mxu0 %v2439_v9  ;;  %1610 = vmatprep.subr.bf16.mxu1 %v2441_v10  ;;  %v216_v8 = vld [vmem:[%s3503_s1 + $0x1f0] sm:$0xff]  ;;  %v209_v9 = vld [vmem:[%s3503_s1 + $0x1b8] sm:$0xff] }
  0x80   :  { %v217_v10 = vld [vmem:[%s3503_s1 + $0x1f8] sm:$0xff]  ;;  %v2379_v13 = vcombine.high %v208_v7, %v216_v8  ;;  %v2378_v19 = vcombine.low %v208_v7, %v216_v8 }
  0x81   :  { %v2381_v14 = vcombine.high %v209_v9, %v217_v10  ;;  %v2380_v20 = vcombine.low %v209_v9, %v217_v10  ;;  %v336_v10 = vld [vmem:[%s3503_s1 + $0x5b0] sm:$0xff] }
  0x82   :  { %1558 = vmatpush1.bf16.msra.mxu0 %v2438_v15  ;;  %1611 = vmatpush1.bf16.msra.mxu1 %v2440_v16  ;;  %v224_v15 = vld [vmem:[%s3503_s1 + $0x230] sm:$0xff] }
  0x83   :  { %1559 = vmatprep.subr.bf16.mxu0 %v2455_v17  ;;  %1612 = vmatprep.subr.bf16.mxu1 %v2457_v18  ;;  %v232_v16 = vld [vmem:[%s3503_s1 + $0x270] sm:$0xff]  ;;  %v225_v17 = vld [vmem:[%s3503_s1 + $0x238] sm:$0xff] }
  0x84   :  { %v233_v18 = vld [vmem:[%s3503_s1 + $0x278] sm:$0xff]  ;;  %v2395_v21 = vcombine.high %v224_v15, %v232_v16  ;;  %v2394_v27 = vcombine.low %v224_v15, %v232_v16 }
  0x85   :  { %v2397_v22 = vcombine.high %v225_v17, %v233_v18  ;;  %v2396_v28 = vcombine.low %v225_v17, %v233_v18 }
  0x86   :  { %1560 = vmatpush1.bf16.msra.mxu0 %v2454_v23  ;;  %1613 = vmatpush1.bf16.msra.mxu1 %v2456_v24  ;;  %v240_v23 = vld [vmem:[%s3503_s1 + $0x2b0] sm:$0xff] }
  0x87   :  { %1561 = vmatprep.subr.bf16.mxu0 %v2471_v25  ;;  %1614 = vmatprep.subr.bf16.mxu1 %v2473_v26  ;;  %v248_v24 = vld [vmem:[%s3503_s1 + $0x2f0] sm:$0xff]  ;;  %v241_v25 = vld [vmem:[%s3503_s1 + $0x2b8] sm:$0xff] }
  0x88   :  { %v249_v26 = vld [vmem:[%s3503_s1 + $0x2f8] sm:$0xff]  ;;  %v2411_v29 = vcombine.high %v240_v23, %v248_v24 }
  0x89   :  { %v2413_v30 = vcombine.high %v241_v25, %v249_v26  ;;  %v2412_v35 = vcombine.low %v241_v25, %v249_v26 }
  0x8a   :  { %1562 = vmatpush1.bf16.msra.mxu0 %v2470_v31  ;;  %1615 = vmatpush1.bf16.msra.mxu1 %v2472_v32  ;;  %v256_v31 = vld [vmem:[%s3503_s1 + $0x330] sm:$0xff] }
  0x8b   :  { %1563 = vmatprep.subr.bf16.mxu0 %v2487_v33  ;;  %1616 = vmatprep.subr.bf16.mxu1 %v2489_v34  ;;  %v264_v32 = vld [vmem:[%s3503_s1 + $0x370] sm:$0xff]  ;;  %v265_v33 = vld [vmem:[%s3503_s1 + $0x378] sm:$0xff]  ;;  %v2410_v34 = vcombine.low %v240_v23, %v248_v24 }
  0x8c   :  { %v2427_v36 = vcombine.high %v256_v31, %v264_v32 }
  0x8e   :  { %1564 = vmatpush1.bf16.msra.mxu0 %v2486_v39  ;;  %1617 = vmatpush1.bf16.msra.mxu1 %v2488_v40  ;;  %v280_v39 = vld [vmem:[%s3503_s1 + $0x3f0] sm:$0xff]  ;;  %v273_v40 = vld [vmem:[%s3503_s1 + $0x3b8] sm:$0xff] }
  0x8f   :  { %1565 = vmatprep.subr.bf16.mxu0 %v2503_v42  ;;  %1618 = vmatprep.subr.bf16.mxu1 %v2505_v44  ;;  %v281_v42 = vld [vmem:[%s3503_s1 + $0x3f8] sm:$0xff]  ;;  %v2426_v44 = vcombine.low %v256_v31, %v264_v32  ;;  %v2443_v46 = vcombine.high %v272_v38, %v280_v39 }
  0x90   :  { %v2445_v47 = vcombine.high %v273_v40, %v281_v42  ;;  %v2444_v54 = vcombine.low %v273_v40, %v281_v42 }
  0x92   :  { %1566 = vmatpush1.bf16.msra.mxu0 %v2502_v49  ;;  %1619 = vmatpush1.bf16.msra.mxu1 %v2504_v50  ;;  %v296_v49 = vld [vmem:[%s3503_s1 + $0x470] sm:$0xff]  ;;  %v289_v50 = vld [vmem:[%s3503_s1 + $0x438] sm:$0xff] }
  0x93   :  { %1649 = vmatprep.subr.bf16.mxu0 %v2331_v52  ;;  %1702 = vmatprep.subr.bf16.mxu1 %v2333_v53  ;;  %v297_v52 = vld [vmem:[%s3503_s1 + $0x478] sm:$0xff]  ;;  %v2442_v53 = vcombine.low %v272_v38, %v280_v39  ;;  %v2459_v55 = vcombine.high %v288_v48, %v296_v49 }
  0x94   :  { %v2461_v56 = vcombine.high %v289_v50, %v297_v52  ;;  %v2460_v63 = vcombine.low %v289_v50, %v297_v52 }
  0x95   :  { %1576 = vmatmul.mubr.bf16.vlgmr.msra.gmra.mrb[16].mxu0 %v2731_v41  ;;  %1629 = vmatmul.mubr.bf16.vlgmr.msra.gmra.mrb[16].mxu1 %v2731_v41 }
  0x96   :  { %1650 = vmatpush1.bf16.msra.mxu0 %v2330_v58  ;;  %1703 = vmatpush1.bf16.msra.mxu1 %v2332_v59  ;;  %v312_v58 = vld [vmem:[%s3503_s1 + $0x4f0] sm:$0xff]  ;;  %v305_v59 = vld [vmem:[%s3503_s1 + $0x4b8] sm:$0xff] }
  0x97   :  { %1651 = vmatprep.subr.bf16.mxu0 %v2347_v60  ;;  %1704 = vmatprep.subr.bf16.mxu1 %v2349_v61  ;;  %v313_v60 = vld [vmem:[%s3503_s1 + $0x4f8] sm:$0xff]  ;;  %v2458_v61 = vcombine.low %v288_v48, %v296_v49  ;;  %v2475_v0 = vcombine.high %v304_v57, %v312_v58 }
  0x98   :  { %2519 = vmatprep.mubr.msk.bf16.mxu0 %vm1324_vm0, %v2748_v51  ;;  %2521 = vmatprep.mubr.msk.bf16.mxu1 %vm1324_vm0, %v2748_v51  ;;  %v2477_v1 = vcombine.high %v305_v59, %v313_v60  ;;  %v2476_v7 = vcombine.low %v305_v59, %v313_v60 }
  0x9a   :  { %1652 = vmatpush1.bf16.msra.mxu0 %v2346_v3  ;;  %1705 = vmatpush1.bf16.msra.mxu1 %v2348_v4  ;;  %v328_v3 = vld [vmem:[%s3503_s1 + $0x570] sm:$0xff]  ;;  %v321_v4 = vld [vmem:[%s3503_s1 + $0x538] sm:$0xff] }
  0x9b   :  { %1653 = vmatprep.subr.bf16.mxu0 %v2363_v5  ;;  %1706 = vmatprep.subr.bf16.mxu1 %v2365_v6  ;;  %v329_v5 = vld [vmem:[%s3503_s1 + $0x578] sm:$0xff]  ;;  %v2474_v6 = vcombine.low %v304_v57, %v312_v58  ;;  %v2491_v8 = vcombine.high %v320_v2, %v328_v3 }
  0x9c   :  { %v2493_v9 = vcombine.high %v321_v4, %v329_v5  ;;  %v2492_v15 = vcombine.low %v321_v4, %v329_v5 }
  0x9d   :  { %1586 = vmatmul.mubr.bf16.gmra.mrb[20].mxu0 %v2777_v62  ;;  %1639 = vmatmul.mubr.bf16.gmra.mrb[20].mxu1 %v2777_v62 }
  0x9e   :  { %1654 = vmatpush1.bf16.msra.mxu0 %v2362_v11  ;;  %1707 = vmatpush1.bf16.msra.mxu1 %v2364_v12  ;;  %v344_v11 = vld [vmem:[%s3503_s1 + $0x5f0] sm:$0xff]  ;;  %v337_v12 = vld [vmem:[%s3503_s1 + $0x5b8] sm:$0xff] }
  0x9f   :  { %1655 = vmatprep.subr.bf16.mxu0 %v2379_v13  ;;  %1708 = vmatprep.subr.bf16.mxu1 %v2381_v14  ;;  %v345_v13 = vld [vmem:[%s3503_s1 + $0x5f8] sm:$0xff]  ;;  %v2490_v14 = vcombine.low %v320_v2, %v328_v3  ;;  %v2507_v16 = vcombine.high %v336_v10, %v344_v11  ;;  %v2506_v18 = vcombine.low %v336_v10, %v344_v11 }
  0xa0   :  { %2522 = vmatprep.mubr.msk.bf16.mxu0 %vm1324_vm0, %v2632_v43  ;;  %2524 = vmatprep.mubr.msk.bf16.mxu1 %vm1324_vm0, %v2632_v43  ;;  %v257_v43 = vld [vmem:[%s3503_s1 + $0x338] sm:$0xff]  ;;  %v2509_v17 = vcombine.high %v337_v12, %v345_v13 }
  0xa1   :  { %v2429_v37 = vcombine.high %v257_v43, %v265_v33  ;;  %v2428_v45 = vcombine.low %v257_v43, %v265_v33 }
  0xa2   :  { %1656 = vmatpush1.bf16.msra.mxu0 %v2378_v19  ;;  %1709 = vmatpush1.bf16.msra.mxu1 %v2380_v20  ;;  %v2508_v19 = vcombine.low %v337_v12, %v345_v13  ;;  %v1954_v20 = vlaneseq }
  0xa3   :  { %1657 = vmatprep.subr.bf16.mxu0 %v2395_v21  ;;  %1710 = vmatprep.subr.bf16.mxu1 %v2397_v22 }
  0xa4   :  { %v3201_v21 = vshrl.u32 %v1954_v20, 7 }
  0xa6   :  { %1658 = vmatpush1.bf16.msra.mxu0 %v2394_v27  ;;  %1711 = vmatpush1.bf16.msra.mxu1 %v2396_v28  ;;  %v3204_v22 = vsub.s32 0, %v3201_v21  ;;  %v3212_v23 = vsub.s32 2, %v3201_v21  ;;  %v3218_v24 = vsub.s32 3, %v3201_v21  ;;  %v3290_v20 = vsub.s32 4, %v3201_v21 }
  0xa7   :  { %1659 = vmatprep.subr.bf16.mxu0 %v2411_v29  ;;  %1712 = vmatprep.subr.bf16.mxu1 %v2413_v30 }
  0xaa   :  { %1660 = vmatpush1.bf16.msra.mxu0 %v2410_v34  ;;  %1713 = vmatpush1.bf16.msra.mxu1 %v2412_v35 }
  0xab   :  { %1661 = vmatprep.subr.bf16.mxu0 %v2427_v36  ;;  %1714 = vmatprep.subr.bf16.mxu1 %v2429_v37 }
  0xae   :  { %1662 = vmatpush1.bf16.msra.mxu0 %v2426_v44  ;;  %1715 = vmatpush1.bf16.msra.mxu1 %v2428_v45 }
  0xaf   :  { %1663 = vmatprep.subr.bf16.mxu0 %v2443_v46  ;;  %1716 = vmatprep.subr.bf16.mxu1 %v2445_v47 }
  0xb2   :  { %1664 = vmatpush1.bf16.msra.mxu0 %v2442_v53  ;;  %1717 = vmatpush1.bf16.msra.mxu1 %v2444_v54 }
  0xb3   :  { %1665 = vmatprep.subr.bf16.mxu0 %v2459_v55  ;;  %1718 = vmatprep.subr.bf16.mxu1 %v2461_v56 }
  0xb6   :  { %1666 = vmatpush1.bf16.msra.mxu0 %v2458_v61  ;;  %1719 = vmatpush1.bf16.msra.mxu1 %v2460_v63 }
  0xb7   :  { %1667 = vmatprep.subr.bf16.mxu0 %v2475_v0  ;;  %1720 = vmatprep.subr.bf16.mxu1 %v2477_v1 }
  0xba   :  { %1668 = vmatpush1.bf16.msra.mxu0 %v2474_v6  ;;  %1721 = vmatpush1.bf16.msra.mxu1 %v2476_v7 }
  0xbb   :  { %1669 = vmatprep.subr.bf16.mxu0 %v2491_v8  ;;  %1722 = vmatprep.subr.bf16.mxu1 %v2493_v9 }
  0xbe   :  { %1670 = vmatpush1.bf16.msra.mxu0 %v2490_v14  ;;  %1723 = vmatpush1.bf16.msra.mxu1 %v2492_v15 }
  0xbf   :  { %1671 = vmatprep.subr.bf16.mxu0 %v2507_v16  ;;  %1724 = vmatprep.subr.bf16.mxu1 %v2509_v17 }
  0xc2   :  { %1672 = vmatpush1.bf16.msra.mxu0 %v2506_v18  ;;  %1725 = vmatpush1.bf16.msra.mxu1 %v2508_v19 }
  0xc5   :  { %1682 = vmatmul.mubr.bf16.vlgmr.msra.gmra.mrb[24].mxu0 %v2731_v41  ;;  %1735 = vmatmul.mubr.bf16.vlgmr.msra.gmra.mrb[24].mxu1 %v2731_v41  ;;  %v3209_v41 = vld [vmem:[%s3505_s2] sm:$0xff] }
  0xc6   :  { %2523 = vmatprep.mubr.msk.bf16.mxu0 %vm1324_vm0, %v2748_v51  ;;  %2525 = vmatprep.mubr.msk.bf16.mxu1 %vm1324_vm0, %v2748_v51  ;;  %v3215_v51 = vsub.s32 1, %v3201_v21  ;;  %v1957_v25 = vrot.slane %v3209_v41, %v3204_v22  ;;  %v1965_v26 = vrot.slane %v3209_v41, %v3212_v23  ;;  %v1969_v29 = vrot.slane %v3209_v41, %v3218_v24 }
  0xc8   :  { %v1961_v27 = vrot.slane %v3209_v41, %v3215_v51 }
  0xcd   :  { %1692 = vmatmul.mubr.bf16.gmra.mrb[28].mxu0 %v2777_v62  ;;  %1745 = vmatmul.mubr.bf16.gmra.mrb[28].mxu1 %v2777_v62  ;;  %v3223_v62 = vld [vmem:[%s3506_s3] sm:$0xff] }
  0xce   :  { %v2105_v28 = vrot.slane %v3223_v62, %v3204_v22  ;;  %v2113_v31 = vrot.slane %v3223_v62, %v3212_v23  ;;  %v2109_v32 = vrot.slane %v3223_v62, %v3215_v51  ;;  %v2117_v35 = vrot.slane %v3223_v62, %v3218_v24 }
 0x108   :  { %v1365_v30 = vpop.f32.mrb[0].mxu0  ;;  %v1418_v33 = vpop.f32.mrb[0].mxu1 }
 0x109   :  { %v2034_v43 = vmul.f32 %v1957_v25, %v1365_v30  ;;  %v1367_v34 = vpop.f32.mrb[1].mxu0  ;;  %v2036_v36 = vmul.f32 %v1965_v26, %v1418_v33  ;;  %v1420_v38 = vpop.f32.mrb[1].mxu1 }
 0x10a   :  { %v2035_v37 = vmul.f32 %v1961_v27, %v1367_v34  ;;  %v1369_v39 = vpop.f32.mrb[2].mxu0  ;;  %v2037_v42 = vmul.f32 %v1969_v29, %v1420_v38  ;;  %v1422_v45 = vpop.f32.mrb[2].mxu1 }
 0x10b   :  { %v2182_v40 = vadd.f32 %v2105_v28, %v2034_v43  ;;  %v2050_v44 = vmul.f32 %v1957_v25, %v1369_v39  ;;  %v1371_v46 = vpop.f32.mrb[3].mxu0  ;;  %v2184_v47 = vadd.f32 %v2113_v31, %v2036_v36  ;;  %v2052_v49 = vmul.f32 %v1965_v26, %v1422_v45  ;;  %v1424_v52 = vpop.f32.mrb[3].mxu1 }
 0x10c   :  { %v2183_v48 = vadd.f32 %v2109_v32, %v2035_v37  ;;  %v2051_v50 = vmul.f32 %v1961_v27, %v1371_v46  ;;  %v2185_v53 = vadd.f32 %v2117_v35, %v2037_v42  ;;  %v2053_v55 = vmul.f32 %v1969_v29, %v1424_v52 }
 0x10d   :  { %2246 = vst [vmem:[%s3507_s4] sm:$0xff] %v2182_v40  ;;  %v2198_v54 = vadd.f32 %v2105_v28, %v2050_v44  ;;  %2248 = vst [vmem:[%s3507_s4 + $0x10] sm:$0xff] %v2184_v47  ;;  %v2200_v56 = vadd.f32 %v2113_v31, %v2052_v49 }
 0x10e   :  { %2247 = vst [vmem:[%s3507_s4 + $0x8] sm:$0xff] %v2183_v48  ;;  %v2199_v57 = vadd.f32 %v2109_v32, %v2051_v50  ;;  %2249 = vst [vmem:[%s3507_s4 + $0x18] sm:$0xff] %v2185_v53  ;;  %v2201_v58 = vadd.f32 %v2117_v35, %v2053_v55 }
 0x10f   :  { %2262 = vst [vmem:[%s3507_s4 + $0x80] sm:$0xff] %v2198_v54  ;;  %2264 = vst [vmem:[%s3507_s4 + $0x90] sm:$0xff] %v2200_v56 }
 0x110   :  { %2263 = vst [vmem:[%s3507_s4 + $0x88] sm:$0xff] %v2199_v57  ;;  %v1375_v59 = vpop.f32.mrb[4].mxu0  ;;  %2265 = vst [vmem:[%s3507_s4 + $0x98] sm:$0xff] %v2201_v58  ;;  %v1428_v61 = vpop.f32.mrb[4].mxu1 }
 0x111   :  { %v2066_v60 = vmul.f32 %v1957_v25, %v1375_v59  ;;  %v1377_v63 = vpop.f32.mrb[5].mxu0  ;;  %v2068_v0 = vmul.f32 %v1965_v26, %v1428_v61  ;;  %v1430_v2 = vpop.f32.mrb[5].mxu1 }
 0x112   :  { %v2067_v1 = vmul.f32 %v1961_v27, %v1377_v63  ;;  %v1379_v3 = vpop.f32.mrb[6].mxu0  ;;  %v2069_v5 = vmul.f32 %v1969_v29, %v1430_v2  ;;  %v1432_v7 = vpop.f32.mrb[6].mxu1 }
 0x113   :  { %v2214_v4 = vadd.f32 %v2105_v28, %v2066_v60  ;;  %v2082_v6 = vmul.f32 %v1957_v25, %v1379_v3  ;;  %v1381_v8 = vpop.f32.mrb[7].mxu0  ;;  %v2216_v9 = vadd.f32 %v2113_v31, %v2068_v0  ;;  %v2084_v11 = vmul.f32 %v1965_v26, %v1432_v7  ;;  %v1434_v13 = vpop.f32.mrb[7].mxu1 }
 0x114   :  { %v2215_v10 = vadd.f32 %v2109_v32, %v2067_v1  ;;  %v2083_v12 = vmul.f32 %v1961_v27, %v1381_v8  ;;  %v2217_v14 = vadd.f32 %v2117_v35, %v2069_v5  ;;  %v2085_v16 = vmul.f32 %v1969_v29, %v1434_v13 }
 0x115   :  { %2278 = vst [vmem:[%s3507_s4 + $0x100] sm:$0xff] %v2214_v4  ;;  %v2230_v15 = vadd.f32 %v2105_v28, %v2082_v6  ;;  %2280 = vst [vmem:[%s3507_s4 + $0x110] sm:$0xff] %v2216_v9  ;;  %v2232_v17 = vadd.f32 %v2113_v31, %v2084_v11  ;;  %v3293_v25 = vsub.s32 6, %v3201_v21  ;;  %v3296_v26 = vsub.s32 5, %v3201_v21 }
 0x116   :  { %2279 = vst [vmem:[%s3507_s4 + $0x108] sm:$0xff] %v2215_v10  ;;  %v2231_v18 = vadd.f32 %v2109_v32, %v2083_v12  ;;  %2281 = vst [vmem:[%s3507_s4 + $0x118] sm:$0xff] %v2217_v14  ;;  %v2233_v19 = vadd.f32 %v2117_v35, %v2085_v16  ;;  %v3299_v27 = vsub.s32 7, %v3201_v21  ;;  %v1973_v28 = vrot.slane %v3209_v41, %v3290_v20 }
 0x117   :  { %2294 = vst [vmem:[%s3507_s4 + $0x180] sm:$0xff] %v2230_v15  ;;  %2296 = vst [vmem:[%s3507_s4 + $0x190] sm:$0xff] %v2232_v17  ;;  %v1981_v29 = vrot.slane %v3209_v41, %v3293_v25  ;;  %v1977_v30 = vrot.slane %v3209_v41, %v3296_v26  ;;  %v2121_v31 = vrot.slane %v3223_v62, %v3290_v20 }
 0x118   :  { %2295 = vst [vmem:[%s3507_s4 + $0x188] sm:$0xff] %v2231_v18  ;;  %2297 = vst [vmem:[%s3507_s4 + $0x198] sm:$0xff] %v2233_v19  ;;  %v1985_v32 = vrot.slane %v3209_v41, %v3299_v27  ;;  %v2129_v21 = vrot.slane %v3223_v62, %v3293_v25  ;;  %v2125_v33 = vrot.slane %v3223_v62, %v3296_v26 }
 0x119   :  { %v2133_v37 = vrot.slane %v3223_v62, %v3299_v27 }
 0x138   :  { %v1471_v43 = vpop.f32.mrb[8].mxu0  ;;  %v1524_v35 = vpop.f32.mrb[8].mxu1 }
 0x139   :  { %v2038_v34 = vmul.f32 %v1973_v28, %v1471_v43  ;;  %v1473_v36 = vpop.f32.mrb[9].mxu0  ;;  %v2040_v38 = vmul.f32 %v1981_v29, %v1524_v35  ;;  %v1526_v40 = vpop.f32.mrb[9].mxu1 }
 0x13a   :  { %v2039_v39 = vmul.f32 %v1977_v30, %v1473_v36  ;;  %v1475_v42 = vpop.f32.mrb[10].mxu0  ;;  %v2041_v45 = vmul.f32 %v1985_v32, %v1526_v40  ;;  %v1528_v46 = vpop.f32.mrb[10].mxu1 }
 0x13b   :  { %v2186_v44 = vadd.f32 %v2121_v31, %v2038_v34  ;;  %v2054_v41 = vmul.f32 %v1973_v28, %v1475_v42  ;;  %v1477_v47 = vpop.f32.mrb[11].mxu0  ;;  %v2188_v48 = vadd.f32 %v2129_v21, %v2040_v38  ;;  %v2056_v50 = vmul.f32 %v1981_v29, %v1528_v46  ;;  %v1530_v53 = vpop.f32.mrb[11].mxu1 }
 0x13c   :  { %v2187_v49 = vadd.f32 %v2125_v33, %v2039_v39  ;;  %v2055_v52 = vmul.f32 %v1977_v30, %v1477_v47  ;;  %v2189_v54 = vadd.f32 %v2133_v37, %v2041_v45  ;;  %v2057_v55 = vmul.f32 %v1985_v32, %v1530_v53 }
 0x13d   :  { %2250 = vst [vmem:[%s3507_s4 + $0x20] sm:$0xff] %v2186_v44  ;;  %v2202_v62 = vadd.f32 %v2121_v31, %v2054_v41  ;;  %2252 = vst [vmem:[%s3507_s4 + $0x30] sm:$0xff] %v2188_v48  ;;  %v2204_v56 = vadd.f32 %v2129_v21, %v2056_v50 }
 0x13e   :  { %2251 = vst [vmem:[%s3507_s4 + $0x28] sm:$0xff] %v2187_v49  ;;  %v2203_v57 = vadd.f32 %v2125_v33, %v2055_v52  ;;  %2253 = vst [vmem:[%s3507_s4 + $0x38] sm:$0xff] %v2189_v54  ;;  %v2205_v58 = vadd.f32 %v2133_v37, %v2057_v55 }
 0x13f   :  { %2266 = vst [vmem:[%s3507_s4 + $0xa0] sm:$0xff] %v2202_v62  ;;  %2268 = vst [vmem:[%s3507_s4 + $0xb0] sm:$0xff] %v2204_v56 }
 0x140   :  { %2267 = vst [vmem:[%s3507_s4 + $0xa8] sm:$0xff] %v2203_v57  ;;  %v1481_v59 = vpop.f32.mrb[12].mxu0  ;;  %2269 = vst [vmem:[%s3507_s4 + $0xb8] sm:$0xff] %v2205_v58  ;;  %v1534_v61 = vpop.f32.mrb[12].mxu1 }
 0x141   :  { %v2070_v60 = vmul.f32 %v1973_v28, %v1481_v59  ;;  %v1483_v63 = vpop.f32.mrb[13].mxu0  ;;  %v2072_v0 = vmul.f32 %v1981_v29, %v1534_v61  ;;  %v1536_v2 = vpop.f32.mrb[13].mxu1 }
 0x142   :  { %v2071_v1 = vmul.f32 %v1977_v30, %v1483_v63  ;;  %v1485_v3 = vpop.f32.mrb[14].mxu0  ;;  %v2073_v5 = vmul.f32 %v1985_v32, %v1536_v2  ;;  %v1538_v7 = vpop.f32.mrb[14].mxu1 }
 0x143   :  { %v2218_v4 = vadd.f32 %v2121_v31, %v2070_v60  ;;  %v2086_v6 = vmul.f32 %v1973_v28, %v1485_v3  ;;  %v1487_v8 = vpop.f32.mrb[15].mxu0  ;;  %v2220_v9 = vadd.f32 %v2129_v21, %v2072_v0  ;;  %v2088_v11 = vmul.f32 %v1981_v29, %v1538_v7  ;;  %v1540_v13 = vpop.f32.mrb[15].mxu1  ;;  %v3368_v28 = vld [vmem:[%s3505_s2 + $0x8] sm:$0xff] }
 0x144   :  { %v2219_v10 = vadd.f32 %v2125_v33, %v2071_v1  ;;  %v2087_v12 = vmul.f32 %v1977_v30, %v1487_v8  ;;  %v2221_v14 = vadd.f32 %v2133_v37, %v2073_v5  ;;  %v2089_v16 = vmul.f32 %v1985_v32, %v1540_v13  ;;  %v3373_v29 = vld [vmem:[%s3506_s3 + $0x8] sm:$0xff] }
 0x145   :  { %2282 = vst [vmem:[%s3507_s4 + $0x120] sm:$0xff] %v2218_v4  ;;  %v2234_v15 = vadd.f32 %v2121_v31, %v2086_v6  ;;  %2284 = vst [vmem:[%s3507_s4 + $0x130] sm:$0xff] %v2220_v9  ;;  %v2236_v17 = vadd.f32 %v2129_v21, %v2088_v11  ;;  %v1989_v30 = vrot.slane %v3368_v28, %v3204_v22 }
 0x146   :  { %2283 = vst [vmem:[%s3507_s4 + $0x128] sm:$0xff] %v2219_v10  ;;  %v2235_v18 = vadd.f32 %v2125_v33, %v2087_v12  ;;  %2285 = vst [vmem:[%s3507_s4 + $0x138] sm:$0xff] %v2221_v14  ;;  %v2237_v19 = vadd.f32 %v2133_v37, %v2089_v16  ;;  %v1997_v31 = vrot.slane %v3368_v28, %v3212_v23 }
 0x147   :  { %2298 = vst [vmem:[%s3507_s4 + $0x1a0] sm:$0xff] %v2234_v15  ;;  %2300 = vst [vmem:[%s3507_s4 + $0x1b0] sm:$0xff] %v2236_v17  ;;  %v1993_v32 = vrot.slane %v3368_v28, %v3215_v51  ;;  %v2137_v43 = vrot.slane %v3373_v29, %v3204_v22  ;;  %v2001_v21 = vrot.slane %v3368_v28, %v3218_v24 }
 0x148   :  { %2299 = vst [vmem:[%s3507_s4 + $0x1a8] sm:$0xff] %v2235_v18  ;;  %2301 = vst [vmem:[%s3507_s4 + $0x1b8] sm:$0xff] %v2237_v19  ;;  %v2145_v34 = vrot.slane %v3373_v29, %v3212_v23  ;;  %v2141_v35 = vrot.slane %v3373_v29, %v3215_v51  ;;  %v2149_v39 = vrot.slane %v3373_v29, %v3218_v24 }
 0x149   :  { %v2005_v18 = vrot.slane %v3368_v28, %v3290_v20  ;;  %v2013_v19 = vrot.slane %v3368_v28, %v3293_v25 }
 0x168   :  { %v1577_v33 = vpop.f32.mrb[16].mxu0  ;;  %v1630_v37 = vpop.f32.mrb[16].mxu1 }
 0x169   :  { %v2042_v36 = vmul.f32 %v1989_v30, %v1577_v33  ;;  %v1579_v38 = vpop.f32.mrb[17].mxu0  ;;  %v2044_v40 = vmul.f32 %v1997_v31, %v1630_v37  ;;  %v1632_v44 = vpop.f32.mrb[17].mxu1  ;;  %v2157_v33 = vrot.slane %v3373_v29, %v3296_v26  ;;  %v2165_v37 = vrot.slane %v3373_v29, %v3299_v27 }
 0x16a   :  { %v2043_v42 = vmul.f32 %v1993_v32, %v1579_v38  ;;  %v1581_v22 = vpop.f32.mrb[18].mxu0  ;;  %v2045_v41 = vmul.f32 %v2001_v21, %v1632_v44  ;;  %v1634_v47 = vpop.f32.mrb[18].mxu1 }
 0x16b   :  { %v2190_v45 = vadd.f32 %v2137_v43, %v2042_v36  ;;  %v2058_v46 = vmul.f32 %v1989_v30, %v1581_v22  ;;  %v1583_v48 = vpop.f32.mrb[19].mxu0  ;;  %v2192_v49 = vadd.f32 %v2145_v34, %v2044_v40  ;;  %v2060_v50 = vmul.f32 %v1997_v31, %v1634_v47  ;;  %v1636_v51 = vpop.f32.mrb[19].mxu1 }
 0x16c   :  { %v2191_v23 = vadd.f32 %v2141_v35, %v2043_v42  ;;  %v2059_v52 = vmul.f32 %v1993_v32, %v1583_v48  ;;  %v2193_v53 = vadd.f32 %v2149_v39, %v2045_v41  ;;  %v2061_v54 = vmul.f32 %v2001_v21, %v1636_v51 }
 0x16d   :  { %2254 = vst [vmem:[%s3507_s4 + $0x40] sm:$0xff] %v2190_v45  ;;  %v2206_v24 = vadd.f32 %v2137_v43, %v2058_v46  ;;  %2256 = vst [vmem:[%s3507_s4 + $0x50] sm:$0xff] %v2192_v49  ;;  %v2208_v62 = vadd.f32 %v2145_v34, %v2060_v50 }
 0x16e   :  { %2255 = vst [vmem:[%s3507_s4 + $0x48] sm:$0xff] %v2191_v23  ;;  %v2207_v55 = vadd.f32 %v2141_v35, %v2059_v52  ;;  %2257 = vst [vmem:[%s3507_s4 + $0x58] sm:$0xff] %v2193_v53  ;;  %v2209_v56 = vadd.f32 %v2149_v39, %v2061_v54 }
 0x16f   :  { %2270 = vst [vmem:[%s3507_s4 + $0xc0] sm:$0xff] %v2206_v24  ;;  %2272 = vst [vmem:[%s3507_s4 + $0xd0] sm:$0xff] %v2208_v62 }
 0x170   :  { %2271 = vst [vmem:[%s3507_s4 + $0xc8] sm:$0xff] %v2207_v55  ;;  %v1587_v57 = vpop.f32.mrb[20].mxu0  ;;  %2273 = vst [vmem:[%s3507_s4 + $0xd8] sm:$0xff] %v2209_v56  ;;  %v1640_v59 = vpop.f32.mrb[20].mxu1 }
 0x171   :  { %v2074_v58 = vmul.f32 %v1989_v30, %v1587_v57  ;;  %v1589_v60 = vpop.f32.mrb[21].mxu0  ;;  %v2076_v61 = vmul.f32 %v1997_v31, %v1640_v59  ;;  %v1642_v0 = vpop.f32.mrb[21].mxu1 }
 0x172   :  { %v2075_v63 = vmul.f32 %v1993_v32, %v1589_v60  ;;  %v1591_v1 = vpop.f32.mrb[22].mxu0  ;;  %v2077_v3 = vmul.f32 %v2001_v21, %v1642_v0  ;;  %v1644_v5 = vpop.f32.mrb[22].mxu1 }
 0x173   :  { %v2222_v2 = vadd.f32 %v2137_v43, %v2074_v58  ;;  %v2090_v4 = vmul.f32 %v1989_v30, %v1591_v1  ;;  %v1593_v6 = vpop.f32.mrb[23].mxu0  ;;  %v2224_v7 = vadd.f32 %v2145_v34, %v2076_v61  ;;  %v2092_v9 = vmul.f32 %v1997_v31, %v1644_v5  ;;  %v1646_v11 = vpop.f32.mrb[23].mxu1 }
 0x174   :  { %v2223_v8 = vadd.f32 %v2141_v35, %v2075_v63  ;;  %v2091_v10 = vmul.f32 %v1993_v32, %v1593_v6  ;;  %v2225_v12 = vadd.f32 %v2149_v39, %v2077_v3  ;;  %v2093_v14 = vmul.f32 %v2001_v21, %v1646_v11 }
 0x175   :  { %2286 = vst [vmem:[%s3507_s4 + $0x140] sm:$0xff] %v2222_v2  ;;  %v2238_v13 = vadd.f32 %v2137_v43, %v2090_v4  ;;  %2288 = vst [vmem:[%s3507_s4 + $0x150] sm:$0xff] %v2224_v7  ;;  %v2240_v15 = vadd.f32 %v2145_v34, %v2092_v9  ;;  %v2009_v30 = vrot.slane %v3368_v28, %v3296_v26 }
 0x176   :  { %2287 = vst [vmem:[%s3507_s4 + $0x148] sm:$0xff] %v2223_v8  ;;  %v2239_v16 = vadd.f32 %v2141_v35, %v2091_v10  ;;  %2289 = vst [vmem:[%s3507_s4 + $0x158] sm:$0xff] %v2225_v12  ;;  %v2241_v17 = vadd.f32 %v2149_v39, %v2093_v14  ;;  %v2153_v31 = vrot.slane %v3373_v29, %v3290_v20 }
 0x177   :  { %2302 = vst [vmem:[%s3507_s4 + $0x1c0] sm:$0xff] %v2238_v13  ;;  %2304 = vst [vmem:[%s3507_s4 + $0x1d0] sm:$0xff] %v2240_v15  ;;  %v2017_v32 = vrot.slane %v3368_v28, %v3299_v27  ;;  %v2161_v21 = vrot.slane %v3373_v29, %v3293_v25 }
 0x178   :  { %2303 = vst [vmem:[%s3507_s4 + $0x1c8] sm:$0xff] %v2239_v16  ;;  %2305 = vst [vmem:[%s3507_s4 + $0x1d8] sm:$0xff] %v2241_v17 }
 0x198   :  { %v1683_v43 = vpop.f32.mrb[24].mxu0  ;;  %v1736_v35 = vpop.f32.mrb[24].mxu1 }
 0x199   :  { %v2046_v34 = vmul.f32 %v2005_v18, %v1683_v43  ;;  %v1685_v36 = vpop.f32.mrb[25].mxu0  ;;  %v2048_v38 = vmul.f32 %v2013_v19, %v1736_v35  ;;  %v1738_v40 = vpop.f32.mrb[25].mxu1 }
 0x19a   :  { %v2047_v39 = vmul.f32 %v2009_v30, %v1685_v36  ;;  %v1687_v20 = vpop.f32.mrb[26].mxu0  ;;  %v2049_v44 = vmul.f32 %v2017_v32, %v1738_v40  ;;  %v1740_v22 = vpop.f32.mrb[26].mxu1 }
 0x19b   :  { %v2194_v42 = vadd.f32 %v2153_v31, %v2046_v34  ;;  %v2062_v28 = vmul.f32 %v2005_v18, %v1687_v20  ;;  %v1689_v45 = vpop.f32.mrb[27].mxu0  ;;  %v2196_v41 = vadd.f32 %v2161_v21, %v2048_v38  ;;  %v2064_v46 = vmul.f32 %v2013_v19, %v1740_v22  ;;  %v1742_v26 = vpop.f32.mrb[27].mxu1 }
 0x19c   :  { %v2195_v25 = vadd.f32 %v2157_v33, %v2047_v39  ;;  %v2063_v47 = vmul.f32 %v2009_v30, %v1689_v45  ;;  %v2197_v48 = vadd.f32 %v2165_v37, %v2049_v44  ;;  %v2065_v29 = vmul.f32 %v2017_v32, %v1742_v26 }
 0x19d   :  { %2258 = vst [vmem:[%s3507_s4 + $0x60] sm:$0xff] %v2194_v42  ;;  %v2210_v27 = vadd.f32 %v2153_v31, %v2062_v28  ;;  %2260 = vst [vmem:[%s3507_s4 + $0x70] sm:$0xff] %v2196_v41  ;;  %v2212_v49 = vadd.f32 %v2161_v21, %v2064_v46 }
 0x19e   :  { %2259 = vst [vmem:[%s3507_s4 + $0x68] sm:$0xff] %v2195_v25  ;;  %v2211_v23 = vadd.f32 %v2157_v33, %v2063_v47  ;;  %2261 = vst [vmem:[%s3507_s4 + $0x78] sm:$0xff] %v2197_v48  ;;  %v2213_v50 = vadd.f32 %v2165_v37, %v2065_v29 }
 0x19f   :  { %2274 = vst [vmem:[%s3507_s4 + $0xe0] sm:$0xff] %v2210_v27  ;;  %2276 = vst [vmem:[%s3507_s4 + $0xf0] sm:$0xff] %v2212_v49 }
 0x1a0   :  { %2275 = vst [vmem:[%s3507_s4 + $0xe8] sm:$0xff] %v2211_v23  ;;  %v1693_v52 = vpop.f32.mrb[28].mxu0  ;;  %2277 = vst [vmem:[%s3507_s4 + $0xf8] sm:$0xff] %v2213_v50  ;;  %v1746_v53 = vpop.f32.mrb[28].mxu1 }
 0x1a1   :  { %v2078_v51 = vmul.f32 %v2005_v18, %v1693_v52  ;;  %v1695_v24 = vpop.f32.mrb[29].mxu0  ;;  %v2080_v54 = vmul.f32 %v2013_v19, %v1746_v53  ;;  %v1748_v55 = vpop.f32.mrb[29].mxu1 }
 0x1a2   :  { %v2079_v62 = vmul.f32 %v2009_v30, %v1695_v24  ;;  %v1697_v56 = vpop.f32.mrb[30].mxu0  ;;  %v2081_v58 = vmul.f32 %v2017_v32, %v1748_v55  ;;  %v1750_v60 = vpop.f32.mrb[30].mxu1 }
 0x1a3   :  { %v2226_v57 = vadd.f32 %v2153_v31, %v2078_v51  ;;  %v2094_v59 = vmul.f32 %v2005_v18, %v1697_v56  ;;  %v1699_v61 = vpop.f32.mrb[31].mxu0  ;;  %v2228_v63 = vadd.f32 %v2161_v21, %v2080_v54  ;;  %v2096_v1 = vmul.f32 %v2013_v19, %v1750_v60  ;;  %v1752_v3 = vpop.f32.mrb[31].mxu1 }
 0x1a4   :  { %v2227_v0 = vadd.f32 %v2157_v33, %v2079_v62  ;;  %v2095_v2 = vmul.f32 %v2009_v30, %v1699_v61  ;;  %v2229_v4 = vadd.f32 %v2165_v37, %v2081_v58  ;;  %v2097_v6 = vmul.f32 %v2017_v32, %v1752_v3 }
 0x1a5   :  { %2290 = vst [vmem:[%s3507_s4 + $0x160] sm:$0xff] %v2226_v57  ;;  %v2242_v5 = vadd.f32 %v2153_v31, %v2094_v59  ;;  %2292 = vst [vmem:[%s3507_s4 + $0x170] sm:$0xff] %v2228_v63  ;;  %v2244_v7 = vadd.f32 %v2161_v21, %v2096_v1 }
 0x1a6   :  { %2291 = vst [vmem:[%s3507_s4 + $0x168] sm:$0xff] %v2227_v0  ;;  %v2243_v8 = vadd.f32 %v2157_v33, %v2095_v2  ;;  %2293 = vst [vmem:[%s3507_s4 + $0x178] sm:$0xff] %v2229_v4  ;;  %v2245_v9 = vadd.f32 %v2165_v37, %v2097_v6 }
 0x1a7   :  { %2306 = vst [vmem:[%s3507_s4 + $0x1e0] sm:$0xff] %v2242_v5  ;;  %2308 = vst [vmem:[%s3507_s4 + $0x1f0] sm:$0xff] %v2244_v7 }
 0x1a8   :  { %2307 = vst [vmem:[%s3507_s4 + $0x1e8] sm:$0xff] %v2243_v8  ;;  %2309 = vst [vmem:[%s3507_s4 + $0x1f8] sm:$0xff] %v2245_v9 }

// kernel: onsets_and_frames_forward.8
= control target key start
LH: loop header
LB: loop body
LE: loop exit
PB: predicated region body
PF: predicated region fallthrough
CT: control target
= control target key end

     0   :  { %s3870_s9 = smov 0   ;;  %s3872_s10 = smov 0   ;;  %s5549_s0 = inlined_call_operand.vmem [shape: f32[16,2,2048], index: 0, kind: input, shape index: {}]   ;;  %s5550_s1 = inlined_call_operand.vmem [shape: bf16[2,256,1024], index: 1, kind: input, shape index: {}]   ;;  %s5551_s2 = inlined_call_operand.vmem [shape: f32[16,2,512], index: 2, kind: output, shape index: {}]  }
   0x1   :  { %s3874_s11 = smov 0   ;;  %s3876_s12 = smov 0  }
   0x2   :  { %s3878_s13 = smov 0   ;;  %s3880_s14 = smov 0  }
   0x3   :  { %s3882_s15 = smov 0  }
   0x4 LB: > { %s21_s16 = sadd.s32 1, %s3843_s13  ;;  %s24_s17 = sadd.s32 1, %s3847_s14  ;;  %s3851_s15 = sphi %s3882_s15, %s12_s15   ;;  %s3847_s14 = sphi %s3880_s14, %s6499_s14   ;;  %s3843_s13 = sphi %s3878_s13, %s6498_s13   ;;  %s3839_s12 = sphi %s3876_s12, %s6497_s12   ;;  %s3835_s11 = sphi %s3874_s11, %s6496_s11   ;;  %s3831_s10 = sphi %s3872_s10, %s6495_s10   ;;  %s3827_s9 = sphi %s3870_s9, %s6494_s9  }
   0x5   : > { %p22_p0 = scmp.ge.s32.totalorder %s21_s16, 2  ;;  %s28_s18 = ssub.s32 1, %s3847_s14 }
   0x6   : > { %s30_s19 = ssub.s32 1, %s3843_s13  ;;  %s3408_s20 = sadd.s32 4294967295, %s3851_s15  }
   0x7   : > { %s6501_s16 = smov (%p22_p0, %s21_s16), 0  ;;  %s6503_s17 = smov (!%p22_p0, %s24_s17), %s3847_s14 }
   0x8   : > { %s29_s21 = smul.u32 %s3843_s13, %s28_s18  ;;  %p26_p1 = scmp.ge.s32.totalorder %s6503_s17, 2 }
   0x9   : > { %s31_s22 = smul.u32 %s3847_s14, %s30_s19  ;;  %s35_s23 = ssub.s32 1, %s6501_s16 }
   0xa   : > { %p50_p2 = scmp.ne.s32.totalorder %s3831_s10, %s3827_s9  ;;  %s6505_s17 = smov (%p26_p1, %s6503_s17), 0 }
   0xb   : > { %s32_s24 = sadd.s32 %s31_s22, %s29_s21  ;;  %p51_p3 = scmp.eq.s32.totalorder %s3851_s15, 0 }
   0xc   : > { %s33_s25 = ssub.s32 1, %s6505_s17  ;;  %s36_s26 = smul.u32 %s35_s23, %s6505_s17 }
   0xd   : > { %s34_s27 = smul.u32 %s33_s25, %s6501_s16  ;;  %s39_s28 = ssub.s32 %s3847_s14, %s6505_s17 }
   0xe   : > { %p52_p4 = por %p51_p3, %p50_p2  ;;  %p118_p5 = scmp.eq.s32.totalorder %s3408_s20, 3 }
   0xf   : > { %s37_s29 = sadd.s32 %s36_s26, %s34_s27  ;;  %s43_s5 = sadd.s32 1, %s3831_s10 }
  0x10   : > { %s38_s30 = ssub.s32 %s32_s24, %s37_s29  ;;  %p3926_p6 = por %p118_p5, %p50_p2 }
  0x11   : > { %s40_s4 = sor.u32 %s39_s28, %s38_s30  ;;  %p3411_p8 = scmp.ge.s32.totalorder %s3851_s15, 4 }
  0x12   : > { %p41_p7 = scmp.eq.s32.totalorder %s40_s4, 0 }
  0x13   : > { %140 = sbr.rel (%p3411_p8) target bundleno = 41 (0x29), region = 16 }
  0x14   : > { %s3932_s6 = scalar_select %p41_p7, %s3831_s10, %s43_s5  }
  0x1a   : > { %143 = sbr.rel (!%p52_p4) target bundleno = 41 (0x29), region = 20  ;;  %s145_s7 = sand.u32 (%p52_p4), 1, %s3831_s10  }
  0x1b   : > { %s3414_s8 = sshll.u32 (%p52_p4), %s3847_s14, 3  ;;  %s3412_s18 = sshll.u32 (%p52_p4), %s145_s7, 7 }
  0x1c   : > { %s3604_s19 = sshll.u32 (%p52_p4), %s32_s24, 7  ;;  %s147_s24 = scalar_lea.vmem (%p52_p4), [#allocation4], %s3412_s18 }
  0x1d   : > { %s156_s20 = sadd.s32 (%p52_p4), %s3604_s19, %s3414_s8 }
  0x1e   : > { %s3416_s21 = sshll.u32 (%p52_p4), %s156_s20, 1 }
  0x1f   : > { %s3940_s25 = scalar_lea.vmem (%p52_p4), %s5549_s0, %s3416_s21 }
  0x20   : > { %v171_v0 = vld [vmem:[%s3940_s25] sm:$0xff] (%p52_p4)  ;;  %v173_v1 = vld [vmem:[%s3940_s25 + $0x8] sm:$0xff] (%p52_p4) }
  0x21   : > { %v175_v2 = vld [vmem:[%s3940_s25 + $0x20] sm:$0xff]  ;;  %172 = vst [vmem:[%s147_s24] sm:$0xff] %v171_v0  ;;  %174 = vst [vmem:[%s147_s24 + $0x8] sm:$0xff] %v173_v1  ;;  %v177_v3 = vld [vmem:[%s3940_s25 + $0x28] sm:$0xff] }
  0x22   : > { %176 = vst [vmem:[%s147_s24 + $0x10] sm:$0xff] %v175_v2  ;;  %v179_v4 = vld [vmem:[%s3940_s25 + $0x40] sm:$0xff]  ;;  %v181_v5 = vld [vmem:[%s3940_s25 + $0x48] sm:$0xff]  ;;  %178 = vst [vmem:[%s147_s24 + $0x18] sm:$0xff] %v177_v3 }
  0x23   : > { %180 = vst [vmem:[%s147_s24 + $0x20] sm:$0xff] %v179_v4  ;;  %182 = vst [vmem:[%s147_s24 + $0x28] sm:$0xff] %v181_v5  ;;  %v183_v6 = vld [vmem:[%s3940_s25 + $0x60] sm:$0xff]  ;;  %v185_v7 = vld [vmem:[%s3940_s25 + $0x68] sm:$0xff] }
  0x24   : > { %v187_v8 = vld [vmem:[%s3940_s25 + $0x80] sm:$0xff]  ;;  %184 = vst [vmem:[%s147_s24 + $0x30] sm:$0xff] %v183_v6  ;;  %186 = vst [vmem:[%s147_s24 + $0x38] sm:$0xff] %v185_v7  ;;  %v189_v9 = vld [vmem:[%s3940_s25 + $0x88] sm:$0xff] }
  0x25   : > { %188 = vst [vmem:[%s147_s24 + $0x40] sm:$0xff] %v187_v8  ;;  %v191_v10 = vld [vmem:[%s3940_s25 + $0xa0] sm:$0xff]  ;;  %v193_v11 = vld [vmem:[%s3940_s25 + $0xa8] sm:$0xff]  ;;  %190 = vst [vmem:[%s147_s24 + $0x48] sm:$0xff] %v189_v9 }
  0x26   : > { %192 = vst [vmem:[%s147_s24 + $0x50] sm:$0xff] %v191_v10  ;;  %194 = vst [vmem:[%s147_s24 + $0x58] sm:$0xff] %v193_v11  ;;  %v195_v12 = vld [vmem:[%s3940_s25 + $0xc0] sm:$0xff]  ;;  %v197_v13 = vld [vmem:[%s3940_s25 + $0xc8] sm:$0xff] }
  0x27   : > { %v199_v14 = vld [vmem:[%s3940_s25 + $0xe0] sm:$0xff]  ;;  %196 = vst [vmem:[%s147_s24 + $0x60] sm:$0xff] %v195_v12  ;;  %198 = vst [vmem:[%s147_s24 + $0x68] sm:$0xff] %v197_v13  ;;  %v201_v15 = vld [vmem:[%s3940_s25 + $0xe8] sm:$0xff] }
  0x28   : > { %200 = vst [vmem:[%s147_s24 + $0x70] sm:$0xff] %v199_v14  ;;  %202 = vst [vmem:[%s147_s24 + $0x78] sm:$0xff] %v201_v15 }
  0x29 PF: > { %p3417_p9 = scmp.ge.s32.totalorder %s3851_s15, 1  ;;  %p215_p10 = scmp.lt.s32.totalorder %s3851_s15, 5 }
  0x2b   : > { %p216_p11 = pnand %p3417_p9, %p215_p10 }
  0x2d   : > { %219 = sbr.rel (%p216_p11) target bundleno = 2774 (0xad6), region = 47 }
  0x34   : > { %s222_s26 = sand.u32 1, %s3827_s9   ;;  %p254_p12 = scmp.lt.s32.totalorder %s3839_s12, 1 }
  0x35   : > { %s3418_s27 = sshll.u32 %s222_s26, 7  ;;  %s3419_s28 = sshll.u32 %s222_s26, 5 }
  0x36   : > { %s255_s29 = scalar_select %p254_p12, %s3839_s12, 1 }
  0x37   : > { %s3968_s8 = scalar_lea.vmem [#allocation4], %s3418_s27  ;;  %s3970_s18 = scalar_lea.vmem [#allocation5], %s3419_s28 }
  0x38   : > { %s3605_s30 = sshll.u32 %s255_s29, 10  ;;  %p3422_p13 = scmp.ne.s32.totalorder %s3835_s11, 0 }
  0x39   : > { %s3966_s7 = scalar_lea.vmem %s5550_s1, %s3605_s30  ;;  %v3853_v16 = vmov (!%p3422_p13), 0.0  }
  0x3a   : > { %269 = sbr.rel (%p3422_p13) target bundleno = 65 (0x41), region = 55  ;;  %270 = vst [vmem:[#allocation2] sm:$0xf] (!%p3422_p13), %v3853_v16  ;;  %271 = vst [vmem:[#allocation3] sm:$0xf] (!%p3422_p13), %v3853_v16 }
  0x41 PF: > { %v272_v17 = vld [vmem:[%s3966_s7] sm:$0xff]  ;;  %v273_v19 = vld [vmem:[%s3966_s7 + $0x8] sm:$0xff]  ;;  %s3606_s9 = smul.u32 112, %s3839_s12  ;;  %s3568_s30 = sshll.u32 %s3839_s12, 4 }
  0x42   : > { %v276_v18 = vld [vmem:[%s3966_s7 + $0x20] sm:$0xff]  ;;  %v277_v21 = vld [vmem:[%s3966_s7 + $0x28] sm:$0xff]  ;;  %s3607_s20 = smul.u32 28, %s3839_s12  ;;  %s3319_s4 = scalar_lea.vmem %s3968_s8, %s3568_s30 [#allocation4] }
  0x43   : > { %v3976_v20 = vcombine.high %v272_v17, %v276_v18  ;;  %v3979_v22 = vcombine.low %v272_v17, %v276_v18  ;;  %v280_v23 = vld [vmem:[%s3966_s7 + $0x40] sm:$0xff]  ;;  %v3983_v25 = vcombine.high %v273_v19, %v277_v21  ;;  %v3985_v26 = vcombine.low %v273_v19, %v277_v21  ;;  %v281_v28 = vld [vmem:[%s3966_s7 + $0x48] sm:$0xff]  ;;  %s403_s19 = scalar_lea.vmem %s3968_s8, %s3606_s9 [#allocation4]  ;;  %s3556_s22 = smul.u32 80, %s3839_s12 }
  0x44   : > { %v284_v24 = vld [vmem:[%s3966_s7 + $0x60] sm:$0xff]  ;;  %v285_v29 = vld [vmem:[%s3966_s7 + $0x68] sm:$0xff]  ;;  %s1305_s21 = scalar_lea.vmem %s3970_s18, %s3607_s20 [#allocation5]  ;;  %s3560_s25 = smul.u32 20, %s3839_s12 }
  0x45   : > { %5815 = vst [vmem:[#allocation6_spill] sm:$0xff] %v3976_v20  ;;  %5816 = vst [vmem:[#allocation7_spill] sm:$0xff] %v3979_v22  ;;  %v3987_v27 = vcombine.high %v280_v23, %v284_v24  ;;  %v288_v30 = vld [vmem:[%s3966_s7 + $0x80] sm:$0xff]  ;;  %1060 = vmatprep.subr.bf16.mxu0 %v3976_v20  ;;  %v3993_v31 = vcombine.high %v281_v28, %v285_v29  ;;  %v289_v33 = vld [vmem:[%s3966_s7 + $0x88] sm:$0xff]  ;;  %1101 = vmatprep.subr.bf16.mxu1 %v3983_v25  ;;  %s3304_s23 = scalar_lea.vmem %s3968_s8, %s3556_s22 [#allocation4]  ;;  %s3562_s26 = smul.u32 48, %s3839_s12 }
  0x46   : > { %5817 = vst [vmem:[#allocation8_spill] sm:$0xff] %v3983_v25  ;;  %5818 = vst [vmem:[#allocation9_spill] sm:$0xff] %v3985_v26  ;;  %v292_v32 = vld [vmem:[%s3966_s7 + $0xa0] sm:$0xff]  ;;  %v293_v34 = vld [vmem:[%s3966_s7 + $0xa8] sm:$0xff]  ;;  %1061 = vmatpush1.bf16.msra.mxu0 %v3979_v22  ;;  %v4000_v35 = vcombine.low %v280_v23, %v284_v24  ;;  %1102 = vmatpush1.bf16.msra.mxu1 %v3985_v26  ;;  %v4004_v36 = vcombine.low %v281_v28, %v285_v29  ;;  %s3308_s24 = scalar_lea.vmem %s3970_s18, %s3560_s25 [#allocation5]  ;;  %s3566_s28 = smul.u32 12, %s3839_s12 }
  0x47   : > { %5819 = vst [vmem:[#allocation10_spill] sm:$0xff] %v3987_v27  ;;  %5820 = vst [vmem:[#allocation11_spill] sm:$0xff] %v3993_v31  ;;  %1062 = vmatprep.subr.bf16.mxu0 %v3987_v27  ;;  %v4006_v37 = vcombine.high %v288_v30, %v292_v32  ;;  %1103 = vmatprep.subr.bf16.mxu1 %v3993_v31  ;;  %v4009_v38 = vcombine.high %v289_v33, %v293_v34  ;;  %v296_v39 = vld [vmem:[%s3966_s7 + $0xc0] sm:$0xff]  ;;  %v297_v41 = vld [vmem:[%s3966_s7 + $0xc8] sm:$0xff]  ;;  %s3312_s27 = scalar_lea.vmem %s3968_s8, %s3562_s26 [#allocation4]  ;;  %s3572_s5 = sshll.u32 %s3839_s12, 2 }
  0x48   : > { %5821 = vst [vmem:[#allocation12_spill] sm:$0xff] %v4000_v35  ;;  %5822 = vst [vmem:[#allocation13_spill] sm:$0xff] %v4004_v36  ;;  %v300_v40 = vld [vmem:[%s3966_s7 + $0xe0] sm:$0xff]  ;;  %v301_v42 = vld [vmem:[%s3966_s7 + $0xe8] sm:$0xff]  ;;  %v4016_v43 = vcombine.low %v288_v30, %v292_v32  ;;  %v4020_v44 = vcombine.low %v289_v33, %v293_v34  ;;  %s3316_s29 = scalar_lea.vmem %s3970_s18, %s3566_s28 [#allocation5]  ;;  %s2110_s9 = ssub.s32 4, %s3839_s12 }
  0x49   : > { %5823 = vst [vmem:[#allocation14_spill] sm:$0xff] %v4006_v37  ;;  %5824 = vst [vmem:[#allocation15_spill] sm:$0xff] %v4009_v38  ;;  %v4022_v45 = vcombine.high %v296_v39, %v300_v40  ;;  %v4025_v46 = vcombine.high %v297_v41, %v301_v42  ;;  %v304_v47 = vld [vmem:[%s3966_s7 + $0x100] sm:$0xff]  ;;  %v305_v49 = vld [vmem:[%s3966_s7 + $0x108] sm:$0xff]  ;;  %v4032_v51 = vcombine.low %v296_v39, %v300_v40 }
  0x4a   : > { %1063 = vmatpush1.bf16.msra.mxu0 %v4000_v35  ;;  %5825 = vst [vmem:[#allocation16_spill] sm:$0xff] %v4016_v43  ;;  %1104 = vmatpush1.bf16.msra.mxu1 %v4004_v36  ;;  %5826 = vst [vmem:[#allocation17_spill] sm:$0xff] %v4020_v44  ;;  %v308_v48 = vld [vmem:[%s3966_s7 + $0x120] sm:$0xff]  ;;  %v309_v50 = vld [vmem:[%s3966_s7 + $0x128] sm:$0xff]  ;;  %v4036_v52 = vcombine.low %v297_v41, %v301_v42 }
  0x4b   : > { %1064 = vmatprep.subr.bf16.mxu0 %v4006_v37  ;;  %5827 = vst [vmem:[#allocation18_spill] sm:$0xff] %v4022_v45  ;;  %1105 = vmatprep.subr.bf16.mxu1 %v4009_v38  ;;  %5828 = vst [vmem:[#allocation19_spill] sm:$0xff] %v4025_v46  ;;  %v4038_v53 = vcombine.high %v304_v47, %v308_v48  ;;  %v4041_v54 = vcombine.high %v305_v49, %v309_v50  ;;  %v312_v55 = vld [vmem:[%s3966_s7 + $0x140] sm:$0xff]  ;;  %v313_v57 = vld [vmem:[%s3966_s7 + $0x148] sm:$0xff] }
  0x4c   : > { %5829 = vst [vmem:[#allocation20_spill] sm:$0xff] %v4032_v51  ;;  %5830 = vst [vmem:[#allocation21_spill] sm:$0xff] %v4036_v52  ;;  %v316_v56 = vld [vmem:[%s3966_s7 + $0x160] sm:$0xff]  ;;  %v317_v58 = vld [vmem:[%s3966_s7 + $0x168] sm:$0xff]  ;;  %v4048_v59 = vcombine.low %v304_v47, %v308_v48  ;;  %v4052_v60 = vcombine.low %v305_v49, %v309_v50 }
  0x4d   : > { %5831 = vst [vmem:[#allocation22_spill] sm:$0xff] %v4038_v53  ;;  %5832 = vst [vmem:[#allocation23_spill] sm:$0xff] %v4041_v54  ;;  %v4054_v61 = vcombine.high %v312_v55, %v316_v56  ;;  %v4057_v62 = vcombine.high %v313_v57, %v317_v58  ;;  %v320_v63 = vld [vmem:[%s3966_s7 + $0x180] sm:$0xff]  ;;  %v321_v1 = vld [vmem:[%s3966_s7 + $0x188] sm:$0xff]  ;;  %v4064_v3 = vcombine.low %v312_v55, %v316_v56 }
  0x4e   : > { %1065 = vmatpush1.bf16.msra.mxu0 %v4016_v43  ;;  %1106 = vmatpush1.bf16.msra.mxu1 %v4020_v44  ;;  %5833 = vst [vmem:[#allocation24_spill] sm:$0xff] %v4048_v59  ;;  %5834 = vst [vmem:[#allocation25_spill] sm:$0xff] %v4052_v60  ;;  %v324_v0 = vld [vmem:[%s3966_s7 + $0x1a0] sm:$0xff]  ;;  %v325_v2 = vld [vmem:[%s3966_s7 + $0x1a8] sm:$0xff]  ;;  %v4068_v4 = vcombine.low %v313_v57, %v317_v58 }
  0x4f   : > { %1066 = vmatprep.subr.bf16.mxu0 %v4022_v45  ;;  %1107 = vmatprep.subr.bf16.mxu1 %v4025_v46  ;;  %5835 = vst [vmem:[#allocation26_spill] sm:$0xff] %v4054_v61  ;;  %5836 = vst [vmem:[#allocation27_spill] sm:$0xff] %v4057_v62  ;;  %v4070_v5 = vcombine.high %v320_v63, %v324_v0  ;;  %v4072_v6 = vld.sshfl [vmem:[#allocation2] sm:$0x33 pattern:$0x76325410]  ;;  %v4075_v7 = vcombine.high %v321_v1, %v325_v2 }
  0x50   : > { %5837 = vst [vmem:[#allocation28_spill] sm:$0xff] %v4064_v3  ;;  %5838 = vst [vmem:[#allocation29_spill] sm:$0xff] %v4068_v4  ;;  %v328_v8 = vld [vmem:[%s3966_s7 + $0x1c0] sm:$0xff]  ;;  %v415_v10 = vcombine.high %v4072_v6, %v4072_v6  ;;  %v329_v11 = vld [vmem:[%s3966_s7 + $0x1c8] sm:$0xff]  ;;  %v4084_v13 = vcombine.low %v320_v63, %v324_v0  ;;  %v4090_v15 = vcombine.low %v321_v1, %v325_v2 }
  0x51   : > { %5839 = vst [vmem:[#allocation30_spill] sm:$0xff] %v4070_v5  ;;  %5840 = vst [vmem:[#allocation31_spill] sm:$0xff] %v4075_v7  ;;  %v332_v9 = vld [vmem:[%s3966_s7 + $0x1e0] sm:$0xff]  ;;  %v333_v12 = vld [vmem:[%s3966_s7 + $0x1e8] sm:$0xff] }
  0x52   : > { %1067 = vmatpush1.bf16.msra.mxu0 %v4032_v51  ;;  %1108 = vmatpush1.bf16.msra.mxu1 %v4036_v52  ;;  %5841 = vst [vmem:[#allocation32_spill] sm:$0xff] %v4084_v13  ;;  %v4086_v14 = vpack.c.bf16 %v415_v10, %v415_v10  ;;  %5842 = vst [vmem:[#allocation33_spill] sm:$0xff] %v4090_v15  ;;  %v4092_v16 = vcombine.high %v328_v8, %v332_v9  ;;  %v336_v18 = vld [vmem:[%s3966_s7 + $0x200] sm:$0xff]  ;;  %v337_v21 = vld [vmem:[%s3966_s7 + $0x208] sm:$0xff] }
  0x53   : > { %1068 = vmatprep.subr.bf16.mxu0 %v4038_v53  ;;  %1109 = vmatprep.subr.bf16.mxu1 %v4041_v54  ;;  %v4095_v17 = vcombine.high %v329_v11, %v333_v12  ;;  %v340_v19 = vld [vmem:[%s3966_s7 + $0x220] sm:$0xff]  ;;  %v341_v23 = vld [vmem:[%s3966_s7 + $0x228] sm:$0xff]  ;;  %v4104_v24 = vcombine.low %v328_v8, %v332_v9  ;;  %v4108_v28 = vcombine.low %v329_v11, %v333_v12 }
  0x54   : > { %5843 = vst [vmem:[#allocation34_spill] sm:$0xff] %v4092_v16  ;;  %1092 = vmatprep.mubr.bf16.mxu0 %v4086_v14  ;;  %1133 = vmatprep.mubr.bf16.mxu1 %v4086_v14  ;;  %v4110_v29 = vcombine.high %v336_v18, %v340_v19  ;;  %v4113_v30 = vcombine.high %v337_v21, %v341_v23  ;;  %v344_v32 = vld [vmem:[%s3966_s7 + $0x240] sm:$0xff]  ;;  %v345_v34 = vld [vmem:[%s3966_s7 + $0x248] sm:$0xff] }
  0x55   : > { %5844 = vst [vmem:[#allocation35_spill] sm:$0xff] %v4095_v17  ;;  %5845 = vst [vmem:[#allocation36_spill] sm:$0xff] %v4104_v24  ;;  %v348_v33 = vld [vmem:[%s3966_s7 + $0x260] sm:$0xff]  ;;  %v349_v39 = vld [vmem:[%s3966_s7 + $0x268] sm:$0xff]  ;;  %v4120_v40 = vcombine.low %v336_v18, %v340_v19  ;;  %v4124_v41 = vcombine.low %v337_v21, %v341_v23 }
  0x56   : > { %1069 = vmatpush1.bf16.msra.mxu0 %v4048_v59  ;;  %1110 = vmatpush1.bf16.msra.mxu1 %v4052_v60  ;;  %5846 = vst [vmem:[#allocation37_spill] sm:$0xff] %v4108_v28  ;;  %5847 = vst [vmem:[#allocation38_spill] sm:$0xff] %v4110_v29  ;;  %v4126_v42 = vcombine.high %v344_v32, %v348_v33  ;;  %v4129_v47 = vcombine.high %v345_v34, %v349_v39  ;;  %v352_v48 = vld [vmem:[%s3966_s7 + $0x280] sm:$0xff]  ;;  %v353_v50 = vld [vmem:[%s3966_s7 + $0x288] sm:$0xff] }
  0x57   : > { %1070 = vmatprep.subr.bf16.mxu0 %v4054_v61  ;;  %1111 = vmatprep.subr.bf16.mxu1 %v4057_v62  ;;  %5848 = vst [vmem:[#allocation39_spill] sm:$0xff] %v4113_v30  ;;  %5849 = vst [vmem:[#allocation40_spill] sm:$0xff] %v4120_v40  ;;  %v356_v49 = vld [vmem:[%s3966_s7 + $0x2a0] sm:$0xff]  ;;  %v357_v55 = vld [vmem:[%s3966_s7 + $0x2a8] sm:$0xff]  ;;  %v4136_v56 = vcombine.low %v344_v32, %v348_v33  ;;  %v4140_v57 = vcombine.low %v345_v34, %v349_v39 }
  0x58   : > { %5850 = vst [vmem:[#allocation41_spill] sm:$0xff] %v4124_v41  ;;  %5851 = vst [vmem:[#allocation42_spill] sm:$0xff] %v4126_v42  ;;  %v4142_v58 = vcombine.high %v352_v48, %v356_v49  ;;  %v4145_v63 = vcombine.high %v353_v50, %v357_v55  ;;  %v360_v0 = vld [vmem:[%s3966_s7 + $0x2c0] sm:$0xff]  ;;  %v361_v2 = vld [vmem:[%s3966_s7 + $0x2c8] sm:$0xff]  ;;  %v4152_v9 = vcombine.low %v352_v48, %v356_v49 }
  0x59   : > { %5852 = vst [vmem:[#allocation43_spill] sm:$0xff] %v4129_v47  ;;  %5853 = vst [vmem:[#allocation44_spill] sm:$0xff] %v4136_v56  ;;  %v364_v1 = vld [vmem:[%s3966_s7 + $0x2e0] sm:$0xff]  ;;  %v365_v8 = vld [vmem:[%s3966_s7 + $0x2e8] sm:$0xff]  ;;  %v4156_v10 = vcombine.low %v353_v50, %v357_v55 }
  0x5a   : > { %1071 = vmatpush1.bf16.msra.mxu0 %v4064_v3  ;;  %1112 = vmatpush1.bf16.msra.mxu1 %v4068_v4  ;;  %5854 = vst [vmem:[#allocation45_spill] sm:$0xff] %v4140_v57  ;;  %5855 = vst [vmem:[#allocation46_spill] sm:$0xff] %v4142_v58  ;;  %v4158_v11 = vcombine.high %v360_v0, %v364_v1  ;;  %v4161_v12 = vcombine.high %v361_v2, %v365_v8  ;;  %v368_v18 = vld [vmem:[%s3966_s7 + $0x300] sm:$0xff]  ;;  %v369_v21 = vld [vmem:[%s3966_s7 + $0x308] sm:$0xff] }
  0x5b   : > { %1072 = vmatprep.subr.bf16.mxu0 %v4070_v5  ;;  %1113 = vmatprep.subr.bf16.mxu1 %v4075_v7  ;;  %5856 = vst [vmem:[#allocation47_spill] sm:$0xff] %v4145_v63  ;;  %5857 = vst [vmem:[#allocation48_spill] sm:$0xff] %v4152_v9  ;;  %v372_v19 = vld [vmem:[%s3966_s7 + $0x320] sm:$0xff]  ;;  %v373_v23 = vld [vmem:[%s3966_s7 + $0x328] sm:$0xff]  ;;  %v4168_v32 = vcombine.low %v360_v0, %v364_v1  ;;  %v4172_v33 = vcombine.low %v361_v2, %v365_v8 }
  0x5c   : > { %5858 = vst [vmem:[#allocation49_spill] sm:$0xff] %v4156_v10  ;;  %5859 = vst [vmem:[#allocation50_spill] sm:$0xff] %v4158_v11  ;;  %v4174_v34 = vcombine.high %v368_v18, %v372_v19  ;;  %v4177_v39 = vcombine.high %v369_v21, %v373_v23  ;;  %v376_v48 = vld [vmem:[%s3966_s7 + $0x340] sm:$0xff]  ;;  %v377_v50 = vld [vmem:[%s3966_s7 + $0x348] sm:$0xff]  ;;  %v4184_v0 = vcombine.low %v368_v18, %v372_v19 }
  0x5d   : > { %5860 = vst [vmem:[#allocation51_spill] sm:$0xff] %v4161_v12  ;;  %5861 = vst [vmem:[#allocation52_spill] sm:$0xff] %v4168_v32  ;;  %v380_v49 = vld [vmem:[%s3966_s7 + $0x360] sm:$0xff]  ;;  %v381_v55 = vld [vmem:[%s3966_s7 + $0x368] sm:$0xff]  ;;  %v4188_v1 = vcombine.low %v369_v21, %v373_v23 }
  0x5e   : > { %1073 = vmatpush1.bf16.msra.mxu0 %v4084_v13  ;;  %1114 = vmatpush1.bf16.msra.mxu1 %v4090_v15  ;;  %5862 = vst [vmem:[#allocation53_spill] sm:$0xff] %v4172_v33  ;;  %5863 = vst [vmem:[#allocation54_spill] sm:$0xff] %v4174_v34  ;;  %v4190_v2 = vcombine.high %v376_v48, %v380_v49  ;;  %v4193_v8 = vcombine.high %v377_v50, %v381_v55  ;;  %v385_v18 = vld [vmem:[%s3966_s7 + $0x388] sm:$0xff] }
  0x5f   : > { %1074 = vmatprep.subr.bf16.mxu0 %v4092_v16  ;;  %1115 = vmatprep.subr.bf16.mxu1 %v4095_v17  ;;  %5864 = vst [vmem:[#allocation55_spill] sm:$0xff] %v4177_v39  ;;  %5865 = vst [vmem:[#allocation56_spill] sm:$0xff] %v4184_v0  ;;  %v389_v19 = vld [vmem:[%s3966_s7 + $0x3a8] sm:$0xff]  ;;  %v4204_v21 = vcombine.low %v377_v50, %v381_v55 }
  0x60   : > { %5866 = vst [vmem:[#allocation57_spill] sm:$0xff] %v4188_v1  ;;  %5867 = vst [vmem:[#allocation58_spill] sm:$0xff] %v4190_v2  ;;  %v4220_v50 = vcombine.low %v385_v18, %v389_v19 }
  0x61   : > { %5868 = vst [vmem:[#allocation59_spill] sm:$0xff] %v4193_v8  ;;  %5870 = vst [vmem:[#allocation61_spill] sm:$0xff] %v4204_v21 }
  0x62   : > { %1075 = vmatpush1.bf16.msra.mxu0 %v4104_v24  ;;  %1116 = vmatpush1.bf16.msra.mxu1 %v4108_v28  ;;  %5874 = vst [vmem:[#allocation65_spill] sm:$0xff] %v4220_v50 }
  0x63   : > { %1076 = vmatprep.subr.bf16.mxu0 %v4110_v29  ;;  %1117 = vmatprep.subr.bf16.mxu1 %v4113_v30 }
  0x66   : > { %1077 = vmatpush1.bf16.msra.mxu0 %v4120_v40  ;;  %1118 = vmatpush1.bf16.msra.mxu1 %v4124_v41 }
  0x67   : > { %1078 = vmatprep.subr.bf16.mxu0 %v4126_v42  ;;  %1119 = vmatprep.subr.bf16.mxu1 %v4129_v47 }
  0x6a   : > { %1079 = vmatpush1.bf16.msra.mxu0 %v4136_v56  ;;  %1120 = vmatpush1.bf16.msra.mxu1 %v4140_v57 }
  0x6b   : > { %1080 = vmatprep.subr.bf16.mxu0 %v4142_v58  ;;  %1121 = vmatprep.subr.bf16.mxu1 %v4145_v63 }
  0x6e   : > { %1081 = vmatpush1.bf16.msra.mxu0 %v4152_v9  ;;  %1122 = vmatpush1.bf16.msra.mxu1 %v4156_v10  ;;  %v399_v10 = vld [vmem:[%s3966_s7 + $0x3f8] sm:$0xff] }
  0x6f   : > { %1082 = vmatprep.subr.bf16.mxu0 %v4158_v11  ;;  %1123 = vmatprep.subr.bf16.mxu1 %v4161_v12  ;;  %v384_v12 = vld [vmem:[%s3966_s7 + $0x380] sm:$0xff]  ;;  %v286_v11 = vld [vmem:[%s3966_s7 + $0x70] sm:$0xff] }
  0x72   : > { %1083 = vmatpush1.bf16.msra.mxu0 %v4168_v32  ;;  %1124 = vmatpush1.bf16.msra.mxu1 %v4172_v33  ;;  %v388_v32 = vld [vmem:[%s3966_s7 + $0x3a0] sm:$0xff]  ;;  %v4200_v33 = vcombine.low %v376_v48, %v380_v49  ;;  %v393_v48 = vld [vmem:[%s3966_s7 + $0x3c8] sm:$0xff] }
  0x73   : > { %1084 = vmatprep.subr.bf16.mxu0 %v4174_v34  ;;  %1125 = vmatprep.subr.bf16.mxu1 %v4177_v39  ;;  %v4206_v23 = vcombine.high %v384_v12, %v388_v32  ;;  %v4209_v39 = vcombine.high %v385_v18, %v389_v19  ;;  %v392_v34 = vld [vmem:[%s3966_s7 + $0x3c0] sm:$0xff]  ;;  %v397_v49 = vld [vmem:[%s3966_s7 + $0x3e8] sm:$0xff] }
  0x74   : > { %5869 = vst [vmem:[#allocation60_spill] sm:$0xff] %v4200_v33  ;;  %v4236_v18 = vcombine.low %v393_v48, %v397_v49 }
  0x75   : > { %5871 = vst [vmem:[#allocation62_spill] sm:$0xff] %v4206_v23  ;;  %5872 = vst [vmem:[#allocation63_spill] sm:$0xff] %v4209_v39 }
  0x76   : > { %1085 = vmatpush1.bf16.msra.mxu0 %v4184_v0  ;;  %1126 = vmatpush1.bf16.msra.mxu1 %v4188_v1  ;;  %v396_v0 = vld [vmem:[%s3966_s7 + $0x3e0] sm:$0xff]  ;;  %v4216_v1 = vcombine.low %v384_v12, %v388_v32  ;;  %v275_v12 = vld [vmem:[%s3966_s7 + $0x18] sm:$0xff]  ;;  %5878 = vst [vmem:[#allocation69_spill] sm:$0xff] %v4236_v18 }
  0x77   : > { %1086 = vmatprep.subr.bf16.mxu0 %v4190_v2  ;;  %1127 = vmatprep.subr.bf16.mxu1 %v4193_v8  ;;  %v4222_v55 = vcombine.high %v392_v34, %v396_v0  ;;  %v4225_v8 = vcombine.high %v393_v48, %v397_v49  ;;  %v274_v2 = vld [vmem:[%s3966_s7 + $0x10] sm:$0xff]  ;;  %v279_v32 = vld [vmem:[%s3966_s7 + $0x38] sm:$0xff] }
  0x78   : > { %5873 = vst [vmem:[#allocation64_spill] sm:$0xff] %v4216_v1  ;;  %v4256_v49 = vcombine.low %v275_v12, %v279_v32 }
  0x79   : > { %5875 = vst [vmem:[#allocation66_spill] sm:$0xff] %v4222_v55  ;;  %5876 = vst [vmem:[#allocation67_spill] sm:$0xff] %v4225_v8 }
  0x7a   : > { %1087 = vmatpush1.bf16.msra.mxu0 %v4200_v33  ;;  %1128 = vmatpush1.bf16.msra.mxu1 %v4204_v21  ;;  %v278_v33 = vld [vmem:[%s3966_s7 + $0x30] sm:$0xff]  ;;  %v4232_v21 = vcombine.low %v392_v34, %v396_v0  ;;  %v4247_v34 = vpack.c.bf16 %v4072_v6, %v4072_v6  ;;  %v283_v0 = vld [vmem:[%s3966_s7 + $0x58] sm:$0xff]  ;;  %5882 = vst [vmem:[#allocation73_spill] sm:$0xff] %v4256_v49 }
  0x7b   : > { %1088 = vmatprep.subr.bf16.mxu0 %v4206_v23  ;;  %1129 = vmatprep.subr.bf16.mxu1 %v4209_v39  ;;  %v4238_v19 = vcombine.high %v274_v2, %v278_v33  ;;  %v4241_v39 = vcombine.high %v275_v12, %v279_v32  ;;  %v282_v23 = vld [vmem:[%s3966_s7 + $0x50] sm:$0xff]  ;;  %v4252_v48 = vcombine.low %v274_v2, %v278_v33  ;;  %v291_v33 = vld [vmem:[%s3966_s7 + $0x98] sm:$0xff] }
  0x7c   : > { %5877 = vst [vmem:[#allocation68_spill] sm:$0xff] %v4232_v21  ;;  %v290_v6 = vld [vmem:[%s3966_s7 + $0x90] sm:$0xff]  ;;  %v295_v2 = vld [vmem:[%s3966_s7 + $0xb8] sm:$0xff]  ;;  %v4270_v12 = vcombine.low %v282_v23, %v286_v11 }
  0x7d   : > { %5879 = vst [vmem:[#allocation70_spill] sm:$0xff] %v4238_v19  ;;  %5880 = vst [vmem:[#allocation71_spill] sm:$0xff] %v4241_v39 }
  0x7e   : > { %1089 = vmatpush1.bf16.msra.mxu0 %v4216_v1  ;;  %1130 = vmatpush1.bf16.msra.mxu1 %v4220_v50  ;;  %5881 = vst [vmem:[#allocation72_spill] sm:$0xff] %v4252_v48  ;;  %v294_v1 = vld [vmem:[%s3966_s7 + $0xb0] sm:$0xff]  ;;  %5885 = vst [vmem:[#allocation76_spill] sm:$0xff] %v4270_v12 }
  0x7f   : > { %1090 = vmatprep.subr.bf16.mxu0 %v4222_v55  ;;  %1131 = vmatprep.subr.bf16.mxu1 %v4225_v8  ;;  %v287_v55 = vld [vmem:[%s3966_s7 + $0x78] sm:$0xff]  ;;  %v4258_v8 = vcombine.high %v282_v23, %v286_v11 }
  0x80   : > { %v4261_v50 = vcombine.high %v283_v0, %v287_v55  ;;  %v4274_v32 = vcombine.low %v283_v0, %v287_v55  ;;  %v299_v11 = vld [vmem:[%s3966_s7 + $0xd8] sm:$0xff]  ;;  %v4288_v55 = vcombine.low %v290_v6, %v294_v1  ;;  %v4292_v0 = vcombine.low %v291_v33, %v295_v2 }
  0x81   : > { %5883 = vst [vmem:[#allocation74_spill] sm:$0xff] %v4258_v8  ;;  %v303_v23 = vld [vmem:[%s3966_s7 + $0xf8] sm:$0xff] }
  0x82   : > { %1091 = vmatpush1.bf16.msra.mxu0 %v4232_v21  ;;  %1132 = vmatpush1.bf16.msra.mxu1 %v4236_v18  ;;  %5884 = vst [vmem:[#allocation75_spill] sm:$0xff] %v4261_v50  ;;  %5886 = vst [vmem:[#allocation77_spill] sm:$0xff] %v4274_v32  ;;  %v298_v18 = vld [vmem:[%s3966_s7 + $0xd0] sm:$0xff] }
  0x83   : > { %1142 = vmatprep.subr.bf16.mxu0 %v4238_v19  ;;  %1183 = vmatprep.subr.bf16.mxu1 %v4241_v39  ;;  %v4276_v39 = vcombine.high %v290_v6, %v294_v1  ;;  %v4279_v19 = vcombine.high %v291_v33, %v295_v2  ;;  %v302_v21 = vld [vmem:[%s3966_s7 + $0xf0] sm:$0xff]  ;;  %5889 = vst [vmem:[#allocation80_spill] sm:$0xff] %v4288_v55  ;;  %5890 = vst [vmem:[#allocation81_spill] sm:$0xff] %v4292_v0  ;;  %v307_v1 = vld [vmem:[%s3966_s7 + $0x118] sm:$0xff] }
  0x84   : > { %v311_v6 = vld [vmem:[%s3966_s7 + $0x138] sm:$0xff]  ;;  %v4308_v33 = vcombine.low %v299_v11, %v303_v23 }
  0x85   : > { %1093 = vmatmul.mubr.bf16.vlgmr.msra.gmra.mrb[0].mxu0 %v4247_v34  ;;  %1134 = vmatmul.mubr.bf16.vlgmr.msra.gmra.mrb[0].mxu1 %v4247_v34  ;;  %5887 = vst [vmem:[#allocation78_spill] sm:$0xff] %v4276_v39  ;;  %5888 = vst [vmem:[#allocation79_spill] sm:$0xff] %v4279_v19 }
  0x86   : > { %1143 = vmatpush1.bf16.msra.mxu0 %v4252_v48  ;;  %1184 = vmatpush1.bf16.msra.mxu1 %v4256_v49  ;;  %5894 = vst [vmem:[#allocation85_spill] sm:$0xff] %v4308_v33  ;;  %v398_v49 = vld [vmem:[%s3966_s7 + $0x3f0] sm:$0xff]  ;;  %v395_v48 = vld [vmem:[%s3966_s7 + $0x3d8] sm:$0xff] }
  0x87   : > { %1144 = vmatprep.subr.bf16.mxu0 %v4258_v8  ;;  %1185 = vmatprep.subr.bf16.mxu1 %v4261_v50  ;;  %v4294_v50 = vcombine.high %v298_v18, %v302_v21  ;;  %v4297_v8 = vcombine.high %v299_v11, %v303_v23  ;;  %v4324_v11 = vcombine.low %v307_v1, %v311_v6 }
  0x88   : > { %1174 = vmatprep.mubr.bf16.mxu0 %v4086_v14  ;;  %1215 = vmatprep.mubr.bf16.mxu1 %v4086_v14  ;;  %v306_v14 = vld [vmem:[%s3966_s7 + $0x110] sm:$0xff] }
  0x89   : > { %5891 = vst [vmem:[#allocation82_spill] sm:$0xff] %v4294_v50  ;;  %5892 = vst [vmem:[#allocation83_spill] sm:$0xff] %v4297_v8 }
  0x8a   : > { %1145 = vmatpush1.bf16.msra.mxu0 %v4270_v12  ;;  %1186 = vmatpush1.bf16.msra.mxu1 %v4274_v32  ;;  %v310_v12 = vld [vmem:[%s3966_s7 + $0x130] sm:$0xff]  ;;  %v4304_v32 = vcombine.low %v298_v18, %v302_v21  ;;  %v315_v21 = vld [vmem:[%s3966_s7 + $0x158] sm:$0xff]  ;;  %5898 = vst [vmem:[#allocation89_spill] sm:$0xff] %v4324_v11 }
  0x8b   : > { %1146 = vmatprep.subr.bf16.mxu0 %v4276_v39  ;;  %1187 = vmatprep.subr.bf16.mxu1 %v4279_v19  ;;  %v4310_v2 = vcombine.high %v306_v14, %v310_v12  ;;  %v4313_v19 = vcombine.high %v307_v1, %v311_v6  ;;  %v314_v39 = vld [vmem:[%s3966_s7 + $0x150] sm:$0xff]  ;;  %v319_v18 = vld [vmem:[%s3966_s7 + $0x178] sm:$0xff] }
  0x8c   : > { %5893 = vst [vmem:[#allocation84_spill] sm:$0xff] %v4304_v32  ;;  %v4340_v1 = vcombine.low %v315_v21, %v319_v18 }
  0x8d   : > { %5895 = vst [vmem:[#allocation86_spill] sm:$0xff] %v4310_v2  ;;  %5896 = vst [vmem:[#allocation87_spill] sm:$0xff] %v4313_v19 }
  0x8e   : > { %1147 = vmatpush1.bf16.msra.mxu0 %v4288_v55  ;;  %1188 = vmatpush1.bf16.msra.mxu1 %v4292_v0  ;;  %v318_v55 = vld [vmem:[%s3966_s7 + $0x170] sm:$0xff]  ;;  %v4320_v0 = vcombine.low %v306_v14, %v310_v12  ;;  %v323_v12 = vld [vmem:[%s3966_s7 + $0x198] sm:$0xff]  ;;  %5902 = vst [vmem:[#allocation93_spill] sm:$0xff] %v4340_v1 }
  0x8f   : > { %1148 = vmatprep.subr.bf16.mxu0 %v4294_v50  ;;  %1189 = vmatprep.subr.bf16.mxu1 %v4297_v8  ;;  %v4326_v23 = vcombine.high %v314_v39, %v318_v55  ;;  %v4329_v8 = vcombine.high %v315_v21, %v319_v18  ;;  %v322_v50 = vld [vmem:[%s3966_s7 + $0x190] sm:$0xff]  ;;  %v327_v14 = vld [vmem:[%s3966_s7 + $0x1b8] sm:$0xff] }
  0x90   : > { %5897 = vst [vmem:[#allocation88_spill] sm:$0xff] %v4320_v0  ;;  %v4356_v21 = vcombine.low %v323_v12, %v327_v14 }
  0x91   : > { %5899 = vst [vmem:[#allocation90_spill] sm:$0xff] %v4326_v23  ;;  %5900 = vst [vmem:[#allocation91_spill] sm:$0xff] %v4329_v8 }
  0x92   : > { %1149 = vmatpush1.bf16.msra.mxu0 %v4304_v32  ;;  %1190 = vmatpush1.bf16.msra.mxu1 %v4308_v33  ;;  %v326_v32 = vld [vmem:[%s3966_s7 + $0x1b0] sm:$0xff]  ;;  %v4336_v33 = vcombine.low %v314_v39, %v318_v55  ;;  %v331_v39 = vld [vmem:[%s3966_s7 + $0x1d8] sm:$0xff]  ;;  %5906 = vst [vmem:[#allocation97_spill] sm:$0xff] %v4356_v21 }
  0x93   : > { %1150 = vmatprep.subr.bf16.mxu0 %v4310_v2  ;;  %1191 = vmatprep.subr.bf16.mxu1 %v4313_v19  ;;  %v4342_v6 = vcombine.high %v322_v50, %v326_v32  ;;  %v4345_v19 = vcombine.high %v323_v12, %v327_v14  ;;  %v330_v2 = vld [vmem:[%s3966_s7 + $0x1d0] sm:$0xff]  ;;  %v335_v55 = vld [vmem:[%s3966_s7 + $0x1f8] sm:$0xff] }
  0x94   : > { %5901 = vst [vmem:[#allocation92_spill] sm:$0xff] %v4336_v33  ;;  %v4372_v12 = vcombine.low %v331_v39, %v335_v55 }
  0x95   : > { %5903 = vst [vmem:[#allocation94_spill] sm:$0xff] %v4342_v6  ;;  %5904 = vst [vmem:[#allocation95_spill] sm:$0xff] %v4345_v19 }
  0x96   : > { %1151 = vmatpush1.bf16.msra.mxu0 %v4320_v0  ;;  %1192 = vmatpush1.bf16.msra.mxu1 %v4324_v11  ;;  %v334_v0 = vld [vmem:[%s3966_s7 + $0x1f0] sm:$0xff]  ;;  %v4352_v11 = vcombine.low %v322_v50, %v326_v32  ;;  %v339_v50 = vld [vmem:[%s3966_s7 + $0x218] sm:$0xff]  ;;  %5910 = vst [vmem:[#allocation101_spill] sm:$0xff] %v4372_v12 }
  0x97   : > { %1152 = vmatprep.subr.bf16.mxu0 %v4326_v23  ;;  %1193 = vmatprep.subr.bf16.mxu1 %v4329_v8  ;;  %v4358_v18 = vcombine.high %v330_v2, %v334_v0  ;;  %v4361_v8 = vcombine.high %v331_v39, %v335_v55  ;;  %v338_v23 = vld [vmem:[%s3966_s7 + $0x210] sm:$0xff]  ;;  %v343_v32 = vld [vmem:[%s3966_s7 + $0x238] sm:$0xff] }
  0x98   : > { %5905 = vst [vmem:[#allocation96_spill] sm:$0xff] %v4352_v11  ;;  %v4388_v39 = vcombine.low %v339_v50, %v343_v32 }
  0x99   : > { %5907 = vst [vmem:[#allocation98_spill] sm:$0xff] %v4358_v18  ;;  %5908 = vst [vmem:[#allocation99_spill] sm:$0xff] %v4361_v8 }
  0x9a   : > { %1153 = vmatpush1.bf16.msra.mxu0 %v4336_v33  ;;  %1194 = vmatpush1.bf16.msra.mxu1 %v4340_v1  ;;  %v342_v33 = vld [vmem:[%s3966_s7 + $0x230] sm:$0xff]  ;;  %v4368_v1 = vcombine.low %v330_v2, %v334_v0  ;;  %v347_v0 = vld [vmem:[%s3966_s7 + $0x258] sm:$0xff]  ;;  %5914 = vst [vmem:[#allocation105_spill] sm:$0xff] %v4388_v39 }
  0x9b   : > { %1154 = vmatprep.subr.bf16.mxu0 %v4342_v6  ;;  %1195 = vmatprep.subr.bf16.mxu1 %v4345_v19  ;;  %v4374_v14 = vcombine.high %v338_v23, %v342_v33  ;;  %v4377_v19 = vcombine.high %v339_v50, %v343_v32  ;;  %v346_v6 = vld [vmem:[%s3966_s7 + $0x250] sm:$0xff]  ;;  %v351_v2 = vld [vmem:[%s3966_s7 + $0x278] sm:$0xff] }
  0x9c   : > { %5909 = vst [vmem:[#allocation100_spill] sm:$0xff] %v4368_v1  ;;  %v4404_v50 = vcombine.low %v347_v0, %v351_v2 }
  0x9d   : > { %5911 = vst [vmem:[#allocation102_spill] sm:$0xff] %v4374_v14  ;;  %5912 = vst [vmem:[#allocation103_spill] sm:$0xff] %v4377_v19 }
  0x9e   : > { %1155 = vmatpush1.bf16.msra.mxu0 %v4352_v11  ;;  %1196 = vmatpush1.bf16.msra.mxu1 %v4356_v21  ;;  %v350_v11 = vld [vmem:[%s3966_s7 + $0x270] sm:$0xff]  ;;  %v4384_v21 = vcombine.low %v338_v23, %v342_v33  ;;  %v355_v33 = vld [vmem:[%s3966_s7 + $0x298] sm:$0xff]  ;;  %5918 = vst [vmem:[#allocation109_spill] sm:$0xff] %v4404_v50 }
  0x9f   : > { %1156 = vmatprep.subr.bf16.mxu0 %v4358_v18  ;;  %1197 = vmatprep.subr.bf16.mxu1 %v4361_v8  ;;  %v4390_v55 = vcombine.high %v346_v6, %v350_v11  ;;  %v4393_v8 = vcombine.high %v347_v0, %v351_v2  ;;  %v354_v18 = vld [vmem:[%s3966_s7 + $0x290] sm:$0xff]  ;;  %v359_v23 = vld [vmem:[%s3966_s7 + $0x2b8] sm:$0xff] }
  0xa0   : > { %5913 = vst [vmem:[#allocation104_spill] sm:$0xff] %v4384_v21  ;;  %v4420_v0 = vcombine.low %v355_v33, %v359_v23 }
  0xa1   : > { %5915 = vst [vmem:[#allocation106_spill] sm:$0xff] %v4390_v55  ;;  %5916 = vst [vmem:[#allocation107_spill] sm:$0xff] %v4393_v8 }
  0xa2   : > { %1157 = vmatpush1.bf16.msra.mxu0 %v4368_v1  ;;  %1198 = vmatpush1.bf16.msra.mxu1 %v4372_v12  ;;  %v358_v1 = vld [vmem:[%s3966_s7 + $0x2b0] sm:$0xff]  ;;  %v4400_v12 = vcombine.low %v346_v6, %v350_v11  ;;  %v363_v11 = vld [vmem:[%s3966_s7 + $0x2d8] sm:$0xff]  ;;  %5922 = vst [vmem:[#allocation113_spill] sm:$0xff] %v4420_v0 }
  0xa3   : > { %1158 = vmatprep.subr.bf16.mxu0 %v4374_v14  ;;  %1199 = vmatprep.subr.bf16.mxu1 %v4377_v19  ;;  %v4406_v32 = vcombine.high %v354_v18, %v358_v1  ;;  %v4409_v19 = vcombine.high %v355_v33, %v359_v23  ;;  %v362_v14 = vld [vmem:[%s3966_s7 + $0x2d0] sm:$0xff]  ;;  %v367_v6 = vld [vmem:[%s3966_s7 + $0x2f8] sm:$0xff] }
  0xa4   : > { %5917 = vst [vmem:[#allocation108_spill] sm:$0xff] %v4400_v12  ;;  %v4436_v33 = vcombine.low %v363_v11, %v367_v6 }
  0xa5   : > { %5919 = vst [vmem:[#allocation110_spill] sm:$0xff] %v4406_v32  ;;  %5920 = vst [vmem:[#allocation111_spill] sm:$0xff] %v4409_v19 }
  0xa6   : > { %1159 = vmatpush1.bf16.msra.mxu0 %v4384_v21  ;;  %1200 = vmatpush1.bf16.msra.mxu1 %v4388_v39  ;;  %v366_v21 = vld [vmem:[%s3966_s7 + $0x2f0] sm:$0xff]  ;;  %v4416_v39 = vcombine.low %v354_v18, %v358_v1  ;;  %v371_v1 = vld [vmem:[%s3966_s7 + $0x318] sm:$0xff]  ;;  %5926 = vst [vmem:[#allocation117_spill] sm:$0xff] %v4436_v33 }
  0xa7   : > { %1160 = vmatprep.subr.bf16.mxu0 %v4390_v55  ;;  %1201 = vmatprep.subr.bf16.mxu1 %v4393_v8  ;;  %v4422_v2 = vcombine.high %v362_v14, %v366_v21  ;;  %v4425_v8 = vcombine.high %v363_v11, %v367_v6  ;;  %v370_v55 = vld [vmem:[%s3966_s7 + $0x310] sm:$0xff]  ;;  %v375_v18 = vld [vmem:[%s3966_s7 + $0x338] sm:$0xff] }
  0xa8   : > { %5921 = vst [vmem:[#allocation112_spill] sm:$0xff] %v4416_v39  ;;  %v4452_v11 = vcombine.low %v371_v1, %v375_v18 }
  0xa9   : > { %5923 = vst [vmem:[#allocation114_spill] sm:$0xff] %v4422_v2  ;;  %5924 = vst [vmem:[#allocation115_spill] sm:$0xff] %v4425_v8 }
  0xaa   : > { %1161 = vmatpush1.bf16.msra.mxu0 %v4400_v12  ;;  %1202 = vmatpush1.bf16.msra.mxu1 %v4404_v50  ;;  %v374_v12 = vld [vmem:[%s3966_s7 + $0x330] sm:$0xff]  ;;  %v4432_v50 = vcombine.low %v362_v14, %v366_v21  ;;  %v379_v21 = vld [vmem:[%s3966_s7 + $0x358] sm:$0xff]  ;;  %5930 = vst [vmem:[#allocation121_spill] sm:$0xff] %v4452_v11 }
  0xab   : > { %1162 = vmatprep.subr.bf16.mxu0 %v4406_v32  ;;  %1203 = vmatprep.subr.bf16.mxu1 %v4409_v19  ;;  %v4438_v23 = vcombine.high %v370_v55, %v374_v12  ;;  %v4441_v19 = vcombine.high %v371_v1, %v375_v18  ;;  %v378_v32 = vld [vmem:[%s3966_s7 + $0x350] sm:$0xff]  ;;  %v383_v14 = vld [vmem:[%s3966_s7 + $0x378] sm:$0xff] }
  0xac   : > { %5925 = vst [vmem:[#allocation116_spill] sm:$0xff] %v4432_v50  ;;  %v4468_v1 = vcombine.low %v379_v21, %v383_v14 }
  0xad   : > { %5927 = vst [vmem:[#allocation118_spill] sm:$0xff] %v4438_v23  ;;  %5928 = vst [vmem:[#allocation119_spill] sm:$0xff] %v4441_v19 }
  0xae   : > { %1163 = vmatpush1.bf16.msra.mxu0 %v4416_v39  ;;  %1204 = vmatpush1.bf16.msra.mxu1 %v4420_v0  ;;  %v382_v39 = vld [vmem:[%s3966_s7 + $0x370] sm:$0xff]  ;;  %v4448_v0 = vcombine.low %v370_v55, %v374_v12  ;;  %v387_v12 = vld [vmem:[%s3966_s7 + $0x398] sm:$0xff]  ;;  %5934 = vst [vmem:[#allocation125_spill] sm:$0xff] %v4468_v1 }
  0xaf   : > { %1164 = vmatprep.subr.bf16.mxu0 %v4422_v2  ;;  %1205 = vmatprep.subr.bf16.mxu1 %v4425_v8  ;;  %v4454_v6 = vcombine.high %v378_v32, %v382_v39  ;;  %v4457_v8 = vcombine.high %v379_v21, %v383_v14  ;;  %v386_v2 = vld [vmem:[%s3966_s7 + $0x390] sm:$0xff]  ;;  %v391_v55 = vld [vmem:[%s3966_s7 + $0x3b8] sm:$0xff]  ;;  %v4489_v14 = vcombine.high %v395_v48, %v399_v10 }
  0xb0   : > { %5929 = vst [vmem:[#allocation120_spill] sm:$0xff] %v4448_v0 }
  0xb1   : > { %5931 = vst [vmem:[#allocation122_spill] sm:$0xff] %v4454_v6  ;;  %5932 = vst [vmem:[#allocation123_spill] sm:$0xff] %v4457_v8 }
  0xb2   : > { %1165 = vmatpush1.bf16.msra.mxu0 %v4432_v50  ;;  %1206 = vmatpush1.bf16.msra.mxu1 %v4436_v33  ;;  %v390_v50 = vld [vmem:[%s3966_s7 + $0x3b0] sm:$0xff]  ;;  %v4464_v33 = vcombine.low %v378_v32, %v382_v39  ;;  %v4484_v32 = vcombine.low %v387_v12, %v391_v55  ;;  %5940 = vst [vmem:[#allocation131_spill] sm:$0xff] %v4489_v14 }
  0xb3   : > { %1166 = vmatprep.subr.bf16.mxu0 %v4438_v23  ;;  %1207 = vmatprep.subr.bf16.mxu1 %v4441_v19  ;;  %v4470_v18 = vcombine.high %v386_v2, %v390_v50  ;;  %v4473_v19 = vcombine.high %v387_v12, %v391_v55  ;;  %v394_v23 = vld [vmem:[%s3966_s7 + $0x3d0] sm:$0xff]  ;;  %v4480_v39 = vcombine.low %v386_v2, %v390_v50  ;;  %v5947_v2 = vld [vmem:[#allocation53_spill] sm:$0xff]  ;;  %v5950_v55 = vld [vmem:[#allocation56_spill] sm:$0xff]  ;;  %s3322_s7 = scalar_lea.vmem %s3970_s18, %s3572_s5 [#allocation5] }
  0xb4   : > { %5933 = vst [vmem:[#allocation124_spill] sm:$0xff] %v4464_v33  ;;  %5938 = vst [vmem:[#allocation129_spill] sm:$0xff] %v4484_v32  ;;  %v4486_v21 = vcombine.high %v394_v23, %v398_v49  ;;  %v4496_v50 = vcombine.low %v395_v48, %v399_v10  ;;  %v5943_v10 = vld [vmem:[#allocation49_spill] sm:$0xff]  ;;  %v5945_v48 = vld [vmem:[#allocation51_spill] sm:$0xff] }
  0xb5   : > { %5935 = vst [vmem:[#allocation126_spill] sm:$0xff] %v4470_v18  ;;  %5936 = vst [vmem:[#allocation127_spill] sm:$0xff] %v4473_v19  ;;  %v5949_v12 = vld [vmem:[#allocation55_spill] sm:$0xff] }
  0xb6   : > { %1167 = vmatpush1.bf16.msra.mxu0 %v4448_v0  ;;  %1208 = vmatpush1.bf16.msra.mxu1 %v4452_v11  ;;  %5937 = vst [vmem:[#allocation128_spill] sm:$0xff] %v4480_v39  ;;  %5939 = vst [vmem:[#allocation130_spill] sm:$0xff] %v4486_v21 }
  0xb7   : > { %1168 = vmatprep.subr.bf16.mxu0 %v4454_v6  ;;  %1209 = vmatprep.subr.bf16.mxu1 %v4457_v8  ;;  %v4492_v8 = vcombine.low %v394_v23, %v398_v49  ;;  %5942 = vst [vmem:[#allocation133_spill] sm:$0xff] %v4496_v50  ;;  %v5946_v49 = vld [vmem:[#allocation52_spill] sm:$0xff]  ;;  %v5948_v23 = vld [vmem:[#allocation54_spill] sm:$0xff] }
  0xb9   : > { %5941 = vst [vmem:[#allocation132_spill] sm:$0xff] %v4492_v8 }
  0xba   : > { %1169 = vmatpush1.bf16.msra.mxu0 %v4464_v33  ;;  %1210 = vmatpush1.bf16.msra.mxu1 %v4468_v1 }
  0xbb   : > { %1170 = vmatprep.subr.bf16.mxu0 %v4470_v18  ;;  %1211 = vmatprep.subr.bf16.mxu1 %v4473_v19 }
  0xbe   : > { %1171 = vmatpush1.bf16.msra.mxu0 %v4480_v39  ;;  %1212 = vmatpush1.bf16.msra.mxu1 %v4484_v32 }
  0xbf   : > { %1172 = vmatprep.subr.bf16.mxu0 %v4486_v21  ;;  %1213 = vmatprep.subr.bf16.mxu1 %v4489_v14 }
  0xc2   : > { %1173 = vmatpush1.bf16.msra.mxu0 %v4492_v8  ;;  %1214 = vmatpush1.bf16.msra.mxu1 %v4496_v50 }
  0xc3   : > { %1328 = vmatprep.subr.bf16.mxu0 %v3976_v20  ;;  %1369 = vmatprep.subr.bf16.mxu1 %v3983_v25 }
  0xc5   : > { %1175 = vmatmul.mubr.bf16.vlgmr.msra.gmra.mrb[4].mxu0 %v4247_v34  ;;  %1216 = vmatmul.mubr.bf16.vlgmr.msra.gmra.mrb[4].mxu1 %v4247_v34  ;;  %v5944_v34 = vld [vmem:[#allocation50_spill] sm:$0xff] }
  0xc6   : > { %1329 = vmatpush1.bf16.msra.mxu0 %v3979_v22  ;;  %1370 = vmatpush1.bf16.msra.mxu1 %v3985_v26 }
  0xc7   : > { %1330 = vmatprep.subr.bf16.mxu0 %v3987_v27  ;;  %1371 = vmatprep.subr.bf16.mxu1 %v3993_v31 }
  0xca   : > { %1331 = vmatpush1.bf16.msra.mxu0 %v4000_v35  ;;  %1372 = vmatpush1.bf16.msra.mxu1 %v4004_v36 }
  0xcb   : > { %1332 = vmatprep.subr.bf16.mxu0 %v4006_v37  ;;  %1373 = vmatprep.subr.bf16.mxu1 %v4009_v38 }
  0xce   : > { %1333 = vmatpush1.bf16.msra.mxu0 %v4016_v43  ;;  %1374 = vmatpush1.bf16.msra.mxu1 %v4020_v44 }
  0xcf   : > { %1334 = vmatprep.subr.bf16.mxu0 %v4022_v45  ;;  %1375 = vmatprep.subr.bf16.mxu1 %v4025_v46 }
  0xd2   : > { %1335 = vmatpush1.bf16.msra.mxu0 %v4032_v51  ;;  %1376 = vmatpush1.bf16.msra.mxu1 %v4036_v52 }
  0xd3   : > { %1336 = vmatprep.subr.bf16.mxu0 %v4038_v53  ;;  %1377 = vmatprep.subr.bf16.mxu1 %v4041_v54 }
  0xd6   : > { %1337 = vmatpush1.bf16.msra.mxu0 %v4048_v59  ;;  %1378 = vmatpush1.bf16.msra.mxu1 %v4052_v60 }
  0xd7   : > { %1338 = vmatprep.subr.bf16.mxu0 %v4054_v61  ;;  %1379 = vmatprep.subr.bf16.mxu1 %v4057_v62 }
  0xda   : > { %1339 = vmatpush1.bf16.msra.mxu0 %v4064_v3  ;;  %1380 = vmatpush1.bf16.msra.mxu1 %v4068_v4 }
  0xdb   : > { %1340 = vmatprep.subr.bf16.mxu0 %v4070_v5  ;;  %1381 = vmatprep.subr.bf16.mxu1 %v4075_v7 }
  0xde   : > { %1341 = vmatpush1.bf16.msra.mxu0 %v4084_v13  ;;  %1382 = vmatpush1.bf16.msra.mxu1 %v4090_v15 }
  0xdf   : > { %1342 = vmatprep.subr.bf16.mxu0 %v4092_v16  ;;  %1383 = vmatprep.subr.bf16.mxu1 %v4095_v17 }
  0xe2   : > { %1343 = vmatpush1.bf16.msra.mxu0 %v4104_v24  ;;  %1384 = vmatpush1.bf16.msra.mxu1 %v4108_v28 }
  0xe3   : > { %1344 = vmatprep.subr.bf16.mxu0 %v4110_v29  ;;  %1385 = vmatprep.subr.bf16.mxu1 %v4113_v30 }
  0xe6   : > { %1345 = vmatpush1.bf16.msra.mxu0 %v4120_v40  ;;  %1386 = vmatpush1.bf16.msra.mxu1 %v4124_v41 }
  0xe7   : > { %1346 = vmatprep.subr.bf16.mxu0 %v4126_v42  ;;  %1387 = vmatprep.subr.bf16.mxu1 %v4129_v47 }
  0xea   : > { %1347 = vmatpush1.bf16.msra.mxu0 %v4136_v56  ;;  %1388 = vmatpush1.bf16.msra.mxu1 %v4140_v57  ;;  %v1237_v57 = vlaneseq }
  0xeb   : > { %1348 = vmatprep.subr.bf16.mxu0 %v4142_v58  ;;  %1389 = vmatprep.subr.bf16.mxu1 %v4145_v63  ;;  %v5951_v58 = vld [vmem:[#allocation57_spill] sm:$0xff]  ;;  %v5952_v63 = vld [vmem:[#allocation58_spill] sm:$0xff] }
  0xee   : > { %1349 = vmatpush1.bf16.msra.mxu0 %v4152_v9  ;;  %1390 = vmatpush1.bf16.msra.mxu1 %v5943_v10  ;;  %v5953_v9 = vld [vmem:[#allocation59_spill] sm:$0xff]  ;;  %v5954_v10 = vld [vmem:[#allocation60_spill] sm:$0xff] }
  0xef   : > { %1350 = vmatprep.subr.bf16.mxu0 %v5944_v34  ;;  %1391 = vmatprep.subr.bf16.mxu1 %v5945_v48  ;;  %v5955_v34 = vld [vmem:[#allocation61_spill] sm:$0xff]  ;;  %v5956_v48 = vld [vmem:[#allocation62_spill] sm:$0xff] }
  0xf2   : > { %1351 = vmatpush1.bf16.msra.mxu0 %v5946_v49  ;;  %1392 = vmatpush1.bf16.msra.mxu1 %v5947_v2  ;;  %v5957_v49 = vld [vmem:[#allocation63_spill] sm:$0xff]  ;;  %v5958_v2 = vld [vmem:[#allocation64_spill] sm:$0xff] }
  0xf3   : > { %1352 = vmatprep.subr.bf16.mxu0 %v5948_v23  ;;  %1393 = vmatprep.subr.bf16.mxu1 %v5949_v12  ;;  %v5959_v23 = vld [vmem:[#allocation65_spill] sm:$0xff]  ;;  %v5960_v12 = vld [vmem:[#allocation66_spill] sm:$0xff] }
  0xf6   : > { %1353 = vmatpush1.bf16.msra.mxu0 %v5950_v55  ;;  %1394 = vmatpush1.bf16.msra.mxu1 %v5951_v58  ;;  %v5961_v55 = vld [vmem:[#allocation67_spill] sm:$0xff]  ;;  %v5962_v58 = vld [vmem:[#allocation68_spill] sm:$0xff] }
  0xf7   : > { %1354 = vmatprep.subr.bf16.mxu0 %v5952_v63  ;;  %1395 = vmatprep.subr.bf16.mxu1 %v5953_v9  ;;  %v5963_v63 = vld [vmem:[#allocation69_spill] sm:$0xff]  ;;  %v5964_v9 = vld [vmem:[#allocation70_spill] sm:$0xff] }
  0xfa   : > { %1355 = vmatpush1.bf16.msra.mxu0 %v5954_v10  ;;  %1396 = vmatpush1.bf16.msra.mxu1 %v5955_v34  ;;  %v5965_v10 = vld [vmem:[#allocation71_spill] sm:$0xff]  ;;  %v3854_v34 = vmov 1983009808  }
  0xfb   : > { %1356 = vmatprep.subr.bf16.mxu0 %v5956_v48  ;;  %1397 = vmatprep.subr.bf16.mxu1 %v5957_v49  ;;  %v1235_v48 = vunpack.c.l.s4 %v3854_v34 }
  0xfd   : > { %v1236_v49 = vunpack.c.0.s8 %v1235_v48 }
  0xfe   : > { %1357 = vmatpush1.bf16.msra.mxu0 %v5958_v2  ;;  %1398 = vmatpush1.bf16.msra.mxu1 %v5959_v23  ;;  %v1238_v2 = vshrl.u32 %v1237_v57, 7  ;;  %v404_v57 = vld [vmem:[%s403_s19] sm:$0xff] }
  0xff   : > { %1358 = vmatprep.subr.bf16.mxu0 %v5960_v12  ;;  %1399 = vmatprep.subr.bf16.mxu1 %v5961_v55 }
 0x100   : > { %v4569_v56 = vsub.s32 %v1236_v49, %v1238_v2 }
 0x102   : > { %1359 = vmatpush1.bf16.msra.mxu0 %v5962_v58  ;;  %1400 = vmatpush1.bf16.msra.mxu1 %v5963_v63 }
 0x103   : > { %1410 = vmatprep.subr.bf16.mxu0 %v5964_v9  ;;  %1451 = vmatprep.subr.bf16.mxu1 %v5965_v10 }
 0x158   : > { %v1094_v23 = vpop.f32.mrb[0].mxu0  ;;  %v1135_v12 = vpop.f32.mrb[0].mxu1 }
 0x159   : > { %v1096_v55 = vpop.f32.mrb[1].mxu0  ;;  %v1137_v58 = vpop.f32.mrb[1].mxu1 }
 0x15a   : > { %v1232_v47 = vcombine.low %v1094_v23, %v1096_v55  ;;  %v1098_v42 = vpop.f32.mrb[2].mxu0  ;;  %v1233_v63 = vcombine.low %v1135_v12, %v1137_v58  ;;  %v1139_v41 = vpop.f32.mrb[2].mxu1 }
 0x15b   : > { %v1099_v9 = vpop.f32.mrb[3].mxu0  ;;  %v1140_v40 = vpop.f32.mrb[3].mxu1 }
 0x15c   : > { %v1240_v10 = vrot.slane %v1232_v47, %v4569_v56  ;;  %v1247_v34 = vrot.slane %v1233_v63, %v4569_v56 }
 0x15e   : > { %v1248_v48 = vcombine.low %v1240_v10, %v1247_v34 }
 0x160   : > { %v1268_v30 = vadd.f32 %v1248_v48, %v404_v57 }
 0x162   : > { %v1277_v49 = vrot.slane %v1268_v30, 4  ;;  %v1270_v29 = vsub.f32 0.0, %v1268_v30 }
 0x164   : > { %v1279_v2 = vsub.f32 0.0, %v1277_v49  ;;  %v1271_v23 = vmul.f32 1.442695, %v1270_v29 }
 0x166   : > { %v1280_v28 = vmul.f32 1.442695, %v1279_v2 }
 0x168   : > { %3669 = vpow2.f32 %v1280_v28  ;;  %v405_v28 = vld [vmem:[%s403_s19 + $0x8] sm:$0xff]  ;;  %s3608_s19 = sshll.u32 %s2110_s9, 4 }
 0x169   : > { %3671 = vpow2.f32 %v1271_v23  ;;  %s2113_s20 = scalar_lea.vmem %s3968_s8, %s3608_s19 [#allocation4]  ;;  %s3190_s19 = ssub.s32 (%p3926_p6), 1, %s3835_s11 }
 0x172   : > { %v3670_v9 = vpop.eup %3669 }
 0x173   : > { %v3672_v63 = vpop.eup %3671  ;;  %v1282_v49 = vadd.f32 1.0, %v3670_v9 }
 0x174   : > { %v1273_v29 = vadd.f32 1.0, %v3672_v63 }
 0x175   : > { %3673 = vrcp.f32 %v1282_v49 }
 0x176   : > { %3675 = vrcp.f32 %v1273_v29 }
 0x198   : > { %v1176_v42 = vpop.f32.mrb[4].mxu0  ;;  %v1217_v41 = vpop.f32.mrb[4].mxu1 }
 0x199   : > { %v1178_v58 = vpop.f32.mrb[5].mxu0  ;;  %v1219_v40 = vpop.f32.mrb[5].mxu1 }
 0x19a   : > { %v1249_v47 = vcombine.low %v1176_v42, %v1178_v58  ;;  %v1180_v12 = vpop.f32.mrb[6].mxu0  ;;  %v1250_v10 = vcombine.low %v1217_v41, %v1219_v40  ;;  %v1221_v55 = vpop.f32.mrb[6].mxu1  ;;  %v1295_v40 = vld [vmem:[#allocation3] sm:$0xf] }
 0x19b   : > { %v1181_v34 = vpop.f32.mrb[7].mxu0  ;;  %v1222_v57 = vpop.f32.mrb[7].mxu1 }
 0x19c   : > { %v1257_v48 = vrot.slane %v1249_v47, %v4569_v56  ;;  %v1264_v30 = vrot.slane %v1250_v10, %v4569_v56  ;;  %v3674_v41 = vpop.eup %3673 }
 0x19d   : > { %v3676_v47 = vpop.eup %3675  ;;  %v1296_v9 = vmul.f32 %v3674_v41, %v1295_v40  ;;  %v5969_v41 = vld [vmem:[#allocation75_spill] sm:$0xff]  ;;  %v5970_v40 = vld [vmem:[#allocation76_spill] sm:$0xff] }
 0x19e   : > { %v1265_v2 = vcombine.low %v1257_v48, %v1264_v30 }
 0x1a0   : > { %v1269_v23 = vadd.f32 %v1265_v2, %v405_v28 }
 0x1a2   : > { %3677 = vtanh.f32 %v1269_v23  ;;  %v1287_v42 = vrot.slane %v1269_v23, 4 }
 0x1a4   : > { %v1289_v58 = vsub.f32 0.0, %v1287_v42  ;;  %v5966_v42 = vld [vmem:[#allocation72_spill] sm:$0xff] }
 0x1a6   : > { %v1290_v12 = vmul.f32 1.442695, %v1289_v58  ;;  %v5967_v58 = vld [vmem:[#allocation73_spill] sm:$0xff] }
 0x1a8   : > { %3679 = vpow2.f32 %v1290_v12  ;;  %v5968_v12 = vld [vmem:[#allocation74_spill] sm:$0xff] }
 0x1ac   : > { %v3678_v55 = vpop.eup %3677 }
 0x1ad   : > { %v1297_v34 = vmul.f32 %v3678_v55, %v3676_v47  ;;  %v5971_v47 = vld [vmem:[#allocation77_spill] sm:$0xff]  ;;  %v5972_v55 = vld [vmem:[#allocation78_spill] sm:$0xff] }
 0x1af   : > { %v1298_v10 = vadd.f32 %v1297_v34, %v1296_v9  ;;  %v5973_v9 = vld [vmem:[#allocation79_spill] sm:$0xff]  ;;  %v5974_v34 = vld [vmem:[#allocation80_spill] sm:$0xff] }
 0x1b1   : > { %1301 = vst [vmem:[#allocation3] sm:$0xf] %v1298_v10  ;;  %3681 = vtanh.f32 %v1298_v10  ;;  %v5975_v10 = vld [vmem:[#allocation81_spill] sm:$0xff] }
 0x1b2   : > { %v3680_v63 = vpop.eup %3679 }
 0x1b3   : > { %v1292_v48 = vadd.f32 1.0, %v3680_v63  ;;  %v5976_v63 = vld [vmem:[#allocation82_spill] sm:$0xff] }
 0x1b5   : > { %3683 = vrcp.f32 %v1292_v48  ;;  %v5977_v48 = vld [vmem:[#allocation83_spill] sm:$0xff] }
 0x1bb   : > { %v3682_v57 = vpop.eup %3681 }
 0x1bf   : > { %v3684_v49 = vpop.eup %3683 }
 0x1c0   : > { %v1300_v30 = vmul.f32 %v3684_v49, %v3682_v57  ;;  %v5978_v57 = vld [vmem:[#allocation84_spill] sm:$0xff]  ;;  %v5979_v49 = vld [vmem:[#allocation85_spill] sm:$0xff] }
 0x1c2   : > { %1302 = vst [vmem:[#allocation2] sm:$0xf] %v1300_v30  ;;  %1306 = vst [vmem:[%s1305_s21] sm:$0xf] %v1300_v30  ;;  %v5980_v30 = vld [vmem:[#allocation86_spill] sm:$0xff]  ;;  %s3609_s21 = sshll.u32 %s2110_s9, 2  ;;  %s3188_s9 = ssub.s32 (%p3926_p6), 1, %s3839_s12 }
 0x1c3   : > { %s2375_s22 = scalar_lea.vmem %s3970_s18, %s3609_s21 [#allocation5]  ;;  %s3191_s21 = smul.u32 (%p3926_p6), %s3839_s12, %s3190_s19 }
 0x1c9   : > { %v3559_v29 = vld.sshfl [vmem:[#allocation2] sm:$0x33 pattern:$0x76325410] }
 0x1ca   : > { %v1323_v28 = vcombine.high %v3559_v29, %v3559_v29  ;;  %v4579_v23 = vpack.c.bf16 %v3559_v29, %v3559_v29  ;;  %v5981_v29 = vld [vmem:[#allocation87_spill] sm:$0xff] }
 0x1cc   : > { %v1327_v2 = vpack.c.bf16 %v1323_v28, %v1323_v28  ;;  %v5982_v28 = vld [vmem:[#allocation88_spill] sm:$0xff] }
 0x1ce   : > { %1360 = vmatprep.mubr.bf16.mxu0 %v1327_v2  ;;  %1401 = vmatprep.mubr.bf16.mxu1 %v1327_v2 }
 0x1cf   : > { %1361 = vmatmul.mubr.bf16.vlgmr.msra.gmra.mrb[8].mxu0 %v4579_v23  ;;  %1402 = vmatmul.mubr.bf16.vlgmr.msra.gmra.mrb[8].mxu1 %v4579_v23 }
 0x1d0   : > { %1411 = vmatpush1.bf16.msra.mxu0 %v5966_v42  ;;  %1452 = vmatpush1.bf16.msra.mxu1 %v5967_v58 }
 0x1d1   : > { %1442 = vmatprep.mubr.bf16.mxu0 %v1327_v2  ;;  %1483 = vmatprep.mubr.bf16.mxu1 %v1327_v2  ;;  %v5983_v2 = vld [vmem:[#allocation89_spill] sm:$0xff] }
 0x1d2   : > { %1412 = vmatprep.subr.bf16.mxu0 %v5968_v12  ;;  %1453 = vmatprep.subr.bf16.mxu1 %v5969_v41 }
 0x1d4   : > { %1413 = vmatpush1.bf16.msra.mxu0 %v5970_v40  ;;  %1454 = vmatpush1.bf16.msra.mxu1 %v5971_v47 }
 0x1d5   : > { %1414 = vmatprep.subr.bf16.mxu0 %v5972_v55  ;;  %1455 = vmatprep.subr.bf16.mxu1 %v5973_v9  ;;  %v5984_v9 = vld [vmem:[#allocation90_spill] sm:$0xff] }
 0x1d8   : > { %1415 = vmatpush1.bf16.msra.mxu0 %v5974_v34  ;;  %1456 = vmatpush1.bf16.msra.mxu1 %v5975_v10  ;;  %v5985_v34 = vld [vmem:[#allocation91_spill] sm:$0xff]  ;;  %v5986_v10 = vld [vmem:[#allocation92_spill] sm:$0xff] }
 0x1d9   : > { %1416 = vmatprep.subr.bf16.mxu0 %v5976_v63  ;;  %1457 = vmatprep.subr.bf16.mxu1 %v5977_v48  ;;  %v5987_v63 = vld [vmem:[#allocation93_spill] sm:$0xff]  ;;  %v5988_v48 = vld [vmem:[#allocation94_spill] sm:$0xff] }
 0x1dc   : > { %1417 = vmatpush1.bf16.msra.mxu0 %v5978_v57  ;;  %1458 = vmatpush1.bf16.msra.mxu1 %v5979_v49  ;;  %v5989_v57 = vld [vmem:[#allocation95_spill] sm:$0xff]  ;;  %v5990_v49 = vld [vmem:[#allocation96_spill] sm:$0xff] }
 0x1dd   : > { %1418 = vmatprep.subr.bf16.mxu0 %v5980_v30  ;;  %1459 = vmatprep.subr.bf16.mxu1 %v5981_v29  ;;  %v5991_v30 = vld [vmem:[#allocation97_spill] sm:$0xff]  ;;  %v5992_v29 = vld [vmem:[#allocation98_spill] sm:$0xff] }
 0x1e0   : > { %1419 = vmatpush1.bf16.msra.mxu0 %v5982_v28  ;;  %1460 = vmatpush1.bf16.msra.mxu1 %v5983_v2  ;;  %v5993_v28 = vld [vmem:[#allocation99_spill] sm:$0xff]  ;;  %v5994_v2 = vld [vmem:[#allocation100_spill] sm:$0xff] }
 0x1e1   : > { %1420 = vmatprep.subr.bf16.mxu0 %v5984_v9  ;;  %1461 = vmatprep.subr.bf16.mxu1 %v5985_v34  ;;  %v5995_v9 = vld [vmem:[#allocation101_spill] sm:$0xff]  ;;  %v5996_v34 = vld [vmem:[#allocation102_spill] sm:$0xff] }
 0x1e4   : > { %1421 = vmatpush1.bf16.msra.mxu0 %v5986_v10  ;;  %1462 = vmatpush1.bf16.msra.mxu1 %v5987_v63  ;;  %v5997_v10 = vld [vmem:[#allocation103_spill] sm:$0xff]  ;;  %v5998_v63 = vld [vmem:[#allocation104_spill] sm:$0xff] }
 0x1e5   : > { %1422 = vmatprep.subr.bf16.mxu0 %v5988_v48  ;;  %1463 = vmatprep.subr.bf16.mxu1 %v5989_v57  ;;  %v5999_v48 = vld [vmem:[#allocation105_spill] sm:$0xff]  ;;  %v6000_v57 = vld [vmem:[#allocation106_spill] sm:$0xff] }
 0x1e8   : > { %1423 = vmatpush1.bf16.msra.mxu0 %v5990_v49  ;;  %1464 = vmatpush1.bf16.msra.mxu1 %v5991_v30  ;;  %v6001_v49 = vld [vmem:[#allocation107_spill] sm:$0xff]  ;;  %v6002_v30 = vld [vmem:[#allocation108_spill] sm:$0xff] }
 0x1e9   : > { %1424 = vmatprep.subr.bf16.mxu0 %v5992_v29  ;;  %1465 = vmatprep.subr.bf16.mxu1 %v5993_v28  ;;  %v6003_v29 = vld [vmem:[#allocation109_spill] sm:$0xff]  ;;  %v6004_v28 = vld [vmem:[#allocation110_spill] sm:$0xff] }
 0x1ec   : > { %1425 = vmatpush1.bf16.msra.mxu0 %v5994_v2  ;;  %1466 = vmatpush1.bf16.msra.mxu1 %v5995_v9  ;;  %v6005_v2 = vld [vmem:[#allocation111_spill] sm:$0xff]  ;;  %v6006_v9 = vld [vmem:[#allocation112_spill] sm:$0xff] }
 0x1ed   : > { %1426 = vmatprep.subr.bf16.mxu0 %v5996_v34  ;;  %1467 = vmatprep.subr.bf16.mxu1 %v5997_v10  ;;  %v6007_v34 = vld [vmem:[#allocation113_spill] sm:$0xff]  ;;  %v6008_v10 = vld [vmem:[#allocation114_spill] sm:$0xff] }
 0x1f0   : > { %1427 = vmatpush1.bf16.msra.mxu0 %v5998_v63  ;;  %1468 = vmatpush1.bf16.msra.mxu1 %v5999_v48  ;;  %v6009_v63 = vld [vmem:[#allocation115_spill] sm:$0xff]  ;;  %v6010_v48 = vld [vmem:[#allocation116_spill] sm:$0xff] }
 0x1f1   : > { %1428 = vmatprep.subr.bf16.mxu0 %v6000_v57  ;;  %1469 = vmatprep.subr.bf16.mxu1 %v6001_v49  ;;  %v6011_v57 = vld [vmem:[#allocation117_spill] sm:$0xff]  ;;  %v6012_v49 = vld [vmem:[#allocation118_spill] sm:$0xff] }
 0x1f4   : > { %1429 = vmatpush1.bf16.msra.mxu0 %v6002_v30  ;;  %1470 = vmatpush1.bf16.msra.mxu1 %v6003_v29  ;;  %v6013_v30 = vld [vmem:[#allocation119_spill] sm:$0xff] }
 0x1f5   : > { %1430 = vmatprep.subr.bf16.mxu0 %v6004_v28  ;;  %1471 = vmatprep.subr.bf16.mxu1 %v6005_v2 }
 0x1f8   : > { %1431 = vmatpush1.bf16.msra.mxu0 %v6006_v9  ;;  %1472 = vmatpush1.bf16.msra.mxu1 %v6007_v34  ;;  %v6014_v9 = vld [vmem:[#allocation123_spill] sm:$0xff] }
 0x1f9   : > { %1432 = vmatprep.subr.bf16.mxu0 %v6008_v10  ;;  %1473 = vmatprep.subr.bf16.mxu1 %v6009_v63 }
 0x1fc   : > { %1433 = vmatpush1.bf16.msra.mxu0 %v6010_v48  ;;  %1474 = vmatpush1.bf16.msra.mxu1 %v6011_v57 }
 0x1fd   : > { %1434 = vmatprep.subr.bf16.mxu0 %v6012_v49  ;;  %1475 = vmatprep.subr.bf16.mxu1 %v6013_v30 }
 0x200   : > { %1435 = vmatpush1.bf16.msra.mxu0 %v4448_v0  ;;  %1476 = vmatpush1.bf16.msra.mxu1 %v4452_v11 }
 0x201   : > { %1436 = vmatprep.subr.bf16.mxu0 %v4454_v6  ;;  %1477 = vmatprep.subr.bf16.mxu1 %v6014_v9 }
 0x204   : > { %1437 = vmatpush1.bf16.msra.mxu0 %v4464_v33  ;;  %1478 = vmatpush1.bf16.msra.mxu1 %v4468_v1 }
 0x205   : > { %1438 = vmatprep.subr.bf16.mxu0 %v4470_v18  ;;  %1479 = vmatprep.subr.bf16.mxu1 %v4473_v19 }
 0x208   : > { %1439 = vmatpush1.bf16.msra.mxu0 %v4480_v39  ;;  %1480 = vmatpush1.bf16.msra.mxu1 %v4484_v32 }
 0x209   : > { %1440 = vmatprep.subr.bf16.mxu0 %v4486_v21  ;;  %1481 = vmatprep.subr.bf16.mxu1 %v4489_v14 }
 0x20c   : > { %1441 = vmatpush1.bf16.msra.mxu0 %v4492_v8  ;;  %1482 = vmatpush1.bf16.msra.mxu1 %v4496_v50 }
 0x20d   : > { %1596 = vmatprep.subr.bf16.mxu0 %v3976_v20  ;;  %1637 = vmatprep.subr.bf16.mxu1 %v3983_v25 }
 0x20f   : > { %1443 = vmatmul.mubr.bf16.vlgmr.msra.gmra.mrb[12].mxu0 %v4579_v23  ;;  %1484 = vmatmul.mubr.bf16.vlgmr.msra.gmra.mrb[12].mxu1 %v4579_v23  ;;  %v6015_v23 = vld [vmem:[#allocation37_spill] sm:$0xff] }
 0x210   : > { %1597 = vmatpush1.bf16.msra.mxu0 %v3979_v22  ;;  %1638 = vmatpush1.bf16.msra.mxu1 %v3985_v26 }
 0x211   : > { %1598 = vmatprep.subr.bf16.mxu0 %v3987_v27  ;;  %1639 = vmatprep.subr.bf16.mxu1 %v3993_v31 }
 0x214   : > { %1599 = vmatpush1.bf16.msra.mxu0 %v4000_v35  ;;  %1640 = vmatpush1.bf16.msra.mxu1 %v4004_v36 }
 0x215   : > { %1600 = vmatprep.subr.bf16.mxu0 %v4006_v37  ;;  %1641 = vmatprep.subr.bf16.mxu1 %v4009_v38 }
 0x218   : > { %1601 = vmatpush1.bf16.msra.mxu0 %v4016_v43  ;;  %1642 = vmatpush1.bf16.msra.mxu1 %v4020_v44 }
 0x219   : > { %1602 = vmatprep.subr.bf16.mxu0 %v4022_v45  ;;  %1643 = vmatprep.subr.bf16.mxu1 %v4025_v46 }
 0x21c   : > { %1603 = vmatpush1.bf16.msra.mxu0 %v4032_v51  ;;  %1644 = vmatpush1.bf16.msra.mxu1 %v4036_v52 }
 0x21d   : > { %1604 = vmatprep.subr.bf16.mxu0 %v4038_v53  ;;  %1645 = vmatprep.subr.bf16.mxu1 %v4041_v54 }
 0x220   : > { %1605 = vmatpush1.bf16.msra.mxu0 %v4048_v59  ;;  %1646 = vmatpush1.bf16.msra.mxu1 %v4052_v60 }
 0x221   : > { %1606 = vmatprep.subr.bf16.mxu0 %v4054_v61  ;;  %1647 = vmatprep.subr.bf16.mxu1 %v4057_v62  ;;  %v6016_v62 = vld [vmem:[#allocation38_spill] sm:$0xff] }
 0x224   : > { %1607 = vmatpush1.bf16.msra.mxu0 %v4064_v3  ;;  %1648 = vmatpush1.bf16.msra.mxu1 %v4068_v4  ;;  %v6017_v3 = vld [vmem:[#allocation39_spill] sm:$0xff]  ;;  %v6018_v4 = vld [vmem:[#allocation40_spill] sm:$0xff] }
 0x225   : > { %1608 = vmatprep.subr.bf16.mxu0 %v4070_v5  ;;  %1649 = vmatprep.subr.bf16.mxu1 %v4075_v7  ;;  %v6019_v5 = vld [vmem:[#allocation41_spill] sm:$0xff]  ;;  %v6020_v7 = vld [vmem:[#allocation42_spill] sm:$0xff] }
 0x228   : > { %1609 = vmatpush1.bf16.msra.mxu0 %v4084_v13  ;;  %1650 = vmatpush1.bf16.msra.mxu1 %v4090_v15  ;;  %v6021_v13 = vld [vmem:[#allocation43_spill] sm:$0xff]  ;;  %v6022_v15 = vld [vmem:[#allocation44_spill] sm:$0xff] }
 0x229   : > { %1610 = vmatprep.subr.bf16.mxu0 %v4092_v16  ;;  %1651 = vmatprep.subr.bf16.mxu1 %v4095_v17  ;;  %v6023_v16 = vld [vmem:[#allocation45_spill] sm:$0xff]  ;;  %v6024_v17 = vld [vmem:[#allocation46_spill] sm:$0xff] }
 0x22c   : > { %1611 = vmatpush1.bf16.msra.mxu0 %v4104_v24  ;;  %1652 = vmatpush1.bf16.msra.mxu1 %v6015_v23  ;;  %v6025_v24 = vld [vmem:[#allocation47_spill] sm:$0xff]  ;;  %v6026_v23 = vld [vmem:[#allocation48_spill] sm:$0xff] }
 0x22d   : > { %1612 = vmatprep.subr.bf16.mxu0 %v6016_v62  ;;  %1653 = vmatprep.subr.bf16.mxu1 %v6017_v3  ;;  %v6027_v62 = vld [vmem:[#allocation49_spill] sm:$0xff]  ;;  %v6028_v3 = vld [vmem:[#allocation50_spill] sm:$0xff] }
 0x230   : > { %1613 = vmatpush1.bf16.msra.mxu0 %v6018_v4  ;;  %1654 = vmatpush1.bf16.msra.mxu1 %v6019_v5  ;;  %v6029_v4 = vld [vmem:[#allocation51_spill] sm:$0xff]  ;;  %v6030_v5 = vld [vmem:[#allocation52_spill] sm:$0xff] }
 0x231   : > { %1614 = vmatprep.subr.bf16.mxu0 %v6020_v7  ;;  %1655 = vmatprep.subr.bf16.mxu1 %v6021_v13  ;;  %v6031_v7 = vld [vmem:[#allocation53_spill] sm:$0xff]  ;;  %v6032_v13 = vld [vmem:[#allocation54_spill] sm:$0xff] }
 0x234   : > { %1615 = vmatpush1.bf16.msra.mxu0 %v6022_v15  ;;  %1656 = vmatpush1.bf16.msra.mxu1 %v6023_v16  ;;  %v6033_v15 = vld [vmem:[#allocation55_spill] sm:$0xff]  ;;  %v6034_v16 = vld [vmem:[#allocation56_spill] sm:$0xff] }
 0x235   : > { %1616 = vmatprep.subr.bf16.mxu0 %v6024_v17  ;;  %1657 = vmatprep.subr.bf16.mxu1 %v6025_v24  ;;  %v6035_v17 = vld [vmem:[#allocation57_spill] sm:$0xff]  ;;  %v6036_v24 = vld [vmem:[#allocation58_spill] sm:$0xff] }
 0x238   : > { %1617 = vmatpush1.bf16.msra.mxu0 %v6026_v23  ;;  %1658 = vmatpush1.bf16.msra.mxu1 %v6027_v62  ;;  %v6037_v23 = vld [vmem:[#allocation59_spill] sm:$0xff]  ;;  %v6038_v62 = vld [vmem:[#allocation60_spill] sm:$0xff] }
 0x239   : > { %1618 = vmatprep.subr.bf16.mxu0 %v6028_v3  ;;  %1659 = vmatprep.subr.bf16.mxu1 %v6029_v4  ;;  %v6039_v3 = vld [vmem:[#allocation61_spill] sm:$0xff]  ;;  %v6040_v4 = vld [vmem:[#allocation62_spill] sm:$0xff] }
 0x23c   : > { %1619 = vmatpush1.bf16.msra.mxu0 %v6030_v5  ;;  %1660 = vmatpush1.bf16.msra.mxu1 %v6031_v7  ;;  %v6041_v5 = vld [vmem:[#allocation63_spill] sm:$0xff]  ;;  %v6042_v7 = vld [vmem:[#allocation64_spill] sm:$0xff] }
 0x23d   : > { %1620 = vmatprep.subr.bf16.mxu0 %v6032_v13  ;;  %1661 = vmatprep.subr.bf16.mxu1 %v6033_v15  ;;  %v6043_v13 = vld [vmem:[#allocation65_spill] sm:$0xff]  ;;  %v6044_v15 = vld [vmem:[#allocation66_spill] sm:$0xff] }
 0x240   : > { %1621 = vmatpush1.bf16.msra.mxu0 %v6034_v16  ;;  %1662 = vmatpush1.bf16.msra.mxu1 %v6035_v17  ;;  %v6045_v16 = vld [vmem:[#allocation67_spill] sm:$0xff]  ;;  %v6046_v17 = vld [vmem:[#allocation68_spill] sm:$0xff] }
 0x241   : > { %1622 = vmatprep.subr.bf16.mxu0 %v6036_v24  ;;  %1663 = vmatprep.subr.bf16.mxu1 %v6037_v23  ;;  %v6047_v24 = vld [vmem:[#allocation69_spill] sm:$0xff]  ;;  %v6048_v23 = vld [vmem:[#allocation70_spill] sm:$0xff] }
 0x244   : > { %1623 = vmatpush1.bf16.msra.mxu0 %v6038_v62  ;;  %1664 = vmatpush1.bf16.msra.mxu1 %v6039_v3  ;;  %v6049_v3 = vld [vmem:[#allocation71_spill] sm:$0xff] }
 0x245   : > { %1624 = vmatprep.subr.bf16.mxu0 %v6040_v4  ;;  %1665 = vmatprep.subr.bf16.mxu1 %v6041_v5 }
 0x248   : > { %1625 = vmatpush1.bf16.msra.mxu0 %v6042_v7  ;;  %1666 = vmatpush1.bf16.msra.mxu1 %v6043_v13 }
 0x249   : > { %1626 = vmatprep.subr.bf16.mxu0 %v6044_v15  ;;  %1667 = vmatprep.subr.bf16.mxu1 %v6045_v16 }
 0x24c   : > { %1627 = vmatpush1.bf16.msra.mxu0 %v6046_v17  ;;  %1668 = vmatpush1.bf16.msra.mxu1 %v6047_v24 }
 0x24d   : > { %1678 = vmatprep.subr.bf16.mxu0 %v6048_v23  ;;  %1719 = vmatprep.subr.bf16.mxu1 %v6049_v3  ;;  %v3557_v23 = vld [vmem:[%s3304_s23 + $0x10] sm:$0xff] }
 0x2a2   : > { %v1362_v4 = vpop.f32.mrb[8].mxu0  ;;  %v1403_v5 = vpop.f32.mrb[8].mxu1 }
 0x2a3   : > { %v1364_v62 = vpop.f32.mrb[9].mxu0  ;;  %v1405_v7 = vpop.f32.mrb[9].mxu1 }
 0x2a4   : > { %v1500_v61 = vcombine.low %v1362_v4, %v1364_v62  ;;  %v1501_v13 = vcombine.low %v1403_v5, %v1405_v7  ;;  %v1366_v60 = vpop.f32.mrb[10].mxu0  ;;  %v1407_v15 = vpop.f32.mrb[10].mxu1 }
 0x2a5   : > { %v1367_v59 = vpop.f32.mrb[11].mxu0  ;;  %v1408_v16 = vpop.f32.mrb[11].mxu1 }
 0x2a6   : > { %v1508_v17 = vrot.slane %v1500_v61, %v4569_v56  ;;  %v1515_v24 = vrot.slane %v1501_v13, %v4569_v56 }
 0x2a8   : > { %v1516_v54 = vcombine.low %v1508_v17, %v1515_v24 }
 0x2aa   : > { %v1536_v53 = vadd.f32 %v3557_v23, %v1516_v54 }
 0x2ac   : > { %v1545_v3 = vrot.slane %v1536_v53, 4  ;;  %v1538_v51 = vsub.f32 0.0, %v1536_v53 }
 0x2ae   : > { %v1547_v52 = vsub.f32 0.0, %v1545_v3  ;;  %v1539_v45 = vmul.f32 1.442695, %v1538_v51 }
 0x2b0   : > { %v1548_v46 = vmul.f32 1.442695, %v1547_v52 }
 0x2b2   : > { %3685 = vpow2.f32 %v1548_v46  ;;  %v3558_v46 = vld [vmem:[%s3304_s23 + $0x18] sm:$0xff]  ;;  %s3579_s23 = smul.u32 4294967248, %s3839_s12 }
 0x2b3   : > { %3687 = vpow2.f32 %v1539_v45 }
 0x2b4   : > { %s3330_s25 = scalar_lea.vmem %s3968_s8, %s3579_s23 [#allocation4] }
 0x2bc   : > { %v3686_v59 = vpop.eup %3685 }
 0x2bd   : > { %v3688_v61 = vpop.eup %3687  ;;  %v1550_v54 = vadd.f32 1.0, %v3686_v59 }
 0x2be   : > { %v1541_v51 = vadd.f32 1.0, %v3688_v61 }
 0x2bf   : > { %3689 = vrcp.f32 %v1550_v54 }
 0x2c0   : > { %3691 = vrcp.f32 %v1541_v51 }
 0x2e2   : > { %v1444_v60 = vpop.f32.mrb[12].mxu0  ;;  %v1485_v62 = vpop.f32.mrb[12].mxu1 }
 0x2e3   : > { %v1446_v4 = vpop.f32.mrb[13].mxu0  ;;  %v1487_v5 = vpop.f32.mrb[13].mxu1 }
 0x2e4   : > { %v1517_v7 = vcombine.low %v1444_v60, %v1446_v4  ;;  %v1518_v13 = vcombine.low %v1485_v62, %v1487_v5  ;;  %v1448_v15 = vpop.f32.mrb[14].mxu0  ;;  %v1489_v16 = vpop.f32.mrb[14].mxu1 }
 0x2e5   : > { %v1449_v17 = vpop.f32.mrb[15].mxu0  ;;  %v1490_v24 = vpop.f32.mrb[15].mxu1  ;;  %v1563_v15 = vld [vmem:[#allocation3] sm:$0xf] }
 0x2e6   : > { %v1525_v3 = vrot.slane %v1517_v7, %v4569_v56  ;;  %v1532_v52 = vrot.slane %v1518_v13, %v4569_v56  ;;  %v3690_v4 = vpop.eup %3689 }
 0x2e7   : > { %v3692_v5 = vpop.eup %3691  ;;  %v1564_v7 = vmul.f32 %v3690_v4, %v1563_v15  ;;  %v6054_v4 = vld [vmem:[#allocation83_spill] sm:$0xff]  ;;  %v6057_v15 = vld [vmem:[#allocation86_spill] sm:$0xff] }
 0x2e8   : > { %v1533_v45 = vcombine.low %v1525_v3, %v1532_v52 }
 0x2ea   : > { %v1537_v53 = vadd.f32 %v3558_v46, %v1533_v45 }
 0x2ec   : > { %3693 = vtanh.f32 %v1537_v53  ;;  %v1555_v23 = vrot.slane %v1537_v53, 4  ;;  %v6050_v53 = vld [vmem:[#allocation79_spill] sm:$0xff] }
 0x2ee   : > { %v1557_v60 = vsub.f32 0.0, %v1555_v23  ;;  %v6051_v23 = vld [vmem:[#allocation80_spill] sm:$0xff] }
 0x2f0   : > { %v1558_v62 = vmul.f32 1.442695, %v1557_v60  ;;  %v6052_v60 = vld [vmem:[#allocation81_spill] sm:$0xff] }
 0x2f2   : > { %3695 = vpow2.f32 %v1558_v62  ;;  %v6053_v62 = vld [vmem:[#allocation82_spill] sm:$0xff] }
 0x2f6   : > { %v3694_v59 = vpop.eup %3693 }
 0x2f7   : > { %v1565_v16 = vmul.f32 %v3694_v59, %v3692_v5  ;;  %v6055_v5 = vld [vmem:[#allocation84_spill] sm:$0xff]  ;;  %v6056_v59 = vld [vmem:[#allocation85_spill] sm:$0xff] }
 0x2f9   : > { %v1566_v13 = vadd.f32 %v1565_v16, %v1564_v7  ;;  %v6058_v7 = vld [vmem:[#allocation87_spill] sm:$0xff]  ;;  %v6059_v16 = vld [vmem:[#allocation88_spill] sm:$0xff] }
 0x2fb   : > { %1569 = vst [vmem:[#allocation3] sm:$0xf] %v1566_v13  ;;  %3697 = vtanh.f32 %v1566_v13  ;;  %v6060_v13 = vld [vmem:[#allocation89_spill] sm:$0xff] }
 0x2fc   : > { %v3696_v61 = vpop.eup %3695 }
 0x2fd   : > { %v1560_v17 = vadd.f32 1.0, %v3696_v61  ;;  %v6061_v61 = vld [vmem:[#allocation90_spill] sm:$0xff] }
 0x2ff   : > { %3699 = vrcp.f32 %v1560_v17  ;;  %v6062_v17 = vld [vmem:[#allocation91_spill] sm:$0xff] }
 0x305   : > { %v3698_v24 = vpop.eup %3697 }
 0x309   : > { %v3700_v54 = vpop.eup %3699 }
 0x30a   : > { %v1568_v3 = vmul.f32 %v3700_v54, %v3698_v24  ;;  %v6063_v24 = vld [vmem:[#allocation92_spill] sm:$0xff]  ;;  %v6064_v54 = vld [vmem:[#allocation93_spill] sm:$0xff] }
 0x30c   : > { %1570 = vst [vmem:[#allocation2] sm:$0xf] %v1568_v3  ;;  %3561 = vst [vmem:[%s3308_s24 + $0x4] sm:$0xf] %v1568_v3  ;;  %v6065_v3 = vld [vmem:[#allocation94_spill] sm:$0xff]  ;;  %s3583_s24 = smul.u32 4294967284, %s3839_s12 }
 0x30e   : > { %s3334_s26 = scalar_lea.vmem %s3970_s18, %s3583_s24 [#allocation5] }
 0x313   : > { %v3565_v52 = vld.sshfl [vmem:[#allocation2] sm:$0x33 pattern:$0x76325410] }
 0x314   : > { %v1591_v51 = vcombine.high %v3565_v52, %v3565_v52  ;;  %v4721_v45 = vpack.c.bf16 %v3565_v52, %v3565_v52  ;;  %v6066_v52 = vld [vmem:[#allocation95_spill] sm:$0xff] }
 0x316   : > { %v1595_v46 = vpack.c.bf16 %v1591_v51, %v1591_v51  ;;  %v6067_v51 = vld [vmem:[#allocation96_spill] sm:$0xff] }
 0x318   : > { %1628 = vmatprep.mubr.bf16.mxu0 %v1595_v46  ;;  %1669 = vmatprep.mubr.bf16.mxu1 %v1595_v46 }
 0x319   : > { %1629 = vmatmul.mubr.bf16.vlgmr.msra.gmra.mrb[16].mxu0 %v4721_v45  ;;  %1670 = vmatmul.mubr.bf16.vlgmr.msra.gmra.mrb[16].mxu1 %v4721_v45 }
 0x31a   : > { %1679 = vmatpush1.bf16.msra.mxu0 %v5966_v42  ;;  %1720 = vmatpush1.bf16.msra.mxu1 %v5967_v58 }
 0x31b   : > { %1710 = vmatprep.mubr.bf16.mxu0 %v1595_v46  ;;  %1751 = vmatprep.mubr.bf16.mxu1 %v1595_v46  ;;  %v6068_v46 = vld [vmem:[#allocation97_spill] sm:$0xff] }
 0x31c   : > { %1680 = vmatprep.subr.bf16.mxu0 %v5968_v12  ;;  %1721 = vmatprep.subr.bf16.mxu1 %v5969_v41 }
 0x31e   : > { %1681 = vmatpush1.bf16.msra.mxu0 %v5970_v40  ;;  %1722 = vmatpush1.bf16.msra.mxu1 %v5971_v47 }
 0x31f   : > { %1682 = vmatprep.subr.bf16.mxu0 %v5972_v55  ;;  %1723 = vmatprep.subr.bf16.mxu1 %v6050_v53 }
 0x322   : > { %1683 = vmatpush1.bf16.msra.mxu0 %v6051_v23  ;;  %1724 = vmatpush1.bf16.msra.mxu1 %v6052_v60 }
 0x323   : > { %1684 = vmatprep.subr.bf16.mxu0 %v6053_v62  ;;  %1725 = vmatprep.subr.bf16.mxu1 %v6054_v4 }
 0x326   : > { %1685 = vmatpush1.bf16.msra.mxu0 %v6055_v5  ;;  %1726 = vmatpush1.bf16.msra.mxu1 %v6056_v59 }
 0x327   : > { %1686 = vmatprep.subr.bf16.mxu0 %v6057_v15  ;;  %1727 = vmatprep.subr.bf16.mxu1 %v6058_v7  ;;  %v6069_v7 = vld [vmem:[#allocation98_spill] sm:$0xff] }
 0x32a   : > { %1687 = vmatpush1.bf16.msra.mxu0 %v6059_v16  ;;  %1728 = vmatpush1.bf16.msra.mxu1 %v6060_v13  ;;  %v6070_v16 = vld [vmem:[#allocation99_spill] sm:$0xff]  ;;  %v6071_v13 = vld [vmem:[#allocation100_spill] sm:$0xff] }
 0x32b   : > { %1688 = vmatprep.subr.bf16.mxu0 %v6061_v61  ;;  %1729 = vmatprep.subr.bf16.mxu1 %v6062_v17  ;;  %v6072_v61 = vld [vmem:[#allocation101_spill] sm:$0xff]  ;;  %v6073_v17 = vld [vmem:[#allocation102_spill] sm:$0xff] }
 0x32e   : > { %1689 = vmatpush1.bf16.msra.mxu0 %v6063_v24  ;;  %1730 = vmatpush1.bf16.msra.mxu1 %v6064_v54  ;;  %v6074_v24 = vld [vmem:[#allocation103_spill] sm:$0xff]  ;;  %v6075_v54 = vld [vmem:[#allocation104_spill] sm:$0xff] }
 0x32f   : > { %1690 = vmatprep.subr.bf16.mxu0 %v6065_v3  ;;  %1731 = vmatprep.subr.bf16.mxu1 %v6066_v52  ;;  %v6076_v3 = vld [vmem:[#allocation105_spill] sm:$0xff]  ;;  %v6077_v52 = vld [vmem:[#allocation106_spill] sm:$0xff] }
 0x332   : > { %1691 = vmatpush1.bf16.msra.mxu0 %v6067_v51  ;;  %1732 = vmatpush1.bf16.msra.mxu1 %v6068_v46  ;;  %v6078_v51 = vld [vmem:[#allocation107_spill] sm:$0xff]  ;;  %v6079_v46 = vld [vmem:[#allocation108_spill] sm:$0xff] }
 0x333   : > { %1692 = vmatprep.subr.bf16.mxu0 %v6069_v7  ;;  %1733 = vmatprep.subr.bf16.mxu1 %v6070_v16 }
 0x336   : > { %1693 = vmatpush1.bf16.msra.mxu0 %v6071_v13  ;;  %1734 = vmatpush1.bf16.msra.mxu1 %v6072_v61  ;;  %v6080_v61 = vld [vmem:[#allocation112_spill] sm:$0xff] }
 0x337   : > { %1694 = vmatprep.subr.bf16.mxu0 %v6073_v17  ;;  %1735 = vmatprep.subr.bf16.mxu1 %v6074_v24 }
 0x33a   : > { %1695 = vmatpush1.bf16.msra.mxu0 %v6075_v54  ;;  %1736 = vmatpush1.bf16.msra.mxu1 %v6076_v3 }
 0x33b   : > { %1696 = vmatprep.subr.bf16.mxu0 %v6077_v52  ;;  %1737 = vmatprep.subr.bf16.mxu1 %v6078_v51 }
 0x33e   : > { %1697 = vmatpush1.bf16.msra.mxu0 %v6079_v46  ;;  %1738 = vmatpush1.bf16.msra.mxu1 %v6003_v29 }
 0x33f   : > { %1698 = vmatprep.subr.bf16.mxu0 %v6004_v28  ;;  %1739 = vmatprep.subr.bf16.mxu1 %v6005_v2 }
 0x342   : > { %1699 = vmatpush1.bf16.msra.mxu0 %v6080_v61  ;;  %1740 = vmatpush1.bf16.msra.mxu1 %v6007_v34 }
 0x343   : > { %1700 = vmatprep.subr.bf16.mxu0 %v6008_v10  ;;  %1741 = vmatprep.subr.bf16.mxu1 %v6009_v63 }
 0x346   : > { %1701 = vmatpush1.bf16.msra.mxu0 %v6010_v48  ;;  %1742 = vmatpush1.bf16.msra.mxu1 %v6011_v57 }
 0x347   : > { %1702 = vmatprep.subr.bf16.mxu0 %v6012_v49  ;;  %1743 = vmatprep.subr.bf16.mxu1 %v6013_v30 }
 0x34a   : > { %1703 = vmatpush1.bf16.msra.mxu0 %v4448_v0  ;;  %1744 = vmatpush1.bf16.msra.mxu1 %v4452_v11 }
 0x34b   : > { %1704 = vmatprep.subr.bf16.mxu0 %v4454_v6  ;;  %1745 = vmatprep.subr.bf16.mxu1 %v6014_v9 }
 0x34e   : > { %1705 = vmatpush1.bf16.msra.mxu0 %v4464_v33  ;;  %1746 = vmatpush1.bf16.msra.mxu1 %v4468_v1 }
 0x34f   : > { %1706 = vmatprep.subr.bf16.mxu0 %v4470_v18  ;;  %1747 = vmatprep.subr.bf16.mxu1 %v4473_v19 }
 0x352   : > { %1707 = vmatpush1.bf16.msra.mxu0 %v4480_v39  ;;  %1748 = vmatpush1.bf16.msra.mxu1 %v4484_v32 }
 0x353   : > { %1708 = vmatprep.subr.bf16.mxu0 %v4486_v21  ;;  %1749 = vmatprep.subr.bf16.mxu1 %v4489_v14 }
 0x356   : > { %1709 = vmatpush1.bf16.msra.mxu0 %v4492_v8  ;;  %1750 = vmatpush1.bf16.msra.mxu1 %v4496_v50 }
 0x357   : > { %1863 = vmatprep.subr.bf16.mxu0 %v3976_v20  ;;  %1904 = vmatprep.subr.bf16.mxu1 %v3983_v25 }
 0x359   : > { %1711 = vmatmul.mubr.bf16.vlgmr.msra.gmra.mrb[20].mxu0 %v4721_v45  ;;  %1752 = vmatmul.mubr.bf16.vlgmr.msra.gmra.mrb[20].mxu1 %v4721_v45  ;;  %v6081_v45 = vld [vmem:[#allocation18_spill] sm:$0xff] }
 0x35a   : > { %1864 = vmatpush1.bf16.msra.mxu0 %v3979_v22  ;;  %1905 = vmatpush1.bf16.msra.mxu1 %v3985_v26  ;;  %v6082_v22 = vld [vmem:[#allocation19_spill] sm:$0xff]  ;;  %v6083_v26 = vld [vmem:[#allocation20_spill] sm:$0xff] }
 0x35b   : > { %1865 = vmatprep.subr.bf16.mxu0 %v3987_v27  ;;  %1906 = vmatprep.subr.bf16.mxu1 %v3993_v31  ;;  %v6084_v27 = vld [vmem:[#allocation21_spill] sm:$0xff]  ;;  %v6085_v31 = vld [vmem:[#allocation22_spill] sm:$0xff] }
 0x35e   : > { %1866 = vmatpush1.bf16.msra.mxu0 %v4000_v35  ;;  %1907 = vmatpush1.bf16.msra.mxu1 %v4004_v36  ;;  %v6086_v35 = vld [vmem:[#allocation23_spill] sm:$0xff]  ;;  %v6087_v36 = vld [vmem:[#allocation24_spill] sm:$0xff] }
 0x35f   : > { %1867 = vmatprep.subr.bf16.mxu0 %v4006_v37  ;;  %1908 = vmatprep.subr.bf16.mxu1 %v4009_v38  ;;  %v6088_v37 = vld [vmem:[#allocation25_spill] sm:$0xff]  ;;  %v6089_v38 = vld [vmem:[#allocation26_spill] sm:$0xff] }
 0x362   : > { %1868 = vmatpush1.bf16.msra.mxu0 %v4016_v43  ;;  %1909 = vmatpush1.bf16.msra.mxu1 %v4020_v44  ;;  %v6090_v43 = vld [vmem:[#allocation27_spill] sm:$0xff]  ;;  %v6091_v44 = vld [vmem:[#allocation28_spill] sm:$0xff] }
 0x363   : > { %1869 = vmatprep.subr.bf16.mxu0 %v6081_v45  ;;  %1910 = vmatprep.subr.bf16.mxu1 %v6082_v22  ;;  %v6092_v45 = vld [vmem:[#allocation29_spill] sm:$0xff]  ;;  %v6093_v22 = vld [vmem:[#allocation30_spill] sm:$0xff] }
 0x366   : > { %1870 = vmatpush1.bf16.msra.mxu0 %v6083_v26  ;;  %1911 = vmatpush1.bf16.msra.mxu1 %v6084_v27  ;;  %v6094_v26 = vld [vmem:[#allocation31_spill] sm:$0xff]  ;;  %v6095_v27 = vld [vmem:[#allocation32_spill] sm:$0xff] }
 0x367   : > { %1871 = vmatprep.subr.bf16.mxu0 %v6085_v31  ;;  %1912 = vmatprep.subr.bf16.mxu1 %v6086_v35  ;;  %v6096_v31 = vld [vmem:[#allocation33_spill] sm:$0xff]  ;;  %v6097_v35 = vld [vmem:[#allocation34_spill] sm:$0xff] }
 0x36a   : > { %1872 = vmatpush1.bf16.msra.mxu0 %v6087_v36  ;;  %1913 = vmatpush1.bf16.msra.mxu1 %v6088_v37  ;;  %v6098_v36 = vld [vmem:[#allocation35_spill] sm:$0xff]  ;;  %v6099_v37 = vld [vmem:[#allocation36_spill] sm:$0xff] }
 0x36b   : > { %1873 = vmatprep.subr.bf16.mxu0 %v6089_v38  ;;  %1914 = vmatprep.subr.bf16.mxu1 %v6090_v43  ;;  %v6100_v38 = vld [vmem:[#allocation37_spill] sm:$0xff]  ;;  %v6101_v43 = vld [vmem:[#allocation38_spill] sm:$0xff] }
 0x36e   : > { %1874 = vmatpush1.bf16.msra.mxu0 %v6091_v44  ;;  %1915 = vmatpush1.bf16.msra.mxu1 %v6092_v45  ;;  %v6102_v44 = vld [vmem:[#allocation39_spill] sm:$0xff]  ;;  %v6103_v45 = vld [vmem:[#allocation40_spill] sm:$0xff] }
 0x36f   : > { %1875 = vmatprep.subr.bf16.mxu0 %v6093_v22  ;;  %1916 = vmatprep.subr.bf16.mxu1 %v6094_v26  ;;  %v6104_v22 = vld [vmem:[#allocation41_spill] sm:$0xff]  ;;  %v6105_v26 = vld [vmem:[#allocation42_spill] sm:$0xff] }
 0x372   : > { %1876 = vmatpush1.bf16.msra.mxu0 %v6095_v27  ;;  %1917 = vmatpush1.bf16.msra.mxu1 %v6096_v31  ;;  %v6106_v27 = vld [vmem:[#allocation43_spill] sm:$0xff]  ;;  %v6107_v31 = vld [vmem:[#allocation44_spill] sm:$0xff] }
 0x373   : > { %1877 = vmatprep.subr.bf16.mxu0 %v6097_v35  ;;  %1918 = vmatprep.subr.bf16.mxu1 %v6098_v36  ;;  %v6108_v35 = vld [vmem:[#allocation45_spill] sm:$0xff]  ;;  %v6109_v36 = vld [vmem:[#allocation46_spill] sm:$0xff] }
 0x376   : > { %1878 = vmatpush1.bf16.msra.mxu0 %v6099_v37  ;;  %1919 = vmatpush1.bf16.msra.mxu1 %v6100_v38  ;;  %v6110_v37 = vld [vmem:[#allocation47_spill] sm:$0xff]  ;;  %v6111_v38 = vld [vmem:[#allocation48_spill] sm:$0xff] }
 0x377   : > { %1879 = vmatprep.subr.bf16.mxu0 %v6101_v43  ;;  %1920 = vmatprep.subr.bf16.mxu1 %v6102_v44  ;;  %v6112_v43 = vld [vmem:[#allocation49_spill] sm:$0xff]  ;;  %v6113_v44 = vld [vmem:[#allocation50_spill] sm:$0xff] }
 0x37a   : > { %1880 = vmatpush1.bf16.msra.mxu0 %v6103_v45  ;;  %1921 = vmatpush1.bf16.msra.mxu1 %v6104_v22  ;;  %v6114_v45 = vld [vmem:[#allocation51_spill] sm:$0xff]  ;;  %v6115_v22 = vld [vmem:[#allocation52_spill] sm:$0xff] }
 0x37b   : > { %1881 = vmatprep.subr.bf16.mxu0 %v6105_v26  ;;  %1922 = vmatprep.subr.bf16.mxu1 %v6106_v27  ;;  %v6116_v26 = vld [vmem:[#allocation53_spill] sm:$0xff]  ;;  %v6117_v27 = vld [vmem:[#allocation54_spill] sm:$0xff] }
 0x37e   : > { %1882 = vmatpush1.bf16.msra.mxu0 %v6107_v31  ;;  %1923 = vmatpush1.bf16.msra.mxu1 %v6108_v35  ;;  %v6118_v31 = vld [vmem:[#allocation55_spill] sm:$0xff]  ;;  %v6119_v35 = vld [vmem:[#allocation56_spill] sm:$0xff] }
 0x37f   : > { %1883 = vmatprep.subr.bf16.mxu0 %v6109_v36  ;;  %1924 = vmatprep.subr.bf16.mxu1 %v6110_v37  ;;  %v6120_v36 = vld [vmem:[#allocation57_spill] sm:$0xff]  ;;  %v6121_v37 = vld [vmem:[#allocation58_spill] sm:$0xff] }
 0x382   : > { %1884 = vmatpush1.bf16.msra.mxu0 %v6111_v38  ;;  %1925 = vmatpush1.bf16.msra.mxu1 %v6112_v43  ;;  %v6122_v38 = vld [vmem:[#allocation59_spill] sm:$0xff]  ;;  %v6123_v43 = vld [vmem:[#allocation60_spill] sm:$0xff] }
 0x383   : > { %1885 = vmatprep.subr.bf16.mxu0 %v6113_v44  ;;  %1926 = vmatprep.subr.bf16.mxu1 %v6114_v45  ;;  %v6124_v44 = vld [vmem:[#allocation61_spill] sm:$0xff]  ;;  %v6125_v45 = vld [vmem:[#allocation62_spill] sm:$0xff] }
 0x386   : > { %1886 = vmatpush1.bf16.msra.mxu0 %v6115_v22  ;;  %1927 = vmatpush1.bf16.msra.mxu1 %v6116_v26  ;;  %v6126_v22 = vld [vmem:[#allocation63_spill] sm:$0xff]  ;;  %v6127_v26 = vld [vmem:[#allocation64_spill] sm:$0xff] }
 0x387   : > { %1887 = vmatprep.subr.bf16.mxu0 %v6117_v27  ;;  %1928 = vmatprep.subr.bf16.mxu1 %v6118_v31  ;;  %v6128_v27 = vld [vmem:[#allocation65_spill] sm:$0xff]  ;;  %v6129_v31 = vld [vmem:[#allocation66_spill] sm:$0xff] }
 0x38a   : > { %1888 = vmatpush1.bf16.msra.mxu0 %v6119_v35  ;;  %1929 = vmatpush1.bf16.msra.mxu1 %v6120_v36  ;;  %v6130_v35 = vld [vmem:[#allocation67_spill] sm:$0xff]  ;;  %v6131_v36 = vld [vmem:[#allocation68_spill] sm:$0xff] }
 0x38b   : > { %1889 = vmatprep.subr.bf16.mxu0 %v6121_v37  ;;  %1930 = vmatprep.subr.bf16.mxu1 %v6122_v38  ;;  %v6132_v37 = vld [vmem:[#allocation69_spill] sm:$0xff]  ;;  %v6133_v38 = vld [vmem:[#allocation70_spill] sm:$0xff] }
 0x38e   : > { %1890 = vmatpush1.bf16.msra.mxu0 %v6123_v43  ;;  %1931 = vmatpush1.bf16.msra.mxu1 %v6124_v44  ;;  %v6134_v44 = vld [vmem:[#allocation71_spill] sm:$0xff] }
 0x38f   : > { %1891 = vmatprep.subr.bf16.mxu0 %v6125_v45  ;;  %1932 = vmatprep.subr.bf16.mxu1 %v6126_v22 }
 0x392   : > { %1892 = vmatpush1.bf16.msra.mxu0 %v6127_v26  ;;  %1933 = vmatpush1.bf16.msra.mxu1 %v6128_v27 }
 0x393   : > { %1893 = vmatprep.subr.bf16.mxu0 %v6129_v31  ;;  %1934 = vmatprep.subr.bf16.mxu1 %v6130_v35 }
 0x396   : > { %1894 = vmatpush1.bf16.msra.mxu0 %v6131_v36  ;;  %1935 = vmatpush1.bf16.msra.mxu1 %v6132_v37 }
 0x397   : > { %1945 = vmatprep.subr.bf16.mxu0 %v6133_v38  ;;  %1986 = vmatprep.subr.bf16.mxu1 %v6134_v44  ;;  %v3563_v38 = vld [vmem:[%s3312_s27 + $0x20] sm:$0xff] }
 0x3ec   : > { %v1630_v45 = vpop.f32.mrb[16].mxu0  ;;  %v1671_v22 = vpop.f32.mrb[16].mxu1 }
 0x3ed   : > { %v1632_v43 = vpop.f32.mrb[17].mxu0  ;;  %v1673_v26 = vpop.f32.mrb[17].mxu1 }
 0x3ee   : > { %v1768_v25 = vcombine.low %v1630_v45, %v1632_v43  ;;  %v1769_v27 = vcombine.low %v1671_v22, %v1673_v26  ;;  %v1634_v20 = vpop.f32.mrb[18].mxu0  ;;  %v1675_v31 = vpop.f32.mrb[18].mxu1 }
 0x3ef   : > { %v1635_v50 = vpop.f32.mrb[19].mxu0  ;;  %v1676_v35 = vpop.f32.mrb[19].mxu1 }
 0x3f0   : > { %v1776_v36 = vrot.slane %v1768_v25, %v4569_v56  ;;  %v1783_v37 = vrot.slane %v1769_v27, %v4569_v56 }
 0x3f2   : > { %v1784_v8 = vcombine.low %v1776_v36, %v1783_v37 }
 0x3f4   : > { %v1804_v14 = vadd.f32 %v3563_v38, %v1784_v8 }
 0x3f6   : > { %v1813_v44 = vrot.slane %v1804_v14, 4  ;;  %v1806_v32 = vsub.f32 0.0, %v1804_v14 }
 0x3f8   : > { %v1815_v21 = vsub.f32 0.0, %v1813_v44  ;;  %v1807_v19 = vmul.f32 1.442695, %v1806_v32 }
 0x3fa   : > { %v1816_v39 = vmul.f32 1.442695, %v1815_v21 }
 0x3fc   : > { %3701 = vpow2.f32 %v1816_v39  ;;  %v3564_v39 = vld [vmem:[%s3312_s27 + $0x28] sm:$0xff]  ;;  %s3585_s27 = smul.u32 4294967216, %s3839_s12 }
 0x3fd   : > { %3703 = vpow2.f32 %v1807_v19 }
 0x3fe   : > { %s3338_s28 = scalar_lea.vmem %s3968_s8, %s3585_s27 [#allocation4] }
 0x406   : > { %v3702_v26 = vpop.eup %3701 }
 0x407   : > { %v3704_v25 = vpop.eup %3703  ;;  %v1818_v38 = vadd.f32 1.0, %v3702_v26 }
 0x408   : > { %v1809_v32 = vadd.f32 1.0, %v3704_v25 }
 0x409   : > { %3705 = vrcp.f32 %v1818_v38 }
 0x40a   : > { %3707 = vrcp.f32 %v1809_v32 }
 0x42c   : > { %v1712_v20 = vpop.f32.mrb[20].mxu0  ;;  %v1753_v22 = vpop.f32.mrb[20].mxu1 }
 0x42d   : > { %v1714_v31 = vpop.f32.mrb[21].mxu0  ;;  %v1755_v35 = vpop.f32.mrb[21].mxu1 }
 0x42e   : > { %v1785_v43 = vcombine.low %v1712_v20, %v1714_v31  ;;  %v1786_v27 = vcombine.low %v1753_v22, %v1755_v35  ;;  %v1716_v36 = vpop.f32.mrb[22].mxu0  ;;  %v1757_v37 = vpop.f32.mrb[22].mxu1 }
 0x42f   : > { %v1717_v50 = vpop.f32.mrb[23].mxu0  ;;  %v1758_v45 = vpop.f32.mrb[23].mxu1  ;;  %v1831_v36 = vld [vmem:[#allocation3] sm:$0xf] }
 0x430   : > { %v1793_v44 = vrot.slane %v1785_v43, %v4569_v56  ;;  %v1800_v8 = vrot.slane %v1786_v27, %v4569_v56  ;;  %v3706_v31 = vpop.eup %3705 }
 0x431   : > { %v3708_v35 = vpop.eup %3707  ;;  %v1832_v43 = vmul.f32 %v3706_v31, %v1831_v36  ;;  %v6139_v31 = vld [vmem:[#allocation91_spill] sm:$0xff]  ;;  %v6142_v36 = vld [vmem:[#allocation94_spill] sm:$0xff] }
 0x432   : > { %v1801_v19 = vcombine.low %v1793_v44, %v1800_v8 }
 0x434   : > { %v1805_v21 = vadd.f32 %v3564_v39, %v1801_v19 }
 0x436   : > { %3709 = vtanh.f32 %v1805_v21  ;;  %v1823_v14 = vrot.slane %v1805_v21, 4  ;;  %v6135_v21 = vld [vmem:[#allocation87_spill] sm:$0xff] }
 0x438   : > { %v1825_v20 = vsub.f32 0.0, %v1823_v14  ;;  %v6136_v14 = vld [vmem:[#allocation88_spill] sm:$0xff] }
 0x43a   : > { %v1826_v22 = vmul.f32 1.442695, %v1825_v20  ;;  %v6137_v20 = vld [vmem:[#allocation89_spill] sm:$0xff] }
 0x43c   : > { %3711 = vpow2.f32 %v1826_v22  ;;  %v6138_v22 = vld [vmem:[#allocation90_spill] sm:$0xff] }
 0x440   : > { %v3710_v26 = vpop.eup %3709 }
 0x441   : > { %v1833_v37 = vmul.f32 %v3710_v26, %v3708_v35  ;;  %v6140_v35 = vld [vmem:[#allocation92_spill] sm:$0xff]  ;;  %v6141_v26 = vld [vmem:[#allocation93_spill] sm:$0xff] }
 0x443   : > { %v1834_v27 = vadd.f32 %v1833_v37, %v1832_v43  ;;  %v6143_v43 = vld [vmem:[#allocation95_spill] sm:$0xff]  ;;  %v6144_v37 = vld [vmem:[#allocation96_spill] sm:$0xff] }
 0x445   : > { %1837 = vst [vmem:[#allocation3] sm:$0xf] %v1834_v27  ;;  %3713 = vtanh.f32 %v1834_v27  ;;  %v6145_v27 = vld [vmem:[#allocation97_spill] sm:$0xff] }
 0x446   : > { %v3712_v25 = vpop.eup %3711 }
 0x447   : > { %v1828_v50 = vadd.f32 1.0, %v3712_v25  ;;  %v6146_v25 = vld [vmem:[#allocation101_spill] sm:$0xff] }
 0x449   : > { %3715 = vrcp.f32 %v1828_v50  ;;  %v6147_v50 = vld [vmem:[#allocation127_spill] sm:$0xff] }
 0x44f   : > { %v3714_v45 = vpop.eup %3713 }
 0x453   : > { %v3716_v38 = vpop.eup %3715 }
 0x454   : > { %v1836_v44 = vmul.f32 %v3716_v38, %v3714_v45  ;;  %v6148_v45 = vld [vmem:[#allocation128_spill] sm:$0xff]  ;;  %v6149_v38 = vld [vmem:[#allocation129_spill] sm:$0xff] }
 0x456   : > { %1838 = vst [vmem:[#allocation2] sm:$0xf] %v1836_v44  ;;  %3567 = vst [vmem:[%s3316_s29 + $0x8] sm:$0xf] %v1836_v44  ;;  %v6150_v44 = vld [vmem:[#allocation130_spill] sm:$0xff]  ;;  %s3589_s29 = smul.u32 4294967276, %s3839_s12 }
 0x458   : > { %s3342_s30 = scalar_lea.vmem %s3970_s18, %s3589_s29 [#allocation5] }
 0x45d   : > { %v3571_v8 = vld.sshfl [vmem:[#allocation2] sm:$0x33 pattern:$0x76325410] }
 0x45e   : > { %v1858_v32 = vcombine.high %v3571_v8, %v3571_v8  ;;  %v4863_v19 = vpack.c.bf16 %v3571_v8, %v3571_v8  ;;  %v6151_v8 = vld [vmem:[#allocation131_spill] sm:$0xff] }
 0x460   : > { %v1862_v39 = vpack.c.bf16 %v1858_v32, %v1858_v32  ;;  %v6152_v32 = vld [vmem:[#allocation132_spill] sm:$0xff] }
 0x462   : > { %1895 = vmatprep.mubr.bf16.mxu0 %v1862_v39  ;;  %1936 = vmatprep.mubr.bf16.mxu1 %v1862_v39 }
 0x463   : > { %1896 = vmatmul.mubr.bf16.vlgmr.msra.gmra.mrb[24].mxu0 %v4863_v19  ;;  %1937 = vmatmul.mubr.bf16.vlgmr.msra.gmra.mrb[24].mxu1 %v4863_v19 }
 0x464   : > { %1946 = vmatpush1.bf16.msra.mxu0 %v5966_v42  ;;  %1987 = vmatpush1.bf16.msra.mxu1 %v5967_v58 }
 0x465   : > { %1977 = vmatprep.mubr.bf16.mxu0 %v1862_v39  ;;  %2018 = vmatprep.mubr.bf16.mxu1 %v1862_v39  ;;  %v6153_v39 = vld [vmem:[#allocation133_spill] sm:$0xff] }
 0x466   : > { %1947 = vmatprep.subr.bf16.mxu0 %v5968_v12  ;;  %1988 = vmatprep.subr.bf16.mxu1 %v5969_v41 }
 0x468   : > { %1948 = vmatpush1.bf16.msra.mxu0 %v5970_v40  ;;  %1989 = vmatpush1.bf16.msra.mxu1 %v5971_v47 }
 0x469   : > { %1949 = vmatprep.subr.bf16.mxu0 %v5972_v55  ;;  %1990 = vmatprep.subr.bf16.mxu1 %v6050_v53 }
 0x46c   : > { %1950 = vmatpush1.bf16.msra.mxu0 %v6051_v23  ;;  %1991 = vmatpush1.bf16.msra.mxu1 %v6052_v60 }
 0x46d   : > { %1951 = vmatprep.subr.bf16.mxu0 %v6053_v62  ;;  %1992 = vmatprep.subr.bf16.mxu1 %v6054_v4 }
 0x470   : > { %1952 = vmatpush1.bf16.msra.mxu0 %v6055_v5  ;;  %1993 = vmatpush1.bf16.msra.mxu1 %v6056_v59 }
 0x471   : > { %1953 = vmatprep.subr.bf16.mxu0 %v6057_v15  ;;  %1994 = vmatprep.subr.bf16.mxu1 %v6135_v21 }
 0x474   : > { %1954 = vmatpush1.bf16.msra.mxu0 %v6136_v14  ;;  %1995 = vmatpush1.bf16.msra.mxu1 %v6137_v20 }
 0x475   : > { %1955 = vmatprep.subr.bf16.mxu0 %v6138_v22  ;;  %1996 = vmatprep.subr.bf16.mxu1 %v6139_v31 }
 0x478   : > { %1956 = vmatpush1.bf16.msra.mxu0 %v6140_v35  ;;  %1997 = vmatpush1.bf16.msra.mxu1 %v6141_v26 }
 0x479   : > { %1957 = vmatprep.subr.bf16.mxu0 %v6142_v36  ;;  %1998 = vmatprep.subr.bf16.mxu1 %v6143_v43 }
 0x47c   : > { %1958 = vmatpush1.bf16.msra.mxu0 %v6144_v37  ;;  %1999 = vmatpush1.bf16.msra.mxu1 %v6145_v27 }
 0x47d   : > { %1959 = vmatprep.subr.bf16.mxu0 %v6069_v7  ;;  %2000 = vmatprep.subr.bf16.mxu1 %v6070_v16 }
 0x480   : > { %1960 = vmatpush1.bf16.msra.mxu0 %v6071_v13  ;;  %2001 = vmatpush1.bf16.msra.mxu1 %v6146_v25 }
 0x481   : > { %1961 = vmatprep.subr.bf16.mxu0 %v6073_v17  ;;  %2002 = vmatprep.subr.bf16.mxu1 %v6074_v24 }
 0x484   : > { %1962 = vmatpush1.bf16.msra.mxu0 %v6075_v54  ;;  %2003 = vmatpush1.bf16.msra.mxu1 %v6076_v3 }
 0x485   : > { %1963 = vmatprep.subr.bf16.mxu0 %v6077_v52  ;;  %2004 = vmatprep.subr.bf16.mxu1 %v6078_v51 }
 0x488   : > { %1964 = vmatpush1.bf16.msra.mxu0 %v6079_v46  ;;  %2005 = vmatpush1.bf16.msra.mxu1 %v6003_v29 }
 0x489   : > { %1965 = vmatprep.subr.bf16.mxu0 %v6004_v28  ;;  %2006 = vmatprep.subr.bf16.mxu1 %v6005_v2 }
 0x48c   : > { %1966 = vmatpush1.bf16.msra.mxu0 %v6080_v61  ;;  %2007 = vmatpush1.bf16.msra.mxu1 %v6007_v34 }
 0x48d   : > { %1967 = vmatprep.subr.bf16.mxu0 %v6008_v10  ;;  %2008 = vmatprep.subr.bf16.mxu1 %v6009_v63 }
 0x490   : > { %1968 = vmatpush1.bf16.msra.mxu0 %v6010_v48  ;;  %2009 = vmatpush1.bf16.msra.mxu1 %v6011_v57 }
 0x491   : > { %1969 = vmatprep.subr.bf16.mxu0 %v6012_v49  ;;  %2010 = vmatprep.subr.bf16.mxu1 %v6013_v30 }
 0x494   : > { %1970 = vmatpush1.bf16.msra.mxu0 %v4448_v0  ;;  %2011 = vmatpush1.bf16.msra.mxu1 %v4452_v11 }
 0x495   : > { %1971 = vmatprep.subr.bf16.mxu0 %v4454_v6  ;;  %2012 = vmatprep.subr.bf16.mxu1 %v6014_v9  ;;  %v6154_v9 = vld [vmem:[#allocation6_spill] sm:$0xff] }
 0x498   : > { %1972 = vmatpush1.bf16.msra.mxu0 %v4464_v33  ;;  %2013 = vmatpush1.bf16.msra.mxu1 %v4468_v1  ;;  %v6155_v33 = vld [vmem:[#allocation8_spill] sm:$0xff] }
 0x499   : > { %1973 = vmatprep.subr.bf16.mxu0 %v4470_v18  ;;  %2014 = vmatprep.subr.bf16.mxu1 %v6147_v50  ;;  %v6156_v50 = vld [vmem:[#allocation7_spill] sm:$0xff]  ;;  %v6165_v18 = vld [vmem:[#allocation17_spill] sm:$0xff] }
 0x49c   : > { %1974 = vmatpush1.bf16.msra.mxu0 %v6148_v45  ;;  %2015 = vmatpush1.bf16.msra.mxu1 %v6149_v38  ;;  %v6157_v45 = vld [vmem:[#allocation9_spill] sm:$0xff]  ;;  %v6158_v38 = vld [vmem:[#allocation10_spill] sm:$0xff] }
 0x49d   : > { %1975 = vmatprep.subr.bf16.mxu0 %v6150_v44  ;;  %2016 = vmatprep.subr.bf16.mxu1 %v6151_v8  ;;  %v6159_v44 = vld [vmem:[#allocation11_spill] sm:$0xff]  ;;  %v6160_v8 = vld [vmem:[#allocation12_spill] sm:$0xff] }
 0x4a0   : > { %1976 = vmatpush1.bf16.msra.mxu0 %v6152_v32  ;;  %2017 = vmatpush1.bf16.msra.mxu1 %v6153_v39  ;;  %v6161_v32 = vld [vmem:[#allocation13_spill] sm:$0xff]  ;;  %v6162_v39 = vld [vmem:[#allocation14_spill] sm:$0xff] }
 0x4a1   : > { %2130 = vmatprep.subr.bf16.mxu0 %v6154_v9  ;;  %2171 = vmatprep.subr.bf16.mxu1 %v6155_v33  ;;  %v6163_v9 = vld [vmem:[#allocation15_spill] sm:$0xff]  ;;  %v6164_v33 = vld [vmem:[#allocation16_spill] sm:$0xff] }
 0x4a3   : > { %1978 = vmatmul.mubr.bf16.vlgmr.msra.gmra.mrb[28].mxu0 %v4863_v19  ;;  %2019 = vmatmul.mubr.bf16.vlgmr.msra.gmra.mrb[28].mxu1 %v4863_v19  ;;  %v6166_v19 = vld [vmem:[#allocation18_spill] sm:$0xff] }
 0x4a4   : > { %2131 = vmatpush1.bf16.msra.mxu0 %v6156_v50  ;;  %2172 = vmatpush1.bf16.msra.mxu1 %v6157_v45  ;;  %v6167_v50 = vld [vmem:[#allocation19_spill] sm:$0xff]  ;;  %v6168_v45 = vld [vmem:[#allocation20_spill] sm:$0xff] }
 0x4a5   : > { %2132 = vmatprep.subr.bf16.mxu0 %v6158_v38  ;;  %2173 = vmatprep.subr.bf16.mxu1 %v6159_v44  ;;  %v6169_v38 = vld [vmem:[#allocation21_spill] sm:$0xff]  ;;  %v6170_v44 = vld [vmem:[#allocation22_spill] sm:$0xff] }
 0x4a8   : > { %2133 = vmatpush1.bf16.msra.mxu0 %v6160_v8  ;;  %2174 = vmatpush1.bf16.msra.mxu1 %v6161_v32  ;;  %v6171_v8 = vld [vmem:[#allocation23_spill] sm:$0xff]  ;;  %v6172_v32 = vld [vmem:[#allocation24_spill] sm:$0xff] }
 0x4a9   : > { %2134 = vmatprep.subr.bf16.mxu0 %v6162_v39  ;;  %2175 = vmatprep.subr.bf16.mxu1 %v6163_v9  ;;  %v6173_v39 = vld [vmem:[#allocation25_spill] sm:$0xff]  ;;  %v6174_v9 = vld [vmem:[#allocation26_spill] sm:$0xff] }
 0x4ac   : > { %2135 = vmatpush1.bf16.msra.mxu0 %v6164_v33  ;;  %2176 = vmatpush1.bf16.msra.mxu1 %v6165_v18  ;;  %v6175_v33 = vld [vmem:[#allocation27_spill] sm:$0xff]  ;;  %v6176_v18 = vld [vmem:[#allocation28_spill] sm:$0xff] }
 0x4ad   : > { %2136 = vmatprep.subr.bf16.mxu0 %v6166_v19  ;;  %2177 = vmatprep.subr.bf16.mxu1 %v6167_v50  ;;  %v6177_v19 = vld [vmem:[#allocation29_spill] sm:$0xff]  ;;  %v6178_v50 = vld [vmem:[#allocation30_spill] sm:$0xff] }
 0x4b0   : > { %2137 = vmatpush1.bf16.msra.mxu0 %v6168_v45  ;;  %2178 = vmatpush1.bf16.msra.mxu1 %v6169_v38  ;;  %v6179_v45 = vld [vmem:[#allocation31_spill] sm:$0xff]  ;;  %v6180_v38 = vld [vmem:[#allocation32_spill] sm:$0xff] }
 0x4b1   : > { %2138 = vmatprep.subr.bf16.mxu0 %v6170_v44  ;;  %2179 = vmatprep.subr.bf16.mxu1 %v6171_v8  ;;  %v6181_v44 = vld [vmem:[#allocation33_spill] sm:$0xff]  ;;  %v6182_v8 = vld [vmem:[#allocation34_spill] sm:$0xff] }
 0x4b4   : > { %2139 = vmatpush1.bf16.msra.mxu0 %v6172_v32  ;;  %2180 = vmatpush1.bf16.msra.mxu1 %v6173_v39  ;;  %v6183_v32 = vld [vmem:[#allocation35_spill] sm:$0xff]  ;;  %v6184_v39 = vld [vmem:[#allocation36_spill] sm:$0xff] }
 0x4b5   : > { %2140 = vmatprep.subr.bf16.mxu0 %v6174_v9  ;;  %2181 = vmatprep.subr.bf16.mxu1 %v6175_v33  ;;  %v6185_v9 = vld [vmem:[#allocation37_spill] sm:$0xff]  ;;  %v6186_v33 = vld [vmem:[#allocation38_spill] sm:$0xff] }
 0x4b8   : > { %2141 = vmatpush1.bf16.msra.mxu0 %v6176_v18  ;;  %2182 = vmatpush1.bf16.msra.mxu1 %v6177_v19  ;;  %v6187_v18 = vld [vmem:[#allocation39_spill] sm:$0xff]  ;;  %v6188_v19 = vld [vmem:[#allocation40_spill] sm:$0xff] }
 0x4b9   : > { %2142 = vmatprep.subr.bf16.mxu0 %v6178_v50  ;;  %2183 = vmatprep.subr.bf16.mxu1 %v6179_v45  ;;  %v6189_v50 = vld [vmem:[#allocation41_spill] sm:$0xff]  ;;  %v6190_v45 = vld [vmem:[#allocation42_spill] sm:$0xff] }
 0x4bc   : > { %2143 = vmatpush1.bf16.msra.mxu0 %v6180_v38  ;;  %2184 = vmatpush1.bf16.msra.mxu1 %v6181_v44  ;;  %v6191_v38 = vld [vmem:[#allocation43_spill] sm:$0xff]  ;;  %v6192_v44 = vld [vmem:[#allocation44_spill] sm:$0xff] }
 0x4bd   : > { %2144 = vmatprep.subr.bf16.mxu0 %v6182_v8  ;;  %2185 = vmatprep.subr.bf16.mxu1 %v6183_v32  ;;  %v6193_v8 = vld [vmem:[#allocation45_spill] sm:$0xff]  ;;  %v6194_v32 = vld [vmem:[#allocation46_spill] sm:$0xff] }
 0x4c0   : > { %2145 = vmatpush1.bf16.msra.mxu0 %v6184_v39  ;;  %2186 = vmatpush1.bf16.msra.mxu1 %v6185_v9  ;;  %v6195_v39 = vld [vmem:[#allocation47_spill] sm:$0xff]  ;;  %v6196_v9 = vld [vmem:[#allocation48_spill] sm:$0xff] }
 0x4c1   : > { %2146 = vmatprep.subr.bf16.mxu0 %v6186_v33  ;;  %2187 = vmatprep.subr.bf16.mxu1 %v6187_v18  ;;  %v6197_v33 = vld [vmem:[#allocation49_spill] sm:$0xff]  ;;  %v6198_v18 = vld [vmem:[#allocation50_spill] sm:$0xff] }
 0x4c4   : > { %2147 = vmatpush1.bf16.msra.mxu0 %v6188_v19  ;;  %2188 = vmatpush1.bf16.msra.mxu1 %v6189_v50  ;;  %v6199_v19 = vld [vmem:[#allocation51_spill] sm:$0xff]  ;;  %v6200_v50 = vld [vmem:[#allocation52_spill] sm:$0xff] }
 0x4c5   : > { %2148 = vmatprep.subr.bf16.mxu0 %v6190_v45  ;;  %2189 = vmatprep.subr.bf16.mxu1 %v6191_v38  ;;  %v6201_v45 = vld [vmem:[#allocation53_spill] sm:$0xff]  ;;  %v6202_v38 = vld [vmem:[#allocation54_spill] sm:$0xff] }
 0x4c8   : > { %2149 = vmatpush1.bf16.msra.mxu0 %v6192_v44  ;;  %2190 = vmatpush1.bf16.msra.mxu1 %v6193_v8  ;;  %v6203_v44 = vld [vmem:[#allocation55_spill] sm:$0xff]  ;;  %v6204_v8 = vld [vmem:[#allocation56_spill] sm:$0xff] }
 0x4c9   : > { %2150 = vmatprep.subr.bf16.mxu0 %v6194_v32  ;;  %2191 = vmatprep.subr.bf16.mxu1 %v6195_v39  ;;  %v6205_v32 = vld [vmem:[#allocation57_spill] sm:$0xff]  ;;  %v6206_v39 = vld [vmem:[#allocation58_spill] sm:$0xff] }
 0x4cc   : > { %2151 = vmatpush1.bf16.msra.mxu0 %v6196_v9  ;;  %2192 = vmatpush1.bf16.msra.mxu1 %v6197_v33  ;;  %v6207_v9 = vld [vmem:[#allocation59_spill] sm:$0xff]  ;;  %v6208_v33 = vld [vmem:[#allocation60_spill] sm:$0xff] }
 0x4cd   : > { %2152 = vmatprep.subr.bf16.mxu0 %v6198_v18  ;;  %2193 = vmatprep.subr.bf16.mxu1 %v6199_v19  ;;  %v6209_v18 = vld [vmem:[#allocation61_spill] sm:$0xff]  ;;  %v6210_v19 = vld [vmem:[#allocation62_spill] sm:$0xff] }
 0x4d0   : > { %2153 = vmatpush1.bf16.msra.mxu0 %v6200_v50  ;;  %2194 = vmatpush1.bf16.msra.mxu1 %v6201_v45  ;;  %v6211_v50 = vld [vmem:[#allocation63_spill] sm:$0xff]  ;;  %v6212_v45 = vld [vmem:[#allocation64_spill] sm:$0xff] }
 0x4d1   : > { %2154 = vmatprep.subr.bf16.mxu0 %v6202_v38  ;;  %2195 = vmatprep.subr.bf16.mxu1 %v6203_v44  ;;  %v6213_v38 = vld [vmem:[#allocation65_spill] sm:$0xff]  ;;  %v6214_v44 = vld [vmem:[#allocation66_spill] sm:$0xff] }
 0x4d4   : > { %2155 = vmatpush1.bf16.msra.mxu0 %v6204_v8  ;;  %2196 = vmatpush1.bf16.msra.mxu1 %v6205_v32  ;;  %v6215_v8 = vld [vmem:[#allocation67_spill] sm:$0xff]  ;;  %v6216_v32 = vld [vmem:[#allocation68_spill] sm:$0xff] }
 0x4d5   : > { %2156 = vmatprep.subr.bf16.mxu0 %v6206_v39  ;;  %2197 = vmatprep.subr.bf16.mxu1 %v6207_v9  ;;  %v6217_v39 = vld [vmem:[#allocation69_spill] sm:$0xff]  ;;  %v6218_v9 = vld [vmem:[#allocation70_spill] sm:$0xff] }
 0x4d8   : > { %2157 = vmatpush1.bf16.msra.mxu0 %v6208_v33  ;;  %2198 = vmatpush1.bf16.msra.mxu1 %v6209_v18  ;;  %v6219_v18 = vld [vmem:[#allocation71_spill] sm:$0xff] }
 0x4d9   : > { %2158 = vmatprep.subr.bf16.mxu0 %v6210_v19  ;;  %2199 = vmatprep.subr.bf16.mxu1 %v6211_v50 }
 0x4dc   : > { %2159 = vmatpush1.bf16.msra.mxu0 %v6212_v45  ;;  %2200 = vmatpush1.bf16.msra.mxu1 %v6213_v38 }
 0x4dd   : > { %2160 = vmatprep.subr.bf16.mxu0 %v6214_v44  ;;  %2201 = vmatprep.subr.bf16.mxu1 %v6215_v8 }
 0x4e0   : > { %2161 = vmatpush1.bf16.msra.mxu0 %v6216_v32  ;;  %2202 = vmatpush1.bf16.msra.mxu1 %v6217_v39 }
 0x4e1   : > { %2212 = vmatprep.subr.bf16.mxu0 %v6218_v9  ;;  %2253 = vmatprep.subr.bf16.mxu1 %v6219_v18  ;;  %v3569_v9 = vld [vmem:[%s3319_s4 + $0x30] sm:$0xff] }
 0x536   : > { %v1897_v19 = vpop.f32.mrb[24].mxu0  ;;  %v1938_v50 = vpop.f32.mrb[24].mxu1 }
 0x537   : > { %v1899_v33 = vpop.f32.mrb[25].mxu0  ;;  %v1940_v45 = vpop.f32.mrb[25].mxu1 }
 0x538   : > { %v2035_v1 = vcombine.low %v1897_v19, %v1899_v33  ;;  %v2036_v38 = vcombine.low %v1938_v50, %v1940_v45  ;;  %v1901_v6 = vpop.f32.mrb[26].mxu0  ;;  %v1942_v44 = vpop.f32.mrb[26].mxu1 }
 0x539   : > { %v1902_v11 = vpop.f32.mrb[27].mxu0  ;;  %v1943_v8 = vpop.f32.mrb[27].mxu1 }
 0x53a   : > { %v2043_v32 = vrot.slane %v2035_v1, %v4569_v56  ;;  %v2050_v39 = vrot.slane %v2036_v38, %v4569_v56 }
 0x53c   : > { %v2051_v0 = vcombine.low %v2043_v32, %v2050_v39 }
 0x53e   : > { %v2071_v30 = vadd.f32 %v3569_v9, %v2051_v0 }
 0x540   : > { %v2080_v18 = vrot.slane %v2071_v30, 4  ;;  %v2073_v57 = vsub.f32 0.0, %v2071_v30 }
 0x542   : > { %v2082_v49 = vsub.f32 0.0, %v2080_v18  ;;  %v2074_v63 = vmul.f32 1.442695, %v2073_v57 }
 0x544   : > { %v2083_v48 = vmul.f32 1.442695, %v2082_v49 }
 0x546   : > { %3717 = vpow2.f32 %v2083_v48  ;;  %v3570_v48 = vld [vmem:[%s3319_s4 + $0x38] sm:$0xff]  ;;  %s3591_s4 = smul.u32 4294967184, %s3839_s12 }
 0x547   : > { %3719 = vpow2.f32 %v2074_v63 }
 0x548   : > { %s3346_s5 = scalar_lea.vmem %s3968_s8, %s3591_s4 [#allocation4]  ;;  %s3595_s8 = smul.u32 4294967268, %s3839_s12 }
 0x550   : > { %v3718_v11 = vpop.eup %3717 }
 0x551   : > { %v3720_v1 = vpop.eup %3719  ;;  %v2085_v0 = vadd.f32 1.0, %v3718_v11 }
 0x552   : > { %v2076_v57 = vadd.f32 1.0, %v3720_v1 }
 0x553   : > { %3721 = vrcp.f32 %v2085_v0 }
 0x554   : > { %3723 = vrcp.f32 %v2076_v57 }
 0x576   : > { %v1979_v33 = vpop.f32.mrb[28].mxu0  ;;  %v2020_v6 = vpop.f32.mrb[28].mxu1 }
 0x577   : > { %v1981_v50 = vpop.f32.mrb[29].mxu0  ;;  %v2022_v45 = vpop.f32.mrb[29].mxu1 }
 0x578   : > { %v2052_v44 = vcombine.low %v1979_v33, %v1981_v50  ;;  %v2053_v38 = vcombine.low %v2020_v6, %v2022_v45  ;;  %v1983_v8 = vpop.f32.mrb[30].mxu0  ;;  %v2024_v32 = vpop.f32.mrb[30].mxu1 }
 0x579   : > { %v1984_v39 = vpop.f32.mrb[31].mxu0  ;;  %v2025_v19 = vpop.f32.mrb[31].mxu1  ;;  %v2098_v8 = vld [vmem:[#allocation3] sm:$0xf] }
 0x57a   : > { %v2060_v18 = vrot.slane %v2052_v44, %v4569_v56  ;;  %v2067_v9 = vrot.slane %v2053_v38, %v4569_v56  ;;  %v3722_v50 = vpop.eup %3721 }
 0x57b   : > { %v3724_v45 = vpop.eup %3723  ;;  %v2099_v44 = vmul.f32 %v3722_v50, %v2098_v8  ;;  %v6224_v50 = vld [vmem:[#allocation119_spill] sm:$0xff]  ;;  %v6227_v8 = vld [vmem:[#allocation122_spill] sm:$0xff] }
 0x57c   : > { %v2068_v63 = vcombine.low %v2060_v18, %v2067_v9 }
 0x57e   : > { %v2072_v49 = vadd.f32 %v3570_v48, %v2068_v63 }
 0x580   : > { %3725 = vtanh.f32 %v2072_v49  ;;  %v2090_v30 = vrot.slane %v2072_v49, 4  ;;  %v6220_v49 = vld [vmem:[#allocation115_spill] sm:$0xff] }
 0x582   : > { %v2092_v33 = vsub.f32 0.0, %v2090_v30  ;;  %v6221_v30 = vld [vmem:[#allocation116_spill] sm:$0xff] }
 0x584   : > { %v2093_v6 = vmul.f32 1.442695, %v2092_v33  ;;  %v6222_v33 = vld [vmem:[#allocation117_spill] sm:$0xff] }
 0x586   : > { %3727 = vpow2.f32 %v2093_v6  ;;  %v6223_v6 = vld [vmem:[#allocation118_spill] sm:$0xff] }
 0x58a   : > { %v3726_v11 = vpop.eup %3725 }
 0x58b   : > { %v2100_v32 = vmul.f32 %v3726_v11, %v3724_v45  ;;  %v6225_v45 = vld [vmem:[#allocation120_spill] sm:$0xff]  ;;  %v6226_v11 = vld [vmem:[#allocation121_spill] sm:$0xff] }
 0x58d   : > { %v2101_v38 = vadd.f32 %v2100_v32, %v2099_v44  ;;  %v6228_v44 = vld [vmem:[#allocation123_spill] sm:$0xff]  ;;  %v6229_v32 = vld [vmem:[#allocation124_spill] sm:$0xff] }
 0x58f   : > { %2104 = vst [vmem:[#allocation3] sm:$0xf] %v2101_v38  ;;  %3729 = vtanh.f32 %v2101_v38  ;;  %v6230_v38 = vld [vmem:[#allocation125_spill] sm:$0xff] }
 0x590   : > { %v3728_v1 = vpop.eup %3727 }
 0x591   : > { %v2095_v39 = vadd.f32 1.0, %v3728_v1  ;;  %v6231_v1 = vld [vmem:[#allocation126_spill] sm:$0xff] }
 0x593   : > { %3731 = vrcp.f32 %v2095_v39  ;;  %v6232_v39 = vld [vmem:[#allocation127_spill] sm:$0xff] }
 0x599   : > { %v3730_v19 = vpop.eup %3729 }
 0x59d   : > { %v3732_v0 = vpop.eup %3731 }
 0x59e   : > { %v2103_v18 = vmul.f32 %v3732_v0, %v3730_v19  ;;  %v6233_v19 = vld [vmem:[#allocation128_spill] sm:$0xff]  ;;  %v6234_v0 = vld [vmem:[#allocation129_spill] sm:$0xff] }
 0x5a0   : > { %2105 = vst [vmem:[#allocation2] sm:$0xf] %v2103_v18  ;;  %3573 = vst [vmem:[%s3322_s7 + $0xc] sm:$0xf] %v2103_v18  ;;  %v6235_v18 = vld [vmem:[#allocation130_spill] sm:$0xff]  ;;  %s3350_s7 = scalar_lea.vmem %s3970_s18, %s3595_s8 [#allocation5] }
 0x5a7   : > { %v3576_v9 = vld.sshfl [vmem:[#allocation2] sm:$0x33 pattern:$0x76325410] }
 0x5a8   : > { %v2125_v57 = vcombine.high %v3576_v9, %v3576_v9  ;;  %v5005_v63 = vpack.c.bf16 %v3576_v9, %v3576_v9  ;;  %v6236_v9 = vld [vmem:[#allocation131_spill] sm:$0xff] }
 0x5aa   : > { %v2129_v48 = vpack.c.bf16 %v2125_v57, %v2125_v57  ;;  %v6237_v57 = vld [vmem:[#allocation132_spill] sm:$0xff] }
 0x5ac   : > { %2162 = vmatprep.mubr.bf16.mxu0 %v2129_v48  ;;  %2203 = vmatprep.mubr.bf16.mxu1 %v2129_v48 }
 0x5ad   : > { %2163 = vmatmul.mubr.bf16.vlgmr.msra.gmra.mrb[32].mxu0 %v5005_v63  ;;  %2204 = vmatmul.mubr.bf16.vlgmr.msra.gmra.mrb[32].mxu1 %v5005_v63 }
 0x5ae   : > { %2213 = vmatpush1.bf16.msra.mxu0 %v5966_v42  ;;  %2254 = vmatpush1.bf16.msra.mxu1 %v5967_v58 }
 0x5af   : > { %2244 = vmatprep.mubr.bf16.mxu0 %v2129_v48  ;;  %2285 = vmatprep.mubr.bf16.mxu1 %v2129_v48  ;;  %v6238_v48 = vld [vmem:[#allocation133_spill] sm:$0xff] }
 0x5b0   : > { %2214 = vmatprep.subr.bf16.mxu0 %v5968_v12  ;;  %2255 = vmatprep.subr.bf16.mxu1 %v5969_v41 }
 0x5b2   : > { %2215 = vmatpush1.bf16.msra.mxu0 %v5970_v40  ;;  %2256 = vmatpush1.bf16.msra.mxu1 %v5971_v47 }
 0x5b3   : > { %2216 = vmatprep.subr.bf16.mxu0 %v5972_v55  ;;  %2257 = vmatprep.subr.bf16.mxu1 %v6050_v53 }
 0x5b6   : > { %2217 = vmatpush1.bf16.msra.mxu0 %v6051_v23  ;;  %2258 = vmatpush1.bf16.msra.mxu1 %v6052_v60 }
 0x5b7   : > { %2218 = vmatprep.subr.bf16.mxu0 %v6053_v62  ;;  %2259 = vmatprep.subr.bf16.mxu1 %v6054_v4 }
 0x5ba   : > { %2219 = vmatpush1.bf16.msra.mxu0 %v6055_v5  ;;  %2260 = vmatpush1.bf16.msra.mxu1 %v6056_v59 }
 0x5bb   : > { %2220 = vmatprep.subr.bf16.mxu0 %v6057_v15  ;;  %2261 = vmatprep.subr.bf16.mxu1 %v6135_v21 }
 0x5be   : > { %2221 = vmatpush1.bf16.msra.mxu0 %v6136_v14  ;;  %2262 = vmatpush1.bf16.msra.mxu1 %v6137_v20 }
 0x5bf   : > { %2222 = vmatprep.subr.bf16.mxu0 %v6138_v22  ;;  %2263 = vmatprep.subr.bf16.mxu1 %v6139_v31 }
 0x5c2   : > { %2223 = vmatpush1.bf16.msra.mxu0 %v6140_v35  ;;  %2264 = vmatpush1.bf16.msra.mxu1 %v6141_v26 }
 0x5c3   : > { %2224 = vmatprep.subr.bf16.mxu0 %v6142_v36  ;;  %2265 = vmatprep.subr.bf16.mxu1 %v6143_v43 }
 0x5c6   : > { %2225 = vmatpush1.bf16.msra.mxu0 %v6144_v37  ;;  %2266 = vmatpush1.bf16.msra.mxu1 %v6145_v27 }
 0x5c7   : > { %2226 = vmatprep.subr.bf16.mxu0 %v6069_v7  ;;  %2267 = vmatprep.subr.bf16.mxu1 %v6070_v16 }
 0x5ca   : > { %2227 = vmatpush1.bf16.msra.mxu0 %v6071_v13  ;;  %2268 = vmatpush1.bf16.msra.mxu1 %v6146_v25 }
 0x5cb   : > { %2228 = vmatprep.subr.bf16.mxu0 %v6073_v17  ;;  %2269 = vmatprep.subr.bf16.mxu1 %v6074_v24 }
 0x5ce   : > { %2229 = vmatpush1.bf16.msra.mxu0 %v6075_v54  ;;  %2270 = vmatpush1.bf16.msra.mxu1 %v6076_v3 }
 0x5cf   : > { %2230 = vmatprep.subr.bf16.mxu0 %v6077_v52  ;;  %2271 = vmatprep.subr.bf16.mxu1 %v6078_v51 }
 0x5d2   : > { %2231 = vmatpush1.bf16.msra.mxu0 %v6079_v46  ;;  %2272 = vmatpush1.bf16.msra.mxu1 %v6003_v29 }
 0x5d3   : > { %2232 = vmatprep.subr.bf16.mxu0 %v6004_v28  ;;  %2273 = vmatprep.subr.bf16.mxu1 %v6005_v2 }
 0x5d6   : > { %2233 = vmatpush1.bf16.msra.mxu0 %v6080_v61  ;;  %2274 = vmatpush1.bf16.msra.mxu1 %v6007_v34 }
 0x5d7   : > { %2234 = vmatprep.subr.bf16.mxu0 %v6008_v10  ;;  %2275 = vmatprep.subr.bf16.mxu1 %v6220_v49 }
 0x5da   : > { %2235 = vmatpush1.bf16.msra.mxu0 %v6221_v30  ;;  %2276 = vmatpush1.bf16.msra.mxu1 %v6222_v33 }
 0x5db   : > { %2236 = vmatprep.subr.bf16.mxu0 %v6223_v6  ;;  %2277 = vmatprep.subr.bf16.mxu1 %v6224_v50 }
 0x5de   : > { %2237 = vmatpush1.bf16.msra.mxu0 %v6225_v45  ;;  %2278 = vmatpush1.bf16.msra.mxu1 %v6226_v11 }
 0x5df   : > { %2238 = vmatprep.subr.bf16.mxu0 %v6227_v8  ;;  %2279 = vmatprep.subr.bf16.mxu1 %v6228_v44  ;;  %v6239_v44 = vld [vmem:[#allocation6_spill] sm:$0xff] }
 0x5e2   : > { %2239 = vmatpush1.bf16.msra.mxu0 %v6229_v32  ;;  %2280 = vmatpush1.bf16.msra.mxu1 %v6230_v38  ;;  %v6240_v32 = vld [vmem:[#allocation8_spill] sm:$0xff] }
 0x5e3   : > { %2240 = vmatprep.subr.bf16.mxu0 %v6231_v1  ;;  %2281 = vmatprep.subr.bf16.mxu1 %v6232_v39  ;;  %v6241_v39 = vld [vmem:[#allocation7_spill] sm:$0xff]  ;;  %v6250_v1 = vld [vmem:[#allocation17_spill] sm:$0xff] }
 0x5e6   : > { %2241 = vmatpush1.bf16.msra.mxu0 %v6233_v19  ;;  %2282 = vmatpush1.bf16.msra.mxu1 %v6234_v0  ;;  %v6242_v19 = vld [vmem:[#allocation9_spill] sm:$0xff]  ;;  %v6243_v0 = vld [vmem:[#allocation10_spill] sm:$0xff] }
 0x5e7   : > { %2242 = vmatprep.subr.bf16.mxu0 %v6235_v18  ;;  %2283 = vmatprep.subr.bf16.mxu1 %v6236_v9  ;;  %v6244_v18 = vld [vmem:[#allocation11_spill] sm:$0xff]  ;;  %v6245_v9 = vld [vmem:[#allocation12_spill] sm:$0xff] }
 0x5ea   : > { %2243 = vmatpush1.bf16.msra.mxu0 %v6237_v57  ;;  %2284 = vmatpush1.bf16.msra.mxu1 %v6238_v48  ;;  %v6246_v57 = vld [vmem:[#allocation13_spill] sm:$0xff]  ;;  %v6247_v48 = vld [vmem:[#allocation14_spill] sm:$0xff] }
 0x5eb   : > { %2398 = vmatprep.subr.bf16.mxu0 %v6239_v44  ;;  %2439 = vmatprep.subr.bf16.mxu1 %v6240_v32  ;;  %v6248_v44 = vld [vmem:[#allocation15_spill] sm:$0xff]  ;;  %v6249_v32 = vld [vmem:[#allocation16_spill] sm:$0xff] }
 0x5ed   : > { %2245 = vmatmul.mubr.bf16.vlgmr.msra.gmra.mrb[36].mxu0 %v5005_v63  ;;  %2286 = vmatmul.mubr.bf16.vlgmr.msra.gmra.mrb[36].mxu1 %v5005_v63  ;;  %v6251_v63 = vld [vmem:[#allocation18_spill] sm:$0xff] }
 0x5ee   : > { %2399 = vmatpush1.bf16.msra.mxu0 %v6241_v39  ;;  %2440 = vmatpush1.bf16.msra.mxu1 %v6242_v19  ;;  %v6252_v39 = vld [vmem:[#allocation19_spill] sm:$0xff]  ;;  %v6253_v19 = vld [vmem:[#allocation20_spill] sm:$0xff] }
 0x5ef   : > { %2400 = vmatprep.subr.bf16.mxu0 %v6243_v0  ;;  %2441 = vmatprep.subr.bf16.mxu1 %v6244_v18  ;;  %v6254_v0 = vld [vmem:[#allocation21_spill] sm:$0xff]  ;;  %v6255_v18 = vld [vmem:[#allocation22_spill] sm:$0xff] }
 0x5f2   : > { %2401 = vmatpush1.bf16.msra.mxu0 %v6245_v9  ;;  %2442 = vmatpush1.bf16.msra.mxu1 %v6246_v57  ;;  %v6256_v9 = vld [vmem:[#allocation23_spill] sm:$0xff]  ;;  %v6257_v57 = vld [vmem:[#allocation24_spill] sm:$0xff] }
 0x5f3   : > { %2402 = vmatprep.subr.bf16.mxu0 %v6247_v48  ;;  %2443 = vmatprep.subr.bf16.mxu1 %v6248_v44  ;;  %v6258_v48 = vld [vmem:[#allocation25_spill] sm:$0xff]  ;;  %v6259_v44 = vld [vmem:[#allocation26_spill] sm:$0xff] }
 0x5f6   : > { %2403 = vmatpush1.bf16.msra.mxu0 %v6249_v32  ;;  %2444 = vmatpush1.bf16.msra.mxu1 %v6250_v1  ;;  %v6260_v32 = vld [vmem:[#allocation27_spill] sm:$0xff]  ;;  %v6261_v1 = vld [vmem:[#allocation28_spill] sm:$0xff] }
 0x5f7   : > { %2404 = vmatprep.subr.bf16.mxu0 %v6251_v63  ;;  %2445 = vmatprep.subr.bf16.mxu1 %v6252_v39  ;;  %v6262_v63 = vld [vmem:[#allocation29_spill] sm:$0xff]  ;;  %v6263_v39 = vld [vmem:[#allocation30_spill] sm:$0xff] }
 0x5fa   : > { %2405 = vmatpush1.bf16.msra.mxu0 %v6253_v19  ;;  %2446 = vmatpush1.bf16.msra.mxu1 %v6254_v0  ;;  %v6264_v19 = vld [vmem:[#allocation31_spill] sm:$0xff]  ;;  %v6265_v0 = vld [vmem:[#allocation32_spill] sm:$0xff] }
 0x5fb   : > { %2406 = vmatprep.subr.bf16.mxu0 %v6255_v18  ;;  %2447 = vmatprep.subr.bf16.mxu1 %v6256_v9  ;;  %v6266_v18 = vld [vmem:[#allocation33_spill] sm:$0xff]  ;;  %v6267_v9 = vld [vmem:[#allocation34_spill] sm:$0xff] }
 0x5fe   : > { %2407 = vmatpush1.bf16.msra.mxu0 %v6257_v57  ;;  %2448 = vmatpush1.bf16.msra.mxu1 %v6258_v48  ;;  %v6268_v57 = vld [vmem:[#allocation35_spill] sm:$0xff]  ;;  %v6269_v48 = vld [vmem:[#allocation36_spill] sm:$0xff] }
 0x5ff   : > { %2408 = vmatprep.subr.bf16.mxu0 %v6259_v44  ;;  %2449 = vmatprep.subr.bf16.mxu1 %v6260_v32  ;;  %v6270_v44 = vld [vmem:[#allocation37_spill] sm:$0xff]  ;;  %v6271_v32 = vld [vmem:[#allocation38_spill] sm:$0xff] }
 0x602   : > { %2409 = vmatpush1.bf16.msra.mxu0 %v6261_v1  ;;  %2450 = vmatpush1.bf16.msra.mxu1 %v6262_v63  ;;  %v6272_v1 = vld [vmem:[#allocation39_spill] sm:$0xff]  ;;  %v6273_v63 = vld [vmem:[#allocation40_spill] sm:$0xff] }
 0x603   : > { %2410 = vmatprep.subr.bf16.mxu0 %v6263_v39  ;;  %2451 = vmatprep.subr.bf16.mxu1 %v6264_v19  ;;  %v6274_v39 = vld [vmem:[#allocation41_spill] sm:$0xff]  ;;  %v6275_v19 = vld [vmem:[#allocation42_spill] sm:$0xff] }
 0x606   : > { %2411 = vmatpush1.bf16.msra.mxu0 %v6265_v0  ;;  %2452 = vmatpush1.bf16.msra.mxu1 %v6266_v18  ;;  %v6276_v0 = vld [vmem:[#allocation43_spill] sm:$0xff]  ;;  %v6277_v18 = vld [vmem:[#allocation44_spill] sm:$0xff] }
 0x607   : > { %2412 = vmatprep.subr.bf16.mxu0 %v6267_v9  ;;  %2453 = vmatprep.subr.bf16.mxu1 %v6268_v57  ;;  %v6278_v9 = vld [vmem:[#allocation45_spill] sm:$0xff]  ;;  %v6279_v57 = vld [vmem:[#allocation46_spill] sm:$0xff] }
 0x60a   : > { %2413 = vmatpush1.bf16.msra.mxu0 %v6269_v48  ;;  %2454 = vmatpush1.bf16.msra.mxu1 %v6270_v44  ;;  %v6280_v48 = vld [vmem:[#allocation47_spill] sm:$0xff]  ;;  %v6281_v44 = vld [vmem:[#allocation48_spill] sm:$0xff] }
 0x60b   : > { %2414 = vmatprep.subr.bf16.mxu0 %v6271_v32  ;;  %2455 = vmatprep.subr.bf16.mxu1 %v6272_v1  ;;  %v6282_v32 = vld [vmem:[#allocation49_spill] sm:$0xff]  ;;  %v6283_v1 = vld [vmem:[#allocation50_spill] sm:$0xff] }
 0x60e   : > { %2415 = vmatpush1.bf16.msra.mxu0 %v6273_v63  ;;  %2456 = vmatpush1.bf16.msra.mxu1 %v6274_v39  ;;  %v6284_v63 = vld [vmem:[#allocation51_spill] sm:$0xff]  ;;  %v6285_v39 = vld [vmem:[#allocation52_spill] sm:$0xff] }
 0x60f   : > { %2416 = vmatprep.subr.bf16.mxu0 %v6275_v19  ;;  %2457 = vmatprep.subr.bf16.mxu1 %v6276_v0  ;;  %v6286_v19 = vld [vmem:[#allocation53_spill] sm:$0xff]  ;;  %v6287_v0 = vld [vmem:[#allocation54_spill] sm:$0xff] }
 0x612   : > { %2417 = vmatpush1.bf16.msra.mxu0 %v6277_v18  ;;  %2458 = vmatpush1.bf16.msra.mxu1 %v6278_v9  ;;  %v6288_v18 = vld [vmem:[#allocation55_spill] sm:$0xff]  ;;  %v6289_v9 = vld [vmem:[#allocation56_spill] sm:$0xff] }
 0x613   : > { %2418 = vmatprep.subr.bf16.mxu0 %v6279_v57  ;;  %2459 = vmatprep.subr.bf16.mxu1 %v6280_v48  ;;  %v6290_v57 = vld [vmem:[#allocation57_spill] sm:$0xff]  ;;  %v6291_v48 = vld [vmem:[#allocation58_spill] sm:$0xff] }
 0x616   : > { %2419 = vmatpush1.bf16.msra.mxu0 %v6281_v44  ;;  %2460 = vmatpush1.bf16.msra.mxu1 %v6282_v32  ;;  %v6292_v44 = vld [vmem:[#allocation59_spill] sm:$0xff]  ;;  %v6293_v32 = vld [vmem:[#allocation60_spill] sm:$0xff] }
 0x617   : > { %2420 = vmatprep.subr.bf16.mxu0 %v6283_v1  ;;  %2461 = vmatprep.subr.bf16.mxu1 %v6284_v63  ;;  %v6294_v1 = vld [vmem:[#allocation61_spill] sm:$0xff]  ;;  %v6295_v63 = vld [vmem:[#allocation62_spill] sm:$0xff] }
 0x61a   : > { %2421 = vmatpush1.bf16.msra.mxu0 %v6285_v39  ;;  %2462 = vmatpush1.bf16.msra.mxu1 %v6286_v19  ;;  %v6296_v39 = vld [vmem:[#allocation63_spill] sm:$0xff]  ;;  %v6297_v19 = vld [vmem:[#allocation64_spill] sm:$0xff] }
 0x61b   : > { %2422 = vmatprep.subr.bf16.mxu0 %v6287_v0  ;;  %2463 = vmatprep.subr.bf16.mxu1 %v6288_v18  ;;  %v6298_v0 = vld [vmem:[#allocation65_spill] sm:$0xff]  ;;  %v6299_v18 = vld [vmem:[#allocation66_spill] sm:$0xff] }
 0x61e   : > { %2423 = vmatpush1.bf16.msra.mxu0 %v6289_v9  ;;  %2464 = vmatpush1.bf16.msra.mxu1 %v6290_v57  ;;  %v6300_v9 = vld [vmem:[#allocation67_spill] sm:$0xff]  ;;  %v6301_v57 = vld [vmem:[#allocation68_spill] sm:$0xff] }
 0x61f   : > { %2424 = vmatprep.subr.bf16.mxu0 %v6291_v48  ;;  %2465 = vmatprep.subr.bf16.mxu1 %v6292_v44  ;;  %v6302_v48 = vld [vmem:[#allocation69_spill] sm:$0xff]  ;;  %v6303_v44 = vld [vmem:[#allocation70_spill] sm:$0xff] }
 0x622   : > { %2425 = vmatpush1.bf16.msra.mxu0 %v6293_v32  ;;  %2466 = vmatpush1.bf16.msra.mxu1 %v6294_v1  ;;  %v6304_v1 = vld [vmem:[#allocation71_spill] sm:$0xff] }
 0x623   : > { %2426 = vmatprep.subr.bf16.mxu0 %v6295_v63  ;;  %2467 = vmatprep.subr.bf16.mxu1 %v6296_v39 }
 0x626   : > { %2427 = vmatpush1.bf16.msra.mxu0 %v6297_v19  ;;  %2468 = vmatpush1.bf16.msra.mxu1 %v6298_v0 }
 0x627   : > { %2428 = vmatprep.subr.bf16.mxu0 %v6299_v18  ;;  %2469 = vmatprep.subr.bf16.mxu1 %v6300_v9 }
 0x62a   : > { %2429 = vmatpush1.bf16.msra.mxu0 %v6301_v57  ;;  %2470 = vmatpush1.bf16.msra.mxu1 %v6302_v48 }
 0x62b   : > { %2480 = vmatprep.subr.bf16.mxu0 %v6303_v44  ;;  %2521 = vmatprep.subr.bf16.mxu1 %v6304_v1  ;;  %v2114_v1 = vld [vmem:[%s2113_s20] sm:$0xff] }
 0x680   : > { %v2164_v39 = vpop.f32.mrb[32].mxu0  ;;  %v2205_v63 = vpop.f32.mrb[32].mxu1 }
 0x681   : > { %v2166_v19 = vpop.f32.mrb[33].mxu0  ;;  %v2207_v32 = vpop.f32.mrb[33].mxu1 }
 0x682   : > { %v2302_v0 = vcombine.low %v2164_v39, %v2166_v19  ;;  %v2303_v38 = vcombine.low %v2205_v63, %v2207_v32  ;;  %v2168_v18 = vpop.f32.mrb[34].mxu0  ;;  %v2209_v8 = vpop.f32.mrb[34].mxu1 }
 0x683   : > { %v2169_v9 = vpop.f32.mrb[35].mxu0  ;;  %v2210_v11 = vpop.f32.mrb[35].mxu1 }
 0x684   : > { %v2310_v57 = vrot.slane %v2302_v0, %v4569_v56  ;;  %v2317_v48 = vrot.slane %v2303_v38, %v4569_v56 }
 0x686   : > { %v2318_v45 = vcombine.low %v2310_v57, %v2317_v48 }
 0x688   : > { %v2338_v44 = vadd.f32 %v2318_v45, %v2114_v1 }
 0x68a   : > { %v2347_v50 = vrot.slane %v2338_v44, 4  ;;  %v2340_v33 = vsub.f32 0.0, %v2338_v44  ;;  %v2115_v44 = vld [vmem:[%s2113_s20 + $0x8] sm:$0xff]  ;;  %s3189_s20 = smul.u32 (%p3926_p6), %s3835_s11, %s3188_s9 }
 0x68c   : > { %v2349_v6 = vsub.f32 0.0, %v2347_v50  ;;  %v2341_v32 = vmul.f32 1.442695, %v2340_v33  ;;  %s3192_s3 = sadd.s32 (%p3926_p6), %s3191_s21, %s3189_s20 }
 0x68d   : > { %s3610_s23 = sshll.u32 (%p3926_p6), %s3192_s3, 5 }
 0x68e   : > { %v2350_v39 = vmul.f32 1.442695, %v2349_v6 }
 0x690   : > { %3733 = vpow2.f32 %v2350_v39 }
 0x691   : > { %3735 = vpow2.f32 %v2341_v32 }
 0x69a   : > { %v3734_v19 = vpop.eup %3733 }
 0x69b   : > { %v3736_v38 = vpop.eup %3735  ;;  %v2352_v45 = vadd.f32 1.0, %v3734_v19 }
 0x69c   : > { %v2343_v33 = vadd.f32 1.0, %v3736_v38 }
 0x69d   : > { %3737 = vrcp.f32 %v2352_v45 }
 0x69e   : > { %3739 = vrcp.f32 %v2343_v33 }
 0x6c0   : > { %v2246_v8 = vpop.f32.mrb[36].mxu0  ;;  %v2287_v11 = vpop.f32.mrb[36].mxu1 }
 0x6c1   : > { %v2248_v0 = vpop.f32.mrb[37].mxu0  ;;  %v2289_v18 = vpop.f32.mrb[37].mxu1 }
 0x6c2   : > { %v2319_v9 = vcombine.low %v2246_v8, %v2248_v0  ;;  %v2320_v57 = vcombine.low %v2287_v11, %v2289_v18  ;;  %v2250_v48 = vpop.f32.mrb[38].mxu0  ;;  %v2291_v63 = vpop.f32.mrb[38].mxu1  ;;  %v2365_v0 = vld [vmem:[#allocation3] sm:$0xf] }
 0x6c3   : > { %v2251_v30 = vpop.f32.mrb[39].mxu0  ;;  %v2292_v49 = vpop.f32.mrb[39].mxu1 }
 0x6c4   : > { %v2327_v50 = vrot.slane %v2319_v9, %v4569_v56  ;;  %v2334_v6 = vrot.slane %v2320_v57, %v4569_v56  ;;  %v3738_v30 = vpop.eup %3737 }
 0x6c5   : > { %v3740_v49 = vpop.eup %3739  ;;  %v2366_v18 = vmul.f32 %v3738_v30, %v2365_v0  ;;  %v6309_v30 = vld [vmem:[#allocation119_spill] sm:$0xff]  ;;  %v6312_v0 = vld [vmem:[#allocation122_spill] sm:$0xff] }
 0x6c6   : > { %v2335_v1 = vcombine.low %v2327_v50, %v2334_v6 }
 0x6c8   : > { %v2339_v39 = vadd.f32 %v2335_v1, %v2115_v44 }
 0x6ca   : > { %3741 = vtanh.f32 %v2339_v39  ;;  %v2357_v32 = vrot.slane %v2339_v39, 4  ;;  %v6305_v39 = vld [vmem:[#allocation115_spill] sm:$0xff] }
 0x6cc   : > { %v2359_v8 = vsub.f32 0.0, %v2357_v32  ;;  %v6306_v32 = vld [vmem:[#allocation116_spill] sm:$0xff] }
 0x6ce   : > { %v2360_v11 = vmul.f32 1.442695, %v2359_v8  ;;  %v6307_v8 = vld [vmem:[#allocation117_spill] sm:$0xff] }
 0x6d0   : > { %3743 = vpow2.f32 %v2360_v11  ;;  %v6308_v11 = vld [vmem:[#allocation118_spill] sm:$0xff] }
 0x6d4   : > { %v3742_v19 = vpop.eup %3741 }
 0x6d5   : > { %v2367_v9 = vmul.f32 %v3742_v19, %v3740_v49  ;;  %v6310_v49 = vld [vmem:[#allocation120_spill] sm:$0xff]  ;;  %v6311_v19 = vld [vmem:[#allocation121_spill] sm:$0xff] }
 0x6d7   : > { %v2368_v57 = vadd.f32 %v2367_v9, %v2366_v18  ;;  %v6313_v18 = vld [vmem:[#allocation123_spill] sm:$0xff]  ;;  %v6314_v9 = vld [vmem:[#allocation124_spill] sm:$0xff] }
 0x6d9   : > { %2371 = vst [vmem:[#allocation3] sm:$0xf] %v2368_v57  ;;  %3745 = vtanh.f32 %v2368_v57  ;;  %v6315_v57 = vld [vmem:[#allocation125_spill] sm:$0xff] }
 0x6da   : > { %v3744_v38 = vpop.eup %3743 }
 0x6db   : > { %v2362_v48 = vadd.f32 1.0, %v3744_v38  ;;  %v6316_v38 = vld [vmem:[#allocation126_spill] sm:$0xff] }
 0x6dd   : > { %3747 = vrcp.f32 %v2362_v48  ;;  %v6317_v48 = vld [vmem:[#allocation127_spill] sm:$0xff] }
 0x6e3   : > { %v3746_v63 = vpop.eup %3745 }
 0x6e7   : > { %v3748_v45 = vpop.eup %3747 }
 0x6e8   : > { %v2370_v50 = vmul.f32 %v3748_v45, %v3746_v63  ;;  %v6318_v63 = vld [vmem:[#allocation128_spill] sm:$0xff]  ;;  %v6319_v45 = vld [vmem:[#allocation129_spill] sm:$0xff] }
 0x6ea   : > { %2376 = vst [vmem:[%s2375_s22] sm:$0xf] %v2370_v50  ;;  %2372 = vst [vmem:[#allocation2] sm:$0xf] %v2370_v50  ;;  %v6320_v50 = vld [vmem:[#allocation130_spill] sm:$0xff]  ;;  %s3599_s22 = sshll.u32 (%p3926_p6), %s3839_s12, 1 }
 0x6f1   : > { %v3582_v6 = vld.sshfl [vmem:[#allocation2] sm:$0x33 pattern:$0x76325410] }
 0x6f2   : > { %v2393_v33 = vcombine.high %v3582_v6, %v3582_v6  ;;  %v5150_v1 = vpack.c.bf16 %v3582_v6, %v3582_v6  ;;  %v6321_v6 = vld [vmem:[#allocation131_spill] sm:$0xff] }
 0x6f4   : > { %v2397_v44 = vpack.c.bf16 %v2393_v33, %v2393_v33  ;;  %v6322_v33 = vld [vmem:[#allocation132_spill] sm:$0xff] }
 0x6f6   : > { %2430 = vmatprep.mubr.bf16.mxu0 %v2397_v44  ;;  %2471 = vmatprep.mubr.bf16.mxu1 %v2397_v44 }
 0x6f7   : > { %2431 = vmatmul.mubr.bf16.vlgmr.msra.gmra.mrb[40].mxu0 %v5150_v1  ;;  %2472 = vmatmul.mubr.bf16.vlgmr.msra.gmra.mrb[40].mxu1 %v5150_v1 }
 0x6f8   : > { %2481 = vmatpush1.bf16.msra.mxu0 %v5966_v42  ;;  %2522 = vmatpush1.bf16.msra.mxu1 %v5967_v58 }
 0x6f9   : > { %2512 = vmatprep.mubr.bf16.mxu0 %v2397_v44  ;;  %2553 = vmatprep.mubr.bf16.mxu1 %v2397_v44  ;;  %v6323_v44 = vld [vmem:[#allocation133_spill] sm:$0xff] }
 0x6fa   : > { %2482 = vmatprep.subr.bf16.mxu0 %v5968_v12  ;;  %2523 = vmatprep.subr.bf16.mxu1 %v5969_v41 }
 0x6fc   : > { %2483 = vmatpush1.bf16.msra.mxu0 %v5970_v40  ;;  %2524 = vmatpush1.bf16.msra.mxu1 %v5971_v47 }
 0x6fd   : > { %2484 = vmatprep.subr.bf16.mxu0 %v5972_v55  ;;  %2525 = vmatprep.subr.bf16.mxu1 %v6050_v53 }
 0x700   : > { %2485 = vmatpush1.bf16.msra.mxu0 %v6051_v23  ;;  %2526 = vmatpush1.bf16.msra.mxu1 %v6052_v60 }
 0x701   : > { %2486 = vmatprep.subr.bf16.mxu0 %v6053_v62  ;;  %2527 = vmatprep.subr.bf16.mxu1 %v6054_v4 }
 0x704   : > { %2487 = vmatpush1.bf16.msra.mxu0 %v6055_v5  ;;  %2528 = vmatpush1.bf16.msra.mxu1 %v6056_v59 }
 0x705   : > { %2488 = vmatprep.subr.bf16.mxu0 %v6057_v15  ;;  %2529 = vmatprep.subr.bf16.mxu1 %v6135_v21 }
 0x708   : > { %2489 = vmatpush1.bf16.msra.mxu0 %v6136_v14  ;;  %2530 = vmatpush1.bf16.msra.mxu1 %v6137_v20 }
 0x709   : > { %2490 = vmatprep.subr.bf16.mxu0 %v6138_v22  ;;  %2531 = vmatprep.subr.bf16.mxu1 %v6139_v31 }
 0x70c   : > { %2491 = vmatpush1.bf16.msra.mxu0 %v6140_v35  ;;  %2532 = vmatpush1.bf16.msra.mxu1 %v6141_v26 }
 0x70d   : > { %2492 = vmatprep.subr.bf16.mxu0 %v6142_v36  ;;  %2533 = vmatprep.subr.bf16.mxu1 %v6143_v43 }
 0x710   : > { %2493 = vmatpush1.bf16.msra.mxu0 %v6144_v37  ;;  %2534 = vmatpush1.bf16.msra.mxu1 %v6145_v27 }
 0x711   : > { %2494 = vmatprep.subr.bf16.mxu0 %v6069_v7  ;;  %2535 = vmatprep.subr.bf16.mxu1 %v6070_v16 }
 0x714   : > { %2495 = vmatpush1.bf16.msra.mxu0 %v6071_v13  ;;  %2536 = vmatpush1.bf16.msra.mxu1 %v6146_v25 }
 0x715   : > { %2496 = vmatprep.subr.bf16.mxu0 %v6073_v17  ;;  %2537 = vmatprep.subr.bf16.mxu1 %v6074_v24 }
 0x718   : > { %2497 = vmatpush1.bf16.msra.mxu0 %v6075_v54  ;;  %2538 = vmatpush1.bf16.msra.mxu1 %v6076_v3 }
 0x719   : > { %2498 = vmatprep.subr.bf16.mxu0 %v6077_v52  ;;  %2539 = vmatprep.subr.bf16.mxu1 %v6078_v51 }
 0x71c   : > { %2499 = vmatpush1.bf16.msra.mxu0 %v6079_v46  ;;  %2540 = vmatpush1.bf16.msra.mxu1 %v6003_v29 }
 0x71d   : > { %2500 = vmatprep.subr.bf16.mxu0 %v6004_v28  ;;  %2541 = vmatprep.subr.bf16.mxu1 %v6005_v2 }
 0x720   : > { %2501 = vmatpush1.bf16.msra.mxu0 %v6080_v61  ;;  %2542 = vmatpush1.bf16.msra.mxu1 %v6007_v34 }
 0x721   : > { %2502 = vmatprep.subr.bf16.mxu0 %v6008_v10  ;;  %2543 = vmatprep.subr.bf16.mxu1 %v6305_v39 }
 0x724   : > { %2503 = vmatpush1.bf16.msra.mxu0 %v6306_v32  ;;  %2544 = vmatpush1.bf16.msra.mxu1 %v6307_v8 }
 0x725   : > { %2504 = vmatprep.subr.bf16.mxu0 %v6308_v11  ;;  %2545 = vmatprep.subr.bf16.mxu1 %v6309_v30 }
 0x728   : > { %2505 = vmatpush1.bf16.msra.mxu0 %v6310_v49  ;;  %2546 = vmatpush1.bf16.msra.mxu1 %v6311_v19 }
 0x729   : > { %2506 = vmatprep.subr.bf16.mxu0 %v6312_v0  ;;  %2547 = vmatprep.subr.bf16.mxu1 %v6313_v18  ;;  %v6324_v18 = vld [vmem:[#allocation6_spill] sm:$0xff] }
 0x72c   : > { %2507 = vmatpush1.bf16.msra.mxu0 %v6314_v9  ;;  %2548 = vmatpush1.bf16.msra.mxu1 %v6315_v57  ;;  %v6325_v9 = vld [vmem:[#allocation8_spill] sm:$0xff] }
 0x72d   : > { %2508 = vmatprep.subr.bf16.mxu0 %v6316_v38  ;;  %2549 = vmatprep.subr.bf16.mxu1 %v6317_v48  ;;  %v6326_v48 = vld [vmem:[#allocation7_spill] sm:$0xff]  ;;  %v6335_v38 = vld [vmem:[#allocation17_spill] sm:$0xff] }
 0x730   : > { %2509 = vmatpush1.bf16.msra.mxu0 %v6318_v63  ;;  %2550 = vmatpush1.bf16.msra.mxu1 %v6319_v45  ;;  %v6327_v63 = vld [vmem:[#allocation9_spill] sm:$0xff]  ;;  %v6328_v45 = vld [vmem:[#allocation10_spill] sm:$0xff] }
 0x731   : > { %2510 = vmatprep.subr.bf16.mxu0 %v6320_v50  ;;  %2551 = vmatprep.subr.bf16.mxu1 %v6321_v6  ;;  %v6329_v50 = vld [vmem:[#allocation11_spill] sm:$0xff]  ;;  %v6330_v6 = vld [vmem:[#allocation12_spill] sm:$0xff] }
 0x734   : > { %2511 = vmatpush1.bf16.msra.mxu0 %v6322_v33  ;;  %2552 = vmatpush1.bf16.msra.mxu1 %v6323_v44  ;;  %v6331_v33 = vld [vmem:[#allocation13_spill] sm:$0xff]  ;;  %v6332_v44 = vld [vmem:[#allocation14_spill] sm:$0xff] }
 0x735   : > { %2666 = vmatprep.subr.bf16.mxu0 %v6324_v18  ;;  %2707 = vmatprep.subr.bf16.mxu1 %v6325_v9  ;;  %v6333_v18 = vld [vmem:[#allocation15_spill] sm:$0xff]  ;;  %v6334_v9 = vld [vmem:[#allocation16_spill] sm:$0xff] }
 0x737   : > { %2513 = vmatmul.mubr.bf16.vlgmr.msra.gmra.mrb[44].mxu0 %v5150_v1  ;;  %2554 = vmatmul.mubr.bf16.vlgmr.msra.gmra.mrb[44].mxu1 %v5150_v1  ;;  %v6336_v1 = vld [vmem:[#allocation18_spill] sm:$0xff] }
 0x738   : > { %2667 = vmatpush1.bf16.msra.mxu0 %v6326_v48  ;;  %2708 = vmatpush1.bf16.msra.mxu1 %v6327_v63  ;;  %v6337_v48 = vld [vmem:[#allocation19_spill] sm:$0xff]  ;;  %v6338_v63 = vld [vmem:[#allocation20_spill] sm:$0xff] }
 0x739   : > { %2668 = vmatprep.subr.bf16.mxu0 %v6328_v45  ;;  %2709 = vmatprep.subr.bf16.mxu1 %v6329_v50  ;;  %v6339_v45 = vld [vmem:[#allocation21_spill] sm:$0xff]  ;;  %v6340_v50 = vld [vmem:[#allocation22_spill] sm:$0xff] }
 0x73c   : > { %2669 = vmatpush1.bf16.msra.mxu0 %v6330_v6  ;;  %2710 = vmatpush1.bf16.msra.mxu1 %v6331_v33  ;;  %v6341_v6 = vld [vmem:[#allocation23_spill] sm:$0xff]  ;;  %v6342_v33 = vld [vmem:[#allocation24_spill] sm:$0xff] }
 0x73d   : > { %2670 = vmatprep.subr.bf16.mxu0 %v6332_v44  ;;  %2711 = vmatprep.subr.bf16.mxu1 %v6333_v18  ;;  %v6343_v44 = vld [vmem:[#allocation25_spill] sm:$0xff]  ;;  %v6344_v18 = vld [vmem:[#allocation26_spill] sm:$0xff] }
 0x740   : > { %2671 = vmatpush1.bf16.msra.mxu0 %v6334_v9  ;;  %2712 = vmatpush1.bf16.msra.mxu1 %v6335_v38  ;;  %v6345_v9 = vld [vmem:[#allocation27_spill] sm:$0xff]  ;;  %v6346_v38 = vld [vmem:[#allocation28_spill] sm:$0xff] }
 0x741   : > { %2672 = vmatprep.subr.bf16.mxu0 %v6336_v1  ;;  %2713 = vmatprep.subr.bf16.mxu1 %v6337_v48  ;;  %v6347_v1 = vld [vmem:[#allocation29_spill] sm:$0xff]  ;;  %v6348_v48 = vld [vmem:[#allocation30_spill] sm:$0xff] }
 0x744   : > { %2673 = vmatpush1.bf16.msra.mxu0 %v6338_v63  ;;  %2714 = vmatpush1.bf16.msra.mxu1 %v6339_v45  ;;  %v6349_v63 = vld [vmem:[#allocation31_spill] sm:$0xff]  ;;  %v6350_v45 = vld [vmem:[#allocation32_spill] sm:$0xff] }
 0x745   : > { %2674 = vmatprep.subr.bf16.mxu0 %v6340_v50  ;;  %2715 = vmatprep.subr.bf16.mxu1 %v6341_v6  ;;  %v6351_v50 = vld [vmem:[#allocation33_spill] sm:$0xff]  ;;  %v6352_v6 = vld [vmem:[#allocation34_spill] sm:$0xff] }
 0x748   : > { %2675 = vmatpush1.bf16.msra.mxu0 %v6342_v33  ;;  %2716 = vmatpush1.bf16.msra.mxu1 %v6343_v44  ;;  %v6353_v33 = vld [vmem:[#allocation35_spill] sm:$0xff]  ;;  %v6354_v44 = vld [vmem:[#allocation36_spill] sm:$0xff] }
 0x749   : > { %2676 = vmatprep.subr.bf16.mxu0 %v6344_v18  ;;  %2717 = vmatprep.subr.bf16.mxu1 %v6345_v9  ;;  %v6355_v18 = vld [vmem:[#allocation37_spill] sm:$0xff]  ;;  %v6356_v9 = vld [vmem:[#allocation38_spill] sm:$0xff] }
 0x74c   : > { %2677 = vmatpush1.bf16.msra.mxu0 %v6346_v38  ;;  %2718 = vmatpush1.bf16.msra.mxu1 %v6347_v1  ;;  %v6357_v38 = vld [vmem:[#allocation39_spill] sm:$0xff]  ;;  %v6358_v1 = vld [vmem:[#allocation40_spill] sm:$0xff] }
 0x74d   : > { %2678 = vmatprep.subr.bf16.mxu0 %v6348_v48  ;;  %2719 = vmatprep.subr.bf16.mxu1 %v6349_v63  ;;  %v6359_v48 = vld [vmem:[#allocation41_spill] sm:$0xff]  ;;  %v6360_v63 = vld [vmem:[#allocation42_spill] sm:$0xff] }
 0x750   : > { %2679 = vmatpush1.bf16.msra.mxu0 %v6350_v45  ;;  %2720 = vmatpush1.bf16.msra.mxu1 %v6351_v50  ;;  %v6361_v45 = vld [vmem:[#allocation43_spill] sm:$0xff]  ;;  %v6362_v50 = vld [vmem:[#allocation44_spill] sm:$0xff] }
 0x751   : > { %2680 = vmatprep.subr.bf16.mxu0 %v6352_v6  ;;  %2721 = vmatprep.subr.bf16.mxu1 %v6353_v33  ;;  %v6363_v6 = vld [vmem:[#allocation45_spill] sm:$0xff]  ;;  %v6364_v33 = vld [vmem:[#allocation46_spill] sm:$0xff] }
 0x754   : > { %2681 = vmatpush1.bf16.msra.mxu0 %v6354_v44  ;;  %2722 = vmatpush1.bf16.msra.mxu1 %v6355_v18  ;;  %v6365_v44 = vld [vmem:[#allocation47_spill] sm:$0xff]  ;;  %v6366_v18 = vld [vmem:[#allocation48_spill] sm:$0xff] }
 0x755   : > { %2682 = vmatprep.subr.bf16.mxu0 %v6356_v9  ;;  %2723 = vmatprep.subr.bf16.mxu1 %v6357_v38  ;;  %v6367_v9 = vld [vmem:[#allocation49_spill] sm:$0xff]  ;;  %v6368_v38 = vld [vmem:[#allocation50_spill] sm:$0xff] }
 0x758   : > { %2683 = vmatpush1.bf16.msra.mxu0 %v6358_v1  ;;  %2724 = vmatpush1.bf16.msra.mxu1 %v6359_v48  ;;  %v6369_v1 = vld [vmem:[#allocation51_spill] sm:$0xff]  ;;  %v6370_v48 = vld [vmem:[#allocation52_spill] sm:$0xff] }
 0x759   : > { %2684 = vmatprep.subr.bf16.mxu0 %v6360_v63  ;;  %2725 = vmatprep.subr.bf16.mxu1 %v6361_v45  ;;  %v6371_v63 = vld [vmem:[#allocation53_spill] sm:$0xff]  ;;  %v6372_v45 = vld [vmem:[#allocation54_spill] sm:$0xff] }
 0x75c   : > { %2685 = vmatpush1.bf16.msra.mxu0 %v6362_v50  ;;  %2726 = vmatpush1.bf16.msra.mxu1 %v6363_v6  ;;  %v6373_v50 = vld [vmem:[#allocation55_spill] sm:$0xff]  ;;  %v6374_v6 = vld [vmem:[#allocation56_spill] sm:$0xff] }
 0x75d   : > { %2686 = vmatprep.subr.bf16.mxu0 %v6364_v33  ;;  %2727 = vmatprep.subr.bf16.mxu1 %v6365_v44  ;;  %v6375_v33 = vld [vmem:[#allocation57_spill] sm:$0xff]  ;;  %v6376_v44 = vld [vmem:[#allocation58_spill] sm:$0xff] }
 0x760   : > { %2687 = vmatpush1.bf16.msra.mxu0 %v6366_v18  ;;  %2728 = vmatpush1.bf16.msra.mxu1 %v6367_v9  ;;  %v6377_v18 = vld [vmem:[#allocation59_spill] sm:$0xff]  ;;  %v6378_v9 = vld [vmem:[#allocation60_spill] sm:$0xff] }
 0x761   : > { %2688 = vmatprep.subr.bf16.mxu0 %v6368_v38  ;;  %2729 = vmatprep.subr.bf16.mxu1 %v6369_v1  ;;  %v6379_v38 = vld [vmem:[#allocation61_spill] sm:$0xff]  ;;  %v6380_v1 = vld [vmem:[#allocation62_spill] sm:$0xff] }
 0x764   : > { %2689 = vmatpush1.bf16.msra.mxu0 %v6370_v48  ;;  %2730 = vmatpush1.bf16.msra.mxu1 %v6371_v63  ;;  %v6381_v48 = vld [vmem:[#allocation63_spill] sm:$0xff]  ;;  %v6382_v63 = vld [vmem:[#allocation64_spill] sm:$0xff] }
 0x765   : > { %2690 = vmatprep.subr.bf16.mxu0 %v6372_v45  ;;  %2731 = vmatprep.subr.bf16.mxu1 %v6373_v50  ;;  %v6383_v45 = vld [vmem:[#allocation65_spill] sm:$0xff]  ;;  %v6384_v50 = vld [vmem:[#allocation66_spill] sm:$0xff] }
 0x768   : > { %2691 = vmatpush1.bf16.msra.mxu0 %v6374_v6  ;;  %2732 = vmatpush1.bf16.msra.mxu1 %v6375_v33  ;;  %v6385_v6 = vld [vmem:[#allocation67_spill] sm:$0xff]  ;;  %v6386_v33 = vld [vmem:[#allocation68_spill] sm:$0xff] }
 0x769   : > { %2692 = vmatprep.subr.bf16.mxu0 %v6376_v44  ;;  %2733 = vmatprep.subr.bf16.mxu1 %v6377_v18  ;;  %v6387_v44 = vld [vmem:[#allocation69_spill] sm:$0xff]  ;;  %v6388_v18 = vld [vmem:[#allocation70_spill] sm:$0xff] }
 0x76c   : > { %2693 = vmatpush1.bf16.msra.mxu0 %v6378_v9  ;;  %2734 = vmatpush1.bf16.msra.mxu1 %v6379_v38  ;;  %v6389_v38 = vld [vmem:[#allocation71_spill] sm:$0xff] }
 0x76d   : > { %2694 = vmatprep.subr.bf16.mxu0 %v6380_v1  ;;  %2735 = vmatprep.subr.bf16.mxu1 %v6381_v48 }
 0x770   : > { %2695 = vmatpush1.bf16.msra.mxu0 %v6382_v63  ;;  %2736 = vmatpush1.bf16.msra.mxu1 %v6383_v45 }
 0x771   : > { %2696 = vmatprep.subr.bf16.mxu0 %v6384_v50  ;;  %2737 = vmatprep.subr.bf16.mxu1 %v6385_v6 }
 0x774   : > { %2697 = vmatpush1.bf16.msra.mxu0 %v6386_v33  ;;  %2738 = vmatpush1.bf16.msra.mxu1 %v6387_v44 }
 0x775   : > { %2748 = vmatprep.subr.bf16.mxu0 %v6388_v18  ;;  %2789 = vmatprep.subr.bf16.mxu1 %v6389_v38  ;;  %v3580_v18 = vld [vmem:[%s3330_s25 + $0x50] sm:$0xff] }
 0x7ca   : > { %v2432_v1 = vpop.f32.mrb[40].mxu0  ;;  %v2473_v48 = vpop.f32.mrb[40].mxu1 }
 0x7cb   : > { %v2434_v9 = vpop.f32.mrb[41].mxu0  ;;  %v2475_v63 = vpop.f32.mrb[41].mxu1 }
 0x7cc   : > { %v2570_v57 = vcombine.low %v2432_v1, %v2434_v9  ;;  %v2571_v45 = vcombine.low %v2473_v48, %v2475_v63  ;;  %v2436_v0 = vpop.f32.mrb[42].mxu0  ;;  %v2477_v50 = vpop.f32.mrb[42].mxu1 }
 0x7cd   : > { %v2437_v19 = vpop.f32.mrb[43].mxu0  ;;  %v2478_v6 = vpop.f32.mrb[43].mxu1 }
 0x7ce   : > { %v2578_v33 = vrot.slane %v2570_v57, %v4569_v56  ;;  %v2585_v44 = vrot.slane %v2571_v45, %v4569_v56 }
 0x7d0   : > { %v2586_v49 = vcombine.low %v2578_v33, %v2585_v44 }
 0x7d2   : > { %v2606_v30 = vadd.f32 %v3580_v18, %v2586_v49 }
 0x7d4   : > { %v2615_v38 = vrot.slane %v2606_v30, 4  ;;  %v2608_v8 = vsub.f32 0.0, %v2606_v30 }
 0x7d6   : > { %v2617_v11 = vsub.f32 0.0, %v2615_v38  ;;  %v2609_v39 = vmul.f32 1.442695, %v2608_v8 }
 0x7d8   : > { %v2618_v32 = vmul.f32 1.442695, %v2617_v11 }
 0x7da   : > { %3749 = vpow2.f32 %v2618_v32  ;;  %v3581_v32 = vld [vmem:[%s3330_s25 + $0x58] sm:$0xff]  ;;  %s3196_s25 = sadd.s32 (%p3926_p6), %s3610_s23, %s3599_s22 }
 0x7db   : > { %3751 = vpow2.f32 %v2609_v39  ;;  %s3601_s24 = sshll.u32 (%p3926_p6), %s3196_s25, 1 }
 0x7e4   : > { %v3750_v19 = vpop.eup %3749 }
 0x7e5   : > { %v3752_v57 = vpop.eup %3751  ;;  %v2620_v49 = vadd.f32 1.0, %v3750_v19 }
 0x7e6   : > { %v2611_v8 = vadd.f32 1.0, %v3752_v57 }
 0x7e7   : > { %3753 = vrcp.f32 %v2620_v49 }
 0x7e8   : > { %3755 = vrcp.f32 %v2611_v8 }
 0x80a   : > { %v2514_v0 = vpop.f32.mrb[44].mxu0  ;;  %v2555_v9 = vpop.f32.mrb[44].mxu1 }
 0x80b   : > { %v2516_v48 = vpop.f32.mrb[45].mxu0  ;;  %v2557_v63 = vpop.f32.mrb[45].mxu1 }
 0x80c   : > { %v2587_v50 = vcombine.low %v2514_v0, %v2516_v48  ;;  %v2588_v45 = vcombine.low %v2555_v9, %v2557_v63  ;;  %v2518_v6 = vpop.f32.mrb[46].mxu0  ;;  %v2559_v33 = vpop.f32.mrb[46].mxu1 }
 0x80d   : > { %v2519_v44 = vpop.f32.mrb[47].mxu0  ;;  %v2560_v1 = vpop.f32.mrb[47].mxu1  ;;  %v2633_v6 = vld [vmem:[#allocation3] sm:$0xf] }
 0x80e   : > { %v2595_v18 = vrot.slane %v2587_v50, %v4569_v56  ;;  %v2602_v11 = vrot.slane %v2588_v45, %v4569_v56  ;;  %v3754_v48 = vpop.eup %3753 }
 0x80f   : > { %v3756_v63 = vpop.eup %3755  ;;  %v2634_v50 = vmul.f32 %v3754_v48, %v2633_v6  ;;  %v6394_v48 = vld [vmem:[#allocation119_spill] sm:$0xff]  ;;  %v6397_v6 = vld [vmem:[#allocation122_spill] sm:$0xff] }
 0x810   : > { %v2603_v39 = vcombine.low %v2595_v18, %v2602_v11 }
 0x812   : > { %v2607_v30 = vadd.f32 %v3581_v32, %v2603_v39 }
 0x814   : > { %3757 = vtanh.f32 %v2607_v30  ;;  %v2625_v38 = vrot.slane %v2607_v30, 4  ;;  %v6390_v30 = vld [vmem:[#allocation115_spill] sm:$0xff] }
 0x816   : > { %v2627_v0 = vsub.f32 0.0, %v2625_v38  ;;  %v6391_v38 = vld [vmem:[#allocation116_spill] sm:$0xff] }
 0x818   : > { %v2628_v9 = vmul.f32 1.442695, %v2627_v0  ;;  %v6392_v0 = vld [vmem:[#allocation117_spill] sm:$0xff] }
 0x81a   : > { %3759 = vpow2.f32 %v2628_v9  ;;  %v6393_v9 = vld [vmem:[#allocation118_spill] sm:$0xff] }
 0x81e   : > { %v3758_v19 = vpop.eup %3757 }
 0x81f   : > { %v2635_v33 = vmul.f32 %v3758_v19, %v3756_v63  ;;  %v6395_v63 = vld [vmem:[#allocation120_spill] sm:$0xff]  ;;  %v6396_v19 = vld [vmem:[#allocation121_spill] sm:$0xff] }
 0x821   : > { %v2636_v45 = vadd.f32 %v2635_v33, %v2634_v50  ;;  %v6398_v50 = vld [vmem:[#allocation123_spill] sm:$0xff]  ;;  %v6399_v33 = vld [vmem:[#allocation124_spill] sm:$0xff] }
 0x823   : > { %2639 = vst [vmem:[#allocation3] sm:$0xf] %v2636_v45  ;;  %3761 = vtanh.f32 %v2636_v45  ;;  %v6400_v45 = vld [vmem:[#allocation125_spill] sm:$0xff] }
 0x824   : > { %v3760_v57 = vpop.eup %3759 }
 0x825   : > { %v2630_v44 = vadd.f32 1.0, %v3760_v57  ;;  %v6401_v57 = vld [vmem:[#allocation126_spill] sm:$0xff] }
 0x827   : > { %3763 = vrcp.f32 %v2630_v44  ;;  %v6402_v44 = vld [vmem:[#allocation127_spill] sm:$0xff] }
 0x82d   : > { %v3762_v1 = vpop.eup %3761 }
 0x831   : > { %v3764_v49 = vpop.eup %3763 }
 0x832   : > { %v2638_v18 = vmul.f32 %v3764_v49, %v3762_v1  ;;  %v6403_v1 = vld [vmem:[#allocation128_spill] sm:$0xff]  ;;  %v6404_v49 = vld [vmem:[#allocation129_spill] sm:$0xff] }
 0x834   : > { %3584 = vst [vmem:[%s3334_s26 + $0x14] sm:$0xf] %v2638_v18  ;;  %2640 = vst [vmem:[#allocation2] sm:$0xf] %v2638_v18  ;;  %v6405_v18 = vld [vmem:[#allocation130_spill] sm:$0xff] }
 0x83b   : > { %v3588_v11 = vld.sshfl [vmem:[#allocation2] sm:$0x33 pattern:$0x76325410] }
 0x83c   : > { %v2661_v8 = vcombine.high %v3588_v11, %v3588_v11  ;;  %v5292_v39 = vpack.c.bf16 %v3588_v11, %v3588_v11  ;;  %v6406_v11 = vld [vmem:[#allocation131_spill] sm:$0xff] }
 0x83e   : > { %v2665_v32 = vpack.c.bf16 %v2661_v8, %v2661_v8  ;;  %v6407_v8 = vld [vmem:[#allocation132_spill] sm:$0xff] }
 0x840   : > { %2698 = vmatprep.mubr.bf16.mxu0 %v2665_v32  ;;  %2739 = vmatprep.mubr.bf16.mxu1 %v2665_v32 }
 0x841   : > { %2699 = vmatmul.mubr.bf16.vlgmr.msra.gmra.mrb[48].mxu0 %v5292_v39  ;;  %2740 = vmatmul.mubr.bf16.vlgmr.msra.gmra.mrb[48].mxu1 %v5292_v39 }
 0x842   : > { %2749 = vmatpush1.bf16.msra.mxu0 %v5966_v42  ;;  %2790 = vmatpush1.bf16.msra.mxu1 %v5967_v58 }
 0x843   : > { %2780 = vmatprep.mubr.bf16.mxu0 %v2665_v32  ;;  %2821 = vmatprep.mubr.bf16.mxu1 %v2665_v32  ;;  %v6408_v32 = vld [vmem:[#allocation133_spill] sm:$0xff] }
 0x844   : > { %2750 = vmatprep.subr.bf16.mxu0 %v5968_v12  ;;  %2791 = vmatprep.subr.bf16.mxu1 %v5969_v41 }
 0x846   : > { %2751 = vmatpush1.bf16.msra.mxu0 %v5970_v40  ;;  %2792 = vmatpush1.bf16.msra.mxu1 %v5971_v47 }
 0x847   : > { %2752 = vmatprep.subr.bf16.mxu0 %v5972_v55  ;;  %2793 = vmatprep.subr.bf16.mxu1 %v6050_v53 }
 0x84a   : > { %2753 = vmatpush1.bf16.msra.mxu0 %v6051_v23  ;;  %2794 = vmatpush1.bf16.msra.mxu1 %v6052_v60 }
 0x84b   : > { %2754 = vmatprep.subr.bf16.mxu0 %v6053_v62  ;;  %2795 = vmatprep.subr.bf16.mxu1 %v6054_v4 }
 0x84e   : > { %2755 = vmatpush1.bf16.msra.mxu0 %v6055_v5  ;;  %2796 = vmatpush1.bf16.msra.mxu1 %v6056_v59 }
 0x84f   : > { %2756 = vmatprep.subr.bf16.mxu0 %v6057_v15  ;;  %2797 = vmatprep.subr.bf16.mxu1 %v6135_v21 }
 0x852   : > { %2757 = vmatpush1.bf16.msra.mxu0 %v6136_v14  ;;  %2798 = vmatpush1.bf16.msra.mxu1 %v6137_v20 }
 0x853   : > { %2758 = vmatprep.subr.bf16.mxu0 %v6138_v22  ;;  %2799 = vmatprep.subr.bf16.mxu1 %v6139_v31 }
 0x856   : > { %2759 = vmatpush1.bf16.msra.mxu0 %v6140_v35  ;;  %2800 = vmatpush1.bf16.msra.mxu1 %v6141_v26 }
 0x857   : > { %2760 = vmatprep.subr.bf16.mxu0 %v6142_v36  ;;  %2801 = vmatprep.subr.bf16.mxu1 %v6143_v43 }
 0x85a   : > { %2761 = vmatpush1.bf16.msra.mxu0 %v6144_v37  ;;  %2802 = vmatpush1.bf16.msra.mxu1 %v6145_v27 }
 0x85b   : > { %2762 = vmatprep.subr.bf16.mxu0 %v6069_v7  ;;  %2803 = vmatprep.subr.bf16.mxu1 %v6070_v16 }
 0x85e   : > { %2763 = vmatpush1.bf16.msra.mxu0 %v6071_v13  ;;  %2804 = vmatpush1.bf16.msra.mxu1 %v6146_v25 }
 0x85f   : > { %2764 = vmatprep.subr.bf16.mxu0 %v6073_v17  ;;  %2805 = vmatprep.subr.bf16.mxu1 %v6074_v24 }
 0x862   : > { %2765 = vmatpush1.bf16.msra.mxu0 %v6075_v54  ;;  %2806 = vmatpush1.bf16.msra.mxu1 %v6076_v3 }
 0x863   : > { %2766 = vmatprep.subr.bf16.mxu0 %v6077_v52  ;;  %2807 = vmatprep.subr.bf16.mxu1 %v6078_v51 }
 0x866   : > { %2767 = vmatpush1.bf16.msra.mxu0 %v6079_v46  ;;  %2808 = vmatpush1.bf16.msra.mxu1 %v6003_v29 }
 0x867   : > { %2768 = vmatprep.subr.bf16.mxu0 %v6004_v28  ;;  %2809 = vmatprep.subr.bf16.mxu1 %v6005_v2 }
 0x86a   : > { %2769 = vmatpush1.bf16.msra.mxu0 %v6080_v61  ;;  %2810 = vmatpush1.bf16.msra.mxu1 %v6007_v34 }
 0x86b   : > { %2770 = vmatprep.subr.bf16.mxu0 %v6008_v10  ;;  %2811 = vmatprep.subr.bf16.mxu1 %v6390_v30 }
 0x86e   : > { %2771 = vmatpush1.bf16.msra.mxu0 %v6391_v38  ;;  %2812 = vmatpush1.bf16.msra.mxu1 %v6392_v0 }
 0x86f   : > { %2772 = vmatprep.subr.bf16.mxu0 %v6393_v9  ;;  %2813 = vmatprep.subr.bf16.mxu1 %v6394_v48 }
 0x872   : > { %2773 = vmatpush1.bf16.msra.mxu0 %v6395_v63  ;;  %2814 = vmatpush1.bf16.msra.mxu1 %v6396_v19 }
 0x873   : > { %2774 = vmatprep.subr.bf16.mxu0 %v6397_v6  ;;  %2815 = vmatprep.subr.bf16.mxu1 %v6398_v50  ;;  %v6409_v50 = vld [vmem:[#allocation6_spill] sm:$0xff] }
 0x876   : > { %2775 = vmatpush1.bf16.msra.mxu0 %v6399_v33  ;;  %2816 = vmatpush1.bf16.msra.mxu1 %v6400_v45  ;;  %v6410_v33 = vld [vmem:[#allocation8_spill] sm:$0xff] }
 0x877   : > { %2776 = vmatprep.subr.bf16.mxu0 %v6401_v57  ;;  %2817 = vmatprep.subr.bf16.mxu1 %v6402_v44  ;;  %v6411_v44 = vld [vmem:[#allocation7_spill] sm:$0xff]  ;;  %v6420_v57 = vld [vmem:[#allocation17_spill] sm:$0xff] }
 0x87a   : > { %2777 = vmatpush1.bf16.msra.mxu0 %v6403_v1  ;;  %2818 = vmatpush1.bf16.msra.mxu1 %v6404_v49  ;;  %v6412_v1 = vld [vmem:[#allocation9_spill] sm:$0xff]  ;;  %v6413_v49 = vld [vmem:[#allocation10_spill] sm:$0xff] }
 0x87b   : > { %2778 = vmatprep.subr.bf16.mxu0 %v6405_v18  ;;  %2819 = vmatprep.subr.bf16.mxu1 %v6406_v11  ;;  %v6414_v18 = vld [vmem:[#allocation11_spill] sm:$0xff]  ;;  %v6415_v11 = vld [vmem:[#allocation12_spill] sm:$0xff] }
 0x87e   : > { %2779 = vmatpush1.bf16.msra.mxu0 %v6407_v8  ;;  %2820 = vmatpush1.bf16.msra.mxu1 %v6408_v32  ;;  %v6416_v8 = vld [vmem:[#allocation13_spill] sm:$0xff]  ;;  %v6417_v32 = vld [vmem:[#allocation14_spill] sm:$0xff] }
 0x87f   : > { %2934 = vmatprep.subr.bf16.mxu0 %v6409_v50  ;;  %2975 = vmatprep.subr.bf16.mxu1 %v6410_v33  ;;  %v6418_v50 = vld [vmem:[#allocation15_spill] sm:$0xff]  ;;  %v6419_v33 = vld [vmem:[#allocation16_spill] sm:$0xff] }
 0x881   : > { %2781 = vmatmul.mubr.bf16.vlgmr.msra.gmra.mrb[52].mxu0 %v5292_v39  ;;  %2822 = vmatmul.mubr.bf16.vlgmr.msra.gmra.mrb[52].mxu1 %v5292_v39  ;;  %v6421_v39 = vld [vmem:[#allocation18_spill] sm:$0xff] }
 0x882   : > { %2935 = vmatpush1.bf16.msra.mxu0 %v6411_v44  ;;  %2976 = vmatpush1.bf16.msra.mxu1 %v6412_v1  ;;  %v6422_v44 = vld [vmem:[#allocation19_spill] sm:$0xff]  ;;  %v6423_v1 = vld [vmem:[#allocation20_spill] sm:$0xff] }
 0x883   : > { %2936 = vmatprep.subr.bf16.mxu0 %v6413_v49  ;;  %2977 = vmatprep.subr.bf16.mxu1 %v6414_v18  ;;  %v6424_v49 = vld [vmem:[#allocation21_spill] sm:$0xff]  ;;  %v6425_v18 = vld [vmem:[#allocation22_spill] sm:$0xff] }
 0x886   : > { %2937 = vmatpush1.bf16.msra.mxu0 %v6415_v11  ;;  %2978 = vmatpush1.bf16.msra.mxu1 %v6416_v8  ;;  %v6426_v11 = vld [vmem:[#allocation23_spill] sm:$0xff]  ;;  %v6427_v8 = vld [vmem:[#allocation24_spill] sm:$0xff] }
 0x887   : > { %2938 = vmatprep.subr.bf16.mxu0 %v6417_v32  ;;  %2979 = vmatprep.subr.bf16.mxu1 %v6418_v50  ;;  %v6428_v32 = vld [vmem:[#allocation25_spill] sm:$0xff]  ;;  %v6429_v50 = vld [vmem:[#allocation26_spill] sm:$0xff] }
 0x88a   : > { %2939 = vmatpush1.bf16.msra.mxu0 %v6419_v33  ;;  %2980 = vmatpush1.bf16.msra.mxu1 %v6420_v57  ;;  %v6430_v33 = vld [vmem:[#allocation27_spill] sm:$0xff]  ;;  %v6431_v57 = vld [vmem:[#allocation28_spill] sm:$0xff] }
 0x88b   : > { %2940 = vmatprep.subr.bf16.mxu0 %v6421_v39  ;;  %2981 = vmatprep.subr.bf16.mxu1 %v6422_v44  ;;  %v6432_v39 = vld [vmem:[#allocation29_spill] sm:$0xff]  ;;  %v6433_v44 = vld [vmem:[#allocation30_spill] sm:$0xff] }
 0x88e   : > { %2941 = vmatpush1.bf16.msra.mxu0 %v6423_v1  ;;  %2982 = vmatpush1.bf16.msra.mxu1 %v6424_v49  ;;  %v6434_v1 = vld [vmem:[#allocation31_spill] sm:$0xff]  ;;  %v6435_v49 = vld [vmem:[#allocation32_spill] sm:$0xff] }
 0x88f   : > { %2942 = vmatprep.subr.bf16.mxu0 %v6425_v18  ;;  %2983 = vmatprep.subr.bf16.mxu1 %v6426_v11  ;;  %v6436_v18 = vld [vmem:[#allocation33_spill] sm:$0xff]  ;;  %v6437_v11 = vld [vmem:[#allocation34_spill] sm:$0xff] }
 0x892   : > { %2943 = vmatpush1.bf16.msra.mxu0 %v6427_v8  ;;  %2984 = vmatpush1.bf16.msra.mxu1 %v6428_v32  ;;  %v6438_v8 = vld [vmem:[#allocation35_spill] sm:$0xff]  ;;  %v6439_v32 = vld [vmem:[#allocation36_spill] sm:$0xff] }
 0x893   : > { %2944 = vmatprep.subr.bf16.mxu0 %v6429_v50  ;;  %2985 = vmatprep.subr.bf16.mxu1 %v6430_v33  ;;  %v6440_v50 = vld [vmem:[#allocation37_spill] sm:$0xff]  ;;  %v6441_v33 = vld [vmem:[#allocation38_spill] sm:$0xff] }
 0x896   : > { %2945 = vmatpush1.bf16.msra.mxu0 %v6431_v57  ;;  %2986 = vmatpush1.bf16.msra.mxu1 %v6432_v39  ;;  %v6442_v57 = vld [vmem:[#allocation39_spill] sm:$0xff]  ;;  %v6443_v39 = vld [vmem:[#allocation40_spill] sm:$0xff] }
 0x897   : > { %2946 = vmatprep.subr.bf16.mxu0 %v6433_v44  ;;  %2987 = vmatprep.subr.bf16.mxu1 %v6434_v1  ;;  %v6444_v44 = vld [vmem:[#allocation41_spill] sm:$0xff]  ;;  %v6445_v1 = vld [vmem:[#allocation42_spill] sm:$0xff] }
 0x89a   : > { %2947 = vmatpush1.bf16.msra.mxu0 %v6435_v49  ;;  %2988 = vmatpush1.bf16.msra.mxu1 %v6436_v18  ;;  %v6446_v49 = vld [vmem:[#allocation43_spill] sm:$0xff]  ;;  %v6447_v18 = vld [vmem:[#allocation44_spill] sm:$0xff] }
 0x89b   : > { %2948 = vmatprep.subr.bf16.mxu0 %v6437_v11  ;;  %2989 = vmatprep.subr.bf16.mxu1 %v6438_v8  ;;  %v6448_v11 = vld [vmem:[#allocation45_spill] sm:$0xff]  ;;  %v6449_v8 = vld [vmem:[#allocation46_spill] sm:$0xff] }
 0x89e   : > { %2949 = vmatpush1.bf16.msra.mxu0 %v6439_v32  ;;  %2990 = vmatpush1.bf16.msra.mxu1 %v6440_v50  ;;  %v6450_v32 = vld [vmem:[#allocation47_spill] sm:$0xff]  ;;  %v6451_v50 = vld [vmem:[#allocation48_spill] sm:$0xff] }
 0x89f   : > { %2950 = vmatprep.subr.bf16.mxu0 %v6441_v33  ;;  %2991 = vmatprep.subr.bf16.mxu1 %v6442_v57  ;;  %v6452_v33 = vld [vmem:[#allocation49_spill] sm:$0xff]  ;;  %v6453_v57 = vld [vmem:[#allocation50_spill] sm:$0xff] }
 0x8a2   : > { %2951 = vmatpush1.bf16.msra.mxu0 %v6443_v39  ;;  %2992 = vmatpush1.bf16.msra.mxu1 %v6444_v44  ;;  %v6454_v39 = vld [vmem:[#allocation51_spill] sm:$0xff]  ;;  %v6455_v44 = vld [vmem:[#allocation52_spill] sm:$0xff] }
 0x8a3   : > { %2952 = vmatprep.subr.bf16.mxu0 %v6445_v1  ;;  %2993 = vmatprep.subr.bf16.mxu1 %v6446_v49  ;;  %v6456_v1 = vld [vmem:[#allocation53_spill] sm:$0xff]  ;;  %v6457_v49 = vld [vmem:[#allocation54_spill] sm:$0xff] }
 0x8a6   : > { %2953 = vmatpush1.bf16.msra.mxu0 %v6447_v18  ;;  %2994 = vmatpush1.bf16.msra.mxu1 %v6448_v11  ;;  %v6458_v18 = vld [vmem:[#allocation55_spill] sm:$0xff]  ;;  %v6459_v11 = vld [vmem:[#allocation56_spill] sm:$0xff] }
 0x8a7   : > { %2954 = vmatprep.subr.bf16.mxu0 %v6449_v8  ;;  %2995 = vmatprep.subr.bf16.mxu1 %v6450_v32  ;;  %v6460_v8 = vld [vmem:[#allocation57_spill] sm:$0xff]  ;;  %v6461_v32 = vld [vmem:[#allocation58_spill] sm:$0xff] }
 0x8aa   : > { %2955 = vmatpush1.bf16.msra.mxu0 %v6451_v50  ;;  %2996 = vmatpush1.bf16.msra.mxu1 %v6452_v33  ;;  %v6462_v50 = vld [vmem:[#allocation59_spill] sm:$0xff]  ;;  %v6463_v33 = vld [vmem:[#allocation60_spill] sm:$0xff] }
 0x8ab   : > { %2956 = vmatprep.subr.bf16.mxu0 %v6453_v57  ;;  %2997 = vmatprep.subr.bf16.mxu1 %v6454_v39  ;;  %v6464_v57 = vld [vmem:[#allocation61_spill] sm:$0xff]  ;;  %v6465_v39 = vld [vmem:[#allocation62_spill] sm:$0xff] }
 0x8ae   : > { %2957 = vmatpush1.bf16.msra.mxu0 %v6455_v44  ;;  %2998 = vmatpush1.bf16.msra.mxu1 %v6456_v1  ;;  %v6466_v44 = vld [vmem:[#allocation63_spill] sm:$0xff]  ;;  %v6467_v1 = vld [vmem:[#allocation64_spill] sm:$0xff] }
 0x8af   : > { %2958 = vmatprep.subr.bf16.mxu0 %v6457_v49  ;;  %2999 = vmatprep.subr.bf16.mxu1 %v6458_v18  ;;  %v6468_v49 = vld [vmem:[#allocation65_spill] sm:$0xff]  ;;  %v6469_v18 = vld [vmem:[#allocation66_spill] sm:$0xff] }
 0x8b2   : > { %2959 = vmatpush1.bf16.msra.mxu0 %v6459_v11  ;;  %3000 = vmatpush1.bf16.msra.mxu1 %v6460_v8  ;;  %v6470_v11 = vld [vmem:[#allocation67_spill] sm:$0xff]  ;;  %v6471_v8 = vld [vmem:[#allocation68_spill] sm:$0xff] }
 0x8b3   : > { %2960 = vmatprep.subr.bf16.mxu0 %v6461_v32  ;;  %3001 = vmatprep.subr.bf16.mxu1 %v6462_v50  ;;  %v6472_v32 = vld [vmem:[#allocation69_spill] sm:$0xff]  ;;  %v6473_v50 = vld [vmem:[#allocation70_spill] sm:$0xff] }
 0x8b6   : > { %2961 = vmatpush1.bf16.msra.mxu0 %v6463_v33  ;;  %3002 = vmatpush1.bf16.msra.mxu1 %v6464_v57  ;;  %v6474_v33 = vld [vmem:[#allocation71_spill] sm:$0xff] }
 0x8b7   : > { %2962 = vmatprep.subr.bf16.mxu0 %v6465_v39  ;;  %3003 = vmatprep.subr.bf16.mxu1 %v6466_v44 }
 0x8ba   : > { %2963 = vmatpush1.bf16.msra.mxu0 %v6467_v1  ;;  %3004 = vmatpush1.bf16.msra.mxu1 %v6468_v49 }
 0x8bb   : > { %2964 = vmatprep.subr.bf16.mxu0 %v6469_v18  ;;  %3005 = vmatprep.subr.bf16.mxu1 %v6470_v11 }
 0x8be   : > { %2965 = vmatpush1.bf16.msra.mxu0 %v6471_v8  ;;  %3006 = vmatpush1.bf16.msra.mxu1 %v6472_v32 }
 0x8bf   : > { %3016 = vmatprep.subr.bf16.mxu0 %v6473_v50  ;;  %3057 = vmatprep.subr.bf16.mxu1 %v6474_v33  ;;  %v3586_v50 = vld [vmem:[%s3338_s28 + $0x60] sm:$0xff] }
 0x914   : > { %v2700_v57 = vpop.f32.mrb[48].mxu0  ;;  %v2741_v39 = vpop.f32.mrb[48].mxu1 }
 0x915   : > { %v2702_v44 = vpop.f32.mrb[49].mxu0  ;;  %v2743_v1 = vpop.f32.mrb[49].mxu1 }
 0x916   : > { %v2838_v45 = vcombine.low %v2700_v57, %v2702_v44  ;;  %v2839_v49 = vcombine.low %v2741_v39, %v2743_v1  ;;  %v2704_v6 = vpop.f32.mrb[50].mxu0  ;;  %v2745_v18 = vpop.f32.mrb[50].mxu1 }
 0x917   : > { %v2705_v19 = vpop.f32.mrb[51].mxu0  ;;  %v2746_v11 = vpop.f32.mrb[51].mxu1 }
 0x918   : > { %v2846_v8 = vrot.slane %v2838_v45, %v4569_v56  ;;  %v2853_v32 = vrot.slane %v2839_v49, %v4569_v56 }
 0x91a   : > { %v2854_v63 = vcombine.low %v2846_v8, %v2853_v32 }
 0x91c   : > { %v2874_v48 = vadd.f32 %v3586_v50, %v2854_v63 }
 0x91e   : > { %v2883_v33 = vrot.slane %v2874_v48, 4  ;;  %v2876_v0 = vsub.f32 0.0, %v2874_v48 }
 0x920   : > { %v2885_v9 = vsub.f32 0.0, %v2883_v33  ;;  %v2877_v30 = vmul.f32 1.442695, %v2876_v0 }
 0x922   : > { %v2886_v38 = vmul.f32 1.442695, %v2885_v9 }
 0x924   : > { %3765 = vpow2.f32 %v2886_v38  ;;  %v3587_v38 = vld [vmem:[%s3338_s28 + $0x68] sm:$0xff]  ;;  %s3198_s28 = scalar_lea.vmem (%p3926_p6), %s5551_s2, %s3601_s24 }
 0x925   : > { %3767 = vpow2.f32 %v2877_v30 }
 0x92e   : > { %v3766_v19 = vpop.eup %3765 }
 0x92f   : > { %v3768_v45 = vpop.eup %3767  ;;  %v2888_v63 = vadd.f32 1.0, %v3766_v19 }
 0x930   : > { %v2879_v0 = vadd.f32 1.0, %v3768_v45 }
 0x931   : > { %3769 = vrcp.f32 %v2888_v63 }
 0x932   : > { %3771 = vrcp.f32 %v2879_v0 }
 0x954   : > { %v2782_v6 = vpop.f32.mrb[52].mxu0  ;;  %v2823_v57 = vpop.f32.mrb[52].mxu1 }
 0x955   : > { %v2784_v39 = vpop.f32.mrb[53].mxu0  ;;  %v2825_v44 = vpop.f32.mrb[53].mxu1 }
 0x956   : > { %v2855_v1 = vcombine.low %v2782_v6, %v2784_v39  ;;  %v2856_v49 = vcombine.low %v2823_v57, %v2825_v44  ;;  %v2786_v18 = vpop.f32.mrb[54].mxu0  ;;  %v2827_v11 = vpop.f32.mrb[54].mxu1 }
 0x957   : > { %v2787_v8 = vpop.f32.mrb[55].mxu0  ;;  %v2828_v32 = vpop.f32.mrb[55].mxu1  ;;  %v2901_v18 = vld [vmem:[#allocation3] sm:$0xf] }
 0x958   : > { %v2863_v50 = vrot.slane %v2855_v1, %v4569_v56  ;;  %v2870_v9 = vrot.slane %v2856_v49, %v4569_v56  ;;  %v3770_v39 = vpop.eup %3769 }
 0x959   : > { %v3772_v44 = vpop.eup %3771  ;;  %v2902_v1 = vmul.f32 %v3770_v39, %v2901_v18 }
 0x95a   : > { %v2871_v30 = vcombine.low %v2863_v50, %v2870_v9 }
 0x95c   : > { %v2875_v48 = vadd.f32 %v3587_v38, %v2871_v30 }
 0x95e   : > { %3773 = vtanh.f32 %v2875_v48  ;;  %v2893_v33 = vrot.slane %v2875_v48, 4 }
 0x960   : > { %v2895_v6 = vsub.f32 0.0, %v2893_v33 }
 0x962   : > { %v2896_v57 = vmul.f32 1.442695, %v2895_v6 }
 0x964   : > { %3775 = vpow2.f32 %v2896_v57 }
 0x968   : > { %v3774_v19 = vpop.eup %3773 }
 0x969   : > { %v2903_v11 = vmul.f32 %v3774_v19, %v3772_v44 }
 0x96b   : > { %v2904_v49 = vadd.f32 %v2903_v11, %v2902_v1 }
 0x96d   : > { %2907 = vst [vmem:[#allocation3] sm:$0xf] %v2904_v49  ;;  %3777 = vtanh.f32 %v2904_v49 }
 0x96e   : > { %v3776_v45 = vpop.eup %3775 }
 0x96f   : > { %v2898_v8 = vadd.f32 1.0, %v3776_v45 }
 0x971   : > { %3779 = vrcp.f32 %v2898_v8  ;;  %v3593_v8 = vld [vmem:[%s3346_s5 + $0x78] sm:$0xff] }
 0x977   : > { %v3778_v32 = vpop.eup %3777 }
 0x97b   : > { %v3780_v63 = vpop.eup %3779 }
 0x97c   : > { %v2906_v50 = vmul.f32 %v3780_v63, %v3778_v32 }
 0x97e   : > { %3590 = vst [vmem:[%s3342_s30 + $0x18] sm:$0xf] %v2906_v50  ;;  %2908 = vst [vmem:[#allocation2] sm:$0xf] %v2906_v50 }
 0x985   : > { %v3594_v9 = vld.sshfl [vmem:[#allocation2] sm:$0x33 pattern:$0x76325410] }
 0x986   : > { %v2929_v0 = vcombine.high %v3594_v9, %v3594_v9  ;;  %v5434_v30 = vpack.c.bf16 %v3594_v9, %v3594_v9 }
 0x988   : > { %v2933_v38 = vpack.c.bf16 %v2929_v0, %v2929_v0 }
 0x98a   : > { %2966 = vmatprep.mubr.bf16.mxu0 %v2933_v38  ;;  %3007 = vmatprep.mubr.bf16.mxu1 %v2933_v38 }
 0x98b   : > { %2967 = vmatmul.mubr.bf16.vlgmr.msra.gmra.mrb[56].mxu0 %v5434_v30  ;;  %3008 = vmatmul.mubr.bf16.vlgmr.msra.gmra.mrb[56].mxu1 %v5434_v30 }
 0x98c   : > { %3017 = vmatpush1.bf16.msra.mxu0 %v5966_v42  ;;  %3058 = vmatpush1.bf16.msra.mxu1 %v5967_v58  ;;  %v6475_v42 = vld [vmem:[#allocation115_spill] sm:$0xff]  ;;  %v6476_v58 = vld [vmem:[#allocation116_spill] sm:$0xff] }
 0x98d   : > { %3048 = vmatprep.mubr.bf16.mxu0 %v2933_v38  ;;  %3089 = vmatprep.mubr.bf16.mxu1 %v2933_v38 }
 0x98e   : > { %3018 = vmatprep.subr.bf16.mxu0 %v5968_v12  ;;  %3059 = vmatprep.subr.bf16.mxu1 %v5969_v41  ;;  %v6477_v12 = vld [vmem:[#allocation117_spill] sm:$0xff]  ;;  %v6478_v41 = vld [vmem:[#allocation118_spill] sm:$0xff] }
 0x990   : > { %3019 = vmatpush1.bf16.msra.mxu0 %v5970_v40  ;;  %3060 = vmatpush1.bf16.msra.mxu1 %v5971_v47  ;;  %v6479_v40 = vld [vmem:[#allocation119_spill] sm:$0xff]  ;;  %v6480_v47 = vld [vmem:[#allocation120_spill] sm:$0xff] }
 0x991   : > { %3020 = vmatprep.subr.bf16.mxu0 %v5972_v55  ;;  %3061 = vmatprep.subr.bf16.mxu1 %v6050_v53  ;;  %v6481_v55 = vld [vmem:[#allocation121_spill] sm:$0xff]  ;;  %v6487_v53 = vld [vmem:[#allocation127_spill] sm:$0xff] }
 0x994   : > { %3021 = vmatpush1.bf16.msra.mxu0 %v6051_v23  ;;  %3062 = vmatpush1.bf16.msra.mxu1 %v6052_v60  ;;  %v6488_v23 = vld [vmem:[#allocation128_spill] sm:$0xff]  ;;  %v6489_v60 = vld [vmem:[#allocation129_spill] sm:$0xff] }
 0x995   : > { %3022 = vmatprep.subr.bf16.mxu0 %v6053_v62  ;;  %3063 = vmatprep.subr.bf16.mxu1 %v6054_v4  ;;  %v6490_v62 = vld [vmem:[#allocation130_spill] sm:$0xff]  ;;  %v6491_v4 = vld [vmem:[#allocation131_spill] sm:$0xff] }
 0x998   : > { %3023 = vmatpush1.bf16.msra.mxu0 %v6055_v5  ;;  %3064 = vmatpush1.bf16.msra.mxu1 %v6056_v59  ;;  %v6492_v5 = vld [vmem:[#allocation132_spill] sm:$0xff]  ;;  %v6493_v59 = vld [vmem:[#allocation133_spill] sm:$0xff] }
 0x999   : > { %3024 = vmatprep.subr.bf16.mxu0 %v6057_v15  ;;  %3065 = vmatprep.subr.bf16.mxu1 %v6135_v21 }
 0x99c   : > { %3025 = vmatpush1.bf16.msra.mxu0 %v6136_v14  ;;  %3066 = vmatpush1.bf16.msra.mxu1 %v6137_v20  ;;  %v3592_v14 = vld [vmem:[%s3346_s5 + $0x70] sm:$0xff] }
 0x99d   : > { %3026 = vmatprep.subr.bf16.mxu0 %v6138_v22  ;;  %3067 = vmatprep.subr.bf16.mxu1 %v6139_v31 }
 0x9a0   : > { %3027 = vmatpush1.bf16.msra.mxu0 %v6140_v35  ;;  %3068 = vmatpush1.bf16.msra.mxu1 %v6141_v26 }
 0x9a1   : > { %3028 = vmatprep.subr.bf16.mxu0 %v6142_v36  ;;  %3069 = vmatprep.subr.bf16.mxu1 %v6143_v43 }
 0x9a4   : > { %3029 = vmatpush1.bf16.msra.mxu0 %v6144_v37  ;;  %3070 = vmatpush1.bf16.msra.mxu1 %v6145_v27 }
 0x9a5   : > { %3030 = vmatprep.subr.bf16.mxu0 %v6069_v7  ;;  %3071 = vmatprep.subr.bf16.mxu1 %v6070_v16 }
 0x9a8   : > { %3031 = vmatpush1.bf16.msra.mxu0 %v6071_v13  ;;  %3072 = vmatpush1.bf16.msra.mxu1 %v6146_v25 }
 0x9a9   : > { %3032 = vmatprep.subr.bf16.mxu0 %v6073_v17  ;;  %3073 = vmatprep.subr.bf16.mxu1 %v6074_v24 }
 0x9ac   : > { %3033 = vmatpush1.bf16.msra.mxu0 %v6075_v54  ;;  %3074 = vmatpush1.bf16.msra.mxu1 %v6076_v3 }
 0x9ad   : > { %3034 = vmatprep.subr.bf16.mxu0 %v6077_v52  ;;  %3075 = vmatprep.subr.bf16.mxu1 %v6078_v51 }
 0x9b0   : > { %3035 = vmatpush1.bf16.msra.mxu0 %v6079_v46  ;;  %3076 = vmatpush1.bf16.msra.mxu1 %v6003_v29  ;;  %v6482_v29 = vld [vmem:[#allocation122_spill] sm:$0xff] }
 0x9b1   : > { %3036 = vmatprep.subr.bf16.mxu0 %v6004_v28  ;;  %3077 = vmatprep.subr.bf16.mxu1 %v6005_v2  ;;  %v6483_v28 = vld [vmem:[#allocation123_spill] sm:$0xff]  ;;  %v6486_v2 = vld [vmem:[#allocation126_spill] sm:$0xff] }
 0x9b4   : > { %3037 = vmatpush1.bf16.msra.mxu0 %v6080_v61  ;;  %3078 = vmatpush1.bf16.msra.mxu1 %v6007_v34  ;;  %v6484_v34 = vld [vmem:[#allocation124_spill] sm:$0xff] }
 0x9b5   : > { %3038 = vmatprep.subr.bf16.mxu0 %v6008_v10  ;;  %3079 = vmatprep.subr.bf16.mxu1 %v6475_v42  ;;  %v6485_v10 = vld [vmem:[#allocation125_spill] sm:$0xff] }
 0x9b8   : > { %3039 = vmatpush1.bf16.msra.mxu0 %v6476_v58  ;;  %3080 = vmatpush1.bf16.msra.mxu1 %v6477_v12  ;;  %v3169_v58 = vld [vmem:[#allocation3] sm:$0xf] }
 0x9b9   : > { %3040 = vmatprep.subr.bf16.mxu0 %v6478_v41  ;;  %3081 = vmatprep.subr.bf16.mxu1 %v6479_v40 }
 0x9bc   : > { %3041 = vmatpush1.bf16.msra.mxu0 %v6480_v47  ;;  %3082 = vmatpush1.bf16.msra.mxu1 %v6481_v55 }
 0x9bd   : > { %3042 = vmatprep.subr.bf16.mxu0 %v6482_v29  ;;  %3083 = vmatprep.subr.bf16.mxu1 %v6483_v28 }
 0x9c0   : > { %3043 = vmatpush1.bf16.msra.mxu0 %v6484_v34  ;;  %3084 = vmatpush1.bf16.msra.mxu1 %v6485_v10 }
 0x9c1   : > { %3044 = vmatprep.subr.bf16.mxu0 %v6486_v2  ;;  %3085 = vmatprep.subr.bf16.mxu1 %v6487_v53 }
 0x9c4   : > { %3045 = vmatpush1.bf16.msra.mxu0 %v6488_v23  ;;  %3086 = vmatpush1.bf16.msra.mxu1 %v6489_v60 }
 0x9c5   : > { %3046 = vmatprep.subr.bf16.mxu0 %v6490_v62  ;;  %3087 = vmatprep.subr.bf16.mxu1 %v6491_v4 }
 0x9c8   : > { %3047 = vmatpush1.bf16.msra.mxu0 %v6492_v5  ;;  %3088 = vmatpush1.bf16.msra.mxu1 %v6493_v59 }
 0x9cb   : > { %3049 = vmatmul.mubr.bf16.vlgmr.msra.gmra.mrb[60].mxu0 %v5434_v30  ;;  %3090 = vmatmul.mubr.bf16.vlgmr.msra.gmra.mrb[60].mxu1 %v5434_v30 }
 0xa5e   : > { %v2968_v15 = vpop.f32.mrb[56].mxu0  ;;  %v3009_v7 = vpop.f32.mrb[56].mxu1 }
 0xa5f   : > { %v2970_v16 = vpop.f32.mrb[57].mxu0  ;;  %v3011_v13 = vpop.f32.mrb[57].mxu1 }
 0xa60   : > { %v3106_v61 = vcombine.low %v2968_v15, %v2970_v16  ;;  %v3107_v17 = vcombine.low %v3009_v7, %v3011_v13  ;;  %v2972_v24 = vpop.f32.mrb[58].mxu0  ;;  %v3013_v54 = vpop.f32.mrb[58].mxu1 }
 0xa61   : > { %v2973_v3 = vpop.f32.mrb[59].mxu0  ;;  %v3014_v52 = vpop.f32.mrb[59].mxu1 }
 0xa62   : > { %v3114_v51 = vrot.slane %v3106_v61, %v4569_v56  ;;  %v3121_v46 = vrot.slane %v3107_v17, %v4569_v56 }
 0xa64   : > { %v3122_v21 = vcombine.low %v3114_v51, %v3121_v46 }
 0xa66   : > { %v3142_v20 = vadd.f32 %v3592_v14, %v3122_v21 }
 0xa68   : > { %v3151_v22 = vrot.slane %v3142_v20, 4  ;;  %v3144_v35 = vsub.f32 0.0, %v3142_v20 }
 0xa6a   : > { %v3153_v31 = vsub.f32 0.0, %v3151_v22  ;;  %v3145_v36 = vmul.f32 1.442695, %v3144_v35 }
 0xa6c   : > { %v3154_v26 = vmul.f32 1.442695, %v3153_v31 }
 0xa6e   : > { %3781 = vpow2.f32 %v3154_v26 }
 0xa6f   : > { %3783 = vpow2.f32 %v3145_v36 }
 0xa78   : > { %v3782_v27 = vpop.eup %3781 }
 0xa79   : > { %v3784_v33 = vpop.eup %3783  ;;  %v3156_v1 = vadd.f32 1.0, %v3782_v27 }
 0xa7a   : > { %v3147_v45 = vadd.f32 1.0, %v3784_v33 }
 0xa7b   : > { %3785 = vrcp.f32 %v3156_v1 }
 0xa7c   : > { %3787 = vrcp.f32 %v3147_v45 }
 0xa85   : > { %v3786_v38 = vpop.eup %3785 }
 0xa86   : > { %v3788_v30 = vpop.eup %3787  ;;  %v3170_v12 = vmul.f32 %v3786_v38, %v3169_v58 }
 0xa9e   : > { %v3050_v43 = vpop.f32.mrb[60].mxu0  ;;  %v3091_v37 = vpop.f32.mrb[60].mxu1 }
 0xa9f   : > { %v3052_v25 = vpop.f32.mrb[61].mxu0  ;;  %v3093_v48 = vpop.f32.mrb[61].mxu1 }
 0xaa0   : > { %v3123_v6 = vcombine.low %v3050_v43, %v3052_v25  ;;  %v3124_v57 = vcombine.low %v3091_v37, %v3093_v48  ;;  %v3054_v39 = vpop.f32.mrb[62].mxu0  ;;  %v3095_v44 = vpop.f32.mrb[62].mxu1 }
 0xaa1   : > { %v3055_v19 = vpop.f32.mrb[63].mxu0  ;;  %v3096_v18 = vpop.f32.mrb[63].mxu1 }
 0xaa2   : > { %v3131_v11 = vrot.slane %v3123_v6, %v4569_v56  ;;  %v3138_v49 = vrot.slane %v3124_v57, %v4569_v56 }
 0xaa4   : > { %v3139_v32 = vcombine.low %v3131_v11, %v3138_v49 }
 0xaa6   : > { %v3143_v63 = vadd.f32 %v3593_v8, %v3139_v32 }
 0xaa8   : > { %3789 = vtanh.f32 %v3143_v63  ;;  %v3161_v50 = vrot.slane %v3143_v63, 4 }
 0xaaa   : > { %v3163_v9 = vsub.f32 0.0, %v3161_v50 }
 0xaac   : > { %v3164_v0 = vmul.f32 1.442695, %v3163_v9 }
 0xaae   : > { %3791 = vpow2.f32 %v3164_v0 }
 0xab2   : > { %v3790_v42 = vpop.eup %3789 }
 0xab3   : > { %v3171_v41 = vmul.f32 %v3790_v42, %v3788_v30 }
 0xab5   : > { %v3172_v56 = vadd.f32 %v3171_v41, %v3170_v12 }
 0xab7   : > { %3175 = vst [vmem:[#allocation3] sm:$0xf] %v3172_v56  ;;  %3793 = vtanh.f32 %v3172_v56 }
 0xab8   : > { %v3792_v40 = vpop.eup %3791 }
 0xab9   : > { %v3166_v47 = vadd.f32 1.0, %v3792_v40 }
 0xabb   : > { %3795 = vrcp.f32 %v3166_v47 }
 0xac1   : > { %v3794_v55 = vpop.eup %3793 }
 0xac2   : > { %3187 = sbr.rel (!%p3926_p6) target bundleno = 2774 (0xad6), region = 59 }
 0xac5   : > { %v3796_v29 = vpop.eup %3795 }
 0xac6   : > { %v3174_v28 = vmul.f32 %v3796_v29, %v3794_v55 }
 0xac8   : > { %3176 = vst [vmem:[#allocation2] sm:$0xf] %v3174_v28  ;;  %3596 = vst [vmem:[%s3350_s7 + $0x1c] sm:$0xf] %v3174_v28 }
 0xacf   : > { %v3214_v34 = vld [vmem:[%s3970_s18] sm:$0xf]  ;;  %v3216_v10 = vld [vmem:[%s3970_s18 + $0x4] sm:$0xf]  ;;  %v3218_v2 = vld [vmem:[%s3970_s18 + $0x8] sm:$0xf] }
 0xad0   : > { %v3220_v53 = vld [vmem:[%s3970_s18 + $0xc] sm:$0xf]  ;;  %v3222_v23 = vld [vmem:[%s3970_s18 + $0x10] sm:$0xf]  ;;  %v3224_v60 = vld [vmem:[%s3970_s18 + $0x14] sm:$0xf] }
 0xad1   : > { %v3226_v62 = vld [vmem:[%s3970_s18 + $0x18] sm:$0xf]  ;;  %v3228_v4 = vld [vmem:[%s3970_s18 + $0x1c] sm:$0xf]  ;;  %3215 = vst [vmem:[%s3198_s28] sm:$0xf] %v3214_v34 }
 0xad2   : > { %3217 = vst [vmem:[%s3198_s28 + $0x8] sm:$0xf] %v3216_v10  ;;  %3219 = vst [vmem:[%s3198_s28 + $0x10] sm:$0xf] %v3218_v2 }
 0xad3   : > { %3221 = vst [vmem:[%s3198_s28 + $0x18] sm:$0xf] %v3220_v53  ;;  %3223 = vst [vmem:[%s3198_s28 + $0x20] sm:$0xf] %v3222_v23 }
 0xad4   : > { %3225 = vst [vmem:[%s3198_s28 + $0x28] sm:$0xf] %v3224_v60  ;;  %3227 = vst [vmem:[%s3198_s28 + $0x30] sm:$0xf] %v3226_v62 }
 0xad5   : > { %3229 = vst [vmem:[%s3198_s28 + $0x38] sm:$0xf] %v3228_v4 }
 0xad6 PF: > { %s12_s15 = sadd.s32 1, %s3851_s15   ;;  %s6494_s9 = smov %s3831_s10 }
 0xad7   : > { %p9_p0 = scmp.ge.s32.totalorder %s12_s15, 6   ;;  %s6495_s10 = smov %s3932_s6 }
 0xad8   : > { %s6496_s11 = smov %s3843_s13  ;;  %s6497_s12 = smov %s3847_s14 }
 0xad9   : > { %s6498_s13 = smov %s6501_s16  ;;  %s6499_s14 = smov %s6505_s17 }
 0xada   :  { %11 = sbr.rel (!%p9_p0) target bundleno = 4 (0x4), region = 150 }

// kernel: onsets_and_frames_forward.9
= control target key start
LH: loop header
LB: loop body
LE: loop exit
PB: predicated region body
PF: predicated region fallthrough
CT: control target
= control target key end

     0   :  { %s1113_s1 = inlined_call_operand.vmem [shape: bf16[512,256], index: 1, kind: input, shape index: {}]   ;;  %s1114_s0 = inlined_call_operand.vmem [shape: bf16[32,512], index: 0, kind: input, shape index: {}]   ;;  %s1115_s2 = inlined_call_operand.vmem [shape: f32[1,256], index: 2, kind: input, shape index: {}]   ;;  %s1116_s3 = inlined_call_operand.vmem [shape: f32[1,256], index: 3, kind: input, shape index: {}]   ;;  %s1117_s4 = inlined_call_operand.vmem [shape: f32[32,256], index: 4, kind: output, shape index: {}]  }
   0x1   :  { %v734_v0 = vld [vmem:[%s1113_s1 + $0x4] ss:$8 sps:$4 sm:$0xff]   ;;  %v738_v2 = vld [vmem:[%s1113_s1] ss:$8 sps:$4 sm:$0xff]   ;;  %v740_v4 = vld [vmem:[%s1113_s1 + $0x14] ss:$8 sps:$4 sm:$0xff]  }
   0x2   :  { %v736_v1 = vld [vmem:[%s1113_s1 + $0x104] ss:$8 sps:$4 sm:$0xff]   ;;  %469 = vmatprep.subr.bf16.mxu1 %v734_v0  ;;  %v739_v3 = vld [vmem:[%s1113_s1 + $0x100] ss:$8 sps:$4 sm:$0xff]   ;;  %v742_v5 = vld [vmem:[%s1113_s1 + $0x114] ss:$8 sps:$4 sm:$0xff]  }
   0x3   :  { %522 = vmatprep.subr.bf16.mxu0 %v736_v1  ;;  %470 = vmatpush1.bf16.msra.mxu1 %v738_v2  ;;  %v744_v6 = vld [vmem:[%s1113_s1 + $0x10] ss:$8 sps:$4 sm:$0xff]   ;;  %v746_v8 = vld [vmem:[%s1113_s1 + $0x24] ss:$8 sps:$4 sm:$0xff]   ;;  %v750_v10 = vld [vmem:[%s1113_s1 + $0x20] ss:$8 sps:$4 sm:$0xff]  }
   0x4   :  { %523 = vmatpush1.bf16.msra.mxu0 %v739_v3  ;;  %471 = vmatprep.subr.bf16.mxu1 %v740_v4  ;;  %v745_v7 = vld [vmem:[%s1113_s1 + $0x110] ss:$8 sps:$4 sm:$0xff]   ;;  %v748_v9 = vld [vmem:[%s1113_s1 + $0x124] ss:$8 sps:$4 sm:$0xff]   ;;  %v751_v11 = vld [vmem:[%s1113_s1 + $0x120] ss:$8 sps:$4 sm:$0xff]  }
   0x5   :  { %524 = vmatprep.subr.bf16.mxu0 %v742_v5  ;;  %v752_v12 = vld [vmem:[%s1113_s1 + $0x34] ss:$8 sps:$4 sm:$0xff]   ;;  %v756_v14 = vld [vmem:[%s1113_s1 + $0x30] ss:$8 sps:$4 sm:$0xff]   ;;  %v758_v16 = vld [vmem:[%s1113_s1 + $0x44] ss:$8 sps:$4 sm:$0xff]  }
   0x6   :  { %v754_v13 = vld [vmem:[%s1113_s1 + $0x134] ss:$8 sps:$4 sm:$0xff]   ;;  %v757_v15 = vld [vmem:[%s1113_s1 + $0x130] ss:$8 sps:$4 sm:$0xff]   ;;  %v760_v17 = vld [vmem:[%s1113_s1 + $0x144] ss:$8 sps:$4 sm:$0xff]  }
   0x7   :  { %472 = vmatpush1.bf16.msra.mxu1 %v744_v6  ;;  %v762_v18 = vld [vmem:[%s1113_s1 + $0x40] ss:$8 sps:$4 sm:$0xff]   ;;  %v764_v20 = vld [vmem:[%s1113_s1 + $0x54] ss:$8 sps:$4 sm:$0xff]   ;;  %v768_v22 = vld [vmem:[%s1113_s1 + $0x50] ss:$8 sps:$4 sm:$0xff]  }
   0x8   :  { %525 = vmatpush1.bf16.msra.mxu0 %v745_v7  ;;  %473 = vmatprep.subr.bf16.mxu1 %v746_v8  ;;  %v763_v19 = vld [vmem:[%s1113_s1 + $0x140] ss:$8 sps:$4 sm:$0xff]   ;;  %v766_v21 = vld [vmem:[%s1113_s1 + $0x154] ss:$8 sps:$4 sm:$0xff]   ;;  %v769_v23 = vld [vmem:[%s1113_s1 + $0x150] ss:$8 sps:$4 sm:$0xff]   ;;  %v604_v8 = vlaneseq }
   0x9   :  { %526 = vmatprep.subr.bf16.mxu0 %v748_v9  ;;  %v770_v24 = vld [vmem:[%s1113_s1 + $0x64] ss:$8 sps:$4 sm:$0xff]   ;;  %v774_v26 = vld [vmem:[%s1113_s1 + $0x60] ss:$8 sps:$4 sm:$0xff]   ;;  %v776_v28 = vld [vmem:[%s1113_s1 + $0x74] ss:$8 sps:$4 sm:$0xff]  }
   0xa   :  { %v772_v25 = vld [vmem:[%s1113_s1 + $0x164] ss:$8 sps:$4 sm:$0xff]   ;;  %v775_v27 = vld [vmem:[%s1113_s1 + $0x160] ss:$8 sps:$4 sm:$0xff]   ;;  %v778_v29 = vld [vmem:[%s1113_s1 + $0x174] ss:$8 sps:$4 sm:$0xff]  }
   0xb   :  { %474 = vmatpush1.bf16.msra.mxu1 %v750_v10  ;;  %v780_v30 = vld [vmem:[%s1113_s1 + $0x70] ss:$8 sps:$4 sm:$0xff]   ;;  %v782_v32 = vld [vmem:[%s1113_s1 + $0x84] ss:$8 sps:$4 sm:$0xff]   ;;  %v786_v34 = vld [vmem:[%s1113_s1 + $0x80] ss:$8 sps:$4 sm:$0xff]  }
   0xc   :  { %527 = vmatpush1.bf16.msra.mxu0 %v751_v11  ;;  %475 = vmatprep.subr.bf16.mxu1 %v752_v12  ;;  %v781_v31 = vld [vmem:[%s1113_s1 + $0x170] ss:$8 sps:$4 sm:$0xff]   ;;  %v784_v33 = vld [vmem:[%s1113_s1 + $0x184] ss:$8 sps:$4 sm:$0xff]   ;;  %v787_v35 = vld [vmem:[%s1113_s1 + $0x180] ss:$8 sps:$4 sm:$0xff]  }
   0xd   :  { %528 = vmatprep.subr.bf16.mxu0 %v754_v13  ;;  %v788_v36 = vld [vmem:[%s1113_s1 + $0x94] ss:$8 sps:$4 sm:$0xff]   ;;  %v792_v38 = vld [vmem:[%s1113_s1 + $0x90] ss:$8 sps:$4 sm:$0xff]   ;;  %v794_v40 = vld [vmem:[%s1113_s1 + $0xa4] ss:$8 sps:$4 sm:$0xff]  }
   0xe   :  { %v790_v37 = vld [vmem:[%s1113_s1 + $0x194] ss:$8 sps:$4 sm:$0xff]   ;;  %v793_v39 = vld [vmem:[%s1113_s1 + $0x190] ss:$8 sps:$4 sm:$0xff]   ;;  %v796_v41 = vld [vmem:[%s1113_s1 + $0x1a4] ss:$8 sps:$4 sm:$0xff]  }
   0xf   :  { %476 = vmatpush1.bf16.msra.mxu1 %v756_v14  ;;  %v798_v42 = vld [vmem:[%s1113_s1 + $0xa0] ss:$8 sps:$4 sm:$0xff]   ;;  %v800_v44 = vld [vmem:[%s1113_s1 + $0xb4] ss:$8 sps:$4 sm:$0xff]   ;;  %v804_v46 = vld [vmem:[%s1113_s1 + $0xb0] ss:$8 sps:$4 sm:$0xff]  }
  0x10   :  { %529 = vmatpush1.bf16.msra.mxu0 %v757_v15  ;;  %477 = vmatprep.subr.bf16.mxu1 %v758_v16  ;;  %v799_v43 = vld [vmem:[%s1113_s1 + $0x1a0] ss:$8 sps:$4 sm:$0xff]   ;;  %v802_v45 = vld [vmem:[%s1113_s1 + $0x1b4] ss:$8 sps:$4 sm:$0xff]   ;;  %v805_v47 = vld [vmem:[%s1113_s1 + $0x1b0] ss:$8 sps:$4 sm:$0xff]  }
  0x11   :  { %530 = vmatprep.subr.bf16.mxu0 %v760_v17  ;;  %v806_v48 = vld [vmem:[%s1113_s1 + $0xc4] ss:$8 sps:$4 sm:$0xff]   ;;  %v810_v52 = vld [vmem:[%s1113_s1 + $0xc0] ss:$8 sps:$4 sm:$0xff]   ;;  %v812_v54 = vld [vmem:[%s1113_s1 + $0xd4] ss:$8 sps:$4 sm:$0xff]  }
  0x12   :  { %v832_v49 = vld [vmem:[%s1114_s0 + $0x4] ss:$16 sps:$4 sm:$0xff]   ;;  %v835_v51 = vld [vmem:[%s1114_s0 + $0xc] ss:$16 sps:$4 sm:$0xff]   ;;  %v811_v53 = vld [vmem:[%s1113_s1 + $0x1c0] ss:$8 sps:$4 sm:$0xff]  }
  0x13   :  { %478 = vmatpush1.bf16.msra.mxu1 %v762_v18  ;;  %v808_v50 = vld [vmem:[%s1113_s1 + $0x1c4] ss:$8 sps:$4 sm:$0xff]   ;;  %501 = vmatprep.mubr.bf16.mxu1 %v832_v49  ;;  %v814_v55 = vld [vmem:[%s1113_s1 + $0x1d4] ss:$8 sps:$4 sm:$0xff]   ;;  %v816_v56 = vld [vmem:[%s1113_s1 + $0xd0] ss:$8 sps:$4 sm:$0xff]  }
  0x14   :  { %531 = vmatpush1.bf16.msra.mxu0 %v763_v19  ;;  %479 = vmatprep.subr.bf16.mxu1 %v764_v20  ;;  %v817_v57 = vld [vmem:[%s1113_s1 + $0x1d0] ss:$8 sps:$4 sm:$0xff]   ;;  %v818_v58 = vld [vmem:[%s1113_s1 + $0xe4] ss:$8 sps:$4 sm:$0xff]   ;;  %v822_v60 = vld [vmem:[%s1113_s1 + $0xe0] ss:$8 sps:$4 sm:$0xff]  }
  0x15   :  { %532 = vmatprep.subr.bf16.mxu0 %v766_v21  ;;  %554 = vmatprep.mubr.bf16.mxu0 %v835_v51  ;;  %v820_v59 = vld [vmem:[%s1113_s1 + $0x1e4] ss:$8 sps:$4 sm:$0xff]   ;;  %v823_v61 = vld [vmem:[%s1113_s1 + $0x1e0] ss:$8 sps:$4 sm:$0xff]   ;;  %v824_v62 = vld [vmem:[%s1113_s1 + $0xf4] ss:$8 sps:$4 sm:$0xff]  }
  0x16   :  { %v826_v63 = vld [vmem:[%s1113_s1 + $0x1f4] ss:$8 sps:$4 sm:$0xff]   ;;  %v828_v0 = vld [vmem:[%s1113_s1 + $0xf0] ss:$8 sps:$4 sm:$0xff]   ;;  %v605_v9 = vshrl.u32 %v604_v8, 7 }
  0x17   :  { %480 = vmatpush1.bf16.msra.mxu1 %v768_v22  ;;  %v829_v1 = vld [vmem:[%s1113_s1 + $0x1f0] ss:$8 sps:$4 sm:$0xff]   ;;  %v836_v4 = vld [vmem:[%s1114_s0 + $0x24] ss:$16 sps:$4 sm:$0xff]   ;;  %v838_v5 = vld [vmem:[%s1114_s0 + $0x2c] ss:$16 sps:$4 sm:$0xff]  }
  0x18   :  { %533 = vmatpush1.bf16.msra.mxu0 %v769_v23  ;;  %481 = vmatprep.subr.bf16.mxu1 %v770_v24  ;;  %v830_v2 = vld [vmem:[%s1114_s0] ss:$16 sps:$4 sm:$0xff]   ;;  %v833_v3 = vld [vmem:[%s1114_s0 + $0x8] ss:$16 sps:$4 sm:$0xff]   ;;  %v606_v10 = vsub.s32 0, %v605_v9  ;;  %v610_v12 = vsub.s32 1, %v605_v9 }
  0x19   :  { %534 = vmatprep.subr.bf16.mxu0 %v772_v25  ;;  %v840_v6 = vld [vmem:[%s1114_s0 + $0x20] ss:$16 sps:$4 sm:$0xff]   ;;  %v841_v7 = vld [vmem:[%s1114_s0 + $0x28] ss:$16 sps:$4 sm:$0xff]  }
  0x1a   :  { %v602_v11 = vld [vmem:[%s1115_s2] sm:$0x3] }
  0x1b   :  { %482 = vmatpush1.bf16.msra.mxu1 %v774_v26  ;;  %v622_v13 = vld [vmem:[%s1116_s3] sm:$0x3]  ;;  %v607_v14 = vrot.slane %v602_v11, %v606_v10  ;;  %v611_v17 = vrot.slane %v602_v11, %v610_v12 }
  0x1c   :  { %535 = vmatpush1.bf16.msra.mxu0 %v775_v27  ;;  %483 = vmatprep.subr.bf16.mxu1 %v776_v28  ;;  %v627_v19 = vrot.slane %v622_v13, %v606_v10  ;;  %v631_v23 = vrot.slane %v622_v13, %v610_v12 }
  0x1d   :  { %536 = vmatprep.subr.bf16.mxu0 %v778_v29 }
  0x1f   :  { %484 = vmatpush1.bf16.msra.mxu1 %v780_v30 }
  0x20   :  { %537 = vmatpush1.bf16.msra.mxu0 %v781_v31  ;;  %485 = vmatprep.subr.bf16.mxu1 %v782_v32 }
  0x21   :  { %538 = vmatprep.subr.bf16.mxu0 %v784_v33 }
  0x23   :  { %486 = vmatpush1.bf16.msra.mxu1 %v786_v34 }
  0x24   :  { %539 = vmatpush1.bf16.msra.mxu0 %v787_v35  ;;  %487 = vmatprep.subr.bf16.mxu1 %v788_v36 }
  0x25   :  { %540 = vmatprep.subr.bf16.mxu0 %v790_v37 }
  0x27   :  { %488 = vmatpush1.bf16.msra.mxu1 %v792_v38 }
  0x28   :  { %541 = vmatpush1.bf16.msra.mxu0 %v793_v39  ;;  %489 = vmatprep.subr.bf16.mxu1 %v794_v40 }
  0x29   :  { %542 = vmatprep.subr.bf16.mxu0 %v796_v41 }
  0x2b   :  { %490 = vmatpush1.bf16.msra.mxu1 %v798_v42 }
  0x2c   :  { %543 = vmatpush1.bf16.msra.mxu0 %v799_v43  ;;  %491 = vmatprep.subr.bf16.mxu1 %v800_v44 }
  0x2d   :  { %544 = vmatprep.subr.bf16.mxu0 %v802_v45 }
  0x2f   :  { %492 = vmatpush1.bf16.msra.mxu1 %v804_v46 }
  0x30   :  { %545 = vmatpush1.bf16.msra.mxu0 %v805_v47  ;;  %493 = vmatprep.subr.bf16.mxu1 %v806_v48 }
  0x31   :  { %546 = vmatprep.subr.bf16.mxu0 %v808_v50 }
  0x33   :  { %494 = vmatpush1.bf16.msra.mxu1 %v810_v52 }
  0x34   :  { %547 = vmatpush1.bf16.msra.mxu0 %v811_v53  ;;  %495 = vmatprep.subr.bf16.mxu1 %v812_v54 }
  0x35   :  { %548 = vmatprep.subr.bf16.mxu0 %v814_v55 }
  0x37   :  { %496 = vmatpush1.bf16.msra.mxu1 %v816_v56 }
  0x38   :  { %549 = vmatpush1.bf16.msra.mxu0 %v817_v57  ;;  %497 = vmatprep.subr.bf16.mxu1 %v818_v58 }
  0x39   :  { %550 = vmatprep.subr.bf16.mxu0 %v820_v59 }
  0x3b   :  { %498 = vmatpush1.bf16.msra.mxu1 %v822_v60 }
  0x3c   :  { %551 = vmatpush1.bf16.msra.mxu0 %v823_v61  ;;  %499 = vmatprep.subr.bf16.mxu1 %v824_v62 }
  0x3d   :  { %552 = vmatprep.subr.bf16.mxu0 %v826_v63 }
  0x3f   :  { %500 = vmatpush1.bf16.msra.mxu1 %v828_v0 }
  0x40   :  { %553 = vmatpush1.bf16.msra.mxu0 %v829_v1 }
  0x42   :  { %502 = vmatmul.mubr.bf16.vlgmr.msra.gmra.mrb[0].mxu1 %v830_v2 }
  0x43   :  { %555 = vmatmul.mubr.bf16.vlgmr.msra.gmra.mrb[0].mxu0 %v833_v3  ;;  %511 = vmatprep.mubr.bf16.mxu1 %v836_v4 }
  0x44   :  { %564 = vmatprep.mubr.bf16.mxu0 %v838_v5 }
  0x4a   :  { %512 = vmatmul.mubr.bf16.gmra.mrb[4].mxu1 %v840_v6 }
  0x4b   :  { %565 = vmatmul.mubr.bf16.gmra.mrb[4].mxu0 %v841_v7 }
 0x115   :  { %v503_v15 = vpop.f32.mrb[0].mxu1 }
 0x116   :  { %v556_v16 = vpop.f32.mrb[0].mxu0  ;;  %v505_v20 = vpop.f32.mrb[1].mxu1 }
 0x117   :  { %v557_v18 = vadd.f32 %v556_v16, %v503_v15  ;;  %v558_v21 = vpop.f32.mrb[1].mxu0  ;;  %v507_v24 = vpop.f32.mrb[2].mxu1 }
 0x118   :  { %v559_v22 = vadd.f32 %v558_v21, %v505_v20  ;;  %v560_v25 = vpop.f32.mrb[2].mxu0  ;;  %v509_v28 = vpop.f32.mrb[3].mxu1 }
 0x119   :  { %v614_v26 = vmul.f32 %v607_v14, %v557_v18  ;;  %v561_v27 = vadd.f32 %v560_v25, %v507_v24  ;;  %v562_v29 = vpop.f32.mrb[3].mxu0 }
 0x11a   :  { %v615_v30 = vmul.f32 %v611_v17, %v559_v22  ;;  %v563_v31 = vadd.f32 %v562_v29, %v509_v28 }
 0x11b   :  { %v634_v32 = vadd.f32 %v627_v19, %v614_v26  ;;  %v616_v33 = vmul.f32 %v607_v14, %v561_v27 }
 0x11c   :  { %v635_v34 = vadd.f32 %v631_v23, %v615_v30  ;;  %v617_v35 = vmul.f32 %v611_v17, %v563_v31 }
 0x11d   :  { %642 = vst [vmem:[%s1117_s4] sm:$0xff] %v634_v32  ;;  %v636_v36 = vadd.f32 %v627_v19, %v616_v33  ;;  %v513_v38 = vpop.f32.mrb[4].mxu1 }
 0x11e   :  { %643 = vst [vmem:[%s1117_s4 + $0x8] sm:$0xff] %v635_v34  ;;  %v637_v37 = vadd.f32 %v631_v23, %v617_v35  ;;  %v566_v39 = vpop.f32.mrb[4].mxu0  ;;  %v515_v41 = vpop.f32.mrb[5].mxu1 }
 0x11f   :  { %644 = vst [vmem:[%s1117_s4 + $0x10] sm:$0xff] %v636_v36  ;;  %v567_v40 = vadd.f32 %v566_v39, %v513_v38  ;;  %v568_v42 = vpop.f32.mrb[5].mxu0  ;;  %v517_v44 = vpop.f32.mrb[6].mxu1 }
 0x120   :  { %645 = vst [vmem:[%s1117_s4 + $0x18] sm:$0xff] %v637_v37  ;;  %v569_v43 = vadd.f32 %v568_v42, %v515_v41  ;;  %v570_v45 = vpop.f32.mrb[6].mxu0  ;;  %v519_v48 = vpop.f32.mrb[7].mxu1 }
 0x121   :  { %v618_v46 = vmul.f32 %v607_v14, %v567_v40  ;;  %v571_v47 = vadd.f32 %v570_v45, %v517_v44  ;;  %v572_v49 = vpop.f32.mrb[7].mxu0 }
 0x122   :  { %v619_v50 = vmul.f32 %v611_v17, %v569_v43  ;;  %v573_v51 = vadd.f32 %v572_v49, %v519_v48 }
 0x123   :  { %v638_v52 = vadd.f32 %v627_v19, %v618_v46  ;;  %v620_v53 = vmul.f32 %v607_v14, %v571_v47 }
 0x124   :  { %v639_v54 = vadd.f32 %v631_v23, %v619_v50  ;;  %v621_v55 = vmul.f32 %v611_v17, %v573_v51 }
 0x125   :  { %646 = vst [vmem:[%s1117_s4 + $0x20] sm:$0xff] %v638_v52  ;;  %v640_v56 = vadd.f32 %v627_v19, %v620_v53 }
 0x126   :  { %647 = vst [vmem:[%s1117_s4 + $0x28] sm:$0xff] %v639_v54  ;;  %v641_v57 = vadd.f32 %v631_v23, %v621_v55 }
 0x127   :  { %648 = vst [vmem:[%s1117_s4 + $0x30] sm:$0xff] %v640_v56 }
 0x128   :  { %649 = vst [vmem:[%s1117_s4 + $0x38] sm:$0xff] %v641_v57 }

</bundles_post_ra>
